<compile_context>
chip_gen: v5e
topology: v5e:2x2
jax: 0.10.0
libtpu: 0.0.40
codegen_flags: <defaults>
</compile_context>

<pallas_src>
import functools

import numpy as np
import jax
import jax.numpy as jnp
from jax import lax
from jax.experimental import pallas as pl
from jax.experimental.pallas import tpu as pltpu


# ----------------------------------------------------------------------------
# Static layout constants
# ----------------------------------------------------------------------------
K1 = 5 * 32       # conv1 folded contraction: 5 kernel rows x (28 cols + 4 zero lanes)
K2 = 5 * 256      # conv2 folded contraction: 5 kernel rows x (14*16 valid + 32 zero)
K3 = 7 * 256      # linear contraction: 7 pooled rows x 256 lanes
NLANE = 256       # padded conv output lane width ((W/2)*Cout = 224 -> 256)
NCLS = 128        # padded logits lane width (10 -> 128)


# ----------------------------------------------------------------------------
# Fused Pallas kernel: conv1 -> relu -> pool -> conv2 -> relu -> pool -> linear
# ----------------------------------------------------------------------------
def _cnn_fused_kernel(lhs_e_ref, lhs_o_ref, w1_ref, b1_ref, w2_ref, b2_ref,
                      w3_ref, b3_ref, feats_ref, logits_ref,
                      acc1_ref, acc2_ref, e2_ref, o2_ref, *, tb):
    """One batch tile (tb images) of the full CNN forward.

    lhs_e_ref/lhs_o_ref : [14*tb, K1] bf16  conv1 LHS for conv-row parity 0/1.
                          Row order = (pooled-row parity, pooled-row idx, image),
                          lanes = 5 kernel-row taps x 32 input columns.
    w1_ref              : [2, K1, 256]  banded conv1 weights (even/odd output col)
    w2_ref              : [2, K2, 256]  banded conv2 weights
    w3_ref              : [K3, 128]     linear weights, rows = (pooled row, lane)
    b*_ref              : [1, N] f32    biases (tiled over pooled width, padded)
    feats_ref           : [7*tb, 256] bf16   conv2 pooled output, rows = (row, image)
    logits_ref          : [tb, 128] f32
    acc1/acc2           : f32 VMEM pool accumulators
    e2/o2               : bf16 VMEM even/odd padded-row planes feeding conv2
    """
    f32 = jnp.float32

    # ---- conv1 (+ bias + ReLU + 2x2 maxpool): batch- & kernel-row-folded matmuls ----
    lhs_e = lhs_e_ref[...]
    lhs_o = lhs_o_ref[...]
    acc1_ref[...] = jnp.dot(lhs_e, w1_ref[0], preferred_element_type=f32)
    acc1_ref[...] = jnp.maximum(
        acc1_ref[...], jnp.dot(lhs_e, w1_ref[1], preferred_element_type=f32))
    acc1_ref[...] = jnp.maximum(
        acc1_ref[...], jnp.dot(lhs_o, w1_ref[0], preferred_element_type=f32))
    acc1_ref[...] = jnp.maximum(
        acc1_ref[...], jnp.dot(lhs_o, w1_ref[1], preferred_element_type=f32))
    # bias is constant over each pool window and ReLU is monotone, so applying them
    # after the max is exactly maxpool(relu(conv + bias)).
    y1 = jnp.maximum(acc1_ref[...] + b1_ref[...], 0.0).astype(jnp.bfloat16)

    # ---- stage y1 as even/odd padded-row planes for conv2 (contiguous 2-D copies) ----
    # y1 rows (per tile): [even pooled rows 0..6 | odd pooled rows 0..6], image-minor.
    zrow = jnp.zeros((tb, NLANE), jnp.bfloat16)
    e2_ref[0:tb, :] = zrow                       # top H-pad row
    e2_ref[8 * tb:9 * tb, :] = zrow              # bottom H-pad row
    o2_ref[0:tb, :] = zrow
    o2_ref[8 * tb:9 * tb, :] = zrow
    e2_ref[tb:8 * tb, :] = y1[0:7 * tb, :]
    o2_ref[tb:8 * tb, :] = y1[7 * tb:14 * tb, :]

    # ---- conv2 (+ bias + ReLU + 2x2 maxpool) ----
    def band(hp, di):
        k = hp + di
        ref = e2_ref if (k % 2) == 0 else o2_ref
        s = k // 2
        return ref[s * tb:(s + 7) * tb, :]       # [7*tb, 256], rows = (out row, image)

    first = True
    for hp in range(2):                          # conv-row parity
        lhs2 = jnp.concatenate([band(hp, di) for di in range(5)], axis=-1)  # [7*tb, K2]
        for wp in range(2):                      # conv-col parity
            d = jnp.dot(lhs2, w2_ref[wp], preferred_element_type=f32)
            if first:
                acc2_ref[...] = d
                first = False
            else:
                acc2_ref[...] = jnp.maximum(acc2_ref[...], d)
    y2 = jnp.maximum(acc2_ref[...] + b2_ref[...], 0.0).astype(jnp.bfloat16)  # [7*tb, 256]
    feats_ref[...] = y2                          # lane-dense (256) store

    # ---- linear: fold the 7 pooled rows into K -> one [tb, K3] x [K3, 128] matmul ----
    lhs3 = jnp.concatenate([y2[h * tb:(h + 1) * tb, :] for h in range(7)], axis=-1)
    logits_ref[...] = (jnp.dot(lhs3, w3_ref[...], preferred_element_type=f32)
                       + b3_ref[...])


# ----------------------------------------------------------------------------
# Host-side tiling / layout plumbing
# ----------------------------------------------------------------------------
def _pick_batch_tile(B):
    """tb = 8 fills the MXU M dim (conv1 M=112, conv2 M=56) while keeping the f32
    accumulators modest; B is padded to a multiple of tb (no tb=1 cliff), and for
    B > 8 the grid always has >= 2 steps (work for both v7x TensorCores)."""
    if B <= 8:
        return B, B                              # single full-extent block
    tb = 8
    return tb, ((B + tb - 1) // tb) * tb


def _prep_conv1_lhs(x_nchw, B_pad, tb):
    """Build the two conv1 LHS slabs [B_pad*14, K1] (conv-row parity 0 / 1).

    Row order inside each batch tile = (pooled-row parity, pooled-row index, image)
    so the kernel's plane staging and all later slices are contiguous.
    Lane order = 5 kernel-row taps x 32 columns (28 real + 4 zero)."""
    B = x_nchw.shape[0]
    H = W = 28
    x = x_nchw.reshape(B, H, W).astype(jnp.bfloat16)
    x = jnp.pad(x, ((0, B_pad - B), (2, 2), (0, 32 - W)))    # [B_pad, 32, 32]
    nb = B_pad // tb

    def build(hp):
        rows = np.array([[[2 * (2 * jj + q) + hp + di for di in range(5)]
                          for jj in range(7)] for q in range(2)], dtype=np.int32)
        g = jnp.take(x, jnp.asarray(rows.reshape(-1)), axis=1)   # [B_pad, 70, 32]
        g = g.reshape(B_pad, 2, 7, 5, 32)
        g = g.reshape(nb, tb, 2, 7, 5, 32).transpose(0, 2, 3, 1, 4, 5)
        return g.reshape(B_pad * 14, K1)
    return build(0), build(1)


def cnn_forward(params, x_nchw):
    B = x_nchw.shape[0]
    tb, B_pad = _pick_batch_tile(B)
    nb = B_pad // tb
    lhs_e, lhs_o = _prep_conv1_lhs(x_nchw, B_pad, tb)

    kernel = functools.partial(_cnn_fused_kernel, tb=tb)
    feats_k, logits_p = pl.pallas_call(
        kernel,
        out_shape=(jax.ShapeDtypeStruct((B_pad * 7, NLANE), jnp.bfloat16),
                   jax.ShapeDtypeStruct((B_pad, NCLS), jnp.float32)),
        grid=(nb,),
        in_specs=[
            pl.BlockSpec((tb * 14, K1), lambda i: (i, 0)),
            pl.BlockSpec((tb * 14, K1), lambda i: (i, 0)),
            pl.BlockSpec((2, K1, NLANE), lambda i: (0, 0, 0)),
            pl.BlockSpec((1, NLANE), lambda i: (0, 0)),
            pl.BlockSpec((2, K2, NLANE), lambda i: (0, 0, 0)),
            pl.BlockSpec((1, NLANE), lambda i: (0, 0)),
            pl.BlockSpec((K3, NCLS), lambda i: (0, 0)),
            pl.BlockSpec((1, NCLS), lambda i: (0, 0)),
        ],
        out_specs=(
            pl.BlockSpec((tb * 7, NLANE), lambda i: (i, 0)),
            pl.BlockSpec((tb, NCLS), lambda i: (i, 0)),
        ),
        scratch_shapes=[
            pltpu.VMEM((tb * 14, NLANE), jnp.float32),   # conv1 pool accumulator
            pltpu.VMEM((tb * 7, NLANE), jnp.float32),    # conv2 pool accumulator
            pltpu.VMEM((tb * 9, NLANE), jnp.bfloat16),   # even-row plane for conv2
            pltpu.VMEM((tb * 9, NLANE), jnp.bfloat16),   # odd-row plane for conv2
        ],
        compiler_params=pltpu.CompilerParams(dimension_semantics=("parallel",)),
    )(lhs_e, lhs_o, params["w1"], params["b1"], params["w2"], params["b2"],
      params["w3"], params["b3"])

    logits = logits_p[:B, :10]

    # feats rows come back as (tile, pooled row, image); un-permute and flatten in
    # PyTorch's NCHW .view() order (tiny XLA ops on a [B, 7, 256] tensor).
    f = feats_k.reshape(nb, 7, tb, NLANE).transpose(0, 2, 1, 3).reshape(B_pad, 7, NLANE)
    f = f[:B, :, :7 * 32].reshape(B, 7, 7, 32)
    feats = jnp.transpose(f, (0, 3, 1, 2)).reshape(B, 32 * 7 * 7).astype(jnp.float32)
    return logits, feats


# ----------------------------------------------------------------------------
# Parameters (same shapes as the PyTorch module) + one-time layout plumbing
# ----------------------------------------------------------------------------
def init_raw_params(key):
    k1, k2, k3 = jax.random.split(key, 3)
    return {
        # conv1: Conv2d(1, 16, 5, 1, 2)
        "w1": 0.1 * jax.random.normal(k1, (16, 1, 5, 5), jnp.float32),
        "b1": jnp.linspace(-0.1, 0.1, 16, dtype=jnp.float32),
        # conv2: Conv2d(16, 32, 5, 1, 2)
        "w2": 0.05 * jax.random.normal(k2, (32, 16, 5, 5), jnp.float32),
        "b2": jnp.linspace(-0.1, 0.1, 32, dtype=jnp.float32),
        # out: Linear(32*7*7, 10)  (PyTorch weight shape [10, 1568])
        "w3": 0.02 * jax.random.normal(k3, (10, 32 * 7 * 7), jnp.float32),
        "b3": jnp.linspace(-0.1, 0.1, 10, dtype=jnp.float32),
    }


def _banded_conv_weights_folded(w_oihw, b_o, W, lane_in, n_pad):
    """Rewrite a kxk 'same' conv + 2x2 maxpool as 2 banded matrices (even/odd output
    column) with the 5 kernel rows folded into the contraction dim.

    Returns wband [2, KH*lane_in, n_pad] bf16 (row = di*lane_in + w_in*Cin + c,
    col = u*Cout + o, zero-padded) and bvec [1, n_pad] f32.  Width zero-padding of
    the activation is absorbed by clipping taps that fall outside [0, W)."""
    O, Cin, KH, KW = (int(s) for s in w_oihw.shape)
    pad = KW // 2
    Wo = W // 2
    n_valid = Wo * O
    bands = {0: [], 1: []}
    for di in range(KH):
        # acc[w_in, c, w_out, o] = sum_dj w[o,c,di,dj] * [w_in == w_out + dj - pad]
        acc = jnp.zeros((W, Cin, W, O), jnp.float32)
        for dj in range(KW):
            tap = jnp.transpose(w_oihw[:, :, di, dj], (1, 0))        # [Cin, O]
            sel = jnp.eye(W, W, k=pad - dj, dtype=jnp.float32)       # clipped shift
            acc = acc + jnp.einsum("pw,co->pcwo", sel, tap)
        for wp in range(2):                                          # output col parity
            blk = acc[:, :, wp::2, :].reshape(W * Cin, n_valid)
            blk = jnp.pad(blk, ((0, lane_in - W * Cin), (0, n_pad - n_valid)))
            bands[wp].append(blk)
    wband = jnp.stack([jnp.concatenate(bands[0], axis=0),
                       jnp.concatenate(bands[1], axis=0)], axis=0).astype(jnp.bfloat16)
    bvec = jnp.pad(jnp.tile(b_o.astype(jnp.float32), Wo),
                   (0, n_pad - n_valid)).reshape(1, n_pad)
    return wband, bvec


def _prep_linear(w3_raw, b3_raw):
    """Permute the Linear weight to the kernel-native (row, col, channel) feature
    layout, insert zero rows for the 224->256 lane padding, and pad N to 128."""
    w = w3_raw.reshape(10, 32, 7, 7)                     # [o, c, h, u]
    w = jnp.transpose(w, (2, 3, 1, 0))                   # [h, u, c, o]
    w = w.reshape(7, 7 * 32, 10)
    w = jnp.pad(w, ((0, 0), (0, NLANE - 7 * 32), (0, NCLS - 10)))
    w = w.reshape(K3, NCLS).astype(jnp.bfloat16)
    b = jnp.pad(b3_raw.astype(jnp.float32), (0, NCLS - 10)).reshape(1, NCLS)
    return w, b


def prepare_params(raw):
    w1, b1 = _banded_conv_weights_folded(raw["w1"], raw["b1"], W=28, lane_in=32,
                                         n_pad=NLANE)
    w2, b2 = _banded_conv_weights_folded(raw["w2"], raw["b2"], W=14, lane_in=NLANE,
                                         n_pad=NLANE)
    w3, b3 = _prep_linear(raw["w3"], raw["b3"])
    return {"w1": w1, "b1": b1, "w2": w2, "b2": b2, "w3": w3, "b3": b3}


# ----------------------------------------------------------------------------
# Pure-JAX/XLA reference (correctness check; f32 end to end)
# ----------------------------------------------------------------------------
def reference_forward(raw, x_nchw):
    y = lax.conv_general_dilated(x_nchw, raw["w1"], (1, 1), ((2, 2), (2, 2)),
                                 dimension_numbers=("NCHW", "OIHW", "NCHW"))
    y = jax.nn.relu(y + raw["b1"][None, :, None, None])
    y = lax.reduce_window(y, -jnp.inf, lax.max, (1, 1, 2, 2), (1, 1, 2, 2), "VALID")
    y = lax.conv_general_dilated(y, raw["w2"], (1, 1), ((2, 2), (2, 2)),
                                 dimension_numbers=("NCHW", "OIHW", "NCHW"))
    y = jax.nn.relu(y + raw["b2"][None, :, None, None])
    y = lax.reduce_window(y, -jnp.inf, lax.max, (1, 1, 2, 2), (1, 1, 2, 2), "VALID")
    feats = y.reshape(y.shape[0], -1)
    logits = feats @ raw["w3"].T + raw["b3"]
    return logits, feats


# ----------------------------------------------------------------------------
if __name__ == "__main__":
    key = jax.random.PRNGKey(0)
    pkey, xkey = jax.random.split(key)

    raw = init_raw_params(pkey)
    params = prepare_params(raw)

    # The Linear layer expects 32*7*7 features -> input must be 1x28x28; batch = 2.
    x = jax.random.normal(xkey, (2, 1, 28, 28), jnp.float32)

    logits, feats = jax.jit(cnn_forward)(params, x)
    jax.block_until_ready((logits, feats))

    assert logits.shape == (2, 10), logits.shape
    assert feats.shape == (2, 32 * 7 * 7), feats.shape

    # Numerical check vs an XLA f32 reference (tolerance accounts for bf16 matmuls).
    ref_logits, ref_feats = jax.jit(reference_forward)(raw, x)
    jax.block_until_ready((ref_logits, ref_feats))
    assert np.allclose(np.asarray(feats), np.asarray(ref_feats),
                       rtol=1e-1, atol=5e-2), "feature mismatch vs reference"
    assert np.allclose(np.asarray(logits), np.asarray(ref_logits),
                       rtol=1e-1, atol=5e-2), "logits mismatch vs reference"

    print("KERNEL_OK")
</pallas_src>

<mosaic_0001>
module attributes {stable_mosaic.version = 11 : i64} {
  func.func @_cnn_fused_kernel(%arg0: i32, %arg1: memref<28x160xbf16, #tpu.memory_space<vmem>>, %arg2: memref<28x160xbf16, #tpu.memory_space<vmem>>, %arg3: memref<2x160x256xbf16, #tpu.memory_space<vmem>>, %arg4: memref<1x256xf32, #tpu.memory_space<vmem>>, %arg5: memref<2x1280x256xbf16, #tpu.memory_space<vmem>>, %arg6: memref<1x256xf32, #tpu.memory_space<vmem>>, %arg7: memref<1792x128xbf16, #tpu.memory_space<vmem>>, %arg8: memref<1x128xf32, #tpu.memory_space<vmem>>, %arg9: memref<14x256xbf16, #tpu.memory_space<vmem>>, %arg10: memref<2x128xf32, #tpu.memory_space<vmem>>, %arg11: memref<28x256xf32, #tpu.memory_space<vmem>>, %arg12: memref<14x256xf32, #tpu.memory_space<vmem>>, %arg13: memref<18x256xbf16, #tpu.memory_space<vmem>>, %arg14: memref<18x256xbf16, #tpu.memory_space<vmem>>) attributes {dimension_semantics = [#tpu.dimension_semantics<parallel>], iteration_bounds = array<i64: 1>, scalar_prefetch = 0 : i64, scratch_operands = 4 : i64, tpu.core_type = #tpu.core_type<tc>, window_params = [{transform_indices = @transform_0, window_bounds = array<i64: 28, 160>}, {transform_indices = @transform_1, window_bounds = array<i64: 28, 160>}, {pipeline_mode = #tpu.pipeline_mode<synchronous>, transform_indices = @transform_2, window_bounds = array<i64: 2, 160, 256>}, {pipeline_mode = #tpu.pipeline_mode<synchronous>, transform_indices = @transform_3, window_bounds = array<i64: 1, 256>}, {pipeline_mode = #tpu.pipeline_mode<synchronous>, transform_indices = @transform_4, window_bounds = array<i64: 2, 1280, 256>}, {pipeline_mode = #tpu.pipeline_mode<synchronous>, transform_indices = @transform_5, window_bounds = array<i64: 1, 256>}, {pipeline_mode = #tpu.pipeline_mode<synchronous>, transform_indices = @transform_6, window_bounds = array<i64: 1792, 128>}, {pipeline_mode = #tpu.pipeline_mode<synchronous>, transform_indices = @transform_7, window_bounds = array<i64: 1, 128>}, {transform_indices = @transform_8, window_bounds = array<i64: 14, 256>}, {transform_indices = @transform_9, window_bounds = array<i64: 2, 128>}]} {
    %c0 = arith.constant 0 : index
    %c0_0 = arith.constant 0 : index
    %0 = vector.load %arg1[%c0, %c0_0] : memref<28x160xbf16, #tpu.memory_space<vmem>>, vector<28x160xbf16>
    %c0_1 = arith.constant 0 : index
    %c0_2 = arith.constant 0 : index
    %1 = vector.load %arg2[%c0_1, %c0_2] : memref<28x160xbf16, #tpu.memory_space<vmem>>, vector<28x160xbf16>
    %c0_3 = arith.constant 0 : index
    %c0_4 = arith.constant 0 : index
    %c0_5 = arith.constant 0 : index
    %2 = vector.load %arg3[%c0_3, %c0_4, %c0_5] : memref<2x160x256xbf16, #tpu.memory_space<vmem>>, vector<1x160x256xbf16>
    %3 = vector.shape_cast %2 : vector<1x160x256xbf16> to vector<160x256xbf16>
    %cst = arith.constant dense<0.000000e+00> : vector<28x256xf32>
    %4 = tpu.matmul %0, %3, %cst {dimension_numbers = #tpu.dot_dimension_numbers<[1], [0], [0], [1], [0, 0, 1, 1], [], []>} : vector<28x160xbf16>, vector<160x256xbf16>, vector<28x256xf32> -> vector<28x256xf32>
    %c0_6 = arith.constant 0 : index
    %c0_7 = arith.constant 0 : index
    %5 = vector.load %arg11[%c0_6, %c0_7] : memref<28x256xf32, #tpu.memory_space<vmem>>, vector<28x256xf32>
    tpu.vector_store %arg11[%c0_6, %c0_7], %4 {strides = array<i32>} : memref<28x256xf32, #tpu.memory_space<vmem>>, vector<28x256xf32>,
    %c0_8 = arith.constant 0 : index
    %c0_9 = arith.constant 0 : index
    %6 = vector.load %arg11[%c0_8, %c0_9] : memref<28x256xf32, #tpu.memory_space<vmem>>, vector<28x256xf32>
    %c1 = arith.constant 1 : index
    %c0_10 = arith.constant 0 : index
    %c0_11 = arith.constant 0 : index
    %7 = vector.load %arg3[%c1, %c0_10, %c0_11] : memref<2x160x256xbf16, #tpu.memory_space<vmem>>, vector<1x160x256xbf16>
    %8 = vector.shape_cast %7 : vector<1x160x256xbf16> to vector<160x256xbf16>
    %cst_12 = arith.constant dense<0.000000e+00> : vector<28x256xf32>
    %9 = tpu.matmul %0, %8, %cst_12 {dimension_numbers = #tpu.dot_dimension_numbers<[1], [0], [0], [1], [0, 0, 1, 1], [], []>} : vector<28x160xbf16>, vector<160x256xbf16>, vector<28x256xf32> -> vector<28x256xf32>
    %10 = arith.maximumf %6, %9 : vector<28x256xf32>
    %c0_13 = arith.constant 0 : index
    %c0_14 = arith.constant 0 : index
    %11 = vector.load %arg11[%c0_13, %c0_14] : memref<28x256xf32, #tpu.memory_space<vmem>>, vector<28x256xf32>
    tpu.vector_store %arg11[%c0_13, %c0_14], %10 {strides = array<i32>} : memref<28x256xf32, #tpu.memory_space<vmem>>, vector<28x256xf32>,
    %c0_15 = arith.constant 0 : index
    %c0_16 = arith.constant 0 : index
    %12 = vector.load %arg11[%c0_15, %c0_16] : memref<28x256xf32, #tpu.memory_space<vmem>>, vector<28x256xf32>
    %c0_17 = arith.constant 0 : index
    %c0_18 = arith.constant 0 : index
    %c0_19 = arith.constant 0 : index
    %13 = vector.load %arg3[%c0_17, %c0_18, %c0_19] : memref<2x160x256xbf16, #tpu.memory_space<vmem>>, vector<1x160x256xbf16>
    %14 = vector.shape_cast %13 : vector<1x160x256xbf16> to vector<160x256xbf16>
    %cst_20 = arith.constant dense<0.000000e+00> : vector<28x256xf32>
    %15 = tpu.matmul %1, %14, %cst_20 {dimension_numbers = #tpu.dot_dimension_numbers<[1], [0], [0], [1], [0, 0, 1, 1], [], []>} : vector<28x160xbf16>, vector<160x256xbf16>, vector<28x256xf32> -> vector<28x256xf32>
    %16 = arith.maximumf %12, %15 : vector<28x256xf32>
    %c0_21 = arith.constant 0 : index
    %c0_22 = arith.constant 0 : index
    %17 = vector.load %arg11[%c0_21, %c0_22] : memref<28x256xf32, #tpu.memory_space<vmem>>, vector<28x256xf32>
    tpu.vector_store %arg11[%c0_21, %c0_22], %16 {strides = array<i32>} : memref<28x256xf32, #tpu.memory_space<vmem>>, vector<28x256xf32>,
    %c0_23 = arith.constant 0 : index
    %c0_24 = arith.constant 0 : index
    %18 = vector.load %arg11[%c0_23, %c0_24] : memref<28x256xf32, #tpu.memory_space<vmem>>, vector<28x256xf32>
    %c1_25 = arith.constant 1 : index
    %c0_26 = arith.constant 0 : index
    %c0_27 = arith.constant 0 : index
    %19 = vector.load %arg3[%c1_25, %c0_26, %c0_27] : memref<2x160x256xbf16, #tpu.memory_space<vmem>>, vector<1x160x256xbf16>
    %20 = vector.shape_cast %19 : vector<1x160x256xbf16> to vector<160x256xbf16>
    %cst_28 = arith.constant dense<0.000000e+00> : vector<28x256xf32>
    %21 = tpu.matmul %1, %20, %cst_28 {dimension_numbers = #tpu.dot_dimension_numbers<[1], [0], [0], [1], [0, 0, 1, 1], [], []>} : vector<28x160xbf16>, vector<160x256xbf16>, vector<28x256xf32> -> vector<28x256xf32>
    %22 = arith.maximumf %18, %21 : vector<28x256xf32>
    %c0_29 = arith.constant 0 : index
    %c0_30 = arith.constant 0 : index
    %23 = vector.load %arg11[%c0_29, %c0_30] : memref<28x256xf32, #tpu.memory_space<vmem>>, vector<28x256xf32>
    tpu.vector_store %arg11[%c0_29, %c0_30], %22 {strides = array<i32>} : memref<28x256xf32, #tpu.memory_space<vmem>>, vector<28x256xf32>,
    %c0_31 = arith.constant 0 : index
    %c0_32 = arith.constant 0 : index
    %24 = vector.load %arg11[%c0_31, %c0_32] : memref<28x256xf32, #tpu.memory_space<vmem>>, vector<28x256xf32>
    %c0_33 = arith.constant 0 : index
    %c0_34 = arith.constant 0 : index
    %25 = vector.load %arg4[%c0_33, %c0_34] : memref<1x256xf32, #tpu.memory_space<vmem>>, vector<1x256xf32>
    %26 = vector.broadcast %25 : vector<1x256xf32> to vector<28x256xf32>
    %27 = arith.addf %24, %26 : vector<28x256xf32>
    %cst_35 = arith.constant 0.000000e+00 : f32
    %28 = vector.broadcast %cst_35 : f32 to vector<28x256xf32>
    %29 = arith.maximumf %27, %28 : vector<28x256xf32>
    %30 = arith.truncf %29 : vector<28x256xf32> to vector<28x256xbf16>
    %cst_36 = arith.constant 0.000000e+00 : bf16
    %31 = vector.broadcast %cst_36 : bf16 to vector<2x256xbf16>
    %c0_37 = arith.constant 0 : index
    %c0_38 = arith.constant 0 : index
    %32 = vector.load %arg13[%c0_37, %c0_38] : memref<18x256xbf16, #tpu.memory_space<vmem>>, vector<2x256xbf16>
    tpu.vector_store %arg13[%c0_37, %c0_38], %31 {strides = array<i32>} : memref<18x256xbf16, #tpu.memory_space<vmem>>, vector<2x256xbf16>,
    %c16 = arith.constant 16 : index
    %c0_39 = arith.constant 0 : index
    %33 = vector.load %arg13[%c16, %c0_39] : memref<18x256xbf16, #tpu.memory_space<vmem>>, vector<2x256xbf16>
    tpu.vector_store %arg13[%c16, %c0_39], %31 {strides = array<i32>} : memref<18x256xbf16, #tpu.memory_space<vmem>>, vector<2x256xbf16>,
    %c0_40 = arith.constant 0 : index
    %c0_41 = arith.constant 0 : index
    %34 = vector.load %arg14[%c0_40, %c0_41] : memref<18x256xbf16, #tpu.memory_space<vmem>>, vector<2x256xbf16>
    tpu.vector_store %arg14[%c0_40, %c0_41], %31 {strides = array<i32>} : memref<18x256xbf16, #tpu.memory_space<vmem>>, vector<2x256xbf16>,
    %c16_42 = arith.constant 16 : index
    %c0_43 = arith.constant 0 : index
    %35 = vector.load %arg14[%c16_42, %c0_43] : memref<18x256xbf16, #tpu.memory_space<vmem>>, vector<2x256xbf16>
    tpu.vector_store %arg14[%c16_42, %c0_43], %31 {strides = array<i32>} : memref<18x256xbf16, #tpu.memory_space<vmem>>, vector<2x256xbf16>,
    %36 = vector.extract_strided_slice %30 {offsets = [0, 0], sizes = [14, 256], strides = [1, 1]} : vector<28x256xbf16> to vector<14x256xbf16>
    %c2 = arith.constant 2 : index
    %c0_44 = arith.constant 0 : index
    %37 = vector.load %arg13[%c2, %c0_44] : memref<18x256xbf16, #tpu.memory_space<vmem>>, vector<14x256xbf16>
    tpu.vector_store %arg13[%c2, %c0_44], %36 {strides = array<i32>} : memref<18x256xbf16, #tpu.memory_space<vmem>>, vector<14x256xbf16>,
    %38 = vector.extract_strided_slice %30 {offsets = [14, 0], sizes = [14, 256], strides = [1, 1]} : vector<28x256xbf16> to vector<14x256xbf16>
    %c2_45 = arith.constant 2 : index
    %c0_46 = arith.constant 0 : index
    %39 = vector.load %arg14[%c2_45, %c0_46] : memref<18x256xbf16, #tpu.memory_space<vmem>>, vector<14x256xbf16>
    tpu.vector_store %arg14[%c2_45, %c0_46], %38 {strides = array<i32>} : memref<18x256xbf16, #tpu.memory_space<vmem>>, vector<14x256xbf16>,
    %c0_47 = arith.constant 0 : index
    %c0_48 = arith.constant 0 : index
    %40 = vector.load %arg13[%c0_47, %c0_48] : memref<18x256xbf16, #tpu.memory_space<vmem>>, vector<14x256xbf16>
    %c0_49 = arith.constant 0 : index
    %c0_50 = arith.constant 0 : index
    %41 = vector.load %arg14[%c0_49, %c0_50] : memref<18x256xbf16, #tpu.memory_space<vmem>>, vector<14x256xbf16>
    %c2_51 = arith.constant 2 : index
    %c0_52 = arith.constant 0 : index
    %42 = vector.load %arg13[%c2_51, %c0_52] : memref<18x256xbf16, #tpu.memory_space<vmem>>, vector<14x256xbf16>
    %c2_53 = arith.constant 2 : index
    %c0_54 = arith.constant 0 : index
    %43 = vector.load %arg14[%c2_53, %c0_54] : memref<18x256xbf16, #tpu.memory_space<vmem>>, vector<14x256xbf16>
    %c4 = arith.constant 4 : index
    %c0_55 = arith.constant 0 : index
    %44 = vector.load %arg13[%c4, %c0_55] : memref<18x256xbf16, #tpu.memory_space<vmem>>, vector<14x256xbf16>
    %45 = tpu.concatenate %40, %41, %42, %43, %44 in 1 : vector<14x256xbf16>, vector<14x256xbf16>, vector<14x256xbf16>, vector<14x256xbf16>, vector<14x256xbf16> -> vector<14x1280xbf16>
    %c0_56 = arith.constant 0 : index
    %c0_57 = arith.constant 0 : index
    %c0_58 = arith.constant 0 : index
    %46 = vector.load %arg5[%c0_56, %c0_57, %c0_58] : memref<2x1280x256xbf16, #tpu.memory_space<vmem>>, vector<1x1280x256xbf16>
    %47 = vector.shape_cast %46 : vector<1x1280x256xbf16> to vector<1280x256xbf16>
    %cst_59 = arith.constant dense<0.000000e+00> : vector<14x256xf32>
    %48 = tpu.matmul %45, %47, %cst_59 {dimension_numbers = #tpu.dot_dimension_numbers<[1], [0], [0], [1], [0, 0, 1, 1], [], []>} : vector<14x1280xbf16>, vector<1280x256xbf16>, vector<14x256xf32> -> vector<14x256xf32>
    %c0_60 = arith.constant 0 : index
    %c0_61 = arith.constant 0 : index
    %49 = vector.load %arg12[%c0_60, %c0_61] : memref<14x256xf32, #tpu.memory_space<vmem>>, vector<14x256xf32>
    tpu.vector_store %arg12[%c0_60, %c0_61], %48 {strides = array<i32>} : memref<14x256xf32, #tpu.memory_space<vmem>>, vector<14x256xf32>,
    %c1_62 = arith.constant 1 : index
    %c0_63 = arith.constant 0 : index
    %c0_64 = arith.constant 0 : index
    %50 = vector.load %arg5[%c1_62, %c0_63, %c0_64] : memref<2x1280x256xbf16, #tpu.memory_space<vmem>>, vector<1x1280x256xbf16>
    %51 = vector.shape_cast %50 : vector<1x1280x256xbf16> to vector<1280x256xbf16>
    %cst_65 = arith.constant dense<0.000000e+00> : vector<14x256xf32>
    %52 = tpu.matmul %45, %51, %cst_65 {dimension_numbers = #tpu.dot_dimension_numbers<[1], [0], [0], [1], [0, 0, 1, 1], [], []>} : vector<14x1280xbf16>, vector<1280x256xbf16>, vector<14x256xf32> -> vector<14x256xf32>
    %c0_66 = arith.constant 0 : index
    %c0_67 = arith.constant 0 : index
    %53 = vector.load %arg12[%c0_66, %c0_67] : memref<14x256xf32, #tpu.memory_space<vmem>>, vector<14x256xf32>
    %54 = arith.maximumf %53, %52 : vector<14x256xf32>
    %c0_68 = arith.constant 0 : index
    %c0_69 = arith.constant 0 : index
    %55 = vector.load %arg12[%c0_68, %c0_69] : memref<14x256xf32, #tpu.memory_space<vmem>>, vector<14x256xf32>
    tpu.vector_store %arg12[%c0_68, %c0_69], %54 {strides = array<i32>} : memref<14x256xf32, #tpu.memory_space<vmem>>, vector<14x256xf32>,
    %c0_70 = arith.constant 0 : index
    %c0_71 = arith.constant 0 : index
    %56 = vector.load %arg14[%c0_70, %c0_71] : memref<18x256xbf16, #tpu.memory_space<vmem>>, vector<14x256xbf16>
    %c2_72 = arith.constant 2 : index
    %c0_73 = arith.constant 0 : index
    %57 = vector.load %arg13[%c2_72, %c0_73] : memref<18x256xbf16, #tpu.memory_space<vmem>>, vector<14x256xbf16>
    %c2_74 = arith.constant 2 : index
    %c0_75 = arith.constant 0 : index
    %58 = vector.load %arg14[%c2_74, %c0_75] : memref<18x256xbf16, #tpu.memory_space<vmem>>, vector<14x256xbf16>
    %c4_76 = arith.constant 4 : index
    %c0_77 = arith.constant 0 : index
    %59 = vector.load %arg13[%c4_76, %c0_77] : memref<18x256xbf16, #tpu.memory_space<vmem>>, vector<14x256xbf16>
    %c4_78 = arith.constant 4 : index
    %c0_79 = arith.constant 0 : index
    %60 = vector.load %arg14[%c4_78, %c0_79] : memref<18x256xbf16, #tpu.memory_space<vmem>>, vector<14x256xbf16>
    %61 = tpu.concatenate %56, %57, %58, %59, %60 in 1 : vector<14x256xbf16>, vector<14x256xbf16>, vector<14x256xbf16>, vector<14x256xbf16>, vector<14x256xbf16> -> vector<14x1280xbf16>
    %c0_80 = arith.constant 0 : index
    %c0_81 = arith.constant 0 : index
    %c0_82 = arith.constant 0 : index
    %62 = vector.load %arg5[%c0_80, %c0_81, %c0_82] : memref<2x1280x256xbf16, #tpu.memory_space<vmem>>, vector<1x1280x256xbf16>
    %63 = vector.shape_cast %62 : vector<1x1280x256xbf16> to vector<1280x256xbf16>
    %cst_83 = arith.constant dense<0.000000e+00> : vector<14x256xf32>
    %64 = tpu.matmul %61, %63, %cst_83 {dimension_numbers = #tpu.dot_dimension_numbers<[1], [0], [0], [1], [0, 0, 1, 1], [], []>} : vector<14x1280xbf16>, vector<1280x256xbf16>, vector<14x256xf32> -> vector<14x256xf32>
    %c0_84 = arith.constant 0 : index
    %c0_85 = arith.constant 0 : index
    %65 = vector.load %arg12[%c0_84, %c0_85] : memref<14x256xf32, #tpu.memory_space<vmem>>, vector<14x256xf32>
    %66 = arith.maximumf %65, %64 : vector<14x256xf32>
    %c0_86 = arith.constant 0 : index
    %c0_87 = arith.constant 0 : index
    %67 = vector.load %arg12[%c0_86, %c0_87] : memref<14x256xf32, #tpu.memory_space<vmem>>, vector<14x256xf32>
    tpu.vector_store %arg12[%c0_86, %c0_87], %66 {strides = array<i32>} : memref<14x256xf32, #tpu.memory_space<vmem>>, vector<14x256xf32>,
    %c1_88 = arith.constant 1 : index
    %c0_89 = arith.constant 0 : index
    %c0_90 = arith.constant 0 : index
    %68 = vector.load %arg5[%c1_88, %c0_89, %c0_90] : memref<2x1280x256xbf16, #tpu.memory_space<vmem>>, vector<1x1280x256xbf16>
    %69 = vector.shape_cast %68 : vector<1x1280x256xbf16> to vector<1280x256xbf16>
    %cst_91 = arith.constant dense<0.000000e+00> : vector<14x256xf32>
    %70 = tpu.matmul %61, %69, %cst_91 {dimension_numbers = #tpu.dot_dimension_numbers<[1], [0], [0], [1], [0, 0, 1, 1], [], []>} : vector<14x1280xbf16>, vector<1280x256xbf16>, vector<14x256xf32> -> vector<14x256xf32>
    %c0_92 = arith.constant 0 : index
    %c0_93 = arith.constant 0 : index
    %71 = vector.load %arg12[%c0_92, %c0_93] : memref<14x256xf32, #tpu.memory_space<vmem>>, vector<14x256xf32>
    %72 = arith.maximumf %71, %70 : vector<14x256xf32>
    %c0_94 = arith.constant 0 : index
    %c0_95 = arith.constant 0 : index
    %73 = vector.load %arg12[%c0_94, %c0_95] : memref<14x256xf32, #tpu.memory_space<vmem>>, vector<14x256xf32>
    tpu.vector_store %arg12[%c0_94, %c0_95], %72 {strides = array<i32>} : memref<14x256xf32, #tpu.memory_space<vmem>>, vector<14x256xf32>,
    %c0_96 = arith.constant 0 : index
    %c0_97 = arith.constant 0 : index
    %74 = vector.load %arg12[%c0_96, %c0_97] : memref<14x256xf32, #tpu.memory_space<vmem>>, vector<14x256xf32>
    %c0_98 = arith.constant 0 : index
    %c0_99 = arith.constant 0 : index
    %75 = vector.load %arg6[%c0_98, %c0_99] : memref<1x256xf32, #tpu.memory_space<vmem>>, vector<1x256xf32>
    %76 = vector.broadcast %75 : vector<1x256xf32> to vector<14x256xf32>
    %77 = arith.addf %74, %76 : vector<14x256xf32>
    %cst_100 = arith.constant 0.000000e+00 : f32
    %78 = vector.broadcast %cst_100 : f32 to vector<14x256xf32>
    %79 = arith.maximumf %77, %78 : vector<14x256xf32>
    %80 = arith.truncf %79 : vector<14x256xf32> to vector<14x256xbf16>
    %c0_101 = arith.constant 0 : index
    %c0_102 = arith.constant 0 : index
    %81 = vector.load %arg9[%c0_101, %c0_102] : memref<14x256xbf16, #tpu.memory_space<vmem>>, vector<14x256xbf16>
    tpu.vector_store %arg9[%c0_101, %c0_102], %80 {strides = array<i32>} : memref<14x256xbf16, #tpu.memory_space<vmem>>, vector<14x256xbf16>,
    %82 = vector.extract_strided_slice %80 {offsets = [0, 0], sizes = [2, 256], strides = [1, 1]} : vector<14x256xbf16> to vector<2x256xbf16>
    %83 = vector.extract_strided_slice %80 {offsets = [2, 0], sizes = [2, 256], strides = [1, 1]} : vector<14x256xbf16> to vector<2x256xbf16>
    %84 = vector.extract_strided_slice %80 {offsets = [4, 0], sizes = [2, 256], strides = [1, 1]} : vector<14x256xbf16> to vector<2x256xbf16>
    %85 = vector.extract_strided_slice %80 {offsets = [6, 0], sizes = [2, 256], strides = [1, 1]} : vector<14x256xbf16> to vector<2x256xbf16>
    %86 = vector.extract_strided_slice %80 {offsets = [8, 0], sizes = [2, 256], strides = [1, 1]} : vector<14x256xbf16> to vector<2x256xbf16>
    %87 = vector.extract_strided_slice %80 {offsets = [10, 0], sizes = [2, 256], strides = [1, 1]} : vector<14x256xbf16> to vector<2x256xbf16>
    %88 = vector.extract_strided_slice %80 {offsets = [12, 0], sizes = [2, 256], strides = [1, 1]} : vector<14x256xbf16> to vector<2x256xbf16>
    %89 = tpu.concatenate %82, %83, %84, %85, %86, %87, %88 in 1 : vector<2x256xbf16>, vector<2x256xbf16>, vector<2x256xbf16>, vector<2x256xbf16>, vector<2x256xbf16>, vector<2x256xbf16>, vector<2x256xbf16> -> vector<2x1792xbf16>
    %c0_103 = arith.constant 0 : index
    %c0_104 = arith.constant 0 : index
    %90 = vector.load %arg7[%c0_103, %c0_104] : memref<1792x128xbf16, #tpu.memory_space<vmem>>, vector<1792x128xbf16>
    %cst_105 = arith.constant dense<0.000000e+00> : vector<2x128xf32>
    %91 = tpu.matmul %89, %90, %cst_105 {dimension_numbers = #tpu.dot_dimension_numbers<[1], [0], [0], [1], [0, 0, 1, 1], [], []>} : vector<2x1792xbf16>, vector<1792x128xbf16>, vector<2x128xf32> -> vector<2x128xf32>
    %c0_106 = arith.constant 0 : index
    %c0_107 = arith.constant 0 : index
    %92 = vector.load %arg8[%c0_106, %c0_107] : memref<1x128xf32, #tpu.memory_space<vmem>>, vector<1x128xf32>
    %93 = vector.broadcast %92 : vector<1x128xf32> to vector<2x128xf32>
    %94 = arith.addf %91, %93 : vector<2x128xf32>
    %c0_108 = arith.constant 0 : index
    %c0_109 = arith.constant 0 : index
    %95 = vector.load %arg10[%c0_108, %c0_109] : memref<2x128xf32, #tpu.memory_space<vmem>>, vector<2x128xf32>
    tpu.vector_store %arg10[%c0_108, %c0_109], %94 {strides = array<i32>} : memref<2x128xf32, #tpu.memory_space<vmem>>, vector<2x128xf32>,
    return
  }
  func.func @transform_0(%arg0: i32) -> (i32, i32) {
    %c0_i32 = arith.constant 0 : i32
    %c0_i32_0 = arith.constant 0 : i32
    return %arg0, %c0_i32 : i32, i32
  }
  func.func @transform_1(%arg0: i32) -> (i32, i32) {
    %c0_i32 = arith.constant 0 : i32
    %c0_i32_0 = arith.constant 0 : i32
    return %arg0, %c0_i32 : i32, i32
  }
  func.func @transform_2(%arg0: i32) -> (i32, i32, i32) {
    %c0_i32 = arith.constant 0 : i32
    %c0_i32_0 = arith.constant 0 : i32
    %c0_i32_1 = arith.constant 0 : i32
    %c0_i32_2 = arith.constant 0 : i32
    return %c0_i32, %c0_i32_0, %c0_i32_1 : i32, i32, i32
  }
  func.func @transform_3(%arg0: i32) -> (i32, i32) {
    %c0_i32 = arith.constant 0 : i32
    %c0_i32_0 = arith.constant 0 : i32
    %c0_i32_1 = arith.constant 0 : i32
    return %c0_i32, %c0_i32_0 : i32, i32
  }
  func.func @transform_4(%arg0: i32) -> (i32, i32, i32) {
    %c0_i32 = arith.constant 0 : i32
    %c0_i32_0 = arith.constant 0 : i32
    %c0_i32_1 = arith.constant 0 : i32
    %c0_i32_2 = arith.constant 0 : i32
    return %c0_i32, %c0_i32_0, %c0_i32_1 : i32, i32, i32
  }
  func.func @transform_5(%arg0: i32) -> (i32, i32) {
    %c0_i32 = arith.constant 0 : i32
    %c0_i32_0 = arith.constant 0 : i32
    %c0_i32_1 = arith.constant 0 : i32
    return %c0_i32, %c0_i32_0 : i32, i32
  }
  func.func @transform_6(%arg0: i32) -> (i32, i32) {
    %c0_i32 = arith.constant 0 : i32
    %c0_i32_0 = arith.constant 0 : i32
    %c0_i32_1 = arith.constant 0 : i32
    return %c0_i32, %c0_i32_0 : i32, i32
  }
  func.func @transform_7(%arg0: i32) -> (i32, i32) {
    %c0_i32 = arith.constant 0 : i32
    %c0_i32_0 = arith.constant 0 : i32
    %c0_i32_1 = arith.constant 0 : i32
    return %c0_i32, %c0_i32_0 : i32, i32
  }
  func.func @transform_8(%arg0: i32) -> (i32, i32) {
    %c0_i32 = arith.constant 0 : i32
    %c0_i32_0 = arith.constant 0 : i32
    return %arg0, %c0_i32 : i32, i32
  }
  func.func @transform_9(%arg0: i32) -> (i32, i32) {
    %c0_i32 = arith.constant 0 : i32
    %c0_i32_0 = arith.constant 0 : i32
    return %arg0, %c0_i32 : i32, i32
  }
}

</mosaic_0001>

<bundles_post_ra>
// kernel: cnn_forward.1
= control target key start
LH: loop header
LB: loop body
LE: loop exit
PB: predicated region body
PF: predicated region fallthrough
CT: control target
= control target key end

     0   :  { %15 = vsyncpa [#allocation7], 0  ;;  %s12529_s0 = inlined_call_operand.vmem [shape: bf16[28,160], index: 0, kind: input, shape index: {}]   ;;  %s12530_s1 = inlined_call_operand.vmem [shape: bf16[28,160], index: 1, kind: input, shape index: {}]   ;;  %s12531_s2 = inlined_call_operand.hbm [shape: bf16[2,160,256], index: 2, kind: input, shape index: {}]   ;;  %s12532_s3 = inlined_call_operand.hbm [shape: f32[1,256], index: 3, kind: input, shape index: {}]   ;;  %s12533_s4 = inlined_call_operand.hbm [shape: bf16[2,1280,256], index: 4, kind: input, shape index: {}]   ;;  %s12534_s5 = inlined_call_operand.hbm [shape: f32[1,256], index: 5, kind: input, shape index: {}]   ;;  %s12535_s6 = inlined_call_operand.hbm [shape: bf16[1792,128], index: 6, kind: input, shape index: {}]   ;;  %s12536_s7 = inlined_call_operand.hbm [shape: f32[1,128], index: 7, kind: input, shape index: {}]   ;;  %s12537_s8 = inlined_call_operand.vmem [shape: bf16[14,256], index: 8, kind: output, shape index: {0}]   ;;  %s12538_s9 = inlined_call_operand.hbm [shape: f32[2,128], index: 9, kind: output, shape index: {1}]  }
   0x1   :  { %16 = vsyncpa [#allocation10], 0 }
   0x2   :  { %17 = vsyncpa [#allocation13], 0 }
   0x3   :  { %18 = vsyncpa [#allocation16], 0  ;;  %s42_s11 = sshll.u32 %s12532_s3, 4  ;;  %s43_s11 = int_to_ptr.hbm [resolvable:$true] %s42_s11 }
   0x4   :  { %19 = vsyncpa [#allocation8], 0  ;;  %s11875_s12 = smov [#allocation9]   ;;  %s66_s16 = sshll.u32 %s12534_s5, 4  ;;  %s67_s16 = int_to_ptr.hbm [resolvable:$true] %s66_s16 }
   0x5   :  { %s44_s13 = sshll.u32 %s11875_s12, 4  ;;  %s11876_s17 = smov [#allocation12]   ;;  %s45_s13 = int_to_ptr.vmem [resolvable:$true] %s44_s13 }
   0x6   :  { %47 = dma.hbm_to_vmem [thread:$0]  %s43_s11, 32, %s45_s13, [#allocation10]  }
   0x7   :  { %s68_s18 = sshll.u32 %s11876_s17, 4  ;;  %s28_s21 = sshll.u32 %s12531_s2, 4  ;;  %s69_s18 = int_to_ptr.vmem [resolvable:$true] %s68_s18  ;;  %s29_s21 = int_to_ptr.hbm [resolvable:$true] %s28_s21 }
   0x8   :  { %71 = dma.hbm_to_vmem [thread:$0]  %s67_s16, 32, %s69_s18, [#allocation13]  }
   0x9   :  { %s11877_s3 = smov [#allocation6]   ;;  %s52_s25 = sshll.u32 %s12533_s4, 4  ;;  %s53_s25 = int_to_ptr.hbm [resolvable:$true] %s52_s25 }
   0xa   :  { %s30_s22 = sshll.u32 %s11877_s3, 4  ;;  %s11878_s26 = smov 128   ;;  %s31_s22 = int_to_ptr.vmem [resolvable:$true] %s30_s22 }
   0xb   :  { %s11879_s5 = smov 8   ;;  %s11880_s27 = smov [#allocation11]  }
   0xc   :  { %36 = dma.hbm_to_vmem [thread:$0]  %s29_s21, 5120, %s31_s22, [#allocation7], %s11878_s26, %s11878_s26, %s11879_s5  }
   0xd   :  { %s54_s28 = sshll.u32 %s11880_s27, 4  ;;  %s76_s2 = sshll.u32 %s12535_s6, 4  ;;  %s55_s28 = int_to_ptr.vmem [resolvable:$true] %s54_s28  ;;  %s77_s2 = int_to_ptr.hbm [resolvable:$true] %s76_s2 }
   0xe   :  { %60 = dma.hbm_to_vmem [thread:$0]  %s53_s25, 40960, %s55_s28, [#allocation10], %s11878_s26, %s11878_s26, %s11879_s5  }
   0xf   :  { %s11881_s10 = smov [#allocation14]   ;;  %s90_s4 = sshll.u32 %s12536_s7, 4  ;;  %s91_s4 = int_to_ptr.hbm [resolvable:$true] %s90_s4 }
  0x10   :  { %s78_s11 = sshll.u32 %s11881_s10, 4  ;;  %s11882_s14 = smov 64   ;;  %s79_s11 = int_to_ptr.vmem [resolvable:$true] %s78_s11 }
  0x11   :  { %s11883_s15 = smov 4   ;;  %s11884_s16 = smov [#allocation15]  }
  0x12   :  { %84 = dma.hbm_to_vmem [thread:$0]  %s77_s2, 14336, %s79_s11, [#allocation13], %s11882_s14, %s11882_s14, %s11883_s15  }
  0x13   :  { %s92_s17 = sshll.u32 %s11884_s16, 4  ;;  %s93_s17 = int_to_ptr.vmem [resolvable:$true] %s92_s17 }
  0x14   :  { %95 = dma.hbm_to_vmem [thread:$0]  %s91_s4, 16, %s93_s17, [#allocation16]  }
  0x15   :  { %11865 = dma.done.wait [#allocation7], 5120  }
  0x16   :  { %11866 = vsyncadd [#allocation7], 4294962176 }
  0x17   :  { %11867 = dma.done.wait [#allocation10], 40992  }
  0x18   :  { %11868 = vsyncadd [#allocation10], 4294926304 }
  0x19   :  { %11869 = dma.done.wait [#allocation13], 14368  }
  0x1a   :  { %11870 = vsyncadd [#allocation13], 4294952928 }
  0x1b   :  { %11871 = dma.done.wait [#allocation16], 16  }
  0x1c   :  { %11872 = vsyncadd [#allocation16], 4294967280  ;;  %v7501_v0 = vld [vmem:[#allocation6 + $0x70] sm:$0xf]  ;;  %v10859_v1 = vld [vmem:[#allocation6 + $0x74] sm:$0xf0] }
  0x1d   :  { %v10858_v2 = vld [vmem:[#allocation6 + $0x74] sm:$0xf]  ;;  %v7502_v3 = vor.u32 %v10859_v1, %v7501_v0  ;;  %v7503_v4 = vld [vmem:[#allocation6 + $0x78] sm:$0xf0]  ;;  %v7493_v9 = vld [vmem:[#allocation6 + $0x60] sm:$0xf] }
  0x1e   :  { %v10862_v5 = vld [vmem:[#allocation6 + $0x94] sm:$0xf]  ;;  %v7519_v6 = vld [vmem:[#allocation6 + $0x98] sm:$0xf0]  ;;  %v7506_v7 = vor.u32 %v10858_v2, %v7503_v4  ;;  %v10857_v10 = vld [vmem:[#allocation6 + $0x64] sm:$0xf0] }
  0x1f   :  { %v7522_v8 = vor.u32 %v10862_v5, %v7519_v6  ;;  %v10856_v11 = vld [vmem:[#allocation6 + $0x64] sm:$0xf]  ;;  %274 = vmatpush.bf16.msra.mxu0 %v7502_v3  ;;  %v7494_v12 = vor.u32 %v10857_v10, %v7493_v9  ;;  %v7495_v13 = vld [vmem:[#allocation6 + $0x68] sm:$0xf0]  ;;  %v7517_v18 = vld [vmem:[#allocation6 + $0x90] sm:$0xf] }
  0x20   :  { %v10860_v14 = vld [vmem:[#allocation6 + $0x84] sm:$0xf]  ;;  %v7511_v15 = vld [vmem:[#allocation6 + $0x88] sm:$0xf0]  ;;  %312 = vmatpush.bf16.msra.mxu2 %v7506_v7  ;;  %v7498_v16 = vor.u32 %v10856_v11, %v7495_v13  ;;  %v10863_v19 = vld [vmem:[#allocation6 + $0x94] sm:$0xf0] }
  0x21   :  { %337 = vmatpush.bf16.msra.mxu3 %v7522_v8  ;;  %v7514_v17 = vor.u32 %v10860_v14, %v7511_v15  ;;  %v10836_v20 = vld [vmem:[%s12529_s0 + $0x4] sm:$0xf]  ;;  %v7518_v21 = vor.u32 %v10863_v19, %v7517_v18  ;;  %v7431_v22 = vld [vmem:[%s12529_s0 + $0x8] sm:$0xf0]  ;;  %v7485_v23 = vld [vmem:[#allocation6 + $0x50] sm:$0xf] }
  0x22   :  { %v10855_v24 = vld [vmem:[#allocation6 + $0x54] sm:$0xf0]  ;;  %v10854_v25 = vld [vmem:[#allocation6 + $0x54] sm:$0xf]  ;;  %v7487_v26 = vld [vmem:[#allocation6 + $0x58] sm:$0xf0]  ;;  %v11961_v28 = vor.u32 %v10836_v20, %v7431_v22 }
  0x23   :  { %v7509_v27 = vld [vmem:[#allocation6 + $0x80] sm:$0xf]  ;;  %275 = vmatpush.bf16.msra.mxu0 %v7494_v12  ;;  %299 = vmatpush.bf16.msra.mxu1 %v7518_v21  ;;  %vm267_vm0 = vcmask 261120   ;;  %v7486_v29 = vor.u32 %v10855_v24, %v7485_v23  ;;  %v10861_v30 = vld [vmem:[#allocation6 + $0x84] sm:$0xf0]  ;;  %v7490_v31 = vor.u32 %v10854_v25, %v7487_v26  ;;  %vm1083_vm1 = vcmask 1040384  }
  0x24   :  { %313 = vmatpush.bf16.msra.mxu2 %v7498_v16  ;;  %v7510_v32 = vor.u32 %v10861_v30, %v7509_v27  ;;  %v7477_v33 = vld [vmem:[#allocation6 + $0x40] sm:$0xf]  ;;  %v10853_v34 = vld [vmem:[#allocation6 + $0x44] sm:$0xf0]  ;;  %v7585_v35 = vld [vmem:[#allocation6 + $0x110] sm:$0xf] }
  0x25   :  { %338 = vmatpush.bf16.msra.mxu3 %v7514_v17  ;;  %v10852_v36 = vld [vmem:[#allocation6 + $0x44] sm:$0xf]  ;;  %v7479_v37 = vld [vmem:[#allocation6 + $0x48] sm:$0xf0]  ;;  %v10879_v38 = vld [vmem:[#allocation6 + $0x114] sm:$0xf0]  ;;  %v7478_v41 = vor.u32 %v10853_v34, %v7477_v33 }
  0x26   :  { %v7586_v39 = vor.u32 %v10879_v38, %v7585_v35  ;;  %v7577_v40 = vld [vmem:[#allocation6 + $0x100] sm:$0xf]  ;;  %v10877_v42 = vld [vmem:[#allocation6 + $0x104] sm:$0xf0]  ;;  %v7482_v43 = vor.u32 %v10852_v36, %v7479_v37  ;;  %v7469_v44 = vld [vmem:[#allocation6 + $0x30] sm:$0xf] }
  0x27   :  { %276 = vmatpush.bf16.msra.mxu0 %v7486_v29  ;;  %300 = vmatpush.bf16.msra.mxu1 %v7510_v32  ;;  %v10851_v45 = vld [vmem:[#allocation6 + $0x34] sm:$0xf0]  ;;  %v10850_v46 = vld [vmem:[#allocation6 + $0x34] sm:$0xf]  ;;  %v7471_v47 = vld [vmem:[#allocation6 + $0x38] sm:$0xf0]  ;;  %v7578_v48 = vor.u32 %v10877_v42, %v7577_v40 }
  0x28   :  { %7525 = vmatmul.msk.bf16.vlgmr.msra.gmra.mxu3 %vm267_vm0, %v11961_v28  ;;  %314 = vmatpush.bf16.msra.mxu2 %v7490_v31  ;;  %v7569_v49 = vld [vmem:[#allocation6 + $0xf0] sm:$0xf]  ;;  %v10875_v50 = vld [vmem:[#allocation6 + $0xf4] sm:$0xf0]  ;;  %v7470_v51 = vor.u32 %v10851_v45, %v7469_v44  ;;  %v7474_v52 = vor.u32 %v10850_v46, %v7471_v47  ;;  %v7461_v53 = vld [vmem:[#allocation6 + $0x20] sm:$0xf] }
  0x29   :  { %v10849_v54 = vld [vmem:[#allocation6 + $0x24] sm:$0xf0]  ;;  %v10848_v55 = vld [vmem:[#allocation6 + $0x24] sm:$0xf]  ;;  %v7463_v56 = vld [vmem:[#allocation6 + $0x28] sm:$0xf0]  ;;  %v7570_v57 = vor.u32 %v10875_v50, %v7569_v49 }
  0x2a   :  { %7523 = vmatmul.msk.bf16.vlgmr.msra.gmra.mxu1 %vm267_vm0, %v11961_v28  ;;  %v7561_v58 = vld [vmem:[#allocation6 + $0xe0] sm:$0xf]  ;;  %v10873_v59 = vld [vmem:[#allocation6 + $0xe4] sm:$0xf0]  ;;  %v7601_v60 = vld [vmem:[#allocation6 + $0x130] sm:$0xf]  ;;  %v7462_v61 = vor.u32 %v10849_v54, %v7461_v53  ;;  %v7466_v1 = vor.u32 %v10848_v55, %v7463_v56 }
  0x2b   :  { %487 = vmatpush.bf16.msrb.mxu1 %v7586_v39  ;;  %277 = vmatpush.bf16.msra.mxu0 %v7478_v41  ;;  %v10838_v62 = vld [vmem:[%s12529_s0 + $0x14] sm:$0xf]  ;;  %v7439_v63 = vld [vmem:[%s12529_s0 + $0x18] sm:$0x30]  ;;  %v10883_v0 = vld [vmem:[#allocation6 + $0x134] sm:$0xf0]  ;;  %v7562_v8 = vor.u32 %v10873_v59, %v7561_v58 }
  0x2c   :  { %315 = vmatpush.bf16.msra.mxu2 %v7482_v43  ;;  %v7453_v2 = vld [vmem:[#allocation6 + $0x10] sm:$0xf]  ;;  %v10847_v3 = vld [vmem:[#allocation6 + $0x14] sm:$0xf0]  ;;  %v7602_v4 = vor.u32 %v10883_v0, %v7601_v60  ;;  %v7593_v5 = vld [vmem:[#allocation6 + $0x120] sm:$0xf]  ;;  %v11973_v13 = vor.u32 %v10838_v62, %v7439_v63 }
  0x2d   :  { %v10846_v6 = vld [vmem:[#allocation6 + $0x14] sm:$0xf]  ;;  %v7455_v7 = vld [vmem:[#allocation6 + $0x18] sm:$0xf0]  ;;  %v10881_v9 = vld [vmem:[#allocation6 + $0x124] sm:$0xf0]  ;;  %v7454_v14 = vor.u32 %v10847_v3, %v7453_v2 }
  0x2e   :  { %v7553_v10 = vld [vmem:[#allocation6 + $0xd0] sm:$0xf]  ;;  %v10871_v11 = vld [vmem:[#allocation6 + $0xd4] sm:$0xf0]  ;;  %512 = vmatpush.bf16.msrb.mxu3 %v7602_v4  ;;  %v7594_v12 = vor.u32 %v10881_v9, %v7593_v5  ;;  %v7458_v15 = vor.u32 %v10846_v6, %v7455_v7  ;;  %v7445_v16 = vld [vmem:[#allocation6] sm:$0xf] }
  0x2f   :  { %488 = vmatpush.bf16.msrb.mxu1 %v7578_v48  ;;  %278 = vmatpush.bf16.msra.mxu0 %v7470_v51  ;;  %v10845_v17 = vld [vmem:[#allocation6 + $0x4] sm:$0xf0]  ;;  %v10844_v18 = vld [vmem:[#allocation6 + $0x4] sm:$0xf]  ;;  %v7447_v19 = vld [vmem:[#allocation6 + $0x8] sm:$0xf0]  ;;  %v7554_v20 = vor.u32 %v10871_v11, %v7553_v10 }
  0x30   :  { %316 = vmatpush.bf16.msra.mxu2 %v7474_v52  ;;  %v10878_v21 = vld [vmem:[#allocation6 + $0x114] sm:$0xf]  ;;  %v7587_v22 = vld [vmem:[#allocation6 + $0x118] sm:$0xf0]  ;;  %v7545_v23 = vld [vmem:[#allocation6 + $0xc0] sm:$0xf]  ;;  %v7446_v25 = vor.u32 %v10845_v17, %v7445_v16  ;;  %v7450_v29 = vor.u32 %v10844_v18, %v7447_v19 }
  0x31   :  { %v10869_v24 = vld [vmem:[#allocation6 + $0xc4] sm:$0xf0]  ;;  %v7429_v26 = vld [vmem:[%s12529_s0] sm:$0xf]  ;;  %v10837_v27 = vld [vmem:[%s12529_s0 + $0x4] sm:$0xf0]  ;;  %v7590_v30 = vor.u32 %v10878_v21, %v7587_v22 }
  0x32   :  { %513 = vmatpush.bf16.msrb.mxu3 %v7594_v12  ;;  %v10876_v31 = vld [vmem:[#allocation6 + $0x104] sm:$0xf]  ;;  %v7546_v32 = vor.u32 %v10869_v24, %v7545_v23  ;;  %v7579_v33 = vld [vmem:[#allocation6 + $0x108] sm:$0xf0]  ;;  %v10882_v34 = vld [vmem:[#allocation6 + $0x134] sm:$0xf]  ;;  %v11983_v36 = vor.u32 %v10837_v27, %v7429_v26 }
  0x33   :  { %489 = vmatpush.bf16.msrb.mxu1 %v7570_v57  ;;  %279 = vmatpush.bf16.msra.mxu0 %v7462_v61  ;;  %v7603_v35 = vld [vmem:[#allocation6 + $0x138] sm:$0xf0]  ;;  %v7537_v37 = vld [vmem:[#allocation6 + $0xb0] sm:$0xf]  ;;  %v10867_v38 = vld [vmem:[#allocation6 + $0xb4] sm:$0xf0]  ;;  %v7582_v42 = vor.u32 %v10876_v31, %v7579_v33 }
  0x34   :  { %317 = vmatpush.bf16.msra.mxu2 %v7466_v1  ;;  %v7606_v39 = vor.u32 %v10882_v34, %v7603_v35  ;;  %v10880_v40 = vld [vmem:[#allocation6 + $0x124] sm:$0xf]  ;;  %v7595_v41 = vld [vmem:[#allocation6 + $0x128] sm:$0xf0]  ;;  %v10874_v43 = vld [vmem:[#allocation6 + $0xf4] sm:$0xf]  ;;  %v7538_v44 = vor.u32 %v10867_v38, %v7537_v37 }
  0x35   :  { %v7571_v45 = vld [vmem:[#allocation6 + $0xf8] sm:$0xf0]  ;;  %v7598_v46 = vor.u32 %v10880_v40, %v7595_v41  ;;  %v7701_v47 = vld [vmem:[#allocation6 + $0x90] sm:$0xf]  ;;  %v10903_v48 = vld [vmem:[#allocation6 + $0x94] sm:$0xf0] }
  0x36   :  { %v7529_v49 = vld [vmem:[#allocation6 + $0xa0] sm:$0xf]  ;;  %v10865_v50 = vld [vmem:[#allocation6 + $0xa4] sm:$0xf0]  ;;  %v7702_v51 = vor.u32 %v10903_v48, %v7701_v47  ;;  %v7685_v52 = vld [vmem:[#allocation6 + $0x70] sm:$0xf]  ;;  %v7574_v55 = vor.u32 %v10874_v43, %v7571_v45 }
  0x37   :  { %490 = vmatpush.bf16.msrb.mxu1 %v7562_v8  ;;  %280 = vmatpush.bf16.msra.mxu0 %v7454_v14  ;;  %v10899_v53 = vld [vmem:[#allocation6 + $0x74] sm:$0xf0]  ;;  %v7693_v54 = vld [vmem:[#allocation6 + $0x80] sm:$0xf]  ;;  %v10901_v56 = vld [vmem:[#allocation6 + $0x84] sm:$0xf0]  ;;  %v7530_v57 = vor.u32 %v10865_v50, %v7529_v49 }
  0x38   :  { %7526 = vmatmul.msk.bf16.gmra.mxu3 %vm267_vm0, %v11973_v13  ;;  %318 = vmatpush.bf16.msra.mxu2 %v7458_v15  ;;  %v10872_v58 = vld [vmem:[#allocation6 + $0xe4] sm:$0xf]  ;;  %v7563_v59 = vld [vmem:[#allocation6 + $0xe8] sm:$0xf0]  ;;  %v7694_v60 = vor.u32 %v10901_v56, %v7693_v54  ;;  %v7686_v61 = vor.u32 %v10899_v53, %v7685_v52  ;;  %v7677_v62 = vld [vmem:[#allocation6 + $0x60] sm:$0xf] }
  0x39   :  { %756 = vmatpush.bf16.msra.mxu3 %v7702_v51  ;;  %v10897_v63 = vld [vmem:[#allocation6 + $0x64] sm:$0xf0]  ;;  %v7566_v0 = vor.u32 %v10872_v58, %v7563_v59  ;;  %v10870_v1 = vld [vmem:[#allocation6 + $0xd4] sm:$0xf]  ;;  %v7555_v2 = vld [vmem:[#allocation6 + $0xd8] sm:$0xf0] }
  0x3a   :  { %7524 = vmatmul.msk.bf16.gmra.mxu1 %vm267_vm0, %v11973_v13  ;;  %v7437_v3 = vld [vmem:[%s12529_s0 + $0x10] sm:$0xf]  ;;  %v7678_v4 = vor.u32 %v10897_v63, %v7677_v62  ;;  %v10839_v5 = vld [vmem:[%s12529_s0 + $0x14] sm:$0x30]  ;;  %v7669_v6 = vld [vmem:[#allocation6 + $0x50] sm:$0xf]  ;;  %v7558_v8 = vor.u32 %v10870_v1, %v7555_v2 }
  0x3b   :  { %491 = vmatpush.bf16.msrb.mxu1 %v7554_v20  ;;  %281 = vmatpush.bf16.msra.mxu0 %v7446_v25  ;;  %v10895_v7 = vld [vmem:[#allocation6 + $0x54] sm:$0xf0]  ;;  %v10868_v9 = vld [vmem:[#allocation6 + $0xc4] sm:$0xf]  ;;  %v7547_v10 = vld [vmem:[#allocation6 + $0xc8] sm:$0xf0]  ;;  %v11997_v11 = vor.u32 %v10839_v5, %v7437_v3 }
  0x3c   :  { %319 = vmatpush.bf16.msra.mxu2 %v7450_v29  ;;  %v7670_v12 = vor.u32 %v10895_v7, %v7669_v6  ;;  %v7661_v14 = vld [vmem:[#allocation6 + $0x40] sm:$0xf]  ;;  %v10893_v15 = vld [vmem:[#allocation6 + $0x44] sm:$0xf0]  ;;  %v7550_v16 = vor.u32 %v10868_v9, %v7547_v10  ;;  %v10866_v17 = vld [vmem:[#allocation6 + $0xb4] sm:$0xf] }
  0x3d   :  { %757 = vmatpush.bf16.msra.mxu3 %v7694_v60  ;;  %v7539_v18 = vld [vmem:[#allocation6 + $0xb8] sm:$0xf0]  ;;  %v7662_v19 = vor.u32 %v10893_v15, %v7661_v14  ;;  %v7653_v20 = vld [vmem:[#allocation6 + $0x30] sm:$0xf]  ;;  %v10891_v21 = vld [vmem:[#allocation6 + $0x34] sm:$0xf0] }
  0x3e   :  { %282 = vmatmul.bf16.vlgmr.msra.gmra.mxu0 %v11983_v36  ;;  %v7542_v22 = vor.u32 %v10866_v17, %v7539_v18  ;;  %v10864_v23 = vld [vmem:[#allocation6 + $0xa4] sm:$0xf]  ;;  %v7531_v24 = vld [vmem:[#allocation6 + $0xa8] sm:$0xf0]  ;;  %v7654_v25 = vor.u32 %v10891_v21, %v7653_v20  ;;  %v10898_v26 = vld [vmem:[#allocation6 + $0x74] sm:$0xf] }
  0x3f   :  { %525 = vmatpush.bf16.msrb.mxu0 %v7590_v30  ;;  %492 = vmatpush.bf16.msrb.mxu1 %v7546_v32  ;;  %v7687_v27 = vld [vmem:[#allocation6 + $0x78] sm:$0xf0]  ;;  %v7645_v29 = vld [vmem:[#allocation6 + $0x20] sm:$0xf]  ;;  %v10889_v30 = vld [vmem:[#allocation6 + $0x24] sm:$0xf0]  ;;  %v7534_v31 = vor.u32 %v10864_v23, %v7531_v24 }
  0x40   :  { %550 = vmatpush.bf16.msrb.mxu2 %v7606_v39  ;;  %v7690_v32 = vor.u32 %v10898_v26, %v7687_v27  ;;  %v10902_v33 = vld [vmem:[#allocation6 + $0x94] sm:$0xf]  ;;  %v7646_v34 = vor.u32 %v10889_v30, %v7645_v29  ;;  %v10896_v35 = vld [vmem:[#allocation6 + $0x64] sm:$0xf]  ;;  %v7679_v37 = vld [vmem:[#allocation6 + $0x68] sm:$0xf0] }
  0x41   :  { %320 = vmatmul.bf16.vlgmr.msra.gmra.mxu2 %v11983_v36  ;;  %v7703_v38 = vld [vmem:[#allocation6 + $0x98] sm:$0xf0]  ;;  %v7637_v39 = vld [vmem:[#allocation6 + $0x10] sm:$0xf]  ;;  %v10887_v40 = vld [vmem:[#allocation6 + $0x14] sm:$0xf0] }
  0x42   :  { %v7706_v41 = vor.u32 %v10902_v33, %v7703_v38  ;;  %v7695_v43 = vld [vmem:[#allocation6 + $0x88] sm:$0xf0]  ;;  %v10894_v47 = vld [vmem:[#allocation6 + $0x54] sm:$0xf]  ;;  %v7671_v48 = vld [vmem:[#allocation6 + $0x58] sm:$0xf0] }
  0x43   :  { %526 = vmatpush.bf16.msrb.mxu0 %v7582_v42  ;;  %493 = vmatpush.bf16.msrb.mxu1 %v7538_v44  ;;  %v10900_v42 = vld [vmem:[#allocation6 + $0x84] sm:$0xf]  ;;  %v7682_v44 = vor.u32 %v10896_v35, %v7679_v37  ;;  %v7629_v49 = vld [vmem:[#allocation6] sm:$0xf]  ;;  %v10885_v50 = vld [vmem:[#allocation6 + $0x4] sm:$0xf0]  ;;  %v7674_v53 = vor.u32 %v10894_v47, %v7671_v48 }
  0x44   :  { %551 = vmatpush.bf16.msrb.mxu2 %v7598_v46  ;;  %v7698_v45 = vor.u32 %v10900_v42, %v7695_v43  ;;  %v7638_v46 = vor.u32 %v10887_v40, %v7637_v39  ;;  %v7769_v51 = vld [vmem:[#allocation6 + $0x110] sm:$0xf]  ;;  %v10919_v52 = vld [vmem:[#allocation6 + $0x114] sm:$0xf0]  ;;  %v7630_v56 = vor.u32 %v10885_v50, %v7629_v49  ;;  %v7663_v58 = vld [vmem:[#allocation6 + $0x48] sm:$0xf0] }
  0x45   :  { %v7785_v54 = vld [vmem:[#allocation6 + $0x130] sm:$0xf]  ;;  %v10840_v60 = vld [vmem:[%s12530_s1 + $0x4] sm:$0xf]  ;;  %v7770_v62 = vor.u32 %v10919_v52, %v7769_v51  ;;  %v7777_v63 = vld [vmem:[#allocation6 + $0x120] sm:$0xf] }
  0x46   :  { %v10921_v1 = vld [vmem:[#allocation6 + $0x124] sm:$0xf0]  ;;  %v7613_v7 = vld [vmem:[%s12530_s1] sm:$0xf]  ;;  %v10888_v14 = vld [vmem:[#allocation6 + $0x24] sm:$0xf] }
  0x47   :  { %527 = vmatpush.bf16.msrb.mxu0 %v7574_v55  ;;  %494 = vmatpush.bf16.msrb.mxu1 %v7530_v57  ;;  %v10923_v55 = vld [vmem:[#allocation6 + $0x134] sm:$0xf0]  ;;  %v10892_v57 = vld [vmem:[#allocation6 + $0x44] sm:$0xf]  ;;  %v7778_v3 = vor.u32 %v10921_v1, %v7777_v63  ;;  %v7753_v10 = vld [vmem:[#allocation6 + $0xf0] sm:$0xf] }
  0x48   :  { %7607 = vmatmul.msk.bf16.vlgmr.msrb.gmra.mxu3 %vm267_vm0, %v11961_v28  ;;  %794 = vmatpush.bf16.msra.mxu2 %v7706_v41  ;;  %v7786_v59 = vor.u32 %v10923_v55, %v7785_v54  ;;  %v7666_v2 = vor.u32 %v10892_v57, %v7663_v58  ;;  %v7647_v15 = vld [vmem:[#allocation6 + $0x28] sm:$0xf0]  ;;  %v10913_v20 = vld [vmem:[#allocation6 + $0xe4] sm:$0xf0]  ;;  %v10886_v21 = vld [vmem:[#allocation6 + $0x14] sm:$0xf] }
  0x49   :  { %v7650_v18 = vor.u32 %v10888_v14, %v7647_v15  ;;  %v10911_v26 = vld [vmem:[#allocation6 + $0xd4] sm:$0xf0]  ;;  %v10884_v27 = vld [vmem:[#allocation6 + $0x4] sm:$0xf]  ;;  %v7631_v29 = vld [vmem:[#allocation6 + $0x8] sm:$0xf0] }
  0x4a   :  { %495 = vmatmul.bf16.vlgmr.msrb.gmra.mxu1 %v11983_v36  ;;  %976 = vmatpush.bf16.msrb.mxu3 %v7786_v59  ;;  %v10918_v30 = vld [vmem:[#allocation6 + $0x114] sm:$0xf]  ;;  %v7623_v33 = vld [vmem:[%s12530_s1 + $0x18] sm:$0x30]  ;;  %v7634_v35 = vor.u32 %v10884_v27, %v7631_v29  ;;  %v10909_v37 = vld [vmem:[#allocation6 + $0xc4] sm:$0xf0] }
  0x4b   :  { %731 = vmatpush.bf16.msra.mxu1 %v7686_v61  ;;  %528 = vmatpush.bf16.msrb.mxu0 %v7566_v0  ;;  %v7615_v61 = vld [vmem:[%s12530_s1 + $0x8] sm:$0xf0]  ;;  %v7761_v0 = vld [vmem:[#allocation6 + $0x100] sm:$0xf]  ;;  %v7763_v40 = vld [vmem:[#allocation6 + $0x108] sm:$0xf0] }
  0x4c   :  { %795 = vmatpush.bf16.msra.mxu2 %v7698_v45  ;;  %v12014_v5 = vor.u32 %v10840_v60, %v7615_v61  ;;  %v7621_v41 = vld [vmem:[%s12530_s1 + $0x10] sm:$0xf]  ;;  %v10843_v42 = vld [vmem:[%s12530_s1 + $0x14] sm:$0x30]  ;;  %v10907_v45 = vld [vmem:[#allocation6 + $0xb4] sm:$0xf0] }
  0x4d   :  { %v7787_v48 = vld [vmem:[#allocation6 + $0x138] sm:$0xf0]  ;;  %v7622_v49 = vor.u32 %v10843_v42, %v7621_v41  ;;  %v10920_v51 = vld [vmem:[#allocation6 + $0x124] sm:$0xf]  ;;  %v7779_v55 = vld [vmem:[#allocation6 + $0x128] sm:$0xf0] }
  0x4e   :  { %287 = vmatmul.bf16.gmra.mxu0 %v11997_v11  ;;  %977 = vmatpush.bf16.msrb.mxu3 %v7778_v3  ;;  %v7755_v54 = vld [vmem:[#allocation6 + $0xf8] sm:$0xf0]  ;;  %v10905_v57 = vld [vmem:[#allocation6 + $0xa4] sm:$0xf0]  ;;  %v7782_v58 = vor.u32 %v10920_v51, %v7779_v55  ;;  %v10912_v61 = vld [vmem:[#allocation6 + $0xe4] sm:$0xf] }
  0x4f   :  { %732 = vmatpush.bf16.msra.mxu1 %v7678_v4  ;;  %529 = vmatpush.bf16.msrb.mxu0 %v7558_v8  ;;  %v10890_v4 = vld [vmem:[#allocation6 + $0x34] sm:$0xf]  ;;  %v10841_v8 = vld [vmem:[%s12530_s1 + $0x4] sm:$0xf0]  ;;  %v7731_v3 = vld [vmem:[#allocation6 + $0xc8] sm:$0xf0] }
  0x50   :  { %v7870_v55 = vld [vmem:[#allocation11 + $0x60] sm:$0xf]  ;;  %vm1084_vm2 = vcmask 1044484   ;;  %vm1096_vm4 = vcmask 1041408   ;;  %vm1097_vm5 = vcmask 1045508   ;;  %vm1174_vm7 = vcmask 1045504  }
  0x51   :  { %325 = vmatmul.bf16.gmra.mxu2 %v11997_v11  ;;  %vm1085_vm3 = vmor %vm1083_vm1, %vm1084_vm2  ;;  %s7412_s25 = sshll.u32 %s12538_s9, 4  ;;  %s7413_s25 = int_to_ptr.hbm [resolvable:$true] %s7412_s25 }
  0x52   :  { %vm12200_vm6 = vmor %vm1096_vm4, %vm1097_vm5 }
  0x53   :  { %733 = vmatpush.bf16.msra.mxu1 %v7670_v12  ;;  %530 = vmatpush.bf16.msrb.mxu0 %v7550_v16  ;;  %v10915_v12 = vld [vmem:[#allocation6 + $0xf4] sm:$0xf0]  ;;  %v12024_v16 = vor.u32 %v10841_v8, %v7613_v7  ;;  %v10904_v8 = vld [vmem:[#allocation6 + $0xa4] sm:$0xf] }
  0x54   :  { %v7754_v17 = vor.u32 %v10915_v12, %v7753_v10 }
  0x57   :  { %734 = vmatpush.bf16.msra.mxu1 %v7662_v19  ;;  %531 = vmatpush.bf16.msrb.mxu0 %v7542_v22  ;;  %v7745_v19 = vld [vmem:[#allocation6 + $0xe0] sm:$0xf]  ;;  %v7639_v22 = vld [vmem:[#allocation6 + $0x18] sm:$0xf0] }
  0x58   :  { %7608 = vmatmul.msk.bf16.gmra.mxu3 %vm267_vm0, %v11973_v13  ;;  %v7746_v23 = vor.u32 %v10913_v20, %v7745_v19  ;;  %v7642_v24 = vor.u32 %v10886_v21, %v7639_v22 }
  0x5a   :  { %500 = vmatmul.bf16.gmra.mxu1 %v11997_v11 }
  0x5b   :  { %735 = vmatpush.bf16.msra.mxu1 %v7654_v25  ;;  %532 = vmatpush.bf16.msrb.mxu0 %v7534_v31  ;;  %v7737_v25 = vld [vmem:[#allocation6 + $0xd0] sm:$0xf]  ;;  %v7771_v31 = vld [vmem:[#allocation6 + $0x118] sm:$0xf0] }
  0x5c   :  { %v7774_v38 = vor.u32 %v10918_v30, %v7771_v31 }
  0x5e   :  { %533 = vmatmul.bf16.vlgmr.msrb.gmra.mxu0 %v11983_v36  ;;  %v10917_v36 = vld [vmem:[#allocation6 + $0x104] sm:$0xf0] }
  0x5f   :  { %769 = vmatpush.bf16.msra.mxu0 %v7690_v32  ;;  %736 = vmatpush.bf16.msra.mxu1 %v7646_v34  ;;  %v7762_v6 = vor.u32 %v10917_v36, %v7761_v0  ;;  %v10842_v32 = vld [vmem:[%s12530_s1 + $0x14] sm:$0xf]  ;;  %v7738_v34 = vor.u32 %v10911_v26, %v7737_v25  ;;  %v10910_v0 = vld [vmem:[#allocation6 + $0xd4] sm:$0xf]  ;;  %v7739_v36 = vld [vmem:[#allocation6 + $0xd8] sm:$0xf0] }
  0x60   :  { %v12036_v39 = vor.u32 %v10842_v32, %v7623_v33  ;;  %v7742_v1 = vor.u32 %v10910_v0, %v7739_v36  ;;  %v7862_v0 = vld [vmem:[#allocation11 + $0x50] sm:$0xf]  ;;  %v10941_v36 = vld [vmem:[#allocation11 + $0x54] sm:$0xf0] }
  0x61   :  { %7609 = vmatmul.msk.bf16.vlgmr.msrb.gmra.mxu2 %vm267_vm0, %v11961_v28  ;;  %v7655_v28 = vld [vmem:[#allocation6 + $0x38] sm:$0xf0] }
  0x62   :  { %v7658_v9 = vor.u32 %v10890_v4, %v7655_v28  ;;  %v10906_v28 = vld [vmem:[#allocation6 + $0xb4] sm:$0xf] }
  0x63   :  { %770 = vmatpush.bf16.msra.mxu0 %v7682_v44  ;;  %737 = vmatpush.bf16.msra.mxu1 %v7638_v46  ;;  %v7721_v44 = vld [vmem:[#allocation6 + $0xb0] sm:$0xf]  ;;  %v10922_v46 = vld [vmem:[#allocation6 + $0x134] sm:$0xf] }
  0x64   :  { %v7790_v50 = vor.u32 %v10922_v46, %v7787_v48  ;;  %v7722_v52 = vor.u32 %v10907_v45, %v7721_v44  ;;  %v7878_v48 = vld [vmem:[#allocation11 + $0x70] sm:$0xf] }
  0x66   :  { %1014 = vmatpush.bf16.msrb.mxu2 %v7790_v50  ;;  %v7942_v50 = vld [vmem:[#allocation11 + $0xf0] sm:$0xf] }
  0x67   :  { %771 = vmatpush.bf16.msra.mxu0 %v7674_v53  ;;  %738 = vmatpush.bf16.msra.mxu1 %v7630_v56  ;;  %v10914_v53 = vld [vmem:[#allocation6 + $0xf4] sm:$0xf]  ;;  %v7713_v56 = vld [vmem:[#allocation6 + $0xa0] sm:$0xf] }
  0x68   :  { %7707 = vmatmul.msk.bf16.vlgmr.msra.gmra.mxu3 %vm267_vm0, %v12014_v5  ;;  %v7758_v59 = vor.u32 %v10914_v53, %v7755_v54  ;;  %v7714_v60 = vor.u32 %v10905_v57, %v7713_v56  ;;  %v10943_v56 = vld [vmem:[#allocation11 + $0x64] sm:$0xf0]  ;;  %v7934_v57 = vld [vmem:[#allocation11 + $0xe0] sm:$0xf] }
  0x6a   :  { %739 = vmatmul.bf16.vlgmr.msra.gmra.mxu1 %v12024_v16  ;;  %1015 = vmatpush.bf16.msrb.mxu2 %v7782_v58 }
  0x6b   :  { %951 = vmatpush.bf16.msrb.mxu1 %v7770_v62  ;;  %772 = vmatpush.bf16.msra.mxu0 %v7666_v2  ;;  %v7747_v62 = vld [vmem:[#allocation6 + $0xe8] sm:$0xf0]  ;;  %v10908_v2 = vld [vmem:[#allocation6 + $0xc4] sm:$0xf] }
  0x6c   :  { %v7750_v63 = vor.u32 %v10912_v61, %v7747_v62  ;;  %v7734_v4 = vor.u32 %v10908_v2, %v7731_v3  ;;  %v10959_v61 = vld [vmem:[#allocation11 + $0xe4] sm:$0xf0]  ;;  %v7926_v2 = vld [vmem:[#allocation11 + $0xd0] sm:$0xf]  ;;  %v10957_v3 = vld [vmem:[#allocation11 + $0xd4] sm:$0xf0] }
  0x6e   :  { %538 = vmatmul.bf16.gmra.mxu0 %v11997_v11  ;;  %v7729_v11 = vld [vmem:[#allocation6 + $0xc0] sm:$0xf] }
  0x6f   :  { %952 = vmatpush.bf16.msrb.mxu1 %v7762_v6  ;;  %773 = vmatpush.bf16.msra.mxu0 %v7658_v9  ;;  %v7730_v43 = vor.u32 %v10909_v37, %v7729_v11  ;;  %v7723_v6 = vld [vmem:[#allocation6 + $0xb8] sm:$0xf0]  ;;  %v7715_v9 = vld [vmem:[#allocation6 + $0xa8] sm:$0xf0] }
  0x70   :  { %v7726_v7 = vor.u32 %v10906_v28, %v7723_v6  ;;  %v7718_v10 = vor.u32 %v10904_v8, %v7715_v9  ;;  %v7854_v8 = vld [vmem:[#allocation11 + $0x40] sm:$0xf]  ;;  %v10939_v9 = vld [vmem:[#allocation11 + $0x44] sm:$0xf0] }
  0x71   :  { %7610 = vmatmul.msk.bf16.gmra.mxu2 %vm267_vm0, %v11973_v13  ;;  %v10916_v13 = vld [vmem:[#allocation6 + $0x104] sm:$0xf] }
  0x72   :  { %v7766_v47 = vor.u32 %v10916_v13, %v7763_v40 }
  0x73   :  { %953 = vmatpush.bf16.msrb.mxu1 %v7754_v17  ;;  %774 = vmatpush.bf16.msra.mxu0 %v7650_v18 }
  0x77   :  { %954 = vmatpush.bf16.msrb.mxu1 %v7746_v23  ;;  %775 = vmatpush.bf16.msra.mxu0 %v7642_v24 }
  0x78   :  { %7708 = vmatmul.msk.bf16.gmra.mxu3 %vm267_vm0, %v12036_v39 }
  0x7a   :  { %744 = vmatmul.bf16.gmra.mxu1 %v7622_v49 }
  0x7b   :  { %955 = vmatpush.bf16.msrb.mxu1 %v7738_v34  ;;  %776 = vmatpush.bf16.msra.mxu0 %v7634_v35 }
  0x7e   :  { %777 = vmatmul.bf16.vlgmr.msra.gmra.mxu0 %v12024_v16 }
  0x7f   :  { %989 = vmatpush.bf16.msrb.mxu0 %v7774_v38  ;;  %956 = vmatpush.bf16.msrb.mxu1 %v7730_v43 }
  0x81   :  { %7709 = vmatmul.msk.bf16.vlgmr.msra.gmra.mxu2 %vm267_vm0, %v12014_v5 }
  0x83   :  { %990 = vmatpush.bf16.msrb.mxu0 %v7766_v47  ;;  %957 = vmatpush.bf16.msrb.mxu1 %v7722_v52  ;;  %v10961_v52 = vld [vmem:[#allocation11 + $0xf4] sm:$0xf0] }
  0x84   :  { %v7943_v53 = vor.u32 %v10961_v52, %v7942_v50  ;;  %v8006_v52 = vld [vmem:[#allocation11 + $0x170] sm:$0xf] }
  0x86   :  { %2157 = vmatpush.bf16.msra.mxu3 %v7943_v53  ;;  %v10977_v53 = vld [vmem:[#allocation11 + $0x174] sm:$0xf0] }
  0x87   :  { %991 = vmatpush.bf16.msrb.mxu0 %v7758_v59  ;;  %958 = vmatpush.bf16.msrb.mxu1 %v7714_v60  ;;  %v7871_v60 = vor.u32 %v10943_v56, %v7870_v55  ;;  %v8070_v55 = vld [vmem:[#allocation11 + $0x1f0] sm:$0xf]  ;;  %v8007_v56 = vor.u32 %v10977_v53, %v8006_v52 }
  0x88   :  { %7791 = vmatmul.msk.bf16.vlgmr.msrb.gmra.mxu3 %vm267_vm0, %v12014_v5 }
  0x8a   :  { %959 = vmatmul.bf16.vlgmr.msrb.gmra.mxu1 %v12024_v16 }
  0x8b   :  { %992 = vmatpush.bf16.msrb.mxu0 %v7750_v63  ;;  %v7935_v63 = vor.u32 %v10959_v61, %v7934_v57  ;;  %v10993_v57 = vld [vmem:[#allocation11 + $0x1f4] sm:$0xf0] }
  0x8d   :  { %2158 = vmatpush.bf16.msra.mxu3 %v7935_v63  ;;  %v8071_v63 = vor.u32 %v10993_v57, %v8070_v55  ;;  %v8054_v57 = vld [vmem:[#allocation11 + $0x1d0] sm:$0xf] }
  0x8e   :  { %782 = vmatmul.bf16.gmra.mxu0 %v7622_v49 }
  0x8f   :  { %993 = vmatpush.bf16.msrb.mxu0 %v7742_v1  ;;  %v7863_v1 = vor.u32 %v10941_v36, %v7862_v0  ;;  %v10933_v0 = vld [vmem:[#allocation11 + $0x14] sm:$0xf0]  ;;  %v7894_v36 = vld [vmem:[#allocation11 + $0x90] sm:$0xf]  ;;  %2185 = vmatpush.bf16.msra.mxu2 %v8071_v63  ;;  %v11007_v63 = vld [vmem:[#allocation11 + $0x264] sm:$0xf0] }
  0x91   :  { %7710 = vmatmul.msk.bf16.gmra.mxu2 %vm267_vm0, %v12036_v39 }
  0x93   :  { %994 = vmatpush.bf16.msrb.mxu0 %v7734_v4  ;;  %v7927_v4 = vor.u32 %v10957_v3, %v7926_v2 }
  0x95   :  { %2159 = vmatpush.bf16.msra.mxu3 %v7927_v4 }
  0x97   :  { %995 = vmatpush.bf16.msrb.mxu0 %v7726_v7 }
  0x98   :  { %7792 = vmatmul.msk.bf16.gmra.mxu3 %vm267_vm0, %v12036_v39 }
  0x9a   :  { %964 = vmatmul.bf16.gmra.mxu1 %v7622_v49 }
  0x9b   :  { %996 = vmatpush.bf16.msrb.mxu0 %v7718_v10  ;;  %v7918_v10 = vld [vmem:[#allocation11 + $0xc0] sm:$0xf] }
  0x9e   :  { %997 = vmatmul.bf16.vlgmr.msrb.gmra.mxu0 %v12024_v16 }
  0x9f   :  { %2171 = vmatpush.bf16.msra.mxu0 %v8007_v56  ;;  %v10973_v56 = vld [vmem:[#allocation11 + $0x154] sm:$0xf0] }
  0xa1   :  { %7793 = vmatmul.msk.bf16.vlgmr.msrb.gmra.mxu2 %vm267_vm0, %v12014_v5 }
  0xa7   :  { %v302_v12 = vpop.f32.mrf.mxu1 }
  0xab   :  { %v340_v14 = vpop.f32.mrf.mxu3 }
  0xae   :  { %1002 = vmatmul.bf16.gmra.mxu0 %v7622_v49  ;;  %v10945_v49 = vld [vmem:[#allocation11 + $0x74] sm:$0xf0] }
  0xaf   :  { %v12061_v15 = vpop.f32.mrf.mxu1  ;;  %v7879_v51 = vor.u32 %v10945_v49, %v7878_v48  ;;  %v10951_v48 = vld [vmem:[#allocation11 + $0xa4] sm:$0xf0] }
  0xb1   :  { %7794 = vmatmul.msk.bf16.gmra.mxu2 %vm267_vm0, %v12036_v39  ;;  %2143 = vmatpush.bf16.msra.mxu1 %v7879_v51 }
  0xb3   :  { %v12063_v17 = vpop.f32.mrf.mxu3 }
  0xb5   :  { %2144 = vmatpush.bf16.msra.mxu1 %v7871_v60  ;;  %v7830_v60 = vld [vmem:[#allocation11 + $0x10] sm:$0xf] }
  0xb6   :  { %v7831_v2 = vor.u32 %v10933_v0, %v7830_v60 }
  0xb7   :  { %v307_v18 = vpop.f32.mrf.mxu1 }
  0xb9   :  { %2145 = vmatpush.bf16.msra.mxu1 %v7863_v1  ;;  %v10949_v1 = vld [vmem:[#allocation11 + $0x94] sm:$0xf0] }
  0xba   :  { %v7895_v3 = vor.u32 %v10949_v1, %v7894_v36 }
  0xbb   :  { %v345_v19 = vpop.f32.mrf.mxu3  ;;  %v283_v20 = vpop.f32.mrf.mxu0 }
  0xbc   :  { %v12065_v21 = vadd.f32 %v302_v12, %v283_v20  ;;  %v7846_v20 = vld [vmem:[#allocation11 + $0x30] sm:$0xf] }
  0xbf   :  { %v309_v22 = vpop.f32.mrf.mxu1 }
  0xc3   :  { %v347_v23 = vpop.f32.mrf.mxu3  ;;  %v12069_v5 = vpop.f32.mrf.mxu0 }
  0xc4   :  { %v321_v16 = vpop.f32.mrf.mxu2 }
  0xc5   :  { %v12067_v24 = vadd.f32 %v340_v14, %v321_v16  ;;  %v7855_v14 = vor.u32 %v10939_v9, %v7854_v8  ;;  %v7910_v16 = vld [vmem:[#allocation11 + $0xb0] sm:$0xf] }
  0xc7   :  { %v12071_v25 = vpop.f32.mrf.mxu1  ;;  %2146 = vmatpush.bf16.msra.mxu1 %v7855_v14  ;;  %v8062_v14 = vld [vmem:[#allocation11 + $0x1e0] sm:$0xf] }
  0xcb   :  { %v12075_v27 = vpop.f32.mrf.mxu3  ;;  %v288_v29 = vpop.f32.mrf.mxu0 }
  0xcc   :  { %v12073_v26 = vpop.f32.mrf.mxu2  ;;  %v12077_v30 = vadd.f32 %v307_v18, %v288_v29  ;;  %v10955_v18 = vld [vmem:[#allocation11 + $0xc4] sm:$0xf0]  ;;  %v10953_v29 = vld [vmem:[#allocation11 + $0xb4] sm:$0xf0] }
  0xcf   :  { %v12079_v31 = vpop.f32.mrf.mxu1 }
  0xd3   :  { %v12081_v33 = vpop.f32.mrf.mxu3  ;;  %v290_v35 = vpop.f32.mrf.mxu0 }
  0xd4   :  { %v326_v32 = vpop.f32.mrf.mxu2  ;;  %v310_v11 = vadd.f32 %v309_v22, %v290_v35  ;;  %v10937_v22 = vld [vmem:[#allocation11 + $0x34] sm:$0xf0]  ;;  %v7911_v35 = vor.u32 %v10953_v29, %v7910_v16  ;;  %v7822_v16 = vld [vmem:[#allocation11] sm:$0xf] }
  0xd5   :  { %v12083_v34 = vadd.f32 %v345_v19, %v326_v32  ;;  %v7919_v19 = vor.u32 %v10955_v18, %v7918_v10  ;;  %v7998_v10 = vld [vmem:[#allocation11 + $0x160] sm:$0xf] }
  0xd6   :  { %356 = vst [vmem:[#allocation2 + $0x28] sm:$0xf] %v310_v11 }
  0xd7   :  { %v12085_v37 = vpop.f32.mrf.mxu1  ;;  %2160 = vmatpush.bf16.msra.mxu3 %v7919_v19 }
  0xdb   :  { %v12087_v39 = vpop.f32.mrf.mxu3  ;;  %v12089_v40 = vpop.f32.mrf.mxu0  ;;  %2161 = vmatpush.bf16.msra.mxu3 %v7911_v35 }
  0xdc   :  { %v328_v38 = vpop.f32.mrf.mxu2 }
  0xdd   :  { %v348_v13 = vadd.f32 %v347_v23, %v328_v38  ;;  %v364_v46 = vld [vmem:[#allocation2 + $0x28] sm:$0xf]  ;;  %v7847_v23 = vor.u32 %v10937_v22, %v7846_v20  ;;  %v10991_v22 = vld [vmem:[#allocation11 + $0x1e4] sm:$0xf0] }
  0xde   :  { %v8063_v29 = vor.u32 %v10991_v22, %v8062_v14  ;;  %v10987_v22 = vld [vmem:[#allocation11 + $0x1c4] sm:$0xf0] }
  0xdf   :  { %357 = vst [vmem:[#allocation2 + $0x38] sm:$0xf] %v348_v13  ;;  %v503_v41 = vpop.f32.mrf.mxu1  ;;  %2147 = vmatpush.bf16.msra.mxu1 %v7847_v23  ;;  %v7838_v13 = vld [vmem:[#allocation11 + $0x20] sm:$0xf]  ;;  %v10931_v23 = vld [vmem:[#allocation11 + $0x4] sm:$0xf0] }
  0xe0   :  { %v7823_v35 = vor.u32 %v10931_v23, %v7822_v16  ;;  %2186 = vmatpush.bf16.msra.mxu2 %v8063_v29  ;;  %v8118_v16 = vld [vmem:[#allocation11 + $0x250] sm:$0xf]  ;;  %v11005_v23 = vld [vmem:[#allocation11 + $0x254] sm:$0xf0] }
  0xe3   :  { %v522_v42 = vpop.f32.mrf.mxu3  ;;  %v12093_v45 = vpop.f32.mrf.mxu0 }
  0xe4   :  { %v12091_v43 = vpop.f32.mrf.mxu2  ;;  %v523_v44 = vadd.f32 %v522_v42, %v503_v41  ;;  %v10935_v41 = vld [vmem:[#allocation11 + $0x24] sm:$0xf0]  ;;  %v7902_v42 = vld [vmem:[#allocation11 + $0xa0] sm:$0xf] }
  0xe5   :  { %v7903_v50 = vor.u32 %v10951_v48, %v7902_v42  ;;  %v516_v42 = vadd.f32 %v12075_v27, %v12071_v25  ;;  %v11009_v48 = vld [vmem:[#allocation11 + $0x274] sm:$0xf0] }
  0xe6   :  { %v569_v47 = vmax.f32 %v364_v46, %v523_v44  ;;  %v365_v49 = vld [vmem:[#allocation2 + $0x38] sm:$0xf]  ;;  %v10989_v27 = vld [vmem:[#allocation11 + $0x1d4] sm:$0xf0] }
  0xe7   :  { %v12095_v54 = vpop.f32.mrf.mxu1  ;;  %2162 = vmatpush.bf16.msra.mxu3 %v7903_v50  ;;  %v11025_v50 = vld [vmem:[#allocation11 + $0x2f4] sm:$0xf0]  ;;  %v563_v0 = vmax.f32 %v12065_v21, %v516_v42  ;;  %v8055_v36 = vor.u32 %v10989_v27, %v8054_v57  ;;  %v8174_v57 = vld [vmem:[#allocation11 + $0x2c0] sm:$0xf]  ;;  %v11019_v27 = vld [vmem:[#allocation11 + $0x2c4] sm:$0xf0] }
  0xe8   :  { %577 = vst [vmem:[#allocation2 + $0x28] sm:$0xf] %v569_v47  ;;  %v7839_v47 = vor.u32 %v10935_v41, %v7838_v13  ;;  %v10947_v13 = vld [vmem:[#allocation11 + $0x84] sm:$0xf0]  ;;  %v8134_v41 = vld [vmem:[#allocation11 + $0x270] sm:$0xf] }
  0xe9   :  { %v8135_v52 = vor.u32 %v11009_v48, %v8134_v41  ;;  %2187 = vmatpush.bf16.msra.mxu2 %v8055_v36  ;;  %v518_v41 = vadd.f32 %v12081_v33, %v12079_v31  ;;  %v10969_v48 = vld [vmem:[#allocation11 + $0x134] sm:$0xf0]  ;;  %v8110_v31 = vld [vmem:[#allocation11 + $0x240] sm:$0xf]  ;;  %v11003_v33 = vld [vmem:[#allocation11 + $0x244] sm:$0xf0] }
  0xea   :  { %2148 = vmatpush.bf16.msra.mxu1 %v7839_v47 }
  0xeb   :  { %v12099_v59 = vpop.f32.mrf.mxu3  ;;  %v12101_v62 = vpop.f32.mrf.mxu0  ;;  %2163 = vmatpush.bf16.msra.mxu3 %v7895_v3  ;;  %v11023_v3 = vld [vmem:[#allocation11 + $0x2e4] sm:$0xf0] }
  0xec   :  { %v12097_v58 = vpop.f32.mrf.mxu2  ;;  %v760_v55 = vadd.f32 %v12099_v59, %v12095_v54  ;;  %v7982_v59 = vld [vmem:[#allocation11 + $0x140] sm:$0xf] }
  0xee   :  { %2149 = vmatpush.bf16.msra.mxu1 %v7831_v2  ;;  %v8190_v2 = vld [vmem:[#allocation11 + $0x2e0] sm:$0xf]  ;;  %v12126_v14 = vmax.f32 %v563_v0, %v760_v55  ;;  %v8175_v0 = vor.u32 %v11019_v27, %v8174_v57 }
  0xef   :  { %v12103_v28 = vpop.f32.mrf.mxu1  ;;  %v585_v4 = vld [vmem:[#allocation2 + $0x28] sm:$0xf]  ;;  %v8014_v57 = vld [vmem:[#allocation11 + $0x180] sm:$0xf] }
  0xf2   :  { %2150 = vmatpush.bf16.msra.mxu1 %v7823_v35  ;;  %v8119_v35 = vor.u32 %v11005_v23, %v8118_v16  ;;  %v521_v16 = vadd.f32 %v12087_v39, %v12085_v37  ;;  %v10999_v37 = vld [vmem:[#allocation11 + $0x224] sm:$0xf0]  ;;  %v8158_v39 = vld [vmem:[#allocation11 + $0x2a0] sm:$0xf] }
  0xf3   :  { %v12107_v7 = vpop.f32.mrf.mxu3  ;;  %v541_v12 = vpop.f32.mrf.mxu0 }
  0xf4   :  { %v12105_v6 = vpop.f32.mrf.mxu2 }
  0xf6   :  { %2199 = vmatpush.bf16.msrb.mxu1 %v8135_v52  ;;  %v8038_v52 = vld [vmem:[#allocation11 + $0x1b0] sm:$0xf] }
  0xf7   :  { %v12109_v32 = vpop.f32.mrf.mxu1 }
  0xfb   :  { %v12111_v38 = vpop.f32.mrf.mxu3  ;;  %v12113_v46 = vpop.f32.mrf.mxu0 }
  0xfc   :  { %v560_v11 = vpop.f32.mrf.mxu2 }
  0xfd   :  { %v561_v44 = vadd.f32 %v560_v11, %v541_v12  ;;  %v10975_v12 = vld [vmem:[#allocation11 + $0x164] sm:$0xf0]  ;;  %v7886_v11 = vld [vmem:[#allocation11 + $0x80] sm:$0xf] }
  0xfe   :  { %v7999_v20 = vor.u32 %v10975_v12, %v7998_v10  ;;  %v7887_v47 = vor.u32 %v10947_v13, %v7886_v11  ;;  %v8046_v10 = vld [vmem:[#allocation11 + $0x1c0] sm:$0xf]  ;;  %v8191_v12 = vor.u32 %v11023_v3, %v8190_v2  ;;  %v8182_v11 = vld [vmem:[#allocation11 + $0x2d0] sm:$0xf]  ;;  %v11021_v13 = vld [vmem:[#allocation11 + $0x2d4] sm:$0xf0] }
  0xff   :  { %v570_v51 = vmax.f32 %v365_v49, %v561_v44  ;;  %v747_v61 = vpop.f32.mrf.mxu1  ;;  %v8198_v49 = vld [vmem:[#allocation11 + $0x2f0] sm:$0xf]  ;;  %v8047_v29 = vor.u32 %v10987_v22, %v8046_v10  ;;  %v11017_v22 = vld [vmem:[#allocation11 + $0x2b4] sm:$0xf0] }
 0x100   :  { %2172 = vmatpush.bf16.msra.mxu0 %v7999_v20  ;;  %v8199_v53 = vor.u32 %v11025_v50, %v8198_v49  ;;  %2164 = vmatpush.bf16.msra.mxu3 %v7887_v47  ;;  %v7974_v47 = vld [vmem:[#allocation11 + $0x130] sm:$0xf]  ;;  %v305_v49 = vadd.f32 %v12061_v15, %v12069_v5  ;;  %v762_v50 = vadd.f32 %v12107_v7, %v12103_v28  ;;  %v7966_v28 = vld [vmem:[#allocation11 + $0x120] sm:$0xf]  ;;  %v10967_v7 = vld [vmem:[#allocation11 + $0x124] sm:$0xf0] }
 0x101   :  { %578 = vst [vmem:[#allocation2 + $0x38] sm:$0xf] %v570_v51  ;;  %v7990_v51 = vld [vmem:[#allocation11 + $0x150] sm:$0xf]  ;;  %2188 = vmatpush.bf16.msra.mxu2 %v8047_v29  ;;  %v7967_v3 = vor.u32 %v10967_v7, %v7966_v28  ;;  %v10979_v28 = vld [vmem:[#allocation11 + $0x184] sm:$0xf0] }
 0x102   :  { %v7991_v25 = vor.u32 %v10973_v56, %v7990_v51  ;;  %v7975_v51 = vor.u32 %v10969_v48, %v7974_v47  ;;  %v10981_v47 = vld [vmem:[#allocation11 + $0x194] sm:$0xf0]  ;;  %v8094_v48 = vld [vmem:[#allocation11 + $0x220] sm:$0xf]  ;;  %v8262_v7 = vld [vmem:[#allocation11 + $0x370] sm:$0xf] }
 0x103   :  { %v766_v8 = vpop.f32.mrf.mxu3  ;;  %v12117_v19 = vpop.f32.mrf.mxu0 }
 0x104   :  { %v12115_v9 = vpop.f32.mrf.mxu2  ;;  %v767_v18 = vadd.f32 %v766_v8, %v747_v61  ;;  %2213 = vmatpush.bf16.msrb.mxu3 %v8199_v53  ;;  %v8126_v61 = vld [vmem:[#allocation11 + $0x260] sm:$0xf]  ;;  %2173 = vmatpush.bf16.msra.mxu0 %v7991_v25  ;;  %v10971_v8 = vld [vmem:[#allocation11 + $0x144] sm:$0xf0]  ;;  %v10985_v53 = vld [vmem:[#allocation11 + $0x1b4] sm:$0xf0]  ;;  %v8111_v25 = vor.u32 %v11003_v33, %v8110_v31 }
 0x105   :  { %v8127_v1 = vor.u32 %v11007_v63, %v8126_v61  ;;  %v7983_v21 = vor.u32 %v10971_v8, %v7982_v59  ;;  %v8039_v56 = vor.u32 %v10985_v53, %v8038_v52  ;;  %v11885_v61 = vmov 0   ;;  %v8030_v63 = vld [vmem:[#allocation11 + $0x1a0] sm:$0xf]  ;;  %v8102_v59 = vld [vmem:[#allocation11 + $0x230] sm:$0xf] }
 0x106   :  { %v813_v44 = vmax.f32 %v585_v4, %v767_v18  ;;  %1077 = vst [vmem:[#allocation4] sm:$0x11] %v11885_v61  ;;  %v11001_v8 = vld [vmem:[#allocation11 + $0x234] sm:$0xf0]  ;;  %v567_v52 = vmax.f32 %v12077_v30, %v521_v16  ;;  %v8095_v53 = vor.u32 %v10999_v37, %v8094_v48  ;;  %v11055_v48 = vld [vmem:[#allocation11 + $0x3e4] sm:$0xf0] }
 0x107   :  { %v960_v60 = vpop.f32.mrf.mxu1  ;;  %2200 = vmatpush.bf16.msrb.mxu1 %v8127_v1  ;;  %2189 = vmatpush.bf16.msra.mxu2 %v8039_v56  ;;  %1078 = vst [vmem:[#allocation4 + $0x10] sm:$0x11] %v11885_v61  ;;  %v11041_v30 = vld [vmem:[#allocation11 + $0x374] sm:$0xf0] }
 0x108   :  { %821 = vst [vmem:[#allocation2 + $0x28] sm:$0xf] %v813_v44  ;;  %2214 = vmatpush.bf16.msrb.mxu3 %v8191_v12  ;;  %v8183_v44 = vor.u32 %v11021_v13, %v8182_v11  ;;  %2174 = vmatpush.bf16.msra.mxu0 %v7983_v21  ;;  %v8103_v12 = vor.u32 %v11001_v8, %v8102_v59  ;;  %v8166_v21 = vld [vmem:[#allocation11 + $0x2b0] sm:$0xf]  ;;  %v10965_v11 = vld [vmem:[#allocation11 + $0x114] sm:$0xf0] }
 0x109   :  { %v8167_v29 = vor.u32 %v11017_v22, %v8166_v21  ;;  %1079 = vst [vmem:[#allocation5] sm:$0x11] %v11885_v61  ;;  %v8022_v13 = vld [vmem:[#allocation11 + $0x190] sm:$0xf]  ;;  %v586_v56 = vld [vmem:[#allocation2 + $0x38] sm:$0xf]  ;;  %v554_v8 = vadd.f32 %v12091_v43, %v12089_v40 }
 0x10a   :  { %1080 = vst [vmem:[#allocation5 + $0x10] sm:$0x11] %v11885_v61  ;;  %v8263_v61 = vor.u32 %v11041_v30, %v8262_v7  ;;  %v8086_v59 = vld [vmem:[#allocation11 + $0x210] sm:$0xf]  ;;  %v10997_v21 = vld [vmem:[#allocation11 + $0x214] sm:$0xf0] }
 0x10b   :  { %v979_v54 = vpop.f32.mrf.mxu3  ;;  %v12130_v20 = vpop.f32.mrf.mxu0  ;;  %2201 = vmatpush.bf16.msrb.mxu1 %v8119_v35  ;;  %v7958_v35 = vld [vmem:[#allocation11 + $0x110] sm:$0xf]  ;;  %v11013_v16 = vld [vmem:[#allocation11 + $0x294] sm:$0xf0]  ;;  %v11039_v40 = vld [vmem:[#allocation11 + $0x364] sm:$0xf0] }
 0x10c   :  { %v12124_v4 = vpop.f32.mrf.mxu2  ;;  %v12128_v18 = vadd.f32 %v979_v54, %v960_v60  ;;  %2215 = vmatpush.bf16.msrb.mxu3 %v8183_v44  ;;  %v565_v60 = vmax.f32 %v305_v49, %v518_v41  ;;  %2175 = vmatpush.bf16.msra.mxu0 %v7975_v51  ;;  %v10983_v54 = vld [vmem:[#allocation11 + $0x1a4] sm:$0xf0]  ;;  %v765_v41 = vadd.f32 %v12111_v38, %v12109_v32  ;;  %v7950_v32 = vld [vmem:[#allocation11 + $0x100] sm:$0xf]  ;;  %v8150_v22 = vld [vmem:[#allocation11 + $0x290] sm:$0xf] }
 0x10d   :  { %v8031_v10 = vor.u32 %v10983_v54, %v8030_v63  ;;  %v7959_v44 = vor.u32 %v10965_v11, %v7958_v35  ;;  %v11015_v51 = vld [vmem:[#allocation11 + $0x2a4] sm:$0xf0]  ;;  %v11057_v54 = vld [vmem:[#allocation11 + $0x3f4] sm:$0xf0]  ;;  %v8087_v35 = vor.u32 %v10997_v21, %v8086_v59  ;;  %v8151_v11 = vor.u32 %v11013_v16, %v8150_v22 }
 0x10e   :  { %v1027_v42 = vmax.f32 %v12126_v14, %v12128_v18  ;;  %v12142_v36 = vmax.f32 %v565_v60, %v762_v50  ;;  %v8023_v50 = vor.u32 %v10981_v47, %v8022_v13  ;;  %v10963_v38 = vld [vmem:[#allocation11 + $0x104] sm:$0xf0]  ;;  %v12153_v60 = vmax.f32 %v567_v52, %v765_v41  ;;  %v8254_v41 = vld [vmem:[#allocation11 + $0x360] sm:$0xf]  ;;  %v11053_v30 = vld [vmem:[#allocation11 + $0x3d4] sm:$0xf0] }
 0x10f   :  { %v962_v55 = vpop.f32.mrf.mxu1  ;;  %2202 = vmatpush.bf16.msrb.mxu1 %v8111_v25  ;;  %2190 = vmatpush.bf16.msra.mxu2 %v8031_v10  ;;  %v798_v13 = vadd.f32 %v12115_v9, %v12113_v46  ;;  %v8318_v47 = vld [vmem:[#allocation11 + $0x3e0] sm:$0xf] }
 0x110   :  { %2216 = vmatpush.bf16.msrb.mxu3 %v8175_v0  ;;  %2176 = vmatpush.bf16.msra.mxu0 %v7967_v3  ;;  %v8015_v0 = vor.u32 %v10979_v28, %v8014_v57  ;;  %v8326_v3 = vld [vmem:[#allocation11 + $0x3f0] sm:$0xf]  ;;  %v8319_v37 = vor.u32 %v11055_v48, %v8318_v47  ;;  %v11037_v57 = vld [vmem:[#allocation11 + $0x354] sm:$0xf0]  ;;  %v11031_v47 = vld [vmem:[#allocation11 + $0x324] sm:$0xf0]  ;;  %v559_v48 = vadd.f32 %v12105_v6, %v12101_v62 }
 0x111   :  { %v829_v28 = vld [vmem:[#allocation2 + $0x28] sm:$0xf] }
 0x112   :  { %v568_v62 = vmax.f32 %v12083_v34, %v559_v48  ;;  %v11087_v48 = vld [vmem:[#allocation11 + $0x4e4] sm:$0xf0] }
 0x113   :  { %v981_v5 = vpop.f32.mrf.mxu3  ;;  %v785_v2 = vpop.f32.mrf.mxu0  ;;  %2203 = vmatpush.bf16.msrb.mxu1 %v8103_v12  ;;  %2191 = vmatpush.bf16.msra.mxu2 %v8023_v50  ;;  %v8327_v12 = vor.u32 %v11057_v54, %v8326_v3  ;;  %v343_v54 = vadd.f32 %v12063_v17, %v12073_v26  ;;  %v11033_v17 = vld [vmem:[#allocation11 + $0x334] sm:$0xf0] }
 0x114   :  { %v12140_v15 = vpop.f32.mrf.mxu2  ;;  %v12144_v1 = vadd.f32 %v981_v5, %v962_v55  ;;  %2217 = vmatpush.bf16.msrb.mxu3 %v8167_v29  ;;  %v8159_v55 = vor.u32 %v11015_v51, %v8158_v39  ;;  %2177 = vmatpush.bf16.msra.mxu0 %v7959_v44  ;;  %v7951_v5 = vor.u32 %v10963_v38, %v7950_v32  ;;  %v1051_v29 = vld [vmem:[#allocation9] sm:$0x3]  ;;  %v8078_v39 = vld [vmem:[#allocation11 + $0x200] sm:$0xf]  ;;  %v10995_v51 = vld [vmem:[#allocation11 + $0x204] sm:$0xf0] }
 0x115   :  { %v8255_v44 = vor.u32 %v11039_v40, %v8254_v41  ;;  %v12164_v50 = vperm.slane %v1051_v29, 0  ;;  %v12166_v52 = vperm.slane %v1051_v29, 1  ;;  %v8246_v38 = vld [vmem:[#allocation11 + $0x350] sm:$0xf] }
 0x116   :  { %v1029_v23 = vmax.f32 %v12142_v36, %v12144_v1  ;;  %v8247_v7 = vor.u32 %v11037_v57, %v8246_v38  ;;  %v8230_v29 = vld [vmem:[#allocation11 + $0x330] sm:$0xf]  ;;  %v803_v36 = vadd.f32 %v12140_v15, %v12130_v20 }
 0x117   :  { %v965_v49 = vpop.f32.mrf.mxu1  ;;  %2204 = vmatpush.bf16.msrb.mxu1 %v8095_v53  ;;  %2192 = vmatpush.bf16.msra.mxu2 %v8015_v0  ;;  %v8079_v53 = vor.u32 %v10995_v51, %v8078_v39  ;;  %v1057_v0 = vadd.f32 %v12164_v50, %v1027_v42  ;;  %v8302_v42 = vld [vmem:[#allocation11 + $0x3c0] sm:$0xf]  ;;  %v8231_v40 = vor.u32 %v11033_v17, %v8230_v29  ;;  %v11047_v51 = vld [vmem:[#allocation11 + $0x3a4] sm:$0xf0] }
 0x118   :  { %2218 = vmatpush.bf16.msrb.mxu3 %v8159_v55  ;;  %2178 = vmatpush.bf16.msra.mxu0 %v7951_v5  ;;  %v8142_v55 = vld [vmem:[#allocation11 + $0x280] sm:$0xf]  ;;  %v556_v5 = vadd.f32 %v12097_v58, %v12093_v45  ;;  %v800_v45 = vadd.f32 %v12124_v4, %v12117_v19  ;;  %v8294_v19 = vld [vmem:[#allocation11 + $0x3b0] sm:$0xf]  ;;  %v11049_v4 = vld [vmem:[#allocation11 + $0x3b4] sm:$0xf0]  ;;  %v812_v20 = vmax.f32 %v568_v62, %v803_v36 }
 0x119   :  { %v1065_v21 = vmax.f32 %v1057_v0, 0.0  ;;  %v8286_v39 = vld [vmem:[#allocation11 + $0x3a0] sm:$0xf]  ;;  %v11069_v36 = vld [vmem:[#allocation11 + $0x454] sm:$0xf0] }
 0x11a   :  { %v566_v14 = vmax.f32 %v343_v54, %v556_v5  ;;  %v11027_v5 = vld [vmem:[#allocation11 + $0x304] sm:$0xf0]  ;;  %v8270_v0 = vld [vmem:[#allocation11 + $0x380] sm:$0xf] }
 0x11b   :  { %v984_v33 = vpop.f32.mrf.mxu3  ;;  %v998_v63 = vpop.f32.mrf.mxu0  ;;  %2241 = vmatpush.bf16.msrb.mxu2 %v8327_v12  ;;  %2205 = vmatpush.bf16.msrb.mxu1 %v8087_v35  ;;  %v11051_v12 = vld [vmem:[#allocation11 + $0x3c4] sm:$0xf0]  ;;  %v8382_v17 = vld [vmem:[#allocation11 + $0x460] sm:$0xf] }
 0x11c   :  { %v804_v31 = vpop.f32.mrf.mxu2  ;;  %v12155_v27 = vadd.f32 %v984_v33, %v965_v49  ;;  %2227 = vmatpush.bf16.msrb.mxu0 %v8263_v61  ;;  %v564_v49 = vmax.f32 %v12067_v24, %v554_v8  ;;  %2219 = vmatpush.bf16.msrb.mxu3 %v8151_v11  ;;  %v8310_v24 = vld [vmem:[#allocation11 + $0x3d0] sm:$0xf]  ;;  %v8238_v8 = vld [vmem:[#allocation11 + $0x340] sm:$0xf]  ;;  %v8303_v16 = vor.u32 %v11051_v12, %v8302_v42  ;;  %v10944_v42 = vld [vmem:[#allocation11 + $0x74] sm:$0xf] }
 0x11d   :  { %v805_v25 = vadd.f32 %v804_v31, %v785_v2  ;;  %v8311_v3 = vor.u32 %v11053_v30, %v8310_v24  ;;  %v810_v26 = vmax.f32 %v566_v14, %v800_v45  ;;  %v1059_v11 = vadd.f32 %v12164_v50, %v1029_v23 }
 0x11e   :  { %v1031_v2 = vmax.f32 %v12153_v60, %v12155_v27  ;;  %v808_v31 = vmax.f32 %v564_v49, %v798_v13 }
 0x11f   :  { %v814_v10 = vmax.f32 %v586_v56, %v805_v25  ;;  %v967_v43 = vpop.f32.mrf.mxu1  ;;  %v11011_v56 = vld [vmem:[#allocation11 + $0x284] sm:$0xf0]  ;;  %2242 = vmatpush.bf16.msrb.mxu2 %v8319_v37  ;;  %2206 = vmatpush.bf16.msrb.mxu1 %v8079_v53  ;;  %v1067_v1 = vmax.f32 %v1059_v11, 0.0  ;;  %v8287_v53 = vor.u32 %v11047_v51, %v8286_v39  ;;  %v8374_v51 = vld [vmem:[#allocation11 + $0x450] sm:$0xf] }
 0x120   :  { %2228 = vmatpush.bf16.msrb.mxu0 %v8255_v44  ;;  %v8143_v25 = vor.u32 %v11011_v56, %v8142_v55  ;;  %v8222_v44 = vld [vmem:[#allocation11 + $0x320] sm:$0xf]  ;;  %v8214_v55 = vld [vmem:[#allocation11 + $0x310] sm:$0xf]  ;;  %v11029_v56 = vld [vmem:[#allocation11 + $0x314] sm:$0xf0]  ;;  %v1061_v34 = vadd.f32 %v12164_v50, %v1031_v2 }
 0x121   :  { %822 = vst [vmem:[#allocation2 + $0x38] sm:$0xf] %v814_v10  ;;  %v11035_v10 = vld [vmem:[#allocation11 + $0x344] sm:$0xf0]  ;;  %v8215_v57 = vor.u32 %v11029_v56, %v8214_v55  ;;  %v8375_v56 = vor.u32 %v11069_v36, %v8374_v51 }
 0x122   :  { %2220 = vmatpush.bf16.msrb.mxu3 %v8143_v25  ;;  %v8239_v18 = vor.u32 %v11035_v10, %v8238_v8  ;;  %v8206_v25 = vld [vmem:[#allocation11 + $0x300] sm:$0xf]  ;;  %v8390_v10 = vld [vmem:[#allocation11 + $0x470] sm:$0xf] }
 0x123   :  { %v986_v46 = vpop.f32.mrf.mxu3  ;;  %v1000_v58 = vpop.f32.mrf.mxu0  ;;  %2243 = vmatpush.bf16.msrb.mxu2 %v8311_v3  ;;  %v8207_v54 = vor.u32 %v11027_v5, %v8206_v25 }
 0x124   :  { %v1017_v9 = vpop.f32.mrf.mxu2  ;;  %v987_v33 = vadd.f32 %v986_v46, %v967_v43  ;;  %2229 = vmatpush.bf16.msrb.mxu0 %v8247_v7  ;;  %v8295_v43 = vor.u32 %v11049_v4, %v8294_v19  ;;  %v8223_v46 = vor.u32 %v11031_v47, %v8222_v44  ;;  %v8446_v47 = vld [vmem:[#allocation11 + $0x4e0] sm:$0xf] }
 0x125   :  { %v1018_v32 = vadd.f32 %v1017_v9, %v998_v63  ;;  %v8447_v39 = vor.u32 %v11087_v48, %v8446_v47  ;;  %v7872_v47 = vld [vmem:[#allocation11 + $0x68] sm:$0xf0]  ;;  %v10958_v48 = vld [vmem:[#allocation11 + $0xe4] sm:$0xf] }
 0x126   :  { %v1033_v61 = vmax.f32 %v829_v28, %v987_v33  ;;  %v11045_v33 = vld [vmem:[#allocation11 + $0x394] sm:$0xf0] }
 0x127   :  { %v1028_v63 = vmax.f32 %v808_v31, %v1018_v32  ;;  %2244 = vmatpush.bf16.msrb.mxu2 %v8303_v16  ;;  %v8278_v31 = vld [vmem:[#allocation11 + $0x390] sm:$0xf]  ;;  %v11089_v16 = vld [vmem:[#allocation11 + $0x4f4] sm:$0xf0] }
 0x128   :  { %1041 = vst [vmem:[#allocation2 + $0x28] sm:$0xf] %v1033_v61  ;;  %2230 = vmatpush.bf16.msrb.mxu0 %v8239_v18  ;;  %v8279_v24 = vor.u32 %v11045_v33, %v8278_v31  ;;  %v11043_v61 = vld [vmem:[#allocation11 + $0x384] sm:$0xf0]  ;;  %v11073_v18 = vld [vmem:[#allocation11 + $0x474] sm:$0xf0] }
 0x129   :  { %v1058_v59 = vadd.f32 %v12166_v52, %v1028_v63  ;;  %v8271_v45 = vor.u32 %v11043_v61, %v8270_v0  ;;  %v830_v14 = vld [vmem:[#allocation2 + $0x38] sm:$0xf]  ;;  %v8391_v4 = vor.u32 %v11073_v18, %v8390_v10  ;;  %v8414_v10 = vld [vmem:[#allocation11 + $0x4a0] sm:$0xf] }
 0x12a   :  { %v11067_v31 = vld [vmem:[#allocation11 + $0x444] sm:$0xf0]  ;;  %v1119_v18 = vld [vmem:[#allocation4 + $0x10] sm:$0x11] }
 0x12b   :  { %v1066_v22 = vmax.f32 %v1058_v59, 0.0  ;;  %v1003_v9 = vpop.f32.mrf.mxu0  ;;  %2245 = vmatpush.bf16.msrb.mxu2 %v8295_v43 }
 0x12c   :  { %v1019_v35 = vpop.f32.mrf.mxu2  ;;  %2231 = vmatpush.bf16.msrb.mxu0 %v8231_v40 }
 0x12d   :  { %v1020_v13 = vadd.f32 %v1019_v35, %v1000_v58  ;;  %v1073_v41 = vpack.c.bf16 %v1066_v22, %v1065_v21  ;;  %v1069_v58 = vmax.f32 %v1061_v34, 0.0  ;;  %v8454_v22 = vld [vmem:[#allocation11 + $0x4f0] sm:$0xf] }
 0x12e   :  { %v8455_v43 = vor.u32 %v11089_v16, %v8454_v22  ;;  %v10960_v16 = vld [vmem:[#allocation11 + $0xf4] sm:$0xf] }
 0x12f   :  { %v1030_v49 = vmax.f32 %v810_v26, %v1020_v13  ;;  %v1086_v37 = vrot.slane %v1073_v41, 7  ;;  %2246 = vmatpush.bf16.msrb.mxu2 %v8287_v53  ;;  %v11071_v26 = vld [vmem:[#allocation11 + $0x464] sm:$0xf0] }
 0x130   :  { %2232 = vmatpush.bf16.msrb.mxu0 %v8223_v46  ;;  %v11085_v46 = vld [vmem:[#allocation11 + $0x4d4] sm:$0xf0] }
 0x131   :  { %v1060_v23 = vadd.f32 %v12166_v52, %v1030_v49  ;;  %1092 = vst [vmem:[#allocation4] sm:$0xee] %v1086_v37  ;;  %v1087_v7 = vrot.slane %v1086_v37, 4  ;;  %v1049_v49 = vld [vmem:[#allocation2 + $0x28] sm:$0xf]  ;;  %v8383_v37 = vor.u32 %v11071_v26, %v8382_v17 }
 0x132   :  { %v8342_v26 = vld [vmem:[#allocation11 + $0x410] sm:$0xf] }
 0x133   :  { %v1068_v6 = vmax.f32 %v1060_v23, 0.0  ;;  %2247 = vmatpush.bf16.msrb.mxu2 %v8279_v24  ;;  %v1005_v60 = vpop.f32.mrf.mxu0  ;;  %v8438_v23 = vld [vmem:[#allocation11 + $0x4d0] sm:$0xf] }
 0x134   :  { %v1022_v32 = vpop.f32.mrf.mxu2  ;;  %2233 = vmatpush.bf16.msrb.mxu0 %v8215_v57  ;;  %v8439_v62 = vor.u32 %v11085_v46, %v8438_v23  ;;  %v11083_v57 = vld [vmem:[#allocation11 + $0x4c4] sm:$0xf0] }
 0x135   :  { %v1074_v15 = vpack.c.bf16 %v1068_v6, %v1067_v1  ;;  %v1023_v38 = vadd.f32 %v1022_v32, %v1003_v9  ;;  %v1063_v1 = vadd.f32 %v12164_v50, %v1049_v49  ;;  %v8366_v6 = vld [vmem:[#allocation11 + $0x440] sm:$0xf] }
 0x136   :  { %v8367_v25 = vor.u32 %v11067_v31, %v8366_v6  ;;  %v11059_v6 = vld [vmem:[#allocation11 + $0x404] sm:$0xf0]  ;;  %v8398_v31 = vld [vmem:[#allocation11 + $0x480] sm:$0xf] }
 0x137   :  { %v1032_v28 = vmax.f32 %v812_v20, %v1023_v38  ;;  %v1088_v30 = vrot.slane %v1074_v15, 7  ;;  %2248 = vmatpush.bf16.msrb.mxu2 %v8271_v45  ;;  %v7795_v29 = vrot.slane %v1074_v15, 10  ;;  %v1071_v20 = vmax.f32 %v1063_v1, 0.0  ;;  %v8430_v38 = vld [vmem:[#allocation11 + $0x4c0] sm:$0xf] }
 0x138   :  { %2234 = vmatpush.bf16.msrb.mxu0 %v8207_v54  ;;  %v7798_v35 = vld [vmem:[#allocation4] sm:$0xf]  ;;  %v10924_v41 = vld [vmem:[#allocation4 + $0x4] sm:$0xf]  ;;  %v11081_v54 = vld [vmem:[#allocation11 + $0x4b4] sm:$0xf0] }
 0x139   :  { %v1062_v63 = vadd.f32 %v12166_v52, %v1032_v28  ;;  %v12195_v3 = vsel %vm1085_vm3, %v1087_v7, %v1088_v30  ;;  %v1114_v9 = vld [vmem:[#allocation4] sm:$0xee]  ;;  %v11065_v7 = vld [vmem:[#allocation11 + $0x434] sm:$0xf0] }
 0x13a   :  { %1093 = vst [vmem:[#allocation4 + $0x8] sm:$0xff] %v12195_v3  ;;  %v1142_v33 = vunpack.c.l.b16 %v1114_v9  ;;  %v1144_v32 = vunpack.c.l.b16 %v12195_v3  ;;  %v1143_v50 = vunpack.c.h.b16 %v1114_v9  ;;  %v1145_v24 = vunpack.c.h.b16 %v12195_v3  ;;  %v8358_v28 = vld [vmem:[#allocation11 + $0x430] sm:$0xf] }
 0x13b   :  { %v1070_v59 = vmax.f32 %v1062_v63, 0.0  ;;  %v8422_v63 = vld [vmem:[#allocation11 + $0x4b0] sm:$0xf] }
 0x13c   :  { %v1024_v27 = vpop.f32.mrf.mxu2  ;;  %v1146_v34 = vpack.c.b16 %v1144_v32, %v1142_v33  ;;  %v1147_v61 = vpack.c.b16 %v1145_v24, %v1143_v50  ;;  %v1118_v22 = vld [vmem:[#allocation4] sm:$0xcc]  ;;  %v11075_v33 = vld [vmem:[#allocation11 + $0x484] sm:$0xf0]  ;;  %v8008_v50 = vld [vmem:[#allocation11 + $0x178] sm:$0xf0] }
 0x13d   :  { %v12198_v2 = vpack.c.bf16 %v1070_v59, %v1069_v58  ;;  %v1025_v8 = vadd.f32 %v1024_v27, %v1005_v60  ;;  %v8359_v58 = vor.u32 %v11065_v7, %v8358_v28  ;;  %v8423_v60 = vor.u32 %v11081_v54, %v8422_v63  ;;  %v8350_v27 = vld [vmem:[#allocation11 + $0x420] sm:$0xf] }
 0x13e   :  { %v12223_v59 = vrot.slane %v1146_v34, 1  ;;  %v1166_v1 = vunpack.c.l.b16 %v1118_v22  ;;  %v1167_v23 = vunpack.c.h.b16 %v1118_v22  ;;  %v10940_v34 = vld [vmem:[#allocation11 + $0x54] sm:$0xf]  ;;  %v8399_v54 = vor.u32 %v11075_v33, %v8398_v31  ;;  %v10954_v22 = vld [vmem:[#allocation11 + $0xc4] sm:$0xf] }
 0x13f   :  { %v1101_v12 = vrot.slane %v12198_v2, 6  ;;  %v1034_v21 = vmax.f32 %v830_v14, %v1025_v8  ;;  %v11063_v2 = vld [vmem:[#allocation11 + $0x424] sm:$0xf0]  ;;  %v12225_v8 = vrot.slane %v1147_v61, 1  ;;  %v7928_v61 = vld [vmem:[#allocation11 + $0xd8] sm:$0xf0] }
 0x140   :  { %v11079_v14 = vld [vmem:[#allocation11 + $0x4a4] sm:$0xf0]  ;;  %v1170_v28 = vpack.c.b16 %v1144_v32, %v1166_v1  ;;  %v1171_v7 = vpack.c.b16 %v1145_v24, %v1167_v23  ;;  %v10938_v24 = vld [vmem:[#allocation11 + $0x44] sm:$0xf]  ;;  %v7848_v1 = vld [vmem:[#allocation11 + $0x38] sm:$0xf0] }
 0x141   :  { %1042 = vst [vmem:[#allocation2 + $0x38] sm:$0xf] %v1034_v21  ;;  %v10925_v19 = vld [vmem:[#allocation4 + $0x4] sm:$0x70]  ;;  %v1102_v11 = vsel %vm12200_vm6, %v7795_v29, %v1101_v12  ;;  %v7800_v40 = vld [vmem:[#allocation4 + $0x8] sm:$0x70]  ;;  %v8351_v21 = vor.u32 %v11063_v2, %v8350_v27  ;;  %v8415_v17 = vor.u32 %v11079_v14, %v8414_v10 }
 0x142   :  { %v12207_v13 = vor.u32 %v10925_v19, %v7798_v35  ;;  %1108 = vst [vmem:[#allocation5] sm:$0xee] %v1102_v11  ;;  %v12209_v44 = vor.u32 %v10924_v41, %v7800_v40  ;;  %v1103_v30 = vrot.slane %v1101_v12, 4  ;;  %v7880_v12 = vld [vmem:[#allocation11 + $0x78] sm:$0xf0]  ;;  %v1168_v41 = vunpack.c.l.b16 %v1119_v18 }
 0x143   :  { %v7944_v29 = vld [vmem:[#allocation11 + $0xf8] sm:$0xf0]  ;;  %v10942_v35 = vld [vmem:[#allocation11 + $0x64] sm:$0xf]  ;;  %v11061_v19 = vld [vmem:[#allocation11 + $0x414] sm:$0xf0]  ;;  %v1169_v40 = vunpack.c.h.b16 %v1119_v18  ;;  %v7883_v51 = vor.u32 %v10944_v42, %v7880_v12 }
 0x144   :  { %2151 = vmatmul.bf16.vlgmr.msra.gmra.mxu1 %v12207_v13  ;;  %2165 = vmatmul.bf16.vlgmr.msra.gmra.mxu3 %v12209_v44  ;;  %v11077_v11 = vld [vmem:[#allocation11 + $0x494] sm:$0xf0]  ;;  %v7947_v36 = vor.u32 %v10960_v16, %v7944_v29  ;;  %v10974_v2 = vld [vmem:[#allocation11 + $0x164] sm:$0xf]  ;;  %v8000_v10 = vld [vmem:[#allocation11 + $0x168] sm:$0xf0] }
 0x145   :  { %2255 = vmatpush.bf16.msra.mxu1 %v8391_v4  ;;  %2269 = vmatpush.bf16.msra.mxu3 %v8455_v43  ;;  %v8406_v4 = vld [vmem:[#allocation11 + $0x490] sm:$0xf]  ;;  %v10990_v14 = vld [vmem:[#allocation11 + $0x1e4] sm:$0xf]  ;;  %v8064_v18 = vld [vmem:[#allocation11 + $0x1e8] sm:$0xf0] }
 0x146   :  { %v7856_v42 = vld [vmem:[#allocation11 + $0x48] sm:$0xf0]  ;;  %v1175_v12 = vrot.slane %v1170_v28, 2  ;;  %v10952_v23 = vld [vmem:[#allocation11 + $0xb4] sm:$0xf] }
 0x147   :  { %v7920_v16 = vld [vmem:[#allocation11 + $0xc8] sm:$0xf0]  ;;  %v10986_v31 = vld [vmem:[#allocation11 + $0x1c4] sm:$0xf] }
 0x148   :  { %v1050_v53 = vld [vmem:[#allocation2 + $0x38] sm:$0xf]  ;;  %v8048_v33 = vld [vmem:[#allocation11 + $0x1c8] sm:$0xf0] }
 0x149   :  { %v1064_v55 = vadd.f32 %v12166_v52, %v1050_v53  ;;  %2256 = vmatpush.bf16.msra.mxu1 %v8383_v37  ;;  %2270 = vmatpush.bf16.msra.mxu3 %v8447_v39  ;;  %v8431_v52 = vor.u32 %v11083_v57, %v8430_v38  ;;  %v7806_v43 = vld [vmem:[#allocation5] sm:$0xf]  ;;  %v10926_v37 = vld [vmem:[#allocation5 + $0x4] sm:$0xf]  ;;  %v1173_v38 = vpack.c.b16 %v1169_v40, %v1169_v40  ;;  %v8056_v40 = vld [vmem:[#allocation11 + $0x1d8] sm:$0xf0] }
 0x14a   :  { %v7936_v53 = vld [vmem:[#allocation11 + $0xe8] sm:$0xf0]  ;;  %v7875_v57 = vor.u32 %v10942_v35, %v7872_v47  ;;  %v8067_v35 = vor.u32 %v10990_v14, %v8064_v18  ;;  %v7814_v47 = vld [vmem:[#allocation5] sm:$0xe]  ;;  %v8051_v28 = vor.u32 %v10986_v31, %v8048_v33 }
 0x14b   :  { %v1072_v15 = vmax.f32 %v1064_v55, 0.0  ;;  %v8343_v55 = vor.u32 %v11061_v19, %v8342_v26  ;;  %v1179_v27 = vrot.slane %v1173_v38, 2  ;;  %v8003_v26 = vor.u32 %v10974_v2, %v8000_v10  ;;  %v10972_v19 = vld [vmem:[#allocation11 + $0x154] sm:$0xf]  ;;  %v10934_v38 = vld [vmem:[#allocation11 + $0x24] sm:$0xf] }
 0x14c   :  { %v10966_v14 = vld [vmem:[#allocation11 + $0x124] sm:$0xf]  ;;  %v7968_v18 = vld [vmem:[#allocation11 + $0x128] sm:$0xf0] }
 0x14d   :  { %2257 = vmatpush.bf16.msra.mxu1 %v8375_v56  ;;  %v1076_v5 = vpack.c.bf16 %v1072_v15, %v1071_v20  ;;  %2271 = vmatpush.bf16.msra.mxu3 %v8439_v62  ;;  %v8407_v56 = vor.u32 %v11077_v11, %v8406_v4  ;;  %v8334_v62 = vld [vmem:[#allocation11 + $0x400] sm:$0xf]  ;;  %v10976_v20 = vld [vmem:[#allocation11 + $0x174] sm:$0xf]  ;;  %v1172_v15 = vpack.c.b16 %v1168_v41, %v1168_v41  ;;  %v7992_v11 = vld [vmem:[#allocation11 + $0x158] sm:$0xf0] }
 0x14e   :  { %v8335_v63 = vor.u32 %v11059_v6, %v8334_v62  ;;  %v7859_v4 = vor.u32 %v10938_v24, %v7856_v42  ;;  %v10988_v41 = vld [vmem:[#allocation11 + $0x1d4] sm:$0xf]  ;;  %v10970_v62 = vld [vmem:[#allocation11 + $0x144] sm:$0xf]  ;;  %v7984_v6 = vld [vmem:[#allocation11 + $0x148] sm:$0xf0] }
 0x14f   :  { %v1104_v0 = vrot.slane %v1076_v5, 6  ;;  %v8072_v5 = vld [vmem:[#allocation11 + $0x1f8] sm:$0xf0]  ;;  %v10978_v31 = vld [vmem:[#allocation11 + $0x184] sm:$0xf] }
 0x150   :  { %v8016_v33 = vld [vmem:[#allocation11 + $0x188] sm:$0xf0] }
 0x151   :  { %2258 = vmatpush.bf16.msra.mxu1 %v8367_v25  ;;  %v1105_v45 = vsel %vm12200_vm6, %v1103_v30, %v1104_v0  ;;  %2272 = vmatpush.bf16.msra.mxu3 %v8431_v52  ;;  %v10992_v25 = vld [vmem:[#allocation11 + $0x1f4] sm:$0xf]  ;;  %v7939_v52 = vor.u32 %v10958_v48, %v7936_v53  ;;  %v7864_v30 = vld [vmem:[#allocation11 + $0x58] sm:$0xf0]  ;;  %v10928_v48 = vld [vmem:[#allocation5 + $0x4] sm:$0xe] }
 0x152   :  { %1109 = vst [vmem:[#allocation5 + $0x8] sm:$0xff] %v1105_v45  ;;  %v10956_v0 = vld [vmem:[#allocation11 + $0xd4] sm:$0xf]  ;;  %v8011_v45 = vor.u32 %v10976_v20, %v8008_v50  ;;  %v7867_v32 = vor.u32 %v10940_v34, %v7864_v30  ;;  %v7912_v53 = vld [vmem:[#allocation11 + $0xb8] sm:$0xf0]  ;;  %v7987_v34 = vor.u32 %v10970_v62, %v7984_v6 }
 0x153   :  { %v7931_v3 = vor.u32 %v10956_v0, %v7928_v61  ;;  %v7976_v30 = vld [vmem:[#allocation11 + $0x138] sm:$0xf0]  ;;  %v10984_v0 = vld [vmem:[#allocation11 + $0x1b4] sm:$0xf]  ;;  %v10962_v62 = vld [vmem:[#allocation11 + $0x104] sm:$0xf] }
 0x154   :  { %2207 = vmatmul.bf16.vlgmr.msrb.gmra.mxu1 %v12223_v59  ;;  %2221 = vmatmul.bf16.vlgmr.msrb.gmra.mxu3 %v12225_v8  ;;  %v8040_v61 = vld [vmem:[#allocation11 + $0x1b8] sm:$0xf0]  ;;  %v7952_v6 = vld [vmem:[#allocation11 + $0x108] sm:$0xf0] }
 0x155   :  { %2259 = vmatpush.bf16.msra.mxu1 %v8359_v58  ;;  %2273 = vmatpush.bf16.msra.mxu3 %v8423_v60  ;;  %v8075_v58 = vor.u32 %v10992_v25, %v8072_v5  ;;  %v1176_v60 = vrot.slane %v1172_v15, 2  ;;  %v7915_v15 = vor.u32 %v10952_v23, %v7912_v53  ;;  %v10950_v5 = vld [vmem:[#allocation11 + $0xa4] sm:$0xf]  ;;  %v8043_v10 = vor.u32 %v10984_v0, %v8040_v61  ;;  %v8192_v53 = vld [vmem:[#allocation11 + $0x2e8] sm:$0xf0] }
 0x156   :  { %v11022_v23 = vld [vmem:[#allocation11 + $0x2e4] sm:$0xf]  ;;  %v7955_v0 = vor.u32 %v10962_v62, %v7952_v6  ;;  %v8019_v61 = vor.u32 %v10978_v31, %v8016_v33  ;;  %v11032_v62 = vld [vmem:[#allocation11 + $0x334] sm:$0xf]  ;;  %v8232_v6 = vld [vmem:[#allocation11 + $0x338] sm:$0xf0] }
 0x157   :  { %v11048_v31 = vld [vmem:[#allocation11 + $0x3b4] sm:$0xf]  ;;  %v8296_v33 = vld [vmem:[#allocation11 + $0x3b8] sm:$0xf0] }
 0x159   :  { %v10927_v49 = vld [vmem:[#allocation5 + $0x4] sm:$0x70]  ;;  %v7808_v39 = vld [vmem:[#allocation5 + $0x8] sm:$0x70]  ;;  %2260 = vmatpush.bf16.msra.mxu1 %v8351_v21  ;;  %2274 = vmatpush.bf16.msra.mxu3 %v8415_v17  ;;  %v1178_v21 = vrot.slane %v1171_v7, 2 }
 0x15a   :  { %v12229_v46 = vor.u32 %v10927_v49, %v7806_v43  ;;  %v12231_v9 = vor.u32 %v10926_v37, %v7808_v39  ;;  %v10929_v29 = vld [vmem:[#allocation5 + $0x4] sm:$0xf0]  ;;  %v7816_v17 = vld [vmem:[#allocation5 + $0x8] sm:$0xf0]  ;;  %v7923_v43 = vor.u32 %v10954_v22, %v7920_v16  ;;  %v12240_v49 = vsel %vm1174_vm7, %v1175_v12, %v1176_v60  ;;  %v10930_v12 = vld [vmem:[#allocation11 + $0x4] sm:$0xf] }
 0x15b   :  { %v12243_v37 = vsel %vm1174_vm7, %v1178_v21, %v1179_v27  ;;  %v10936_v39 = vld [vmem:[#allocation11 + $0x34] sm:$0xf]  ;;  %v7896_v27 = vld [vmem:[#allocation11 + $0x98] sm:$0xf0]  ;;  %v7824_v21 = vld [vmem:[#allocation11 + $0x8] sm:$0xf0] }
 0x15c   :  { %2179 = vmatmul.bf16.vlgmr.msra.gmra.mxu0 %v12229_v46  ;;  %2193 = vmatmul.bf16.vlgmr.msra.gmra.mxu2 %v12231_v9  ;;  %v7851_v20 = vor.u32 %v10936_v39, %v7848_v1  ;;  %v10968_v7 = vld [vmem:[#allocation11 + $0x134] sm:$0xf]  ;;  %v10946_v22 = vld [vmem:[#allocation11 + $0x84] sm:$0xf]  ;;  %v7888_v16 = vld [vmem:[#allocation11 + $0x88] sm:$0xf0] }
 0x15d   :  { %2283 = vmatpush.bf16.msra.mxu0 %v7883_v51  ;;  %2297 = vmatpush.bf16.msra.mxu2 %v7947_v36  ;;  %v7815_v51 = vor.u32 %v10929_v29, %v7814_v47  ;;  %v7819_v36 = vor.u32 %v10928_v48, %v7816_v17  ;;  %v10948_v60 = vld [vmem:[#allocation11 + $0x94] sm:$0xf]  ;;  %v7979_v2 = vor.u32 %v10968_v7, %v7976_v30  ;;  %v8136_v17 = vld [vmem:[#allocation11 + $0x278] sm:$0xf0]  ;;  %v8128_v1 = vld [vmem:[#allocation11 + $0x268] sm:$0xf0] }
 0x15e   :  { %2261 = vmatpush.bf16.msra.mxu1 %v8343_v55  ;;  %2275 = vmatpush.bf16.msra.mxu3 %v8407_v56  ;;  %v7995_v55 = vor.u32 %v10972_v19, %v7992_v11  ;;  %v8059_v56 = vor.u32 %v10988_v41, %v8056_v40  ;;  %v7899_v42 = vor.u32 %v10948_v60, %v7896_v27  ;;  %v11008_v29 = vld [vmem:[#allocation11 + $0x274] sm:$0xf]  ;;  %v7960_v41 = vld [vmem:[#allocation11 + $0x118] sm:$0xf0]  ;;  %v11054_v60 = vld [vmem:[#allocation11 + $0x3e4] sm:$0xf] }
 0x15f   :  { %v12247_v50 = vrot.slane %v7815_v51, 1  ;;  %v12249_v25 = vrot.slane %v7819_v36, 1  ;;  %v7971_v19 = vor.u32 %v10966_v14, %v7968_v18  ;;  %v10964_v11 = vld [vmem:[#allocation11 + $0x114] sm:$0xf]  ;;  %v7827_v47 = vor.u32 %v10930_v12, %v7824_v21  ;;  %v11006_v36 = vld [vmem:[#allocation11 + $0x264] sm:$0xf] }
 0x160   :  { %v10980_v40 = vld [vmem:[#allocation11 + $0x194] sm:$0xf]  ;;  %v7891_v48 = vor.u32 %v10946_v22, %v7888_v16  ;;  %v8139_v39 = vor.u32 %v11008_v29, %v8136_v17  ;;  %v8184_v30 = vld [vmem:[#allocation11 + $0x2d8] sm:$0xf0]  ;;  %v8320_v27 = vld [vmem:[#allocation11 + $0x3e8] sm:$0xf0] }
 0x161   :  { %2284 = vmatpush.bf16.msra.mxu0 %v7875_v57  ;;  %2298 = vmatpush.bf16.msra.mxu2 %v7939_v52  ;;  %v7840_v57 = vld [vmem:[#allocation11 + $0x28] sm:$0xf0]  ;;  %v11020_v7 = vld [vmem:[#allocation11 + $0x2d4] sm:$0xf]  ;;  %v11002_v14 = vld [vmem:[#allocation11 + $0x244] sm:$0xf] }
 0x162   :  { %2262 = vmatpush.bf16.msra.mxu1 %v8335_v63  ;;  %2276 = vmatpush.bf16.msra.mxu3 %v8399_v54  ;;  %v7904_v52 = vld [vmem:[#allocation11 + $0xa8] sm:$0xf0]  ;;  %v7843_v63 = vor.u32 %v10934_v38, %v7840_v57  ;;  %v11056_v38 = vld [vmem:[#allocation11 + $0x3f4] sm:$0xf]  ;;  %v8328_v57 = vld [vmem:[#allocation11 + $0x3f8] sm:$0xf0] }
 0x163   :  { %v7907_v54 = vor.u32 %v10950_v5, %v7904_v52  ;;  %v8131_v5 = vor.u32 %v11006_v36, %v8128_v1  ;;  %v8195_v52 = vor.u32 %v11022_v23, %v8192_v53  ;;  %v8112_v18 = vld [vmem:[#allocation11 + $0x248] sm:$0xf0]  ;;  %v11036_v12 = vld [vmem:[#allocation11 + $0x354] sm:$0xf]  ;;  %v8248_v21 = vld [vmem:[#allocation11 + $0x358] sm:$0xf0] }
 0x164   :  { %v11052_v22 = vld [vmem:[#allocation11 + $0x3d4] sm:$0xf]  ;;  %v8312_v16 = vld [vmem:[#allocation11 + $0x3d8] sm:$0xf0]  ;;  %v8115_v29 = vor.u32 %v11002_v14, %v8112_v18  ;;  %v10998_v36 = vld [vmem:[#allocation11 + $0x224] sm:$0xf] }
 0x165   :  { %2285 = vmatpush.bf16.msra.mxu0 %v7867_v32  ;;  %2299 = vmatpush.bf16.msra.mxu2 %v7931_v3  ;;  %v10982_v32 = vld [vmem:[#allocation11 + $0x1a4] sm:$0xf]  ;;  %v8032_v3 = vld [vmem:[#allocation11 + $0x1a8] sm:$0xf0]  ;;  %v11088_v14 = vld [vmem:[#allocation11 + $0x4f4] sm:$0xf] }
 0x166   :  { %2311 = vmatpush.bf16.msrb.mxu1 %v8011_v45  ;;  %2325 = vmatpush.bf16.msrb.mxu3 %v8075_v58  ;;  %v10932_v45 = vld [vmem:[#allocation11 + $0x14] sm:$0xf]  ;;  %v7832_v58 = vld [vmem:[#allocation11 + $0x18] sm:$0xf0]  ;;  %v8096_v1 = vld [vmem:[#allocation11 + $0x228] sm:$0xf0] }
 0x167   :  { %2263 = vmatmul.bf16.vlgmr.msra.gmra.mxu1 %v12240_v49  ;;  %2277 = vmatmul.bf16.vlgmr.msra.gmra.mxu3 %v12243_v37  ;;  %v7835_v24 = vor.u32 %v10932_v45, %v7832_v58  ;;  %v11038_v45 = vld [vmem:[#allocation11 + $0x364] sm:$0xf]  ;;  %v8256_v58 = vld [vmem:[#allocation11 + $0x368] sm:$0xf0]  ;;  %v8456_v18 = vld [vmem:[#allocation11 + $0x4f8] sm:$0xf0] }
 0x168   :  { %v11014_v23 = vld [vmem:[#allocation11 + $0x2a4] sm:$0xf]  ;;  %v8160_v53 = vld [vmem:[#allocation11 + $0x2a8] sm:$0xf0] }
 0x169   :  { %2286 = vmatpush.bf16.msra.mxu0 %v7859_v4  ;;  %2300 = vmatpush.bf16.msra.mxu2 %v7923_v43  ;;  %v8035_v4 = vor.u32 %v10982_v32, %v8032_v3  ;;  %v8024_v43 = vld [vmem:[#allocation11 + $0x198] sm:$0xf0]  ;;  %v11018_v32 = vld [vmem:[#allocation11 + $0x2c4] sm:$0xf]  ;;  %v8176_v3 = vld [vmem:[#allocation11 + $0x2c8] sm:$0xf0] }
 0x16a   :  { %2312 = vmatpush.bf16.msrb.mxu1 %v8003_v26  ;;  %2326 = vmatpush.bf16.msrb.mxu3 %v8067_v35  ;;  %v11024_v26 = vld [vmem:[#allocation11 + $0x2f4] sm:$0xf]  ;;  %v8200_v35 = vld [vmem:[#allocation11 + $0x2f8] sm:$0xf0]  ;;  %v8179_v17 = vor.u32 %v11018_v32, %v8176_v3 }
 0x16b   :  { %v8203_v51 = vor.u32 %v11024_v26, %v8200_v35  ;;  %v11000_v26 = vld [vmem:[#allocation11 + $0x234] sm:$0xf]  ;;  %v8104_v35 = vld [vmem:[#allocation11 + $0x238] sm:$0xf0] }
 0x16c   :  { %2235 = vmatmul.bf16.vlgmr.msrb.gmra.mxu0 %v12247_v50  ;;  %2249 = vmatmul.bf16.vlgmr.msrb.gmra.mxu2 %v12249_v25 }
 0x16d   :  { %2287 = vmatpush.bf16.msra.mxu0 %v7851_v20  ;;  %2301 = vmatpush.bf16.msra.mxu2 %v7915_v15  ;;  %v11040_v20 = vld [vmem:[#allocation11 + $0x374] sm:$0xf]  ;;  %v8264_v15 = vld [vmem:[#allocation11 + $0x378] sm:$0xf0] }
 0x16e   :  { %2313 = vmatpush.bf16.msrb.mxu1 %v7995_v55  ;;  %2327 = vmatpush.bf16.msrb.mxu3 %v8059_v56  ;;  %v7963_v55 = vor.u32 %v10964_v11, %v7960_v41  ;;  %v8027_v56 = vor.u32 %v10980_v40, %v8024_v43  ;;  %v8251_v11 = vor.u32 %v11036_v12, %v8248_v21  ;;  %v11034_v40 = vld [vmem:[#allocation11 + $0x344] sm:$0xf]  ;;  %v8240_v43 = vld [vmem:[#allocation11 + $0x348] sm:$0xf0]  ;;  %v11044_v12 = vld [vmem:[#allocation11 + $0x394] sm:$0xf] }
 0x16f   :  { %v8315_v41 = vor.u32 %v11052_v22, %v8312_v16  ;;  %v8280_v21 = vld [vmem:[#allocation11 + $0x398] sm:$0xf0] }
 0x171   :  { %2288 = vmatpush.bf16.msra.mxu0 %v7843_v63  ;;  %2302 = vmatpush.bf16.msra.mxu2 %v7907_v54  ;;  %v8267_v63 = vor.u32 %v11040_v20, %v8264_v15  ;;  %v8331_v54 = vor.u32 %v11056_v38, %v8328_v57  ;;  %v8099_v20 = vor.u32 %v10998_v36, %v8096_v1  ;;  %v10996_v38 = vld [vmem:[#allocation11 + $0x214] sm:$0xf]  ;;  %v8088_v57 = vld [vmem:[#allocation11 + $0x218] sm:$0xf0]  ;;  %v8582_v36 = vld [vmem:[#allocation11 + $0x5f0] sm:$0xf] }
 0x172   :  { %2314 = vmatpush.bf16.msrb.mxu1 %v7987_v34  ;;  %2328 = vmatpush.bf16.msrb.mxu3 %v8051_v28  ;;  %v11004_v34 = vld [vmem:[#allocation11 + $0x254] sm:$0xf]  ;;  %v8120_v28 = vld [vmem:[#allocation11 + $0x258] sm:$0xf0]  ;;  %v8163_v15 = vor.u32 %v11014_v23, %v8160_v53  ;;  %v11121_v1 = vld [vmem:[#allocation11 + $0x5f4] sm:$0xf0] }
 0x175   :  { %2289 = vmatpush.bf16.msra.mxu0 %v7835_v24  ;;  %2303 = vmatpush.bf16.msra.mxu2 %v7899_v42  ;;  %v8259_v24 = vor.u32 %v11038_v45, %v8256_v58  ;;  %v8323_v42 = vor.u32 %v11054_v60, %v8320_v27  ;;  %v10994_v45 = vld [vmem:[#allocation11 + $0x204] sm:$0xf]  ;;  %v8080_v58 = vld [vmem:[#allocation11 + $0x208] sm:$0xf0] }
 0x176   :  { %2315 = vmatpush.bf16.msrb.mxu1 %v7979_v2  ;;  %2329 = vmatpush.bf16.msrb.mxu3 %v8043_v10  ;;  %v8123_v2 = vor.u32 %v11004_v34, %v8120_v28  ;;  %v8187_v10 = vor.u32 %v11020_v7, %v8184_v30  ;;  %v8235_v34 = vor.u32 %v11032_v62, %v8232_v6  ;;  %v11030_v7 = vld [vmem:[#allocation11 + $0x324] sm:$0xf]  ;;  %v8224_v30 = vld [vmem:[#allocation11 + $0x328] sm:$0xf0]  ;;  %v11084_v62 = vld [vmem:[#allocation11 + $0x4d4] sm:$0xf] }
 0x177   :  { %v8299_v28 = vor.u32 %v11048_v31, %v8296_v33  ;;  %v11010_v60 = vld [vmem:[#allocation11 + $0x284] sm:$0xf]  ;;  %v8144_v27 = vld [vmem:[#allocation11 + $0x288] sm:$0xf0]  ;;  %v8227_v32 = vor.u32 %v11030_v7, %v8224_v30  ;;  %v8083_v22 = vor.u32 %v10994_v45, %v8080_v58  ;;  %v8440_v6 = vld [vmem:[#allocation11 + $0x4d8] sm:$0xf0] }
 0x178   :  { %v8147_v16 = vor.u32 %v11010_v60, %v8144_v27  ;;  %v11066_v7 = vld [vmem:[#allocation11 + $0x444] sm:$0xf]  ;;  %v8368_v30 = vld [vmem:[#allocation11 + $0x448] sm:$0xf0]  ;;  %v8502_v45 = vld [vmem:[#allocation11 + $0x550] sm:$0xf] }
 0x179   :  { %2290 = vmatpush.bf16.msra.mxu0 %v7827_v47  ;;  %2304 = vmatpush.bf16.msra.mxu2 %v7891_v48  ;;  %v11050_v47 = vld [vmem:[#allocation11 + $0x3c4] sm:$0xf]  ;;  %v8304_v48 = vld [vmem:[#allocation11 + $0x3c8] sm:$0xf0]  ;;  %v11101_v58 = vld [vmem:[#allocation11 + $0x554] sm:$0xf0] }
 0x17a   :  { %2316 = vmatpush.bf16.msrb.mxu1 %v7971_v19  ;;  %2330 = vmatpush.bf16.msrb.mxu3 %v8035_v4  ;;  %v11016_v19 = vld [vmem:[#allocation11 + $0x2b4] sm:$0xf]  ;;  %v8168_v4 = vld [vmem:[#allocation11 + $0x2b8] sm:$0xf0]  ;;  %v8566_v60 = vld [vmem:[#allocation11 + $0x5d0] sm:$0xf] }
 0x17b   :  { %v11117_v27 = vld [vmem:[#allocation11 + $0x5d4] sm:$0xf0] }
 0x17c   :  { %2291 = vmatmul.bf16.vlgmr.msra.gmra.mxu0 %v12207_v13  ;;  %2305 = vmatmul.bf16.vlgmr.msra.gmra.mxu2 %v12209_v44 }
 0x17d   :  { %2339 = vmatpush.bf16.msrb.mxu0 %v8139_v39  ;;  %2353 = vmatpush.bf16.msrb.mxu2 %v8203_v51  ;;  %v8107_v39 = vor.u32 %v11000_v26, %v8104_v35  ;;  %v8171_v51 = vor.u32 %v11016_v19, %v8168_v4  ;;  %v11070_v26 = vld [vmem:[#allocation11 + $0x464] sm:$0xf]  ;;  %v8384_v35 = vld [vmem:[#allocation11 + $0x468] sm:$0xf0] }
 0x17e   :  { %2317 = vmatpush.bf16.msrb.mxu1 %v7963_v55  ;;  %2331 = vmatpush.bf16.msrb.mxu3 %v8027_v56  ;;  %v8243_v55 = vor.u32 %v11034_v40, %v8240_v43  ;;  %v8307_v56 = vor.u32 %v11050_v47, %v8304_v48  ;;  %v11086_v19 = vld [vmem:[#allocation11 + $0x4e4] sm:$0xf]  ;;  %v8448_v4 = vld [vmem:[#allocation11 + $0x4e8] sm:$0xf0]  ;;  %v8387_v23 = vor.u32 %v11070_v26, %v8384_v35 }
 0x17f   :  { %v11026_v40 = vld [vmem:[#allocation11 + $0x304] sm:$0xf]  ;;  %v8208_v43 = vld [vmem:[#allocation11 + $0x308] sm:$0xf0]  ;;  %v8451_v53 = vor.u32 %v11086_v19, %v8448_v4 }
 0x180   :  { %v11042_v47 = vld [vmem:[#allocation11 + $0x384] sm:$0xf]  ;;  %v8272_v48 = vld [vmem:[#allocation11 + $0x388] sm:$0xf0]  ;;  %v8211_v31 = vor.u32 %v11026_v40, %v8208_v43  ;;  %v8486_v40 = vld [vmem:[#allocation11 + $0x530] sm:$0xf] }
 0x181   :  { %2340 = vmatpush.bf16.msrb.mxu0 %v8131_v5  ;;  %2354 = vmatpush.bf16.msrb.mxu2 %v8195_v52  ;;  %v11012_v5 = vld [vmem:[#allocation11 + $0x294] sm:$0xf]  ;;  %v8152_v52 = vld [vmem:[#allocation11 + $0x298] sm:$0xf0]  ;;  %v8275_v33 = vor.u32 %v11042_v47, %v8272_v48  ;;  %v11062_v26 = vld [vmem:[#allocation11 + $0x424] sm:$0xf] }
 0x182   :  { %2318 = vmatpush.bf16.msrb.mxu1 %v7955_v0  ;;  %2332 = vmatpush.bf16.msrb.mxu3 %v8019_v61  ;;  %v11046_v0 = vld [vmem:[#allocation11 + $0x3a4] sm:$0xf]  ;;  %v8288_v61 = vld [vmem:[#allocation11 + $0x3a8] sm:$0xf0]  ;;  %v11097_v43 = vld [vmem:[#allocation11 + $0x534] sm:$0xf0] }
 0x183   :  { %v8291_v3 = vor.u32 %v11046_v0, %v8288_v61  ;;  %v11082_v0 = vld [vmem:[#allocation11 + $0x4c4] sm:$0xf]  ;;  %v8432_v61 = vld [vmem:[#allocation11 + $0x4c8] sm:$0xf0]  ;;  %v8550_v47 = vld [vmem:[#allocation11 + $0x5b0] sm:$0xf] }
 0x184   :  { %v8352_v35 = vld [vmem:[#allocation11 + $0x428] sm:$0xf0]  ;;  %v11078_v19 = vld [vmem:[#allocation11 + $0x4a4] sm:$0xf]  ;;  %v11113_v48 = vld [vmem:[#allocation11 + $0x5b4] sm:$0xf0] }
 0x185   :  { %2341 = vmatpush.bf16.msrb.mxu0 %v8123_v2  ;;  %2355 = vmatpush.bf16.msrb.mxu2 %v8187_v10  ;;  %v11072_v2 = vld [vmem:[#allocation11 + $0x474] sm:$0xf]  ;;  %v8392_v10 = vld [vmem:[#allocation11 + $0x478] sm:$0xf0]  ;;  %v8416_v4 = vld [vmem:[#allocation11 + $0x4a8] sm:$0xf0] }
 0x186   :  { %2367 = vmatpush.bf16.msra.mxu1 %v8267_v63  ;;  %2381 = vmatpush.bf16.msra.mxu3 %v8331_v54  ;;  %v8091_v63 = vor.u32 %v10996_v38, %v8088_v57  ;;  %v8155_v54 = vor.u32 %v11012_v5, %v8152_v52  ;;  %v8510_v38 = vld [vmem:[#allocation11 + $0x560] sm:$0xf]  ;;  %v11103_v57 = vld [vmem:[#allocation11 + $0x564] sm:$0xf0] }
 0x187   :  { %2319 = vmatmul.bf16.vlgmr.msrb.gmra.mxu1 %v12229_v46  ;;  %2333 = vmatmul.bf16.vlgmr.msrb.gmra.mxu3 %v12231_v9  ;;  %v8574_v5 = vld [vmem:[#allocation11 + $0x5e0] sm:$0xf]  ;;  %v11119_v52 = vld [vmem:[#allocation11 + $0x5e4] sm:$0xf0] }
 0x189   :  { %2342 = vmatpush.bf16.msrb.mxu0 %v8115_v29  ;;  %2356 = vmatpush.bf16.msrb.mxu2 %v8179_v17  ;;  %v8395_v29 = vor.u32 %v11072_v2, %v8392_v10  ;;  %v8459_v17 = vor.u32 %v11088_v14, %v8456_v18  ;;  %v8371_v2 = vor.u32 %v11066_v7, %v8368_v30  ;;  %v11064_v14 = vld [vmem:[#allocation11 + $0x434] sm:$0xf]  ;;  %v8360_v18 = vld [vmem:[#allocation11 + $0x438] sm:$0xf0]  ;;  %v8710_v7 = vld [vmem:[#allocation11 + $0x6f0] sm:$0xf] }
 0x18a   :  { %2368 = vmatpush.bf16.msra.mxu1 %v8259_v24  ;;  %2382 = vmatpush.bf16.msra.mxu3 %v8323_v42  ;;  %v11028_v24 = vld [vmem:[#allocation11 + $0x314] sm:$0xf]  ;;  %v8216_v42 = vld [vmem:[#allocation11 + $0x318] sm:$0xf0]  ;;  %v8435_v10 = vor.u32 %v11082_v0, %v8432_v61  ;;  %v11153_v30 = vld [vmem:[#allocation11 + $0x6f4] sm:$0xf0] }
 0x18d   :  { %2343 = vmatpush.bf16.msrb.mxu0 %v8107_v39  ;;  %2357 = vmatpush.bf16.msrb.mxu2 %v8171_v51  ;;  %v8518_v39 = vld [vmem:[#allocation11 + $0x570] sm:$0xf]  ;;  %v11105_v51 = vld [vmem:[#allocation11 + $0x574] sm:$0xf0] }
 0x18e   :  { %2369 = vmatpush.bf16.msra.mxu1 %v8251_v11  ;;  %2383 = vmatpush.bf16.msra.mxu3 %v8315_v41  ;;  %v8219_v11 = vor.u32 %v11028_v24, %v8216_v42  ;;  %v8283_v41 = vor.u32 %v11044_v12, %v8280_v21  ;;  %v8503_v24 = vor.u32 %v11101_v58, %v8502_v45  ;;  %v8494_v12 = vld [vmem:[#allocation11 + $0x540] sm:$0xf]  ;;  %v11099_v21 = vld [vmem:[#allocation11 + $0x544] sm:$0xf0]  ;;  %v8534_v45 = vld [vmem:[#allocation11 + $0x590] sm:$0xf] }
 0x18f   :  { %v8567_v42 = vor.u32 %v11117_v27, %v8566_v60  ;;  %v11109_v58 = vld [vmem:[#allocation11 + $0x594] sm:$0xf0] }
 0x191   :  { %2344 = vmatpush.bf16.msrb.mxu0 %v8099_v20  ;;  %2358 = vmatpush.bf16.msrb.mxu2 %v8163_v15  ;;  %v8519_v20 = vor.u32 %v11105_v51, %v8518_v39  ;;  %v8583_v15 = vor.u32 %v11121_v1, %v8582_v36  ;;  %v8355_v39 = vor.u32 %v11062_v26, %v8352_v35  ;;  %v11060_v36 = vld [vmem:[#allocation11 + $0x414] sm:$0xf]  ;;  %v8344_v1 = vld [vmem:[#allocation11 + $0x418] sm:$0xf0]  ;;  %v8838_v26 = vld [vmem:[#allocation11 + $0x7f0] sm:$0xf] }
 0x192   :  { %2370 = vmatpush.bf16.msra.mxu1 %v8243_v55  ;;  %2384 = vmatpush.bf16.msra.mxu3 %v8307_v56  ;;  %v11068_v55 = vld [vmem:[#allocation11 + $0x454] sm:$0xf]  ;;  %v8376_v56 = vld [vmem:[#allocation11 + $0x458] sm:$0xf0]  ;;  %v8419_v51 = vor.u32 %v11078_v19, %v8416_v4  ;;  %v11185_v35 = vld [vmem:[#allocation11 + $0x7f4] sm:$0xf0] }
 0x195   :  { %2345 = vmatpush.bf16.msrb.mxu0 %v8091_v63  ;;  %2359 = vmatpush.bf16.msrb.mxu2 %v8155_v54  ;;  %v8511_v63 = vor.u32 %v11103_v57, %v8510_v38  ;;  %v8575_v54 = vor.u32 %v11119_v52, %v8574_v5  ;;  %v11058_v38 = vld [vmem:[#allocation11 + $0x404] sm:$0xf]  ;;  %v8336_v57 = vld [vmem:[#allocation11 + $0x408] sm:$0xf0] }
 0x196   :  { %2371 = vmatpush.bf16.msra.mxu1 %v8235_v34  ;;  %2385 = vmatpush.bf16.msra.mxu3 %v8299_v28  ;;  %v8379_v34 = vor.u32 %v11068_v55, %v8376_v56  ;;  %v8443_v28 = vor.u32 %v11084_v62, %v8440_v6  ;;  %v8487_v55 = vor.u32 %v11097_v43, %v8486_v40  ;;  %v8478_v62 = vld [vmem:[#allocation11 + $0x520] sm:$0xf]  ;;  %v11095_v6 = vld [vmem:[#allocation11 + $0x524] sm:$0xf0]  ;;  %v11074_v5 = vld [vmem:[#allocation11 + $0x484] sm:$0xf] }
 0x197   :  { %v8551_v56 = vor.u32 %v11113_v48, %v8550_v47  ;;  %v8400_v52 = vld [vmem:[#allocation11 + $0x488] sm:$0xf0]  ;;  %v8479_v0 = vor.u32 %v11095_v6, %v8478_v62  ;;  %v8339_v60 = vor.u32 %v11058_v38, %v8336_v57  ;;  %v8694_v40 = vld [vmem:[#allocation11 + $0x6d0] sm:$0xf]  ;;  %v11149_v43 = vld [vmem:[#allocation11 + $0x6d4] sm:$0xf0] }
 0x198   :  { %v8403_v27 = vor.u32 %v11074_v5, %v8400_v52  ;;  %v8622_v62 = vld [vmem:[#allocation11 + $0x640] sm:$0xf]  ;;  %v11131_v6 = vld [vmem:[#allocation11 + $0x644] sm:$0xf0]  ;;  %v8758_v38 = vld [vmem:[#allocation11 + $0x750] sm:$0xf] }
 0x199   :  { %2346 = vmatpush.bf16.msrb.mxu0 %v8083_v22  ;;  %2360 = vmatpush.bf16.msrb.mxu2 %v8147_v16  ;;  %v8558_v22 = vld [vmem:[#allocation11 + $0x5c0] sm:$0xf]  ;;  %v11115_v16 = vld [vmem:[#allocation11 + $0x5c4] sm:$0xf0]  ;;  %v11165_v57 = vld [vmem:[#allocation11 + $0x754] sm:$0xf0] }
 0x19a   :  { %2372 = vmatpush.bf16.msra.mxu1 %v8227_v32  ;;  %2386 = vmatpush.bf16.msra.mxu3 %v8291_v3  ;;  %v11080_v32 = vld [vmem:[#allocation11 + $0x4b4] sm:$0xf]  ;;  %v8424_v3 = vld [vmem:[#allocation11 + $0x4b8] sm:$0xf0]  ;;  %v8822_v5 = vld [vmem:[#allocation11 + $0x7d0] sm:$0xf] }
 0x19b   :  { %v11181_v52 = vld [vmem:[#allocation11 + $0x7d4] sm:$0xf0] }
 0x19c   :  { %2347 = vmatmul.bf16.vlgmr.msrb.gmra.mxu0 %v12223_v59  ;;  %2361 = vmatmul.bf16.vlgmr.msrb.gmra.mxu2 %v12225_v8 }
 0x19d   :  { %2395 = vmatpush.bf16.msra.mxu0 %v8395_v29  ;;  %2409 = vmatpush.bf16.msra.mxu2 %v8459_v17  ;;  %v8363_v29 = vor.u32 %v11064_v14, %v8360_v18  ;;  %v8427_v17 = vor.u32 %v11080_v32, %v8424_v3  ;;  %v8638_v14 = vld [vmem:[#allocation11 + $0x660] sm:$0xf]  ;;  %v11135_v18 = vld [vmem:[#allocation11 + $0x664] sm:$0xf0] }
 0x19e   :  { %2373 = vmatpush.bf16.msra.mxu1 %v8219_v11  ;;  %2387 = vmatpush.bf16.msra.mxu3 %v8283_v41  ;;  %v8495_v11 = vor.u32 %v11099_v21, %v8494_v12  ;;  %v8559_v41 = vor.u32 %v11115_v16, %v8558_v22  ;;  %v8702_v32 = vld [vmem:[#allocation11 + $0x6e0] sm:$0xf]  ;;  %v11151_v3 = vld [vmem:[#allocation11 + $0x6e4] sm:$0xf0]  ;;  %v8639_v19 = vor.u32 %v11135_v18, %v8638_v14 }
 0x19f   :  { %v8462_v12 = vld [vmem:[#allocation11 + $0x500] sm:$0xf]  ;;  %v11091_v21 = vld [vmem:[#allocation11 + $0x504] sm:$0xf0]  ;;  %v8703_v4 = vor.u32 %v11151_v3, %v8702_v32 }
 0x1a0   :  { %v8526_v22 = vld [vmem:[#allocation11 + $0x580] sm:$0xf]  ;;  %v11107_v16 = vld [vmem:[#allocation11 + $0x584] sm:$0xf0]  ;;  %v8463_v47 = vor.u32 %v11091_v21, %v8462_v12  ;;  %v8742_v12 = vld [vmem:[#allocation11 + $0x730] sm:$0xf] }
 0x1a1   :  { %2396 = vmatpush.bf16.msra.mxu0 %v8387_v23  ;;  %2410 = vmatpush.bf16.msra.mxu2 %v8451_v53  ;;  %v11076_v23 = vld [vmem:[#allocation11 + $0x494] sm:$0xf]  ;;  %v8408_v53 = vld [vmem:[#allocation11 + $0x498] sm:$0xf0]  ;;  %v8527_v48 = vor.u32 %v11107_v16, %v8526_v22  ;;  %v8606_v14 = vld [vmem:[#allocation11 + $0x620] sm:$0xf] }
 0x1a2   :  { %2374 = vmatpush.bf16.msra.mxu1 %v8211_v31  ;;  %2388 = vmatpush.bf16.msra.mxu3 %v8275_v33  ;;  %v8542_v31 = vld [vmem:[#allocation11 + $0x5a0] sm:$0xf]  ;;  %v11111_v33 = vld [vmem:[#allocation11 + $0x5a4] sm:$0xf0]  ;;  %v11161_v21 = vld [vmem:[#allocation11 + $0x734] sm:$0xf0] }
 0x1a3   :  { %v8543_v61 = vor.u32 %v11111_v33, %v8542_v31  ;;  %v8686_v31 = vld [vmem:[#allocation11 + $0x6c0] sm:$0xf]  ;;  %v11147_v33 = vld [vmem:[#allocation11 + $0x6c4] sm:$0xf0]  ;;  %v8806_v22 = vld [vmem:[#allocation11 + $0x7b0] sm:$0xf] }
 0x1a4   :  { %v11127_v18 = vld [vmem:[#allocation11 + $0x624] sm:$0xf0]  ;;  %v8670_v32 = vld [vmem:[#allocation11 + $0x6a0] sm:$0xf]  ;;  %v11177_v16 = vld [vmem:[#allocation11 + $0x7b4] sm:$0xf0] }
 0x1a5   :  { %2397 = vmatpush.bf16.msra.mxu0 %v8379_v34  ;;  %2411 = vmatpush.bf16.msra.mxu2 %v8443_v28  ;;  %v8646_v34 = vld [vmem:[#allocation11 + $0x670] sm:$0xf]  ;;  %v11137_v28 = vld [vmem:[#allocation11 + $0x674] sm:$0xf0]  ;;  %v11143_v3 = vld [vmem:[#allocation11 + $0x6a4] sm:$0xf0] }
 0x1a6   :  { %3388 = vmatpush.bf16.msrb.mxu1 %v8519_v20  ;;  %3402 = vmatpush.bf16.msrb.mxu3 %v8583_v15  ;;  %v8347_v20 = vor.u32 %v11060_v36, %v8344_v1  ;;  %v8411_v15 = vor.u32 %v11076_v23, %v8408_v53  ;;  %v8766_v36 = vld [vmem:[#allocation11 + $0x760] sm:$0xf]  ;;  %v11167_v1 = vld [vmem:[#allocation11 + $0x764] sm:$0xf0] }
 0x1a7   :  { %2375 = vmatmul.bf16.vlgmr.msra.gmra.mxu1 %v12247_v50  ;;  %2389 = vmatmul.bf16.vlgmr.msra.gmra.mxu3 %v12249_v25  ;;  %v8830_v23 = vld [vmem:[#allocation11 + $0x7e0] sm:$0xf]  ;;  %v11183_v53 = vld [vmem:[#allocation11 + $0x7e4] sm:$0xf0] }
 0x1a9   :  { %2398 = vmatpush.bf16.msra.mxu0 %v8371_v2  ;;  %2412 = vmatpush.bf16.msra.mxu2 %v8435_v10  ;;  %v8647_v2 = vor.u32 %v11137_v28, %v8646_v34  ;;  %v8711_v10 = vor.u32 %v11153_v30, %v8710_v7  ;;  %v8623_v34 = vor.u32 %v11131_v6, %v8622_v62  ;;  %v8614_v7 = vld [vmem:[#allocation11 + $0x630] sm:$0xf]  ;;  %v11129_v30 = vld [vmem:[#allocation11 + $0x634] sm:$0xf0] }
 0x1aa   :  { %3389 = vmatpush.bf16.msrb.mxu1 %v8511_v63  ;;  %3403 = vmatpush.bf16.msrb.mxu3 %v8575_v54  ;;  %v8470_v63 = vld [vmem:[#allocation11 + $0x510] sm:$0xf]  ;;  %v11093_v54 = vld [vmem:[#allocation11 + $0x514] sm:$0xf0]  ;;  %v8687_v28 = vor.u32 %v11147_v33, %v8686_v31 }
 0x1ab   :  { %v8902_v62 = vld [vmem:[#allocation11 + $0x870] sm:$0xf]  ;;  %v11201_v6 = vld [vmem:[#allocation11 + $0x874] sm:$0xf0] }
 0x1ac   :  { %v8966_v31 = vld [vmem:[#allocation11 + $0x8f0] sm:$0xf]  ;;  %v11217_v33 = vld [vmem:[#allocation11 + $0x8f4] sm:$0xf0] }
 0x1ad   :  { %2399 = vmatpush.bf16.msra.mxu0 %v8363_v29  ;;  %2413 = vmatpush.bf16.msra.mxu2 %v8427_v17  ;;  %v8774_v29 = vld [vmem:[#allocation11 + $0x770] sm:$0xf]  ;;  %v11169_v17 = vld [vmem:[#allocation11 + $0x774] sm:$0xf0] }
 0x1ae   :  { %3390 = vmatpush.bf16.msrb.mxu1 %v8503_v24  ;;  %3404 = vmatpush.bf16.msrb.mxu3 %v8567_v42  ;;  %v8471_v24 = vor.u32 %v11093_v54, %v8470_v63  ;;  %v8535_v42 = vor.u32 %v11109_v58, %v8534_v45  ;;  %v8759_v63 = vor.u32 %v11165_v57, %v8758_v38  ;;  %v8750_v45 = vld [vmem:[#allocation11 + $0x740] sm:$0xf]  ;;  %v11163_v58 = vld [vmem:[#allocation11 + $0x744] sm:$0xf0]  ;;  %v8726_v38 = vld [vmem:[#allocation11 + $0x710] sm:$0xf] }
 0x1af   :  { %v8823_v54 = vor.u32 %v11181_v52, %v8822_v5  ;;  %v11157_v57 = vld [vmem:[#allocation11 + $0x714] sm:$0xf0]  ;;  %v8790_v5 = vld [vmem:[#allocation11 + $0x790] sm:$0xf] }
 0x1b0   :  { %v11173_v52 = vld [vmem:[#allocation11 + $0x794] sm:$0xf0] }
 0x1b1   :  { %2400 = vmatpush.bf16.msra.mxu0 %v8355_v39  ;;  %2414 = vmatpush.bf16.msra.mxu2 %v8419_v51  ;;  %v8775_v39 = vor.u32 %v11169_v17, %v8774_v29  ;;  %v8839_v51 = vor.u32 %v11185_v35, %v8838_v26  ;;  %v8607_v29 = vor.u32 %v11127_v18, %v8606_v14  ;;  %v8598_v26 = vld [vmem:[#allocation11 + $0x610] sm:$0xf]  ;;  %v11125_v35 = vld [vmem:[#allocation11 + $0x614] sm:$0xf0] }
 0x1b2   :  { %3391 = vmatpush.bf16.msrb.mxu1 %v8495_v11  ;;  %3405 = vmatpush.bf16.msrb.mxu3 %v8559_v41  ;;  %v8630_v11 = vld [vmem:[#allocation11 + $0x650] sm:$0xf]  ;;  %v11133_v41 = vld [vmem:[#allocation11 + $0x654] sm:$0xf0]  ;;  %v8671_v17 = vor.u32 %v11143_v3, %v8670_v32 }
 0x1b3   :  { %v9030_v14 = vld [vmem:[#allocation11 + $0x970] sm:$0xf]  ;;  %v11233_v18 = vld [vmem:[#allocation11 + $0x974] sm:$0xf0] }
 0x1b4   :  { %v9094_v32 = vld [vmem:[#allocation11 + $0x9f0] sm:$0xf]  ;;  %v11249_v3 = vld [vmem:[#allocation11 + $0x9f4] sm:$0xf0] }
 0x1b5   :  { %2401 = vmatpush.bf16.msra.mxu0 %v8347_v20  ;;  %2415 = vmatpush.bf16.msra.mxu2 %v8411_v15  ;;  %v8767_v20 = vor.u32 %v11167_v1, %v8766_v36  ;;  %v8831_v15 = vor.u32 %v11183_v53, %v8830_v23  ;;  %v8590_v1 = vld [vmem:[#allocation11 + $0x600] sm:$0xf]  ;;  %v11123_v23 = vld [vmem:[#allocation11 + $0x604] sm:$0xf0] }
 0x1b6   :  { %3392 = vmatpush.bf16.msrb.mxu1 %v8487_v55  ;;  %3406 = vmatpush.bf16.msrb.mxu3 %v8551_v56  ;;  %v8631_v55 = vor.u32 %v11133_v41, %v8630_v11  ;;  %v8695_v56 = vor.u32 %v11149_v43, %v8694_v40  ;;  %v8743_v11 = vor.u32 %v11161_v21, %v8742_v12  ;;  %v8734_v40 = vld [vmem:[#allocation11 + $0x720] sm:$0xf]  ;;  %v8886_v21 = vld [vmem:[#allocation11 + $0x850] sm:$0xf] }
 0x1b7   :  { %v8807_v41 = vor.u32 %v11177_v16, %v8806_v22  ;;  %v8654_v53 = vld [vmem:[#allocation11 + $0x680] sm:$0xf]  ;;  %v11197_v22 = vld [vmem:[#allocation11 + $0x854] sm:$0xf0]  ;;  %v8950_v16 = vld [vmem:[#allocation11 + $0x8d0] sm:$0xf] }
 0x1b9   :  { %2402 = vmatpush.bf16.msra.mxu0 %v8339_v60  ;;  %2416 = vmatpush.bf16.msra.mxu2 %v8403_v27  ;;  %v8814_v60 = vld [vmem:[#allocation11 + $0x7c0] sm:$0xf]  ;;  %v11179_v27 = vld [vmem:[#allocation11 + $0x7c4] sm:$0xf0] }
 0x1ba   :  { %3393 = vmatpush.bf16.msrb.mxu1 %v8479_v0  ;;  %3407 = vmatpush.bf16.msrb.mxu3 %v8543_v61  ;;  %v8678_v0 = vld [vmem:[#allocation11 + $0x6b0] sm:$0xf]  ;;  %v11145_v61 = vld [vmem:[#allocation11 + $0x6b4] sm:$0xf0] }
 0x1bc   :  { %2403 = vmatmul.bf16.vlgmr.msra.gmra.mxu0 %v12240_v49  ;;  %2417 = vmatmul.bf16.vlgmr.msra.gmra.mxu2 %v12243_v37 }
 0x1bd   :  { %3416 = vmatpush.bf16.msrb.mxu0 %v8647_v2  ;;  %3430 = vmatpush.bf16.msrb.mxu2 %v8711_v10  ;;  %v8615_v2 = vor.u32 %v11129_v30, %v8614_v7  ;;  %v8679_v10 = vor.u32 %v11145_v61, %v8678_v0  ;;  %v8903_v7 = vor.u32 %v11201_v6, %v8902_v62  ;;  %v8894_v0 = vld [vmem:[#allocation11 + $0x860] sm:$0xf]  ;;  %v11199_v61 = vld [vmem:[#allocation11 + $0x864] sm:$0xf0]  ;;  %v9014_v62 = vld [vmem:[#allocation11 + $0x950] sm:$0xf] }
 0x1be   :  { %3394 = vmatpush.bf16.msrb.mxu1 %v8471_v24  ;;  %3408 = vmatpush.bf16.msrb.mxu3 %v8535_v42  ;;  %v8751_v24 = vor.u32 %v11163_v58, %v8750_v45  ;;  %v8815_v42 = vor.u32 %v11179_v27, %v8814_v60  ;;  %v8967_v30 = vor.u32 %v11217_v33, %v8966_v31  ;;  %v8718_v60 = vld [vmem:[#allocation11 + $0x700] sm:$0xf]  ;;  %v11155_v27 = vld [vmem:[#allocation11 + $0x704] sm:$0xf0]  ;;  %v11229_v6 = vld [vmem:[#allocation11 + $0x954] sm:$0xf0] }
 0x1bf   :  { %v8727_v45 = vor.u32 %v11157_v57, %v8726_v38  ;;  %v8791_v58 = vor.u32 %v11173_v52, %v8790_v5  ;;  %v9078_v31 = vld [vmem:[#allocation11 + $0x9d0] sm:$0xf]  ;;  %v11245_v33 = vld [vmem:[#allocation11 + $0x9d4] sm:$0xf0] }
 0x1c0   :  { %v8870_v57 = vld [vmem:[#allocation11 + $0x830] sm:$0xf]  ;;  %v11193_v5 = vld [vmem:[#allocation11 + $0x834] sm:$0xf0] }
 0x1c1   :  { %3417 = vmatpush.bf16.msrb.mxu0 %v8639_v19  ;;  %3431 = vmatpush.bf16.msrb.mxu2 %v8703_v4  ;;  %v8662_v19 = vld [vmem:[#allocation11 + $0x690] sm:$0xf]  ;;  %v11141_v4 = vld [vmem:[#allocation11 + $0x694] sm:$0xf0]  ;;  %v12265_v43 = vpop.f32.mrf.mxu1 }
 0x1c2   :  { %3395 = vmatpush.bf16.msrb.mxu1 %v8463_v47  ;;  %3409 = vmatpush.bf16.msrb.mxu3 %v8527_v48  ;;  %v11159_v47 = vld [vmem:[#allocation11 + $0x724] sm:$0xf0]  ;;  %v8798_v48 = vld [vmem:[#allocation11 + $0x7a0] sm:$0xf]  ;;  %v8663_v36 = vor.u32 %v11141_v4, %v8662_v19  ;;  %v9031_v19 = vor.u32 %v11233_v18, %v9030_v14  ;;  %v9095_v4 = vor.u32 %v11249_v3, %v9094_v32  ;;  %v8934_v52 = vld [vmem:[#allocation11 + $0x8b0] sm:$0xf] }
 0x1c3   :  { %v11207_v14 = vld [vmem:[#allocation11 + $0x8a4] sm:$0xf0] }
 0x1c5   :  { %3418 = vmatpush.bf16.msrb.mxu0 %v8631_v55  ;;  %3432 = vmatpush.bf16.msrb.mxu2 %v8695_v56  ;;  %v11139_v56 = vld [vmem:[#allocation11 + $0x684] sm:$0xf0] }
 0x1c6   :  { %3444 = vmatpush.bf16.msra.mxu1 %v8775_v39  ;;  %3458 = vmatpush.bf16.msra.mxu3 %v8839_v51  ;;  %v11175_v39 = vld [vmem:[#allocation11 + $0x7a4] sm:$0xf0]  ;;  %v8599_v51 = vor.u32 %v11125_v35, %v8598_v26 }
 0x1c7   :  { %3396 = vmatmul.bf16.vlgmr.msrb.gmra.mxu1 %v12207_v13  ;;  %3410 = vmatmul.bf16.vlgmr.msrb.gmra.mxu3 %v12209_v44  ;;  %v12267_v55 = vpop.f32.mrf.mxu3 }
 0x1c9   :  { %3419 = vmatpush.bf16.msrb.mxu0 %v8623_v34  ;;  %3433 = vmatpush.bf16.msrb.mxu2 %v8687_v28  ;;  %v8591_v34 = vor.u32 %v11123_v23, %v8590_v1  ;;  %v8655_v28 = vor.u32 %v11139_v56, %v8654_v53  ;;  %v8942_v1 = vld [vmem:[#allocation11 + $0x8c0] sm:$0xf]  ;;  %v11211_v23 = vld [vmem:[#allocation11 + $0x8c4] sm:$0xf0] }
 0x1ca   :  { %3445 = vmatpush.bf16.msra.mxu1 %v8767_v20  ;;  %3459 = vmatpush.bf16.msra.mxu3 %v8831_v15  ;;  %v8735_v20 = vor.u32 %v11159_v47, %v8734_v40  ;;  %v8799_v15 = vor.u32 %v11175_v39, %v8798_v48  ;;  %v9086_v40 = vld [vmem:[#allocation11 + $0x9e0] sm:$0xf]  ;;  %v11247_v47 = vld [vmem:[#allocation11 + $0x9e4] sm:$0xf0]  ;;  %v8887_v48 = vor.u32 %v11197_v22, %v8886_v21  ;;  %v11225_v21 = vld [vmem:[#allocation11 + $0x934] sm:$0xf0] }
 0x1cb   :  { %v9087_v56 = vor.u32 %v11247_v47, %v9086_v40  ;;  %v8943_v38 = vor.u32 %v11211_v23, %v8942_v1  ;;  %v9062_v22 = vld [vmem:[#allocation11 + $0x9b0] sm:$0xf]  ;;  %v11205_v40 = vld [vmem:[#allocation11 + $0x894] sm:$0xf0] }
 0x1cd   :  { %3420 = vmatpush.bf16.msrb.mxu0 %v8615_v2  ;;  %3434 = vmatpush.bf16.msrb.mxu2 %v8679_v10  ;;  %v8782_v2 = vld [vmem:[#allocation11 + $0x780] sm:$0xf]  ;;  %v11171_v10 = vld [vmem:[#allocation11 + $0x784] sm:$0xf0] }
 0x1ce   :  { %3446 = vmatpush.bf16.msra.mxu1 %v8759_v63  ;;  %3460 = vmatpush.bf16.msra.mxu3 %v8823_v54  ;;  %v8958_v63 = vld [vmem:[#allocation11 + $0x8e0] sm:$0xf]  ;;  %v11215_v54 = vld [vmem:[#allocation11 + $0x8e4] sm:$0xf0]  ;;  %v8783_v26 = vor.u32 %v11171_v10, %v8782_v2 }
 0x1cf   :  { %v8959_v12 = vor.u32 %v11215_v54, %v8958_v63  ;;  %v12273_v35 = vpop.f32.mrf.mxu3  ;;  %v9070_v63 = vld [vmem:[#allocation11 + $0x9c0] sm:$0xf]  ;;  %v11243_v54 = vld [vmem:[#allocation11 + $0x9c4] sm:$0xf0] }
 0x1d0   :  { %v11191_v2 = vld [vmem:[#allocation11 + $0x824] sm:$0xf0]  ;;  %v8926_v10 = vld [vmem:[#allocation11 + $0x8a0] sm:$0xf]  ;;  %v9071_v3 = vor.u32 %v11243_v54, %v9070_v63  ;;  %v9046_v63 = vld [vmem:[#allocation11 + $0x990] sm:$0xf] }
 0x1d1   :  { %3421 = vmatpush.bf16.msrb.mxu0 %v8607_v29  ;;  %3435 = vmatpush.bf16.msrb.mxu2 %v8671_v17  ;;  %v11213_v29 = vld [vmem:[#allocation11 + $0x8d4] sm:$0xf0]  ;;  %v8719_v17 = vor.u32 %v11155_v27, %v8718_v60  ;;  %v8862_v27 = vld [vmem:[#allocation11 + $0x820] sm:$0xf] }
 0x1d2   :  { %3447 = vmatpush.bf16.msra.mxu1 %v8751_v24  ;;  %3461 = vmatpush.bf16.msra.mxu3 %v8815_v42  ;;  %v12269_v24 = vpop.f32.mrf.mxu1  ;;  %v8895_v42 = vor.u32 %v11199_v61, %v8894_v0  ;;  %v8951_v39 = vor.u32 %v11213_v29, %v8950_v16  ;;  %v9006_v0 = vld [vmem:[#allocation11 + $0x940] sm:$0xf]  ;;  %v11227_v61 = vld [vmem:[#allocation11 + $0x944] sm:$0xf0]  ;;  %v11241_v16 = vld [vmem:[#allocation11 + $0x9b4] sm:$0xf0] }
 0x1d3   :  { %v9007_v32 = vor.u32 %v11227_v61, %v9006_v0  ;;  %v11221_v61 = vld [vmem:[#allocation11 + $0x914] sm:$0xf0] }
 0x1d4   :  { %v11237_v54 = vld [vmem:[#allocation11 + $0x994] sm:$0xf0] }
 0x1d5   :  { %3422 = vmatpush.bf16.msrb.mxu0 %v8599_v51  ;;  %3436 = vmatpush.bf16.msrb.mxu2 %v8663_v36  ;;  %v8878_v51 = vld [vmem:[#allocation11 + $0x840] sm:$0xf]  ;;  %v11195_v36 = vld [vmem:[#allocation11 + $0x844] sm:$0xf0] }
 0x1d6   :  { %3448 = vmatpush.bf16.msra.mxu1 %v8743_v11  ;;  %3462 = vmatpush.bf16.msra.mxu3 %v8807_v41  ;;  %v9022_v11 = vld [vmem:[#allocation11 + $0x960] sm:$0xf]  ;;  %v11231_v41 = vld [vmem:[#allocation11 + $0x964] sm:$0xf0] }
 0x1d7   :  { %v9023_v53 = vor.u32 %v11231_v41, %v9022_v11  ;;  %v11189_v11 = vld [vmem:[#allocation11 + $0x814] sm:$0xf0]  ;;  %v8918_v41 = vld [vmem:[#allocation11 + $0x890] sm:$0xf] }
 0x1d9   :  { %3423 = vmatpush.bf16.msrb.mxu0 %v8591_v34  ;;  %3437 = vmatpush.bf16.msrb.mxu2 %v8655_v28  ;;  %v11209_v34 = vld [vmem:[#allocation11 + $0x8b4] sm:$0xf0] }
 0x1da   :  { %3449 = vmatpush.bf16.msra.mxu1 %v8735_v20  ;;  %3463 = vmatpush.bf16.msra.mxu3 %v8799_v15  ;;  %v2180_v20 = vpop.f32.mrf.mxu0  ;;  %v8879_v15 = vor.u32 %v11195_v36, %v8878_v51  ;;  %v12277_v28 = vpop.f32.mrf.mxu1  ;;  %v8935_v60 = vor.u32 %v11209_v34, %v8934_v52  ;;  %v11239_v36 = vld [vmem:[#allocation11 + $0x9a4] sm:$0xf0] }
 0x1dc   :  { %3424 = vmatmul.bf16.vlgmr.msrb.gmra.mxu0 %v12229_v46  ;;  %3438 = vmatmul.bf16.vlgmr.msrb.gmra.mxu2 %v12231_v9 }
 0x1dd   :  { %3472 = vmatpush.bf16.msra.mxu0 %v8903_v7  ;;  %3486 = vmatpush.bf16.msra.mxu2 %v8967_v30  ;;  %v9015_v7 = vor.u32 %v11229_v6, %v9014_v62  ;;  %v9079_v30 = vor.u32 %v11245_v33, %v9078_v31  ;;  %v11187_v62 = vld [vmem:[#allocation11 + $0x804] sm:$0xf0]  ;;  %v8910_v6 = vld [vmem:[#allocation11 + $0x880] sm:$0xf]  ;;  %v11104_v33 = vld [vmem:[#allocation11 + $0x574] sm:$0xf] }
 0x1de   :  { %3450 = vmatpush.bf16.msra.mxu1 %v8727_v45  ;;  %3464 = vmatpush.bf16.msra.mxu3 %v8791_v58  ;;  %v12279_v45 = vpop.f32.mrf.mxu3  ;;  %v8871_v58 = vor.u32 %v11193_v5, %v8870_v57  ;;  %v11203_v31 = vld [vmem:[#allocation11 + $0x884] sm:$0xf0]  ;;  %v11120_v57 = vld [vmem:[#allocation11 + $0x5f4] sm:$0xf]  ;;  %v8584_v5 = vld [vmem:[#allocation11 + $0x5f8] sm:$0xf0] }
 0x1df   :  { %v2194_v18 = vpop.f32.mrf.mxu2 }
 0x1e1   :  { %3473 = vmatpush.bf16.msra.mxu0 %v8895_v42  ;;  %3487 = vmatpush.bf16.msra.mxu2 %v8959_v12  ;;  %v8998_v42 = vld [vmem:[#allocation11 + $0x930] sm:$0xf]  ;;  %v2167_v12 = vadd.f32 %v12267_v55, %v12265_v43  ;;  %v11223_v43 = vld [vmem:[#allocation11 + $0x924] sm:$0xf0]  ;;  %v9054_v55 = vld [vmem:[#allocation11 + $0x9a0] sm:$0xf] }
 0x1e2   :  { %3451 = vmatpush.bf16.msra.mxu1 %v8719_v17  ;;  %3465 = vmatpush.bf16.msra.mxu3 %v8783_v26  ;;  %v2182_v29 = vpop.f32.mrf.mxu0  ;;  %v8863_v17 = vor.u32 %v11191_v2, %v8862_v27  ;;  %v8927_v26 = vor.u32 %v11207_v14, %v8926_v10  ;;  %v8999_v47 = vor.u32 %v11225_v21, %v8998_v42  ;;  %v12283_v1 = vpop.f32.mrf.mxu1  ;;  %v11102_v2 = vld [vmem:[#allocation11 + $0x564] sm:$0xf]  ;;  %v8576_v42 = vld [vmem:[#allocation11 + $0x5e8] sm:$0xf0]  ;;  %v9038_v21 = vld [vmem:[#allocation11 + $0x980] sm:$0xf] }
 0x1e3   :  { %v9055_v34 = vor.u32 %v11239_v36, %v9054_v55  ;;  %v8911_v27 = vor.u32 %v11203_v31, %v8910_v6  ;;  %v11134_v6 = vld [vmem:[#allocation11 + $0x664] sm:$0xf]  ;;  %v8640_v31 = vld [vmem:[#allocation11 + $0x668] sm:$0xf0] }
 0x1e5   :  { %3474 = vmatpush.bf16.msra.mxu0 %v8887_v48  ;;  %3488 = vmatpush.bf16.msra.mxu2 %v8951_v39  ;;  %v9063_v48 = vor.u32 %v11241_v16, %v9062_v22  ;;  %v8990_v39 = vld [vmem:[#allocation11 + $0x920] sm:$0xf] }
 0x1e6   :  { %3500 = vmatpush.bf16.msrb.mxu1 %v9031_v19  ;;  %3514 = vmatpush.bf16.msrb.mxu3 %v9095_v4  ;;  %v8854_v19 = vld [vmem:[#allocation11 + $0x810] sm:$0xf]  ;;  %v2181_v4 = vadd.f32 %v2180_v20, %v2167_v12  ;;  %v8520_v20 = vld [vmem:[#allocation11 + $0x578] sm:$0xf0]  ;;  %v8991_v52 = vor.u32 %v11223_v43, %v8990_v39  ;;  %v11219_v12 = vld [vmem:[#allocation11 + $0x904] sm:$0xf0] }
 0x1e7   :  { %3452 = vmatmul.bf16.vlgmr.msra.gmra.mxu1 %v12223_v59  ;;  %3466 = vmatmul.bf16.vlgmr.msra.gmra.mxu3 %v12225_v8  ;;  %v8855_v23 = vor.u32 %v11189_v11, %v8854_v19  ;;  %v8523_v14 = vor.u32 %v11104_v33, %v8520_v20  ;;  %v8648_v19 = vld [vmem:[#allocation11 + $0x678] sm:$0xf0]  ;;  %v11150_v20 = vld [vmem:[#allocation11 + $0x6e4] sm:$0xf] }
 0x1e8   :  { %v2195_v51 = vadd.f32 %v2194_v18, %v2181_v4  ;;  %v8587_v18 = vor.u32 %v11120_v57, %v8584_v5  ;;  %v8712_v4 = vld [vmem:[#allocation11 + $0x6f8] sm:$0xf0] }
 0x1e9   :  { %3475 = vmatpush.bf16.msra.mxu0 %v8879_v15  ;;  %3489 = vmatpush.bf16.msra.mxu2 %v8943_v38  ;;  %v2196_v15 = vpop.f32.mrf.mxu2  ;;  %v12285_v38 = vpop.f32.mrf.mxu3  ;;  %v8568_v43 = vld [vmem:[#allocation11 + $0x5d8] sm:$0xf0] }
 0x1ea   :  { %3501 = vmatpush.bf16.msrb.mxu1 %v9023_v53  ;;  %3515 = vmatpush.bf16.msrb.mxu3 %v9087_v56  ;;  %v8919_v53 = vor.u32 %v11205_v40, %v8918_v41  ;;  %v8846_v56 = vld [vmem:[#allocation11 + $0x800] sm:$0xf]  ;;  %v2209_v0 = vadd.f32 %v12277_v28, %v2195_v51  ;;  %v8504_v51 = vld [vmem:[#allocation11 + $0x558] sm:$0xf0] }
 0x1eb   :  { %v8974_v28 = vld [vmem:[#allocation11 + $0x900] sm:$0xf] }
 0x1ec   :  { %v2223_v22 = vadd.f32 %v12279_v45, %v2209_v0  ;;  %v11116_v45 = vld [vmem:[#allocation11 + $0x5d4] sm:$0xf]  ;;  %v8975_v55 = vor.u32 %v11219_v12, %v8974_v28  ;;  %v8560_v0 = vld [vmem:[#allocation11 + $0x5c8] sm:$0xf0] }
 0x1ed   :  { %3476 = vmatpush.bf16.msra.mxu0 %v8871_v58  ;;  %3490 = vmatpush.bf16.msra.mxu2 %v8935_v60  ;;  %v2236_v58 = vpop.f32.mrf.mxu0  ;;  %v8847_v60 = vor.u32 %v11187_v62, %v8846_v56 }
 0x1ee   :  { %3502 = vmatpush.bf16.msrb.mxu1 %v9015_v7  ;;  %3516 = vmatpush.bf16.msrb.mxu3 %v9079_v30  ;;  %v8982_v7 = vld [vmem:[#allocation11 + $0x910] sm:$0xf]  ;;  %v2169_v30 = vadd.f32 %v12273_v35, %v12269_v24  ;;  %v9047_v35 = vor.u32 %v11237_v54, %v9046_v63  ;;  %v2237_v11 = vadd.f32 %v2236_v58, %v2223_v22  ;;  %v11130_v22 = vld [vmem:[#allocation11 + $0x644] sm:$0xf] }
 0x1ef   :  { %v8983_v24 = vor.u32 %v11221_v61, %v8982_v7  ;;  %v8643_v61 = vor.u32 %v11134_v6, %v8640_v31  ;;  %v11092_v6 = vld [vmem:[#allocation11 + $0x514] sm:$0xf]  ;;  %v8472_v31 = vld [vmem:[#allocation11 + $0x518] sm:$0xf0] }
 0x1f0   :  { %v2183_v10 = vadd.f32 %v2182_v29, %v2169_v30  ;;  %v11152_v29 = vld [vmem:[#allocation11 + $0x6f4] sm:$0xf]  ;;  %v11114_v30 = vld [vmem:[#allocation11 + $0x5c4] sm:$0xf] }
 0x1f1   :  { %3477 = vmatpush.bf16.msra.mxu0 %v8863_v17  ;;  %3491 = vmatpush.bf16.msra.mxu2 %v8927_v26  ;;  %v11235_v17 = vld [vmem:[#allocation11 + $0x984] sm:$0xf0]  ;;  %v11136_v26 = vld [vmem:[#allocation11 + $0x674] sm:$0xf]  ;;  %v2250_v39 = vpop.f32.mrf.mxu2  ;;  %v8715_v62 = vor.u32 %v11152_v29, %v8712_v4  ;;  %v2278_v33 = vpop.f32.mrf.mxu3 }
 0x1f2   :  { %3503 = vmatpush.bf16.msrb.mxu1 %v9007_v32  ;;  %3517 = vmatpush.bf16.msrb.mxu3 %v9071_v3  ;;  %v8512_v32 = vld [vmem:[#allocation11 + $0x568] sm:$0xf0]  ;;  %v11118_v3 = vld [vmem:[#allocation11 + $0x5e4] sm:$0xf]  ;;  %v2197_v16 = vadd.f32 %v2196_v15, %v2183_v10  ;;  %v9039_v36 = vor.u32 %v11235_v17, %v9038_v21  ;;  %v2251_v56 = vadd.f32 %v2250_v39, %v2237_v11  ;;  %v8696_v10 = vld [vmem:[#allocation11 + $0x6d8] sm:$0xf0] }
 0x1f3   :  { %v8515_v41 = vor.u32 %v11102_v2, %v8512_v32  ;;  %v8579_v40 = vor.u32 %v11118_v3, %v8576_v42  ;;  %v8704_v15 = vld [vmem:[#allocation11 + $0x6e8] sm:$0xf0]  ;;  %v11148_v2 = vld [vmem:[#allocation11 + $0x6d4] sm:$0xf]  ;;  %v8563_v32 = vor.u32 %v11114_v30, %v8560_v0  ;;  %v11090_v0 = vld [vmem:[#allocation11 + $0x504] sm:$0xf] }
 0x1f4   :  { %v8707_v58 = vor.u32 %v11150_v20, %v8704_v15  ;;  %v11096_v3 = vld [vmem:[#allocation11 + $0x534] sm:$0xf]  ;;  %v8699_v21 = vor.u32 %v11148_v2, %v8696_v10  ;;  %v8624_v17 = vld [vmem:[#allocation11 + $0x648] sm:$0xf0]  ;;  %v8536_v20 = vld [vmem:[#allocation11 + $0x598] sm:$0xf0] }
 0x1f5   :  { %3478 = vmatpush.bf16.msra.mxu0 %v8855_v23  ;;  %3492 = vmatpush.bf16.msra.mxu2 %v8919_v53  ;;  %v8651_v23 = vor.u32 %v11136_v26, %v8648_v19  ;;  %v2211_v53 = vadd.f32 %v12283_v1, %v2197_v16  ;;  %v2238_v7 = vpop.f32.mrf.mxu0  ;;  %v8496_v1 = vld [vmem:[#allocation11 + $0x548] sm:$0xf0]  ;;  %v11146_v26 = vld [vmem:[#allocation11 + $0x6c4] sm:$0xf]  ;;  %v8840_v2 = vld [vmem:[#allocation11 + $0x7f8] sm:$0xf0] }
 0x1f6   :  { %3504 = vmatpush.bf16.msrb.mxu1 %v8999_v47  ;;  %3518 = vmatpush.bf16.msrb.mxu3 %v9063_v48  ;;  %v11100_v47 = vld [vmem:[#allocation11 + $0x554] sm:$0xf]  ;;  %v2264_v48 = vpop.f32.mrf.mxu1  ;;  %v8688_v19 = vld [vmem:[#allocation11 + $0x6c8] sm:$0xf0] }
 0x1f7   :  { %v2265_v57 = vadd.f32 %v2264_v48, %v2251_v56  ;;  %v8507_v5 = vor.u32 %v11100_v47, %v8504_v51  ;;  %v2225_v63 = vadd.f32 %v12285_v38, %v2211_v53  ;;  %v8488_v38 = vld [vmem:[#allocation11 + $0x538] sm:$0xf0]  ;;  %v8480_v47 = vld [vmem:[#allocation11 + $0x528] sm:$0xf0]  ;;  %v11110_v48 = vld [vmem:[#allocation11 + $0x5a4] sm:$0xf] }
 0x1f8   :  { %v8491_v4 = vor.u32 %v11096_v3, %v8488_v38  ;;  %v8544_v39 = vld [vmem:[#allocation11 + $0x5a8] sm:$0xf0]  ;;  %v8680_v53 = vld [vmem:[#allocation11 + $0x6b8] sm:$0xf0]  ;;  %v11140_v3 = vld [vmem:[#allocation11 + $0x694] sm:$0xf] }
 0x1f9   :  { %3479 = vmatpush.bf16.msra.mxu0 %v8847_v60  ;;  %3493 = vmatpush.bf16.msra.mxu2 %v8911_v27  ;;  %v2279_v54 = vadd.f32 %v2278_v33, %v2265_v57  ;;  %v11132_v60 = vld [vmem:[#allocation11 + $0x654] sm:$0xf]  ;;  %v8632_v27 = vld [vmem:[#allocation11 + $0x658] sm:$0xf0]  ;;  %v2252_v42 = vpop.f32.mrf.mxu2 }
 0x1fa   :  { %3505 = vmatpush.bf16.msrb.mxu1 %v8991_v52  ;;  %3519 = vmatpush.bf16.msrb.mxu3 %v9055_v34  ;;  %v8571_v52 = vor.u32 %v11116_v45, %v8568_v43  ;;  %v11098_v34 = vld [vmem:[#allocation11 + $0x544] sm:$0xf]  ;;  %v8635_v12 = vor.u32 %v11132_v60, %v8632_v27  ;;  %v8627_v45 = vor.u32 %v11130_v22, %v8624_v17  ;;  %v11108_v33 = vld [vmem:[#allocation11 + $0x594] sm:$0xf]  ;;  %v8776_v60 = vld [vmem:[#allocation11 + $0x778] sm:$0xf0] }
 0x1fb   :  { %2423 = vst [vmem:[#allocation3] sm:$0xff] %v2279_v54  ;;  %v8691_v43 = vor.u32 %v11146_v26, %v8688_v19  ;;  %v8539_v30 = vor.u32 %v11108_v33, %v8536_v20  ;;  %v8528_v54 = vld [vmem:[#allocation11 + $0x588] sm:$0xf0]  ;;  %v11184_v27 = vld [vmem:[#allocation11 + $0x7f4] sm:$0xf] }
 0x1fc   :  { %3480 = vmatmul.bf16.vlgmr.msra.gmra.mxu0 %v12247_v50  ;;  %3494 = vmatmul.bf16.vlgmr.msra.gmra.mxu2 %v12249_v25  ;;  %v11182_v22 = vld [vmem:[#allocation11 + $0x7e4] sm:$0xf]  ;;  %v8960_v20 = vld [vmem:[#allocation11 + $0x8e8] sm:$0xf0] }
 0x1fd   :  { %3528 = vmatpush.bf16.msrb.mxu0 %v8523_v14  ;;  %3542 = vmatpush.bf16.msrb.mxu2 %v8587_v18  ;;  %v2239_v14 = vadd.f32 %v2238_v7, %v2225_v63  ;;  %v8499_v18 = vor.u32 %v11098_v34, %v8496_v1  ;;  %v11142_v34 = vld [vmem:[#allocation11 + $0x6a4] sm:$0xf]  ;;  %v8672_v7 = vld [vmem:[#allocation11 + $0x6a8] sm:$0xf0]  ;;  %v8475_v1 = vor.u32 %v11092_v6, %v8472_v31 }
 0x1fe   :  { %3506 = vmatpush.bf16.msrb.mxu1 %v8983_v24  ;;  %3520 = vmatpush.bf16.msrb.mxu3 %v9047_v35  ;;  %v11112_v24 = vld [vmem:[#allocation11 + $0x5b4] sm:$0xf]  ;;  %v8552_v35 = vld [vmem:[#allocation11 + $0x5b8] sm:$0xf0]  ;;  %v2266_v16 = vpop.f32.mrf.mxu1  ;;  %v11106_v63 = vld [vmem:[#allocation11 + $0x584] sm:$0xf] }
 0x1ff   :  { %v2253_v28 = vadd.f32 %v2252_v42, %v2239_v14  ;;  %v8555_v11 = vor.u32 %v11112_v24, %v8552_v35  ;;  %v8675_v14 = vor.u32 %v11142_v34, %v8672_v7  ;;  %v8664_v42 = vld [vmem:[#allocation11 + $0x698] sm:$0xf0]  ;;  %v8531_v24 = vor.u32 %v11106_v63, %v8528_v54  ;;  %v11122_v19 = vld [vmem:[#allocation11 + $0x604] sm:$0xf]  ;;  %v8896_v31 = vld [vmem:[#allocation11 + $0x868] sm:$0xf0] }
 0x200   :  { %v8667_v26 = vor.u32 %v11140_v3, %v8664_v42  ;;  %v11198_v6 = vld [vmem:[#allocation11 + $0x864] sm:$0xf]  ;;  %v8752_v34 = vld [vmem:[#allocation11 + $0x748] sm:$0xf0]  ;;  %v8952_v63 = vld [vmem:[#allocation11 + $0x8d8] sm:$0xf0] }
 0x201   :  { %3529 = vmatpush.bf16.msrb.mxu0 %v8515_v41  ;;  %3543 = vmatpush.bf16.msrb.mxu2 %v8579_v40  ;;  %v2267_v29 = vadd.f32 %v2266_v16, %v2253_v28  ;;  %v11094_v41 = vld [vmem:[#allocation11 + $0x524] sm:$0xf]  ;;  %v2280_v40 = vpop.f32.mrf.mxu3  ;;  %v8843_v28 = vor.u32 %v11184_v27, %v8840_v2  ;;  %v8832_v16 = vld [vmem:[#allocation11 + $0x7e8] sm:$0xf0]  ;;  %v8744_v27 = vld [vmem:[#allocation11 + $0x738] sm:$0xf0] }
 0x202   :  { %3507 = vmatpush.bf16.msrb.mxu1 %v8975_v55  ;;  %3521 = vmatpush.bf16.msrb.mxu3 %v9039_v36  ;;  %v11128_v55 = vld [vmem:[#allocation11 + $0x634] sm:$0xf]  ;;  %v8616_v36 = vld [vmem:[#allocation11 + $0x638] sm:$0xf0]  ;;  %v8483_v56 = vor.u32 %v11094_v41, %v8480_v47  ;;  %v11214_v33 = vld [vmem:[#allocation11 + $0x8e4] sm:$0xf] }
 0x203   :  { %v2281_v51 = vadd.f32 %v2280_v40, %v2267_v29  ;;  %v8619_v15 = vor.u32 %v11128_v55, %v8616_v36  ;;  %v8592_v29 = vld [vmem:[#allocation11 + $0x608] sm:$0xf0]  ;;  %v11200_v41 = vld [vmem:[#allocation11 + $0x874] sm:$0xf]  ;;  %v8904_v40 = vld [vmem:[#allocation11 + $0x878] sm:$0xf0] }
 0x204   :  { %v11216_v47 = vld [vmem:[#allocation11 + $0x8f4] sm:$0xf]  ;;  %v8824_v36 = vld [vmem:[#allocation11 + $0x7d8] sm:$0xf0]  ;;  %v11178_v7 = vld [vmem:[#allocation11 + $0x7c4] sm:$0xf] }
 0x205   :  { %3530 = vmatpush.bf16.msrb.mxu0 %v8507_v5  ;;  %3544 = vmatpush.bf16.msrb.mxu2 %v8571_v52  ;;  %2425 = vst [vmem:[#allocation3 + $0x10] sm:$0x3f] %v2281_v51  ;;  %v11126_v5 = vld [vmem:[#allocation11 + $0x624] sm:$0xf]  ;;  %v8608_v52 = vld [vmem:[#allocation11 + $0x628] sm:$0xf0]  ;;  %v8835_v51 = vor.u32 %v11182_v22, %v8832_v16 }
 0x206   :  { %3556 = vmatpush.bf16.msra.mxu1 %v8651_v23  ;;  %3570 = vmatpush.bf16.msra.mxu3 %v8715_v62  ;;  %v11144_v23 = vld [vmem:[#allocation11 + $0x6b4] sm:$0xf]  ;;  %v8547_v62 = vor.u32 %v11110_v48, %v8544_v39  ;;  %v8611_v10 = vor.u32 %v11126_v5, %v8608_v52  ;;  %v8968_v48 = vld [vmem:[#allocation11 + $0x8f8] sm:$0xf0]  ;;  %v11162_v52 = vld [vmem:[#allocation11 + $0x744] sm:$0xf] }
 0x207   :  { %3508 = vmatmul.bf16.vlgmr.msrb.gmra.mxu1 %v12240_v49  ;;  %3522 = vmatmul.bf16.vlgmr.msrb.gmra.mxu3 %v12243_v37  ;;  %v8683_v57 = vor.u32 %v11144_v23, %v8680_v53  ;;  %v11180_v55 = vld [vmem:[#allocation11 + $0x7d4] sm:$0xf]  ;;  %v8595_v23 = vor.u32 %v11122_v19, %v8592_v29  ;;  %v8755_v54 = vor.u32 %v11162_v52, %v8752_v34  ;;  %v11194_v3 = vld [vmem:[#allocation11 + $0x844] sm:$0xf]  ;;  %v8880_v42 = vld [vmem:[#allocation11 + $0x848] sm:$0xf0] }
 0x208   :  { %v8827_v5 = vor.u32 %v11180_v55, %v8824_v36  ;;  %v11176_v2 = vld [vmem:[#allocation11 + $0x7b4] sm:$0xf]  ;;  %v8883_v16 = vor.u32 %v11194_v3, %v8880_v42  ;;  %v8872_v19 = vld [vmem:[#allocation11 + $0x838] sm:$0xf0]  ;;  %v11190_v55 = vld [vmem:[#allocation11 + $0x824] sm:$0xf] }
 0x209   :  { %3531 = vmatpush.bf16.msrb.mxu0 %v8499_v18  ;;  %3545 = vmatpush.bf16.msrb.mxu2 %v8563_v32  ;;  %v11124_v18 = vld [vmem:[#allocation11 + $0x614] sm:$0xf]  ;;  %v8600_v32 = vld [vmem:[#allocation11 + $0x618] sm:$0xf0]  ;;  %v8864_v36 = vld [vmem:[#allocation11 + $0x828] sm:$0xf0] }
 0x20a   :  { %3557 = vmatpush.bf16.msra.mxu1 %v8643_v61  ;;  %3571 = vmatpush.bf16.msra.mxu3 %v8707_v58  ;;  %v8464_v61 = vld [vmem:[#allocation11 + $0x508] sm:$0xf0]  ;;  %v11168_v58 = vld [vmem:[#allocation11 + $0x774] sm:$0xf]  ;;  %v8603_v17 = vor.u32 %v11124_v18, %v8600_v32  ;;  %v9032_v34 = vld [vmem:[#allocation11 + $0x978] sm:$0xf0] }
 0x20b   :  { %v8467_v38 = vor.u32 %v11090_v0, %v8464_v61  ;;  %v8779_v35 = vor.u32 %v11168_v58, %v8776_v60  ;;  %v8888_v0 = vld [vmem:[#allocation11 + $0x858] sm:$0xf0]  ;;  %v11212_v61 = vld [vmem:[#allocation11 + $0x8d4] sm:$0xf]  ;;  %v11246_v3 = vld [vmem:[#allocation11 + $0x9e4] sm:$0xf] }
 0x20c   :  { %v11160_v60 = vld [vmem:[#allocation11 + $0x734] sm:$0xf]  ;;  %v8955_v32 = vor.u32 %v11212_v61, %v8952_v63  ;;  %v8856_v63 = vld [vmem:[#allocation11 + $0x818] sm:$0xf0]  ;;  %v9088_v42 = vld [vmem:[#allocation11 + $0x9e8] sm:$0xf0] }
 0x20d   :  { %3532 = vmatpush.bf16.msrb.mxu0 %v8491_v4  ;;  %3546 = vmatpush.bf16.msrb.mxu2 %v8555_v11  ;;  %v11138_v4 = vld [vmem:[#allocation11 + $0x684] sm:$0xf]  ;;  %v8656_v11 = vld [vmem:[#allocation11 + $0x688] sm:$0xf0]  ;;  %v11208_v29 = vld [vmem:[#allocation11 + $0x8b4] sm:$0xf] }
 0x20e   :  { %3558 = vmatpush.bf16.msra.mxu1 %v8635_v12  ;;  %3572 = vmatpush.bf16.msra.mxu3 %v8699_v21  ;;  %v11166_v12 = vld [vmem:[#allocation11 + $0x764] sm:$0xf]  ;;  %v8768_v21 = vld [vmem:[#allocation11 + $0x768] sm:$0xf0]  ;;  %v8659_v53 = vor.u32 %v11138_v4, %v8656_v11  ;;  %v8936_v4 = vld [vmem:[#allocation11 + $0x8b8] sm:$0xf0] }
 0x20f   :  { %v8771_v39 = vor.u32 %v11166_v12, %v8768_v21  ;;  %v8736_v12 = vld [vmem:[#allocation11 + $0x728] sm:$0xf0]  ;;  %v11232_v52 = vld [vmem:[#allocation11 + $0x974] sm:$0xf] }
 0x210   :  { %v8800_v21 = vld [vmem:[#allocation11 + $0x7a8] sm:$0xf0] }
 0x211   :  { %3533 = vmatpush.bf16.msrb.mxu0 %v8483_v56  ;;  %3547 = vmatpush.bf16.msrb.mxu2 %v8547_v62  ;;  %v8907_v56 = vor.u32 %v11200_v41, %v8904_v40  ;;  %v8971_v62 = vor.u32 %v11216_v47, %v8968_v48  ;;  %v11156_v40 = vld [vmem:[#allocation11 + $0x714] sm:$0xf]  ;;  %v8728_v47 = vld [vmem:[#allocation11 + $0x718] sm:$0xf0] }
 0x212   :  { %3559 = vmatpush.bf16.msra.mxu1 %v8627_v45  ;;  %3573 = vmatpush.bf16.msra.mxu3 %v8691_v43  ;;  %v11164_v45 = vld [vmem:[#allocation11 + $0x754] sm:$0xf]  ;;  %v8760_v43 = vld [vmem:[#allocation11 + $0x758] sm:$0xf0] }
 0x213   :  { %v11172_v48 = vld [vmem:[#allocation11 + $0x794] sm:$0xf] }
 0x215   :  { %3534 = vmatpush.bf16.msrb.mxu0 %v8475_v1  ;;  %3548 = vmatpush.bf16.msrb.mxu2 %v8539_v30  ;;  %v8963_v1 = vor.u32 %v11214_v33, %v8960_v20  ;;  %v11196_v30 = vld [vmem:[#allocation11 + $0x854] sm:$0xf]  ;;  %v11154_v33 = vld [vmem:[#allocation11 + $0x704] sm:$0xf]  ;;  %v8720_v20 = vld [vmem:[#allocation11 + $0x708] sm:$0xf0] }
 0x216   :  { %3560 = vmatpush.bf16.msra.mxu1 %v8619_v15  ;;  %3574 = vmatpush.bf16.msra.mxu3 %v8683_v57  ;;  %v12299_v15 = vpop.f32.mrf.mxu0  ;;  %v8763_v57 = vor.u32 %v11164_v45, %v8760_v43  ;;  %v8891_v18 = vor.u32 %v11196_v30, %v8888_v0  ;;  %v8939_v43 = vor.u32 %v11208_v29, %v8936_v4  ;;  %v11188_v0 = vld [vmem:[#allocation11 + $0x814] sm:$0xf] }
 0x217   :  { %v9091_v29 = vor.u32 %v11246_v3, %v9088_v42  ;;  %v11228_v4 = vld [vmem:[#allocation11 + $0x954] sm:$0xf]  ;;  %v9142_v42 = vld [vmem:[#allocation11 + $0x40] sm:$0xf] }
 0x219   :  { %3535 = vmatpush.bf16.msrb.mxu0 %v8467_v38  ;;  %3549 = vmatpush.bf16.msrb.mxu2 %v8531_v24  ;;  %v11210_v38 = vld [vmem:[#allocation11 + $0x8c4] sm:$0xf]  ;;  %v8944_v24 = vld [vmem:[#allocation11 + $0x8c8] sm:$0xf0] }
 0x21a   :  { %3561 = vmatpush.bf16.msra.mxu1 %v8611_v10  ;;  %3575 = vmatpush.bf16.msra.mxu3 %v8675_v14  ;;  %v8808_v10 = vld [vmem:[#allocation11 + $0x7b8] sm:$0xf0]  ;;  %v12303_v14 = vpop.f32.mrf.mxu2 }
 0x21b   :  { %v2307_v61 = vadd.f32 %v12303_v14, %v12299_v15  ;;  %v11202_v14 = vld [vmem:[#allocation11 + $0x884] sm:$0xf] }
 0x21c   :  { %3536 = vmatmul.bf16.vlgmr.msrb.gmra.mxu0 %v12207_v13  ;;  %3550 = vmatmul.bf16.vlgmr.msrb.gmra.mxu2 %v12209_v44  ;;  %v8816_v13 = vld [vmem:[#allocation11 + $0x7c8] sm:$0xf0]  ;;  %v8899_v44 = vor.u32 %v11198_v6, %v8896_v31  ;;  %v8731_v6 = vor.u32 %v11156_v40, %v8728_v47  ;;  %v9016_v40 = vld [vmem:[#allocation11 + $0x958] sm:$0xf0]  ;;  %v11244_v47 = vld [vmem:[#allocation11 + $0x9d4] sm:$0xf] }
 0x21d   :  { %3584 = vmatpush.bf16.msra.mxu0 %v8779_v35  ;;  %3598 = vmatpush.bf16.msra.mxu2 %v8843_v28  ;;  %v8819_v58 = vor.u32 %v11178_v7, %v8816_v13  ;;  %v8747_v35 = vor.u32 %v11160_v60, %v8744_v27  ;;  %v8811_v28 = vor.u32 %v11176_v2, %v8808_v10  ;;  %v11248_v13 = vld [vmem:[#allocation11 + $0x9f4] sm:$0xf] }
 0x21e   :  { %3562 = vmatpush.bf16.msra.mxu1 %v8603_v17  ;;  %3576 = vmatpush.bf16.msra.mxu3 %v8667_v26  ;;  %v12305_v22 = vpop.f32.mrf.mxu0  ;;  %v8947_v17 = vor.u32 %v11210_v38, %v8944_v24  ;;  %v11192_v26 = vld [vmem:[#allocation11 + $0x834] sm:$0xf]  ;;  %v8723_v60 = vor.u32 %v11154_v33, %v8720_v20  ;;  %v9035_v2 = vor.u32 %v11232_v52, %v9032_v34  ;;  %v11226_v20 = vld [vmem:[#allocation11 + $0x944] sm:$0xf] }
 0x21f   :  { %v8875_v45 = vor.u32 %v11192_v26, %v8872_v19  ;;  %v8859_v38 = vor.u32 %v11188_v0, %v8856_v63  ;;  %v11283_v26 = vld [vmem:[#allocation11 + $0xf4] sm:$0xf0]  ;;  %v11224_v63 = vld [vmem:[#allocation11 + $0x934] sm:$0xf] }
 0x221   :  { %3585 = vmatpush.bf16.msra.mxu0 %v8771_v39  ;;  %3599 = vmatpush.bf16.msra.mxu2 %v8835_v51  ;;  %v8792_v39 = vld [vmem:[#allocation11 + $0x798] sm:$0xf0]  ;;  %v2320_v51 = vpop.f32.mrf.mxu1 }
 0x222   :  { %3563 = vmatpush.bf16.msra.mxu1 %v8595_v23  ;;  %3577 = vmatpush.bf16.msra.mxu3 %v8659_v53  ;;  %v11206_v23 = vld [vmem:[#allocation11 + $0x8a4] sm:$0xf]  ;;  %v8928_v53 = vld [vmem:[#allocation11 + $0x8a8] sm:$0xf0]  ;;  %v8795_v31 = vor.u32 %v11172_v48, %v8792_v39  ;;  %v2321_v15 = vadd.f32 %v2320_v51, %v2307_v61  ;;  %v9080_v48 = vld [vmem:[#allocation11 + $0x9d8] sm:$0xf0] }
 0x223   :  { %v8931_v30 = vor.u32 %v11206_v23, %v8928_v53  ;;  %v11265_v53 = vld [vmem:[#allocation11 + $0x64] sm:$0xf0]  ;;  %v9083_v33 = vor.u32 %v11244_v47, %v9080_v48  ;;  %v11220_v48 = vld [vmem:[#allocation11 + $0x914] sm:$0xf] }
 0x225   :  { %3586 = vmatpush.bf16.msra.mxu0 %v8763_v57  ;;  %3600 = vmatpush.bf16.msra.mxu2 %v8827_v5  ;;  %v11170_v57 = vld [vmem:[#allocation11 + $0x784] sm:$0xf]  ;;  %v8784_v5 = vld [vmem:[#allocation11 + $0x788] sm:$0xf0] }
 0x226   :  { %3612 = vmatpush.bf16.msrb.mxu1 %v8907_v56  ;;  %3626 = vmatpush.bf16.msrb.mxu3 %v8971_v62  ;;  %v2308_v56 = vpop.f32.mrf.mxu2  ;;  %v12307_v62 = vpop.f32.mrf.mxu3  ;;  %v8787_v27 = vor.u32 %v11170_v57, %v8784_v5 }
 0x227   :  { %3564 = vmatmul.bf16.vlgmr.msra.gmra.mxu1 %v12229_v46  ;;  %3578 = vmatmul.bf16.vlgmr.msra.gmra.mxu3 %v12231_v9  ;;  %v11158_v46 = vld [vmem:[#allocation11 + $0x724] sm:$0xf]  ;;  %v12309_v7 = vpop.f32.mrf.mxu0 }
 0x228   :  { %v11174_v9 = vld [vmem:[#allocation11 + $0x7a4] sm:$0xf]  ;;  %v8739_v11 = vor.u32 %v11158_v46, %v8736_v12  ;;  %v8912_v46 = vld [vmem:[#allocation11 + $0x888] sm:$0xf0]  ;;  %v9166_v12 = vld [vmem:[#allocation11 + $0x70] sm:$0xf] }
 0x229   :  { %3587 = vmatpush.bf16.msra.mxu0 %v8755_v54  ;;  %3601 = vmatpush.bf16.msra.mxu2 %v8819_v58  ;;  %v8803_v41 = vor.u32 %v11174_v9, %v8800_v21  ;;  %v11204_v54 = vld [vmem:[#allocation11 + $0x894] sm:$0xf]  ;;  %v8920_v58 = vld [vmem:[#allocation11 + $0x898] sm:$0xf0]  ;;  %v2322_v9 = vpop.f32.mrf.mxu1  ;;  %v8915_v51 = vor.u32 %v11202_v14, %v8912_v46  ;;  %v11222_v46 = vld [vmem:[#allocation11 + $0x924] sm:$0xf] }
 0x22a   :  { %3613 = vmatpush.bf16.msrb.mxu1 %v8899_v44  ;;  %3627 = vmatpush.bf16.msrb.mxu3 %v8963_v1  ;;  %v9096_v44 = vld [vmem:[#allocation11 + $0x9f8] sm:$0xf0]  ;;  %v8867_v1 = vor.u32 %v11190_v55, %v8864_v36  ;;  %v8923_v24 = vor.u32 %v11204_v54, %v8920_v58  ;;  %v9158_v36 = vld [vmem:[#allocation11 + $0x60] sm:$0xf] }
 0x22b   :  { %v9099_v10 = vor.u32 %v11248_v13, %v9096_v44  ;;  %v9159_v52 = vor.u32 %v11265_v53, %v9158_v36  ;;  %v9150_v13 = vld [vmem:[#allocation11 + $0x50] sm:$0xf] }
 0x22d   :  { %3588 = vmatpush.bf16.msra.mxu0 %v8747_v35  ;;  %3602 = vmatpush.bf16.msra.mxu2 %v8811_v28  ;;  %v11186_v35 = vld [vmem:[#allocation11 + $0x804] sm:$0xf]  ;;  %v8848_v28 = vld [vmem:[#allocation11 + $0x808] sm:$0xf0] }
 0x22e   :  { %3614 = vmatpush.bf16.msrb.mxu1 %v8891_v18  ;;  %3628 = vmatpush.bf16.msrb.mxu3 %v8955_v32  ;;  %v11230_v18 = vld [vmem:[#allocation11 + $0x964] sm:$0xf]  ;;  %v9024_v32 = vld [vmem:[#allocation11 + $0x968] sm:$0xf0]  ;;  %v2362_v21 = vpop.f32.mrf.mxu2  ;;  %v8851_v39 = vor.u32 %v11186_v35, %v8848_v28  ;;  %v9206_v35 = vld [vmem:[#allocation11 + $0xc0] sm:$0xf] }
 0x22f   :  { %v9027_v19 = vor.u32 %v11230_v18, %v9024_v32  ;;  %v2350_v23 = vpop.f32.mrf.mxu0  ;;  %v11277_v28 = vld [vmem:[#allocation11 + $0xc4] sm:$0xf0] }
 0x231   :  { %3589 = vmatpush.bf16.msra.mxu0 %v8739_v11  ;;  %3603 = vmatpush.bf16.msra.mxu2 %v8803_v41  ;;  %v2309_v11 = vadd.f32 %v2308_v56, %v12305_v22  ;;  %v2336_v41 = vpop.f32.mrf.mxu3  ;;  %v9222_v22 = vld [vmem:[#allocation11 + $0xe0] sm:$0xf]  ;;  %v11281_v56 = vld [vmem:[#allocation11 + $0xe4] sm:$0xf0]  ;;  %v2376_v44 = vpop.f32.mrf.mxu1 }
 0x232   :  { %3615 = vmatpush.bf16.msrb.mxu1 %v8883_v16  ;;  %3629 = vmatpush.bf16.msrb.mxu3 %v8947_v17  ;;  %v11267_v16 = vld [vmem:[#allocation11 + $0x74] sm:$0xf0]  ;;  %v9230_v17 = vld [vmem:[#allocation11 + $0xf0] sm:$0xf]  ;;  %v9223_v34 = vor.u32 %v11281_v56, %v9222_v22  ;;  %v9126_v56 = vld [vmem:[#allocation11 + $0x20] sm:$0xf] }
 0x233   :  { %v9231_v55 = vor.u32 %v11283_v26, %v9230_v17  ;;  %v2323_v57 = vadd.f32 %v2322_v9, %v2309_v11  ;;  %v9056_v9 = vld [vmem:[#allocation11 + $0x9a8] sm:$0xf0]  ;;  %v9207_v26 = vor.u32 %v11277_v28, %v9206_v35  ;;  %v11275_v11 = vld [vmem:[#allocation11 + $0xb4] sm:$0xf0]  ;;  %v11313_v35 = vld [vmem:[#allocation11 + $0x1e4] sm:$0xf0] }
 0x235   :  { %3590 = vmatpush.bf16.msra.mxu0 %v8731_v6  ;;  %3604 = vmatpush.bf16.msra.mxu2 %v8795_v31  ;;  %v9019_v31 = vor.u32 %v11228_v4, %v9016_v40  ;;  %v2337_v54 = vadd.f32 %v2336_v41, %v2323_v57  ;;  %v9198_v4 = vld [vmem:[#allocation11 + $0xb0] sm:$0xf]  ;;  %v11273_v57 = vld [vmem:[#allocation11 + $0xa4] sm:$0xf0] }
 0x236   :  { %3616 = vmatpush.bf16.msrb.mxu1 %v8875_v45  ;;  %3630 = vmatpush.bf16.msrb.mxu3 %v8939_v43  ;;  %v2335_v45 = vadd.f32 %v12307_v62, %v2321_v15  ;;  %v9167_v43 = vor.u32 %v11267_v16, %v9166_v12  ;;  %v11242_v62 = vld [vmem:[#allocation11 + $0x9c4] sm:$0xf]  ;;  %v2364_v58 = vpop.f32.mrf.mxu2  ;;  %v9199_v22 = vor.u32 %v11275_v11, %v9198_v4  ;;  %v11295_v4 = vld [vmem:[#allocation11 + $0x154] sm:$0xf0]  ;;  %v9342_v11 = vld [vmem:[#allocation11 + $0x1d0] sm:$0xf] }
 0x237   :  { %v2351_v15 = vadd.f32 %v2350_v23, %v2337_v54  ;;  %v11238_v12 = vld [vmem:[#allocation11 + $0x9a4] sm:$0xf]  ;;  %v11255_v54 = vld [vmem:[#allocation11 + $0x14] sm:$0xf0] }
 0x238   :  { %v2349_v6 = vadd.f32 %v12309_v7, %v2335_v45  ;;  %v9214_v7 = vld [vmem:[#allocation11 + $0xd0] sm:$0xf]  ;;  %v9059_v47 = vor.u32 %v11238_v12, %v9056_v9  ;;  %v8984_v45 = vld [vmem:[#allocation11 + $0x918] sm:$0xf0]  ;;  %v11269_v12 = vld [vmem:[#allocation11 + $0x84] sm:$0xf0] }
 0x239   :  { %3591 = vmatpush.bf16.msra.mxu0 %v8723_v60  ;;  %3605 = vmatpush.bf16.msra.mxu2 %v8787_v27  ;;  %v2390_v60 = vpop.f32.mrf.mxu3  ;;  %v9000_v27 = vld [vmem:[#allocation11 + $0x938] sm:$0xf0]  ;;  %v2365_v16 = vadd.f32 %v2364_v58, %v2351_v15  ;;  %v9182_v58 = vld [vmem:[#allocation11 + $0x90] sm:$0xf] }
 0x23a   :  { %3617 = vmatpush.bf16.msrb.mxu1 %v8867_v1  ;;  %3631 = vmatpush.bf16.msrb.mxu3 %v8931_v30  ;;  %v2363_v5 = vadd.f32 %v2362_v21, %v2349_v6  ;;  %v11263_v1 = vld [vmem:[#allocation11 + $0x54] sm:$0xf0]  ;;  %v9003_v14 = vor.u32 %v11224_v63, %v9000_v27  ;;  %v9118_v63 = vld [vmem:[#allocation11 + $0x10] sm:$0xf] }
 0x23b   :  { %v11279_v30 = vld [vmem:[#allocation11 + $0xd4] sm:$0xf0]  ;;  %v9151_v32 = vor.u32 %v11263_v1, %v9150_v13  ;;  %v9294_v13 = vld [vmem:[#allocation11 + $0x170] sm:$0xf]  ;;  %v9119_v15 = vor.u32 %v11255_v54, %v9118_v63  ;;  %v9398_v54 = vld [vmem:[#allocation11 + $0x240] sm:$0xf] }
 0x23c   :  { %3592 = vmatmul.bf16.vlgmr.msra.gmra.mxu0 %v12223_v59  ;;  %3606 = vmatmul.bf16.vlgmr.msra.gmra.mxu2 %v12225_v8  ;;  %v9008_v59 = vld [vmem:[#allocation11 + $0x948] sm:$0xf0]  ;;  %v2377_v18 = vadd.f32 %v2376_v44, %v2363_v5  ;;  %v9215_v3 = vor.u32 %v11279_v30, %v9214_v7  ;;  %v11234_v5 = vld [vmem:[#allocation11 + $0x984] sm:$0xf]  ;;  %v11299_v44 = vld [vmem:[#allocation11 + $0x174] sm:$0xf0] }
 0x23d   :  { %3640 = vmatpush.bf16.msrb.mxu0 %v9035_v2  ;;  %3654 = vmatpush.bf16.msrb.mxu2 %v9099_v10  ;;  %v9072_v8 = vld [vmem:[#allocation11 + $0x9c8] sm:$0xf0]  ;;  %v9011_v0 = vor.u32 %v11226_v20, %v9008_v59  ;;  %v11240_v2 = vld [vmem:[#allocation11 + $0x9b4] sm:$0xf]  ;;  %v9064_v10 = vld [vmem:[#allocation11 + $0x9b8] sm:$0xf0]  ;;  %v8987_v59 = vor.u32 %v11220_v48, %v8984_v45 }
 0x23e   :  { %3618 = vmatpush.bf16.msrb.mxu1 %v8859_v38  ;;  %3632 = vmatpush.bf16.msrb.mxu3 %v8923_v24  ;;  %v9075_v61 = vor.u32 %v11242_v62, %v9072_v8  ;;  %v11261_v38 = vld [vmem:[#allocation11 + $0x44] sm:$0xf0]  ;;  %v2404_v24 = vpop.f32.mrf.mxu0  ;;  %v2391_v17 = vadd.f32 %v2390_v60, %v2377_v18  ;;  %v9190_v20 = vld [vmem:[#allocation11 + $0xa0] sm:$0xf]  ;;  %v8976_v8 = vld [vmem:[#allocation11 + $0x908] sm:$0xf0] }
 0x23f   :  { %v9143_v21 = vor.u32 %v11261_v38, %v9142_v42  ;;  %v9358_v7 = vld [vmem:[#allocation11 + $0x1f0] sm:$0xf]  ;;  %v11315_v30 = vld [vmem:[#allocation11 + $0x1f4] sm:$0xf0]  ;;  %v9286_v18 = vld [vmem:[#allocation11 + $0x160] sm:$0xf] }
 0x240   :  { %v2405_v41 = vadd.f32 %v2404_v24, %v2391_v17  ;;  %v11271_v60 = vld [vmem:[#allocation11 + $0x94] sm:$0xf0]  ;;  %v9359_v42 = vor.u32 %v11315_v30, %v9358_v7  ;;  %v11297_v38 = vld [vmem:[#allocation11 + $0x164] sm:$0xf0]  ;;  %v9350_v24 = vld [vmem:[#allocation11 + $0x1e0] sm:$0xf] }
 0x241   :  { %3641 = vmatpush.bf16.msrb.mxu0 %v9027_v19  ;;  %3655 = vmatpush.bf16.msrb.mxu2 %v9091_v29  ;;  %v9134_v19 = vld [vmem:[#allocation11 + $0x30] sm:$0xf]  ;;  %v11259_v29 = vld [vmem:[#allocation11 + $0x34] sm:$0xf0]  ;;  %v2392_v6 = vpop.f32.mrf.mxu3  ;;  %v11329_v45 = vld [vmem:[#allocation11 + $0x264] sm:$0xf0] }
 0x242   :  { %3619 = vmatpush.bf16.msrb.mxu1 %v8851_v39  ;;  %3633 = vmatpush.bf16.msrb.mxu3 %v8915_v51  ;;  %v2378_v39 = vpop.f32.mrf.mxu1  ;;  %v2418_v51 = vpop.f32.mrf.mxu2  ;;  %v9135_v36 = vor.u32 %v11259_v29, %v9134_v19  ;;  %v9422_v9 = vld [vmem:[#allocation11 + $0x270] sm:$0xf]  ;;  %v11347_v17 = vld [vmem:[#allocation11 + $0x2f4] sm:$0xf0]  ;;  %v9351_v19 = vor.u32 %v11313_v35, %v9350_v24  ;;  %v11305_v24 = vld [vmem:[#allocation11 + $0x1a4] sm:$0xf0] }
 0x243   :  { %v2379_v23 = vadd.f32 %v2378_v39, %v2365_v16  ;;  %v2419_v53 = vadd.f32 %v2418_v51, %v2405_v41  ;;  %v9486_v16 = vld [vmem:[#allocation11 + $0x2f0] sm:$0xf]  ;;  %v11311_v41 = vld [vmem:[#allocation11 + $0x1d4] sm:$0xf0]  ;;  %v9414_v51 = vld [vmem:[#allocation11 + $0x260] sm:$0xf] }
 0x244   :  { %v9278_v29 = vld [vmem:[#allocation11 + $0x150] sm:$0xf]  ;;  %v9487_v39 = vor.u32 %v11347_v17, %v9486_v16  ;;  %v11291_v7 = vld [vmem:[#allocation11 + $0x134] sm:$0xf0] }
 0x245   :  { %3642 = vmatpush.bf16.msrb.mxu0 %v9019_v31  ;;  %3656 = vmatpush.bf16.msrb.mxu2 %v9083_v33  ;;  %v11218_v31 = vld [vmem:[#allocation11 + $0x904] sm:$0xf]  ;;  %v11257_v33 = vld [vmem:[#allocation11 + $0x24] sm:$0xf0]  ;;  %2424 = vst [vmem:[#allocation3 + $0x18] sm:$0xff] %v2419_v53  ;;  %v2393_v1 = vadd.f32 %v2392_v6, %v2379_v23  ;;  %v9343_v23 = vor.u32 %v11311_v41, %v9342_v11 }
 0x246   :  { %4720 = vmatpush.bf16.msra.mxu1 %v9167_v43  ;;  %4734 = vmatpush.bf16.msra.mxu3 %v9231_v55  ;;  %v11236_v43 = vld [vmem:[#allocation11 + $0x994] sm:$0xf]  ;;  %v9048_v55 = vld [vmem:[#allocation11 + $0x998] sm:$0xf0]  ;;  %v9270_v53 = vld [vmem:[#allocation11 + $0x140] sm:$0xf] }
 0x247   :  { %3620 = vmatmul.bf16.vlgmr.msrb.gmra.mxu1 %v12247_v50  ;;  %3634 = vmatmul.bf16.vlgmr.msrb.gmra.mxu3 %v12249_v25  ;;  %v9067_v50 = vor.u32 %v11240_v2, %v9064_v10  ;;  %v8992_v25 = vld [vmem:[#allocation11 + $0x928] sm:$0xf0]  ;;  %v9051_v62 = vor.u32 %v11236_v43, %v9048_v55  ;;  %v8979_v2 = vor.u32 %v11218_v31, %v8976_v8  ;;  %v9478_v43 = vld [vmem:[#allocation11 + $0x2e0] sm:$0xf]  ;;  %v11345_v55 = vld [vmem:[#allocation11 + $0x2e4] sm:$0xf0] }
 0x248   :  { %v8995_v40 = vor.u32 %v11222_v46, %v8992_v25  ;;  %v11253_v46 = vld [vmem:[#allocation11 + $0x4] sm:$0xf0]  ;;  %v9174_v25 = vld [vmem:[#allocation11 + $0x80] sm:$0xf]  ;;  %v9326_v30 = vld [vmem:[#allocation11 + $0x1b0] sm:$0xf] }
 0x249   :  { %3643 = vmatpush.bf16.msrb.mxu0 %v9011_v0  ;;  %3657 = vmatpush.bf16.msrb.mxu2 %v9075_v61  ;;  %v9127_v0 = vor.u32 %v11257_v33, %v9126_v56  ;;  %v9191_v61 = vor.u32 %v11273_v57, %v9190_v20  ;;  %v9104_v56 = vld [vmem:[#allocation5 + $0x8] sm:$0x70]  ;;  %v11293_v6 = vld [vmem:[#allocation11 + $0x144] sm:$0xf0]  ;;  %v9334_v31 = vld [vmem:[#allocation11 + $0x1c0] sm:$0xf]  ;;  %v9415_v20 = vor.u32 %v11329_v45, %v9414_v51 }
 0x24a   :  { %4721 = vmatpush.bf16.msra.mxu1 %v9159_v52  ;;  %4735 = vmatpush.bf16.msra.mxu3 %v9223_v34  ;;  %v2406_v52 = vpop.f32.mrf.mxu0  ;;  %v9040_v34 = vld [vmem:[#allocation11 + $0x988] sm:$0xf0]  ;;  %v9479_v57 = vor.u32 %v11345_v55, %v9478_v43  ;;  %v12333_v17 = vpop.f32.mrf.mxu3  ;;  %v9238_v43 = vld [vmem:[#allocation11 + $0x100] sm:$0xf]  ;;  %v11285_v55 = vld [vmem:[#allocation11 + $0x104] sm:$0xf0] }
 0x24b   :  { %v2407_v27 = vadd.f32 %v2406_v52, %v2393_v1  ;;  %v9043_v10 = vor.u32 %v11234_v5, %v9040_v34  ;;  %v11250_v33 = vld [vmem:[#allocation5 + $0x4] sm:$0xf]  ;;  %v11327_v5 = vld [vmem:[#allocation11 + $0x254] sm:$0xf0]  ;;  %v9470_v52 = vld [vmem:[#allocation11 + $0x2d0] sm:$0xf] }
 0x24c   :  { %v12324_v8 = vor.u32 %v11250_v33, %v9104_v56  ;;  %v11343_v34 = vld [vmem:[#allocation11 + $0x2d4] sm:$0xf0]  ;;  %v9262_v1 = vld [vmem:[#allocation11 + $0x130] sm:$0xf]  ;;  %v11301_v56 = vld [vmem:[#allocation11 + $0x184] sm:$0xf0] }
 0x24d   :  { %3644 = vmatpush.bf16.msrb.mxu0 %v9003_v14  ;;  %3658 = vmatpush.bf16.msrb.mxu2 %v9067_v50  ;;  %v9183_v14 = vor.u32 %v11271_v60, %v9182_v58  ;;  %v9110_v50 = vld [vmem:[#allocation11] sm:$0xf]  ;;  %v9471_v63 = vor.u32 %v11343_v34, %v9470_v52  ;;  %v12328_v58 = vpop.f32.mrf.mxu1  ;;  %v11325_v60 = vld [vmem:[#allocation11 + $0x244] sm:$0xf0]  ;;  %v9614_v33 = vld [vmem:[#allocation11 + $0x3f0] sm:$0xf] }
 0x24e   :  { %4722 = vmatpush.bf16.msra.mxu1 %v9151_v32  ;;  %4736 = vmatpush.bf16.msra.mxu3 %v9215_v3  ;;  %v2420_v32 = vpop.f32.mrf.mxu2  ;;  %v9295_v3 = vor.u32 %v11299_v44, %v9294_v13  ;;  %v9271_v13 = vor.u32 %v11293_v6, %v9270_v53  ;;  %v9399_v35 = vor.u32 %v11325_v60, %v9398_v54  ;;  %v12337_v53 = vld [vmem:[#allocation5 + $0x8] sm:$0xff]  ;;  %v11319_v34 = vld [vmem:[#allocation11 + $0x214] sm:$0xf0]  ;;  %v9542_v60 = vld [vmem:[#allocation11 + $0x360] sm:$0xf] }
 0x24f   :  { %v2421_v28 = vadd.f32 %v2420_v32, %v2407_v27  ;;  %v9462_v27 = vld [vmem:[#allocation11 + $0x2c0] sm:$0xf]  ;;  %v9550_v6 = vld [vmem:[#allocation11 + $0x370] sm:$0xf] }
 0x250   :  { %v9254_v32 = vld [vmem:[#allocation11 + $0x120] sm:$0xf] }
 0x251   :  { %3645 = vmatpush.bf16.msrb.mxu0 %v8995_v40  ;;  %3659 = vmatpush.bf16.msrb.mxu2 %v9059_v47  ;;  %2426 = vst [vmem:[#allocation3 + $0x8] sm:$0x3f] %v2421_v28  ;;  %v9111_v40 = vor.u32 %v11253_v46, %v9110_v50  ;;  %v9175_v47 = vor.u32 %v11269_v12, %v9174_v25  ;;  %v11323_v50 = vld [vmem:[#allocation11 + $0x234] sm:$0xf0]  ;;  %v9454_v46 = vld [vmem:[#allocation11 + $0x2b0] sm:$0xf] }
 0x252   :  { %4723 = vmatpush.bf16.msra.mxu1 %v9143_v21  ;;  %4737 = vmatpush.bf16.msra.mxu3 %v9207_v26  ;;  %v11331_v21 = vld [vmem:[#allocation11 + $0x274] sm:$0xf0]  ;;  %v9287_v26 = vor.u32 %v11297_v38, %v9286_v18  ;;  %v9318_v38 = vld [vmem:[#allocation11 + $0x1a0] sm:$0xf] }
 0x253   :  { %v9423_v48 = vor.u32 %v11331_v21, %v9422_v9  ;;  %v11339_v25 = vld [vmem:[#allocation11 + $0x2b4] sm:$0xf0]  ;;  %v9319_v9 = vor.u32 %v11305_v24, %v9318_v38  ;;  %v9246_v21 = vld [vmem:[#allocation11 + $0x110] sm:$0xf]  ;;  %v9366_v38 = vld [vmem:[#allocation11 + $0x200] sm:$0xf] }
 0x254   :  { %v9455_v11 = vor.u32 %v11339_v25, %v9454_v46  ;;  %v11317_v24 = vld [vmem:[#allocation11 + $0x204] sm:$0xf0] }
 0x255   :  { %3646 = vmatpush.bf16.msrb.mxu0 %v8987_v59  ;;  %3660 = vmatpush.bf16.msrb.mxu2 %v9051_v62  ;;  %v9406_v59 = vld [vmem:[#allocation11 + $0x250] sm:$0xf] }
 0x256   :  { %4724 = vmatpush.bf16.msra.mxu1 %v9135_v36  ;;  %4738 = vmatpush.bf16.msra.mxu3 %v9199_v22  ;;  %v9279_v36 = vor.u32 %v11295_v4, %v9278_v29  ;;  %v11251_v22 = vld [vmem:[#allocation5 + $0x4] sm:$0x70]  ;;  %v11303_v29 = vld [vmem:[#allocation11 + $0x194] sm:$0xf0] }
 0x259   :  { %3647 = vmatpush.bf16.msrb.mxu0 %v8979_v2  ;;  %3661 = vmatpush.bf16.msrb.mxu2 %v9043_v10  ;;  %v11341_v2 = vld [vmem:[#allocation11 + $0x2c4] sm:$0xf0]  ;;  %v9263_v10 = vor.u32 %v11291_v7, %v9262_v1  ;;  %v9239_v1 = vor.u32 %v11285_v55, %v9238_v43 }
 0x25a   :  { %4725 = vmatpush.bf16.msra.mxu1 %v9127_v0  ;;  %4739 = vmatpush.bf16.msra.mxu3 %v9191_v61  ;;  %v11307_v0 = vld [vmem:[#allocation11 + $0x1b4] sm:$0xf0]  ;;  %v9407_v61 = vor.u32 %v11327_v5, %v9406_v59  ;;  %v9463_v28 = vor.u32 %v11341_v2, %v9462_v27  ;;  %v9374_v5 = vld [vmem:[#allocation11 + $0x210] sm:$0xf]  ;;  %v11361_v27 = vld [vmem:[#allocation11 + $0x364] sm:$0xf0] }
 0x25b   :  { %v9327_v18 = vor.u32 %v11307_v0, %v9326_v30  ;;  %v3684_v0 = vld [vmem:[#allocation5] sm:$0xee]  ;;  %v9606_v2 = vld [vmem:[#allocation11 + $0x3e0] sm:$0xf] }
 0x25c   :  { %3648 = vmatmul.bf16.vlgmr.msrb.gmra.mxu0 %v12240_v49  ;;  %3662 = vmatmul.bf16.vlgmr.msrb.gmra.mxu2 %v12243_v37  ;;  %v11309_v49 = vld [vmem:[#allocation11 + $0x1c4] sm:$0xf0]  ;;  %v3714_v46 = vunpack.c.l.b16 %v3684_v0 }
 0x25d   :  { %4748 = vmatpush.bf16.msra.mxu0 %v9295_v3  ;;  %4762 = vmatpush.bf16.msra.mxu2 %v9359_v42  ;;  %v9102_v37 = vld [vmem:[#allocation5] sm:$0xf]  ;;  %v9335_v44 = vor.u32 %v11309_v49, %v9334_v31  ;;  %v12330_v3 = vld [vmem:[#allocation4 + $0x8] sm:$0xff] }
 0x25e   :  { %4726 = vmatpush.bf16.msra.mxu1 %v9119_v15  ;;  %4740 = vmatpush.bf16.msra.mxu3 %v9183_v14  ;;  %v12322_v62 = vor.u32 %v11251_v22, %v9102_v37  ;;  %v11289_v42 = vld [vmem:[#allocation11 + $0x124] sm:$0xf0]  ;;  %v9390_v15 = vld [vmem:[#allocation11 + $0x230] sm:$0xf]  ;;  %v3704_v16 = vunpack.c.l.b16 %v12330_v3  ;;  %v12339_v22 = vpop.f32.mrf.mxu1  ;;  %v11363_v31 = vld [vmem:[#allocation11 + $0x374] sm:$0xf0]  ;;  %v3705_v49 = vunpack.c.h.b16 %v12330_v3  ;;  %v12342_v37 = vpop.f32.mrf.mxu0 }
 0x25f   :  { %v3682_v14 = vld [vmem:[#allocation4] sm:$0xee]  ;;  %v9255_v12 = vor.u32 %v11289_v42, %v9254_v32  ;;  %v9391_v4 = vor.u32 %v11323_v50, %v9390_v15  ;;  %v9375_v32 = vor.u32 %v11319_v34, %v9374_v5  ;;  %v9430_v15 = vld [vmem:[#allocation11 + $0x280] sm:$0xf]  ;;  %v3439_v25 = vpop.f32.mrf.mxu2 }
 0x260   :  { %v3702_v41 = vunpack.c.l.b16 %v3682_v14  ;;  %v3703_v52 = vunpack.c.h.b16 %v3682_v14  ;;  %v11333_v14 = vld [vmem:[#allocation11 + $0x284] sm:$0xf0]  ;;  %v9678_v50 = vld [vmem:[#allocation11 + $0x470] sm:$0xf] }
 0x261   :  { %4749 = vmatpush.bf16.msra.mxu0 %v9287_v26  ;;  %4763 = vmatpush.bf16.msra.mxu2 %v9351_v19  ;;  %v11287_v26 = vld [vmem:[#allocation11 + $0x114] sm:$0xf0]  ;;  %v9310_v19 = vld [vmem:[#allocation11 + $0x190] sm:$0xf]  ;;  %v9431_v43 = vor.u32 %v11333_v14, %v9430_v15 }
 0x262   :  { %4727 = vmatpush.bf16.msra.mxu1 %v9111_v40  ;;  %4741 = vmatpush.bf16.msra.mxu3 %v9175_v47  ;;  %v9382_v40 = vld [vmem:[#allocation11 + $0x220] sm:$0xf]  ;;  %v11321_v47 = vld [vmem:[#allocation11 + $0x224] sm:$0xf0]  ;;  %v9247_v51 = vor.u32 %v11287_v26, %v9246_v21  ;;  %v9311_v45 = vor.u32 %v11303_v29, %v9310_v19  ;;  %v3707_v54 = vpack.c.b16 %v3705_v49, %v3703_v52  ;;  %v11411_v21 = vld [vmem:[#allocation11 + $0x4f4] sm:$0xf0]  ;;  %v3715_v26 = vunpack.c.h.b16 %v3684_v0 }
 0x264   :  { %v12354_v29 = vrot.slane %v3707_v54, 1 }
 0x265   :  { %4750 = vmatpush.bf16.msra.mxu0 %v9279_v36  ;;  %4764 = vmatpush.bf16.msra.mxu2 %v9343_v23  ;;  %v9302_v36 = vld [vmem:[#allocation11 + $0x180] sm:$0xf]  ;;  %v3706_v23 = vpack.c.b16 %v3704_v16, %v3702_v41  ;;  %v9534_v41 = vld [vmem:[#allocation11 + $0x350] sm:$0xf] }
 0x266   :  { %4776 = vmatpush.bf16.msrb.mxu1 %v9423_v48  ;;  %4790 = vmatpush.bf16.msrb.mxu3 %v9487_v39  ;;  %v9446_v48 = vld [vmem:[#allocation11 + $0x2a0] sm:$0xf]  ;;  %v11337_v39 = vld [vmem:[#allocation11 + $0x2a4] sm:$0xf0]  ;;  %v9303_v7 = vor.u32 %v11301_v56, %v9302_v36  ;;  %v12352_v19 = vpop.f32.mrf.mxu1  ;;  %v3412_v36 = vadd.f32 %v12333_v17, %v12328_v58 }
 0x267   :  { %4728 = vmatmul.bf16.vlgmr.msra.gmra.mxu1 %v12322_v62  ;;  %4742 = vmatmul.bf16.vlgmr.msra.gmra.mxu3 %v12324_v8  ;;  %v9447_v59 = vor.u32 %v11337_v39, %v9446_v48  ;;  %v12344_v30 = vrot.slane %v3706_v23, 1  ;;  %v11359_v48 = vld [vmem:[#allocation11 + $0x354] sm:$0xf0]  ;;  %v9598_v39 = vld [vmem:[#allocation11 + $0x3d0] sm:$0xf] }
 0x268   :  { %v3426_v52 = vadd.f32 %v12342_v37, %v3412_v36  ;;  %v9535_v34 = vor.u32 %v11359_v48, %v9534_v41  ;;  %v9526_v17 = vld [vmem:[#allocation11 + $0x340] sm:$0xf]  ;;  %v11353_v36 = vld [vmem:[#allocation11 + $0x324] sm:$0xf0] }
 0x269   :  { %4751 = vmatpush.bf16.msra.mxu0 %v9271_v13  ;;  %4765 = vmatpush.bf16.msra.mxu2 %v9335_v44  ;;  %v9438_v13 = vld [vmem:[#allocation11 + $0x290] sm:$0xf]  ;;  %v11335_v44 = vld [vmem:[#allocation11 + $0x294] sm:$0xf0]  ;;  %v9718_v48 = vld [vmem:[#allocation11 + $0x4c0] sm:$0xf] }
 0x26a   :  { %4777 = vmatpush.bf16.msrb.mxu1 %v9415_v20  ;;  %4791 = vmatpush.bf16.msrb.mxu3 %v9479_v57  ;;  %v11379_v20 = vld [vmem:[#allocation11 + $0x3f4] sm:$0xf0]  ;;  %v9383_v57 = vor.u32 %v11321_v47, %v9382_v40  ;;  %v9439_v42 = vor.u32 %v11335_v44, %v9438_v13  ;;  %v12358_v47 = vld [vmem:[#allocation4 + $0x10] sm:$0x11]  ;;  %v11357_v44 = vld [vmem:[#allocation11 + $0x344] sm:$0xf0] }
 0x26b   :  { %v3728_v5 = vunpack.c.l.b16 %v12358_v47  ;;  %v9527_v15 = vor.u32 %v11357_v44, %v9526_v17 }
 0x26d   :  { %4752 = vmatpush.bf16.msra.mxu0 %v9263_v10  ;;  %4766 = vmatpush.bf16.msra.mxu2 %v9327_v18  ;;  %v3716_v10 = vunpack.c.l.b16 %v12337_v53  ;;  %v11377_v18 = vld [vmem:[#allocation11 + $0x3e4] sm:$0xf0] }
 0x26e   :  { %4778 = vmatpush.bf16.msrb.mxu1 %v9407_v61  ;;  %4792 = vmatpush.bf16.msrb.mxu3 %v9471_v63  ;;  %v9551_v61 = vor.u32 %v11363_v31, %v9550_v6  ;;  %v9615_v63 = vor.u32 %v11379_v20, %v9614_v33  ;;  %v9670_v6 = vld [vmem:[#allocation11 + $0x460] sm:$0xf]  ;;  %v3686_v31 = vld [vmem:[#allocation4] sm:$0xcc]  ;;  %v3427_v33 = vpop.f32.mrf.mxu0  ;;  %v11393_v20 = vld [vmem:[#allocation11 + $0x464] sm:$0xf0]  ;;  %v3455_v41 = vpop.f32.mrf.mxu1 }
 0x26f   :  { %v3718_v40 = vpack.c.b16 %v3716_v10, %v3714_v46  ;;  %v3726_v0 = vunpack.c.l.b16 %v3686_v31  ;;  %v9671_v37 = vor.u32 %v11393_v20, %v9670_v6 }
 0x271   :  { %4753 = vmatpush.bf16.msra.mxu0 %v9255_v12  ;;  %4767 = vmatpush.bf16.msra.mxu2 %v9319_v9  ;;  %v11395_v12 = vld [vmem:[#allocation11 + $0x474] sm:$0xf0]  ;;  %v9742_v9 = vld [vmem:[#allocation11 + $0x4f0] sm:$0xf]  ;;  %v12368_v13 = vrot.slane %v3718_v40, 1  ;;  %v12377_v46 = vpack.c.b16 %v3704_v16, %v3726_v0 }
 0x272   :  { %4779 = vmatpush.bf16.msrb.mxu1 %v9399_v35  ;;  %4793 = vmatpush.bf16.msrb.mxu3 %v9463_v28  ;;  %v3717_v35 = vunpack.c.h.b16 %v12337_v53  ;;  %v12350_v28 = vpop.f32.mrf.mxu3  ;;  %v9679_v23 = vor.u32 %v11395_v12, %v9678_v50  ;;  %v9743_v56 = vor.u32 %v11411_v21, %v9742_v9  ;;  %v9518_v50 = vld [vmem:[#allocation11 + $0x330] sm:$0xf]  ;;  %v3441_v12 = vpop.f32.mrf.mxu2  ;;  %v11355_v9 = vld [vmem:[#allocation11 + $0x334] sm:$0xf0] }
 0x273   :  { %v9582_v21 = vld [vmem:[#allocation11 + $0x3b0] sm:$0xf]  ;;  %v9519_v3 = vor.u32 %v11355_v9, %v9518_v50  ;;  %v11401_v9 = vld [vmem:[#allocation11 + $0x4a4] sm:$0xf0] }
 0x274   :  { %v3719_v55 = vpack.c.b16 %v3717_v35, %v3715_v26  ;;  %v11371_v26 = vld [vmem:[#allocation11 + $0x3b4] sm:$0xf0]  ;;  %v9502_v0 = vld [vmem:[#allocation11 + $0x310] sm:$0xf] }
 0x275   :  { %4754 = vmatpush.bf16.msra.mxu0 %v9247_v51  ;;  %4768 = vmatpush.bf16.msra.mxu2 %v9311_v45  ;;  %v11375_v51 = vld [vmem:[#allocation11 + $0x3d4] sm:$0xf0]  ;;  %v9367_v45 = vor.u32 %v11317_v24, %v9366_v38  ;;  %v3727_v38 = vunpack.c.h.b16 %v3686_v31  ;;  %v3729_v24 = vunpack.c.h.b16 %v12358_v47 }
 0x276   :  { %4780 = vmatpush.bf16.msrb.mxu1 %v9391_v4  ;;  %4794 = vmatpush.bf16.msrb.mxu3 %v9455_v11  ;;  %v9543_v4 = vor.u32 %v11361_v27, %v9542_v60  ;;  %v9607_v11 = vor.u32 %v11377_v18, %v9606_v2  ;;  %v9599_v58 = vor.u32 %v11375_v51, %v9598_v39  ;;  %v12370_v54 = vrot.slane %v3719_v55, 1  ;;  %v9662_v27 = vld [vmem:[#allocation11 + $0x450] sm:$0xf]  ;;  %v11391_v2 = vld [vmem:[#allocation11 + $0x454] sm:$0xf0] }
 0x277   :  { %v9726_v18 = vld [vmem:[#allocation11 + $0x4d0] sm:$0xf]  ;;  %v9663_v16 = vor.u32 %v11391_v2, %v9662_v27  ;;  %v11405_v39 = vld [vmem:[#allocation11 + $0x4c4] sm:$0xf0]  ;;  %v3734_v55 = vrot.slane %v12377_v46, 2 }
 0x278   :  { %v11367_v27 = vld [vmem:[#allocation11 + $0x394] sm:$0xf0]  ;;  %v9152_v46 = vld [vmem:[#allocation11 + $0x58] sm:$0xf0] }
 0x279   :  { %4755 = vmatpush.bf16.msra.mxu0 %v9239_v1  ;;  %4769 = vmatpush.bf16.msra.mxu2 %v9303_v7  ;;  %v9590_v1 = vld [vmem:[#allocation11 + $0x3c0] sm:$0xf]  ;;  %v11373_v7 = vld [vmem:[#allocation11 + $0x3c4] sm:$0xf0]  ;;  %v3481_v47 = vpop.f32.mrf.mxu0 }
 0x27a   :  { %4781 = vmatpush.bf16.msrb.mxu1 %v9383_v57  ;;  %4795 = vmatpush.bf16.msrb.mxu3 %v9447_v59  ;;  %v9734_v57 = vld [vmem:[#allocation11 + $0x4e0] sm:$0xf]  ;;  %v11409_v59 = vld [vmem:[#allocation11 + $0x4e4] sm:$0xf0]  ;;  %v9591_v14 = vor.u32 %v11373_v7, %v9590_v1 }
 0x27b   :  { %v9735_v60 = vor.u32 %v11409_v59, %v9734_v57  ;;  %v9719_v57 = vor.u32 %v11405_v39, %v9718_v48  ;;  %v9646_v59 = vld [vmem:[#allocation11 + $0x430] sm:$0xf]  ;;  %v11266_v48 = vld [vmem:[#allocation11 + $0x74] sm:$0xf]  ;;  %v9168_v39 = vld [vmem:[#allocation11 + $0x78] sm:$0xf0] }
 0x27c   :  { %4756 = vmatmul.bf16.vlgmr.msra.gmra.mxu0 %v12344_v30  ;;  %4770 = vmatmul.bf16.vlgmr.msra.gmra.mxu2 %v12354_v29 }
 0x27d   :  { %4804 = vmatpush.bf16.msrb.mxu0 %v9551_v61  ;;  %4818 = vmatpush.bf16.msrb.mxu2 %v9615_v63  ;;  %v3440_v61 = vadd.f32 %v3439_v25, %v3426_v52  ;;  %v3467_v63 = vpop.f32.mrf.mxu3  ;;  %v3414_v25 = vadd.f32 %v12350_v28, %v12339_v22  ;;  %v9654_v22 = vld [vmem:[#allocation11 + $0x440] sm:$0xf]  ;;  %v11389_v28 = vld [vmem:[#allocation11 + $0x444] sm:$0xf0]  ;;  %v9710_v52 = vld [vmem:[#allocation11 + $0x4b0] sm:$0xf] }
 0x27e   :  { %4782 = vmatpush.bf16.msrb.mxu1 %v9375_v32  ;;  %4796 = vmatpush.bf16.msrb.mxu3 %v9439_v42  ;;  %v11407_v32 = vld [vmem:[#allocation11 + $0x4d4] sm:$0xf0]  ;;  %v12372_v42 = vpack.c.b16 %v3728_v5, %v3728_v5  ;;  %v9655_v6 = vor.u32 %v11389_v28, %v9654_v22 }
 0x27f   :  { %v9727_v40 = vor.u32 %v11407_v32, %v9726_v18  ;;  %v11387_v5 = vld [vmem:[#allocation11 + $0x434] sm:$0xf0] }
 0x280   :  { %v3735_v51 = vrot.slane %v12372_v42, 2  ;;  %v9647_v2 = vor.u32 %v11387_v5, %v9646_v59 }
 0x281   :  { %4805 = vmatpush.bf16.msrb.mxu0 %v9543_v4  ;;  %4819 = vmatpush.bf16.msrb.mxu2 %v9607_v11  ;;  %v12385_v4 = vpack.c.b16 %v3705_v49, %v3727_v38  ;;  %v3454_v11 = vadd.f32 %v12352_v19, %v3440_v61  ;;  %v9583_v49 = vor.u32 %v11371_v26, %v9582_v21  ;;  %v9510_v19 = vld [vmem:[#allocation11 + $0x320] sm:$0xf]  ;;  %v3483_v22 = vpop.f32.mrf.mxu0 }
 0x282   :  { %4783 = vmatpush.bf16.msrb.mxu1 %v9367_v45  ;;  %4797 = vmatpush.bf16.msrb.mxu3 %v9431_v43  ;;  %v12389_v45 = vpack.c.b16 %v3729_v24, %v3729_v24  ;;  %v3428_v43 = vadd.f32 %v3427_v33, %v3414_v25  ;;  %v9511_v1 = vor.u32 %v11353_v36, %v9510_v19  ;;  %v11385_v25 = vld [vmem:[#allocation11 + $0x424] sm:$0xf0] }
 0x283   :  { %v3468_v20 = vadd.f32 %v3467_v63, %v3454_v11  ;;  %v3737_v33 = vrot.slane %v12385_v4, 2  ;;  %v3495_v63 = vpop.f32.mrf.mxu2  ;;  %v9494_v11 = vld [vmem:[#allocation11 + $0x300] sm:$0xf]  ;;  %v11296_v4 = vld [vmem:[#allocation11 + $0x164] sm:$0xf] }
 0x284   :  { %v3442_v31 = vadd.f32 %v3441_v12, %v3428_v43  ;;  %v3738_v61 = vrot.slane %v12389_v45, 2  ;;  %v3509_v38 = vpop.f32.mrf.mxu1  ;;  %v9702_v12 = vld [vmem:[#allocation11 + $0x4a0] sm:$0xf] }
 0x285   :  { %4806 = vmatpush.bf16.msrb.mxu0 %v9535_v34  ;;  %4820 = vmatpush.bf16.msrb.mxu2 %v9599_v58  ;;  %v11403_v34 = vld [vmem:[#allocation11 + $0x4b4] sm:$0xf0]  ;;  %v12393_v58 = vld [vmem:[#allocation5] sm:$0xcc]  ;;  %v3469_v17 = vpop.f32.mrf.mxu3  ;;  %v3482_v44 = vadd.f32 %v3481_v47, %v3468_v20  ;;  %v9703_v36 = vor.u32 %v11401_v9, %v9702_v12  ;;  %v11298_v12 = vld [vmem:[#allocation11 + $0x174] sm:$0xf] }
 0x286   :  { %4832 = vmatpush.bf16.msra.mxu1 %v9679_v23  ;;  %4846 = vmatpush.bf16.msra.mxu3 %v9743_v56  ;;  %v9574_v23 = vld [vmem:[#allocation11 + $0x3a0] sm:$0xf]  ;;  %v11369_v56 = vld [vmem:[#allocation11 + $0x3a4] sm:$0xf0]  ;;  %v3456_v18 = vadd.f32 %v3455_v41, %v3442_v31  ;;  %v9711_v24 = vor.u32 %v11403_v34, %v9710_v52  ;;  %v3744_v50 = vunpack.c.l.b16 %v12393_v58  ;;  %v11399_v31 = vld [vmem:[#allocation11 + $0x494] sm:$0xf0]  ;;  %v12423_v42 = vsel %vm1174_vm7, %v3737_v33, %v3738_v61 }
 0x287   :  { %4784 = vmatmul.bf16.vlgmr.msrb.gmra.mxu1 %v12368_v13  ;;  %4798 = vmatmul.bf16.vlgmr.msrb.gmra.mxu3 %v12370_v54  ;;  %v9575_v7 = vor.u32 %v11369_v56, %v9574_v23  ;;  %v3496_v32 = vadd.f32 %v3495_v63, %v3482_v44  ;;  %v9558_v41 = vld [vmem:[#allocation11 + $0x380] sm:$0xf]  ;;  %v11365_v47 = vld [vmem:[#allocation11 + $0x384] sm:$0xf0]  ;;  %v9630_v23 = vld [vmem:[#allocation11 + $0x410] sm:$0xf] }
 0x288   :  { %v3470_v43 = vadd.f32 %v3469_v17, %v3456_v18  ;;  %v11383_v56 = vld [vmem:[#allocation11 + $0x414] sm:$0xf0]  ;;  %v9559_v5 = vor.u32 %v11365_v47, %v9558_v41  ;;  %v3668_v34 = vld [vmem:[#allocation3] sm:$0xff]  ;;  %v11264_v63 = vld [vmem:[#allocation11 + $0x64] sm:$0xf] }
 0x289   :  { %4807 = vmatpush.bf16.msrb.mxu0 %v9527_v15  ;;  %4821 = vmatpush.bf16.msrb.mxu2 %v9591_v14  ;;  %v9638_v15 = vld [vmem:[#allocation11 + $0x420] sm:$0xf]  ;;  %v12396_v14 = vld [vmem:[#allocation5 + $0x10] sm:$0x11]  ;;  %v3510_v28 = vadd.f32 %v3509_v38, %v3496_v32  ;;  %v9224_v18 = vld [vmem:[#allocation11 + $0xe8] sm:$0xf0]  ;;  %v9631_v32 = vor.u32 %v11383_v56, %v9630_v23 }
 0x28a   :  { %4833 = vmatpush.bf16.msra.mxu1 %v9671_v37  ;;  %4847 = vmatpush.bf16.msra.mxu3 %v9735_v60  ;;  %v11351_v37 = vld [vmem:[#allocation11 + $0x314] sm:$0xf0]  ;;  %v9566_v60 = vld [vmem:[#allocation11 + $0x390] sm:$0xf]  ;;  %v9639_v19 = vor.u32 %v11385_v25, %v9638_v15  ;;  %v3746_v20 = vunpack.c.l.b16 %v12396_v14  ;;  %v11381_v15 = vld [vmem:[#allocation11 + $0x404] sm:$0xf0] }
 0x28b   :  { %v9503_v21 = vor.u32 %v11351_v37, %v9502_v0  ;;  %v9567_v26 = vor.u32 %v11367_v27, %v9566_v60  ;;  %v3497_v44 = vpop.f32.mrf.mxu2  ;;  %v9160_v37 = vld [vmem:[#allocation11 + $0x68] sm:$0xf0]  ;;  %v11280_v60 = vld [vmem:[#allocation11 + $0xe4] sm:$0xf]  ;;  %v3745_v27 = vunpack.c.h.b16 %v12393_v58  ;;  %v11397_v25 = vld [vmem:[#allocation11 + $0x484] sm:$0xf0]  ;;  %v12416_v58 = vsel %vm1174_vm7, %v3734_v55, %v3735_v51 }
 0x28c   :  { %v3750_v9 = vpack.c.b16 %v3746_v20, %v3746_v20  ;;  %v9360_v41 = vld [vmem:[#allocation11 + $0x1f8] sm:$0xf0]  ;;  %v11262_v47 = vld [vmem:[#allocation11 + $0x54] sm:$0xf]  ;;  %v9288_v33 = vld [vmem:[#allocation11 + $0x168] sm:$0xf0] }
 0x28d   :  { %4808 = vmatpush.bf16.msrb.mxu0 %v9519_v3  ;;  %4822 = vmatpush.bf16.msrb.mxu2 %v9583_v49  ;;  %v11282_v3 = vld [vmem:[#allocation11 + $0xf4] sm:$0xf]  ;;  %v9232_v49 = vld [vmem:[#allocation11 + $0xf8] sm:$0xf0]  ;;  %v3523_v52 = vpop.f32.mrf.mxu3  ;;  %v11312_v61 = vld [vmem:[#allocation11 + $0x1e4] sm:$0xf]  ;;  %v9155_v23 = vor.u32 %v11262_v47, %v9152_v46 }
 0x28e   :  { %4834 = vmatpush.bf16.msra.mxu1 %v9663_v16  ;;  %4848 = vmatpush.bf16.msra.mxu3 %v9727_v40  ;;  %v11349_v16 = vld [vmem:[#allocation11 + $0x304] sm:$0xf0]  ;;  %v12401_v40 = vpack.c.b16 %v3716_v10, %v3744_v50  ;;  %v3747_v10 = vunpack.c.h.b16 %v12396_v14  ;;  %v3524_v0 = vadd.f32 %v3523_v52, %v3510_v28  ;;  %v9686_v50 = vld [vmem:[#allocation11 + $0x480] sm:$0xf]  ;;  %v9227_v28 = vor.u32 %v11280_v60, %v9224_v18  ;;  %v11278_v51 = vld [vmem:[#allocation11 + $0xd4] sm:$0xf] }
 0x28f   :  { %v9495_v59 = vor.u32 %v11349_v16, %v9494_v11  ;;  %v9296_v11 = vld [vmem:[#allocation11 + $0x178] sm:$0xf0]  ;;  %v11314_v16 = vld [vmem:[#allocation11 + $0x1f4] sm:$0xf]  ;;  %v11260_v20 = vld [vmem:[#allocation11 + $0x44] sm:$0xf] }
 0x290   :  { %v3752_v17 = vrot.slane %v12401_v40, 2  ;;  %v3672_v14 = vmax.f32 %v3668_v34, %v3524_v0  ;;  %v9216_v55 = vld [vmem:[#allocation11 + $0xd8] sm:$0xf0]  ;;  %v9291_v34 = vor.u32 %v11296_v4, %v9288_v33  ;;  %v11258_v18 = vld [vmem:[#allocation11 + $0x34] sm:$0xf] }
 0x291   :  { %4809 = vmatpush.bf16.msrb.mxu0 %v9511_v1  ;;  %4823 = vmatpush.bf16.msrb.mxu2 %v9575_v7  ;;  %v9171_v1 = vor.u32 %v11266_v48, %v9168_v39  ;;  %v9235_v7 = vor.u32 %v11282_v3, %v9232_v49  ;;  %v9687_v39 = vor.u32 %v11397_v25, %v9686_v50  ;;  %v3753_v49 = vrot.slane %v3750_v9, 2  ;;  %v9280_v0 = vld [vmem:[#allocation11 + $0x158] sm:$0xf0]  ;;  %v11308_v50 = vld [vmem:[#allocation11 + $0x1c4] sm:$0xf] }
 0x292   :  { %4835 = vmatpush.bf16.msra.mxu1 %v9655_v6  ;;  %4849 = vmatpush.bf16.msra.mxu3 %v9719_v57  ;;  %v9694_v6 = vld [vmem:[#allocation11 + $0x490] sm:$0xf]  ;;  %v3484_v57 = vadd.f32 %v3483_v22, %v3470_v43  ;;  %v3751_v22 = vpack.c.b16 %v3747_v10, %v3747_v10  ;;  %3676 = vst [vmem:[#allocation3] sm:$0xff] %v3672_v14  ;;  %v9136_v40 = vld [vmem:[#allocation11 + $0x38] sm:$0xf0] }
 0x293   :  { %v9695_v38 = vor.u32 %v11399_v31, %v9694_v6  ;;  %v9299_v43 = vor.u32 %v11298_v12, %v9296_v11  ;;  %v9363_v3 = vor.u32 %v11314_v16, %v9360_v41  ;;  %v9219_v56 = vor.u32 %v11278_v51, %v9216_v55  ;;  %v3670_v31 = vld [vmem:[#allocation3 + $0x10] sm:$0x3f]  ;;  %v9272_v14 = vld [vmem:[#allocation11 + $0x148] sm:$0xf0]  ;;  %v11272_v11 = vld [vmem:[#allocation11 + $0xa4] sm:$0xf] }
 0x294   :  { %v3756_v10 = vrot.slane %v3751_v22, 2  ;;  %v9336_v25 = vld [vmem:[#allocation11 + $0x1c8] sm:$0xf0]  ;;  %v9139_v12 = vor.u32 %v11258_v18, %v9136_v40  ;;  %v9328_v47 = vld [vmem:[#allocation11 + $0x1b8] sm:$0xf0] }
 0x295   :  { %4810 = vmatpush.bf16.msrb.mxu0 %v9503_v21  ;;  %4824 = vmatpush.bf16.msrb.mxu2 %v9567_v26  ;;  %v12409_v21 = vpack.c.b16 %v3717_v35, %v3745_v27  ;;  %v3511_v26 = vpop.f32.mrf.mxu1  ;;  %v9163_v35 = vor.u32 %v11264_v63, %v9160_v37  ;;  %v11310_v63 = vld [vmem:[#allocation11 + $0x1d4] sm:$0xf]  ;;  %v9344_v37 = vld [vmem:[#allocation11 + $0x1d8] sm:$0xf0]  ;;  %v9192_v16 = vld [vmem:[#allocation11 + $0xa8] sm:$0xf0]  ;;  %v9339_v22 = vor.u32 %v11308_v50, %v9336_v25 }
 0x296   :  { %4836 = vmatpush.bf16.msra.mxu1 %v9647_v2  ;;  %4850 = vmatpush.bf16.msra.mxu3 %v9711_v24  ;;  %v3498_v2 = vadd.f32 %v3497_v44, %v3484_v57  ;;  %v9622_v24 = vld [vmem:[#allocation11 + $0x400] sm:$0xf]  ;;  %v9144_v57 = vld [vmem:[#allocation11 + $0x48] sm:$0xf0]  ;;  %v9195_v51 = vor.u32 %v11272_v11, %v9192_v16  ;;  %v11254_v55 = vld [vmem:[#allocation11 + $0x14] sm:$0xf] }
 0x297   :  { %v9623_v48 = vor.u32 %v11381_v15, %v9622_v24  ;;  %v3755_v45 = vrot.slane %v12409_v21, 2  ;;  %v9147_v60 = vor.u32 %v11260_v20, %v9144_v57  ;;  %v9347_v24 = vor.u32 %v11310_v63, %v9344_v37  ;;  %v11292_v15 = vld [vmem:[#allocation11 + $0x144] sm:$0xf]  ;;  %v9256_v4 = vld [vmem:[#allocation11 + $0x128] sm:$0xf0] }
 0x298   :  { %v3512_v53 = vadd.f32 %v3511_v26, %v3498_v2  ;;  %v11256_v21 = vld [vmem:[#allocation11 + $0x24] sm:$0xf]  ;;  %v9128_v26 = vld [vmem:[#allocation11 + $0x28] sm:$0xf0]  ;;  %v9275_v41 = vor.u32 %v11292_v15, %v9272_v14  ;;  %v11330_v20 = vld [vmem:[#allocation11 + $0x274] sm:$0xf] }
 0x299   :  { %4811 = vmatpush.bf16.msrb.mxu0 %v9495_v59  ;;  %4825 = vmatpush.bf16.msrb.mxu2 %v9559_v5  ;;  %v11276_v59 = vld [vmem:[#allocation11 + $0xc4] sm:$0xf]  ;;  %v9208_v5 = vld [vmem:[#allocation11 + $0xc8] sm:$0xf0]  ;;  %v12434_v2 = vsel %vm1174_vm7, %v3755_v45, %v3756_v10  ;;  %v9131_v46 = vor.u32 %v11256_v21, %v9128_v26  ;;  %v9424_v10 = vld [vmem:[#allocation11 + $0x278] sm:$0xf0] }
 0x29a   :  { %4837 = vmatpush.bf16.msra.mxu1 %v9639_v19  ;;  %4851 = vmatpush.bf16.msra.mxu3 %v9703_v36  ;;  %v3525_v19 = vpop.f32.mrf.mxu3  ;;  %v9352_v36 = vld [vmem:[#allocation11 + $0x1e8] sm:$0xf0]  ;;  %v9211_v27 = vor.u32 %v11276_v59, %v9208_v5  ;;  %v11288_v45 = vld [vmem:[#allocation11 + $0x124] sm:$0xf]  ;;  %v11346_v57 = vld [vmem:[#allocation11 + $0x2f4] sm:$0xf] }
 0x29b   :  { %v3526_v6 = vadd.f32 %v3525_v19, %v3512_v53  ;;  %v9355_v44 = vor.u32 %v11312_v61, %v9352_v36  ;;  %v11290_v53 = vld [vmem:[#allocation11 + $0x134] sm:$0xf]  ;;  %v11304_v19 = vld [vmem:[#allocation11 + $0x1a4] sm:$0xf]  ;;  %v9320_v33 = vld [vmem:[#allocation11 + $0x1a8] sm:$0xf0]  ;;  %v9259_v5 = vor.u32 %v11288_v45, %v9256_v4 }
 0x29c   :  { %4812 = vmatmul.bf16.vlgmr.msrb.gmra.mxu0 %v12416_v58  ;;  %4826 = vmatmul.bf16.vlgmr.msrb.gmra.mxu2 %v12423_v42  ;;  %v9488_v59 = vld [vmem:[#allocation11 + $0x2f8] sm:$0xf0]  ;;  %v11328_v18 = vld [vmem:[#allocation11 + $0x264] sm:$0xf]  ;;  %v9416_v40 = vld [vmem:[#allocation11 + $0x268] sm:$0xf0] }
 0x29d   :  { %4860 = vmatpush.bf16.msra.mxu0 %v9171_v1  ;;  %4874 = vmatpush.bf16.msra.mxu2 %v9235_v7  ;;  %v3674_v52 = vmax.f32 %v3670_v31, %v3526_v6  ;;  %v11294_v1 = vld [vmem:[#allocation11 + $0x154] sm:$0xf]  ;;  %v12431_v7 = vsel %vm1174_vm7, %v3752_v17, %v3753_v49  ;;  %v9200_v17 = vld [vmem:[#allocation11 + $0xb8] sm:$0xf0]  ;;  %v11268_v6 = vld [vmem:[#allocation11 + $0x84] sm:$0xf]  ;;  %v9419_v11 = vor.u32 %v11328_v18, %v9416_v40 }
 0x29e   :  { %4838 = vmatpush.bf16.msra.mxu1 %v9631_v32  ;;  %4852 = vmatpush.bf16.msra.mxu3 %v9695_v38  ;;  %v11274_v32 = vld [vmem:[#allocation11 + $0xb4] sm:$0xf]  ;;  %v9283_v38 = vor.u32 %v11294_v1, %v9280_v0  ;;  %v9176_v31 = vld [vmem:[#allocation11 + $0x88] sm:$0xf0]  ;;  %v9312_v0 = vld [vmem:[#allocation11 + $0x198] sm:$0xf0] }
 0x29f   :  { %3678 = vst [vmem:[#allocation3 + $0x10] sm:$0x3f] %v3674_v52  ;;  %v9203_v9 = vor.u32 %v11274_v32, %v9200_v17  ;;  %v9323_v52 = vor.u32 %v11304_v19, %v9320_v33  ;;  %v11302_v1 = vld [vmem:[#allocation11 + $0x194] sm:$0xf]  ;;  %v9179_v37 = vor.u32 %v11268_v6, %v9176_v31  ;;  %v11344_v32 = vld [vmem:[#allocation11 + $0x2e4] sm:$0xf] }
 0x2a0   :  { %v9480_v17 = vld [vmem:[#allocation11 + $0x2e8] sm:$0xf0]  ;;  %v11284_v15 = vld [vmem:[#allocation11 + $0x104] sm:$0xf]  ;;  %v11378_v21 = vld [vmem:[#allocation11 + $0x3f4] sm:$0xf] }
 0x2a1   :  { %4861 = vmatpush.bf16.msra.mxu0 %v9163_v35  ;;  %4875 = vmatpush.bf16.msra.mxu2 %v9227_v28  ;;  %v9264_v35 = vld [vmem:[#allocation11 + $0x138] sm:$0xf0]  ;;  %v11306_v28 = vld [vmem:[#allocation11 + $0x1b4] sm:$0xf]  ;;  %v9240_v14 = vld [vmem:[#allocation11 + $0x108] sm:$0xf0]  ;;  %v9483_v16 = vor.u32 %v11344_v32, %v9480_v17 }
 0x2a2   :  { %4839 = vmatpush.bf16.msra.mxu1 %v9623_v48  ;;  %4853 = vmatpush.bf16.msra.mxu3 %v9687_v39  ;;  %v9120_v48 = vld [vmem:[#allocation11 + $0x18] sm:$0xf0]  ;;  %v11270_v39 = vld [vmem:[#allocation11 + $0x94] sm:$0xf]  ;;  %v9331_v49 = vor.u32 %v11306_v28, %v9328_v47  ;;  %v11300_v50 = vld [vmem:[#allocation11 + $0x184] sm:$0xf]  ;;  %v9243_v28 = vor.u32 %v11284_v15, %v9240_v14 }
 0x2a3   :  { %v9123_v61 = vor.u32 %v11254_v55, %v9120_v48  ;;  %v9304_v25 = vld [vmem:[#allocation11 + $0x188] sm:$0xf0]  ;;  %v9616_v26 = vld [vmem:[#allocation11 + $0x3f8] sm:$0xf0]  ;;  %v11360_v55 = vld [vmem:[#allocation11 + $0x364] sm:$0xf] }
 0x2a4   :  { %v9307_v47 = vor.u32 %v11300_v50, %v9304_v25  ;;  %v9544_v48 = vld [vmem:[#allocation11 + $0x368] sm:$0xf0]  ;;  %v11324_v4 = vld [vmem:[#allocation11 + $0x244] sm:$0xf]  ;;  %v9536_v6 = vld [vmem:[#allocation11 + $0x358] sm:$0xf0] }
 0x2a5   :  { %4862 = vmatpush.bf16.msra.mxu0 %v9155_v23  ;;  %4876 = vmatpush.bf16.msra.mxu2 %v9219_v56  ;;  %v11252_v23 = vld [vmem:[#allocation11 + $0x4] sm:$0xf]  ;;  %v9112_v56 = vld [vmem:[#allocation11 + $0x8] sm:$0xf0]  ;;  %v11374_v31 = vld [vmem:[#allocation11 + $0x3d4] sm:$0xf] }
 0x2a6   :  { %4888 = vmatpush.bf16.msrb.mxu1 %v9299_v43  ;;  %4902 = vmatpush.bf16.msrb.mxu3 %v9363_v3  ;;  %v9184_v43 = vld [vmem:[#allocation11 + $0x98] sm:$0xf0]  ;;  %v9267_v3 = vor.u32 %v11290_v53, %v9264_v35  ;;  %v9115_v63 = vor.u32 %v11252_v23, %v9112_v56  ;;  %v11342_v53 = vld [vmem:[#allocation11 + $0x2d4] sm:$0xf]  ;;  %v9400_v19 = vld [vmem:[#allocation11 + $0x248] sm:$0xf0] }
 0x2a7   :  { %4840 = vmatmul.bf16.vlgmr.msra.gmra.mxu1 %v12431_v7  ;;  %4854 = vmatmul.bf16.vlgmr.msra.gmra.mxu3 %v12434_v2  ;;  %v9187_v36 = vor.u32 %v11270_v39, %v9184_v43  ;;  %v9472_v35 = vld [vmem:[#allocation11 + $0x2d8] sm:$0xf0]  ;;  %v11376_v39 = vld [vmem:[#allocation11 + $0x3e4] sm:$0xf]  ;;  %v9608_v43 = vld [vmem:[#allocation11 + $0x3e8] sm:$0xf0] }
 0x2a8   :  { %v9475_v45 = vor.u32 %v11342_v53, %v9472_v35  ;;  %v11340_v33 = vld [vmem:[#allocation11 + $0x2c4] sm:$0xf]  ;;  %v9611_v23 = vor.u32 %v11376_v39, %v9608_v43  ;;  %v11358_v56 = vld [vmem:[#allocation11 + $0x354] sm:$0xf]  ;;  %v9384_v17 = vld [vmem:[#allocation11 + $0x228] sm:$0xf0] }
 0x2a9   :  { %4863 = vmatpush.bf16.msra.mxu0 %v9147_v60  ;;  %4877 = vmatpush.bf16.msra.mxu2 %v9211_v27  ;;  %v9427_v60 = vor.u32 %v11330_v20, %v9424_v10  ;;  %v9491_v27 = vor.u32 %v11346_v57, %v9488_v59  ;;  %v9600_v20 = vld [vmem:[#allocation11 + $0x3d8] sm:$0xf0]  ;;  %v9403_v10 = vor.u32 %v11324_v4, %v9400_v19  ;;  %v11322_v59 = vld [vmem:[#allocation11 + $0x234] sm:$0xf]  ;;  %v11320_v32 = vld [vmem:[#allocation11 + $0x224] sm:$0xf] }
 0x2aa   :  { %4889 = vmatpush.bf16.msrb.mxu1 %v9291_v34  ;;  %4903 = vmatpush.bf16.msrb.mxu3 %v9355_v44  ;;  %v11286_v34 = vld [vmem:[#allocation11 + $0x114] sm:$0xf]  ;;  %v9248_v44 = vld [vmem:[#allocation11 + $0x118] sm:$0xf0]  ;;  %v9576_v39 = vld [vmem:[#allocation11 + $0x3a8] sm:$0xf0] }
 0x2ab   :  { %v11354_v25 = vld [vmem:[#allocation11 + $0x334] sm:$0xf]  ;;  %v9376_v53 = vld [vmem:[#allocation11 + $0x218] sm:$0xf0]  ;;  %v11316_v4 = vld [vmem:[#allocation11 + $0x204] sm:$0xf] }
 0x2ac   :  { %v11334_v35 = vld [vmem:[#allocation11 + $0x294] sm:$0xf]  ;;  %v9368_v19 = vld [vmem:[#allocation11 + $0x208] sm:$0xf0] }
 0x2ad   :  { %4864 = vmatpush.bf16.msra.mxu0 %v9139_v12  ;;  %4878 = vmatpush.bf16.msra.mxu2 %v9203_v9  ;;  %v11362_v12 = vld [vmem:[#allocation11 + $0x374] sm:$0xf]  ;;  %v9552_v9 = vld [vmem:[#allocation11 + $0x378] sm:$0xf0] }
 0x2ae   :  { %4890 = vmatpush.bf16.msrb.mxu1 %v9283_v38  ;;  %4904 = vmatpush.bf16.msrb.mxu3 %v9347_v24  ;;  %v9251_v38 = vor.u32 %v11286_v34, %v9248_v44  ;;  %v9315_v24 = vor.u32 %v11302_v1, %v9312_v0  ;;  %v9456_v34 = vld [vmem:[#allocation11 + $0x2b8] sm:$0xf0]  ;;  %v12444_v44 = vpop.f32.mrf.mxu2  ;;  %v9539_v1 = vor.u32 %v11358_v56, %v9536_v6  ;;  %v11410_v6 = vld [vmem:[#allocation11 + $0x4f4] sm:$0xf] }
 0x2af   :  { %v9603_v0 = vor.u32 %v11374_v31, %v9600_v20  ;;  %v9744_v31 = vld [vmem:[#allocation11 + $0x4f8] sm:$0xf0] }
 0x2b1   :  { %4865 = vmatpush.bf16.msra.mxu0 %v9131_v46  ;;  %4879 = vmatpush.bf16.msra.mxu2 %v9195_v51  ;;  %v9555_v46 = vor.u32 %v11362_v12, %v9552_v9  ;;  %v9619_v51 = vor.u32 %v11378_v21, %v9616_v26  ;;  %v9520_v12 = vld [vmem:[#allocation11 + $0x338] sm:$0xf0]  ;;  %v11370_v9 = vld [vmem:[#allocation11 + $0x3b4] sm:$0xf]  ;;  %v9387_v26 = vor.u32 %v11320_v32, %v9384_v17 }
 0x2b2   :  { %4891 = vmatpush.bf16.msrb.mxu1 %v9275_v41  ;;  %4905 = vmatpush.bf16.msrb.mxu3 %v9339_v22  ;;  %v11326_v41 = vld [vmem:[#allocation11 + $0x254] sm:$0xf]  ;;  %v9408_v22 = vld [vmem:[#allocation11 + $0x258] sm:$0xf0] }
 0x2b3   :  { %v9584_v21 = vld [vmem:[#allocation11 + $0x3b8] sm:$0xf0] }
 0x2b5   :  { %4866 = vmatpush.bf16.msra.mxu0 %v9123_v61  ;;  %4880 = vmatpush.bf16.msra.mxu2 %v9187_v36  ;;  %v9464_v61 = vld [vmem:[#allocation11 + $0x2c8] sm:$0xf0]  ;;  %v9547_v36 = vor.u32 %v11360_v55, %v9544_v48  ;;  %v11368_v48 = vld [vmem:[#allocation11 + $0x3a4] sm:$0xf] }
 0x2b6   :  { %4892 = vmatpush.bf16.msrb.mxu1 %v9267_v3  ;;  %4906 = vmatpush.bf16.msrb.mxu3 %v9331_v49  ;;  %v12440_v3 = vpop.f32.mrf.mxu0  ;;  %v9411_v49 = vor.u32 %v11326_v41, %v9408_v22  ;;  %v9467_v57 = vor.u32 %v11340_v33, %v9464_v61  ;;  %v3565_v41 = vpop.f32.mrf.mxu1  ;;  %v9512_v55 = vld [vmem:[#allocation11 + $0x328] sm:$0xf0]  ;;  %v11332_v33 = vld [vmem:[#allocation11 + $0x284] sm:$0xf] }
 0x2b7   :  { %v12448_v22 = vpop.f32.mrf.mxu3  ;;  %v3553_v43 = vpop.f32.mrf.mxu2  ;;  %v9432_v61 = vld [vmem:[#allocation11 + $0x288] sm:$0xf0] }
 0x2b9   :  { %4867 = vmatpush.bf16.msra.mxu0 %v9115_v63  ;;  %4881 = vmatpush.bf16.msra.mxu2 %v9179_v37  ;;  %v11356_v63 = vld [vmem:[#allocation11 + $0x344] sm:$0xf]  ;;  %v9528_v37 = vld [vmem:[#allocation11 + $0x348] sm:$0xf0] }
 0x2ba   :  { %4893 = vmatpush.bf16.msrb.mxu1 %v9259_v5  ;;  %4907 = vmatpush.bf16.msrb.mxu3 %v9323_v52  ;;  %v9392_v5 = vld [vmem:[#allocation11 + $0x238] sm:$0xf0]  ;;  %v11338_v52 = vld [vmem:[#allocation11 + $0x2b4] sm:$0xf]  ;;  %v9531_v14 = vor.u32 %v11356_v63, %v9528_v37  ;;  %v9747_v37 = vor.u32 %v11410_v6, %v9744_v31  ;;  %v11404_v31 = vld [vmem:[#allocation11 + $0x4c4] sm:$0xf] }
 0x2bb   :  { %v9395_v18 = vor.u32 %v11322_v59, %v9392_v5  ;;  %v9459_v40 = vor.u32 %v11338_v52, %v9456_v34  ;;  %v3552_v59 = vadd.f32 %v12444_v44, %v12440_v3  ;;  %v9504_v5 = vld [vmem:[#allocation11 + $0x318] sm:$0xf0]  ;;  %v11366_v52 = vld [vmem:[#allocation11 + $0x394] sm:$0xf] }
 0x2bc   :  { %4868 = vmatmul.bf16.vlgmr.msra.gmra.mxu0 %v12322_v62  ;;  %4882 = vmatmul.bf16.vlgmr.msra.gmra.mxu2 %v12324_v8  ;;  %v9568_v34 = vld [vmem:[#allocation11 + $0x398] sm:$0xf0] }
 0x2bd   :  { %4916 = vmatpush.bf16.msrb.mxu0 %v9427_v60  ;;  %4930 = vmatpush.bf16.msrb.mxu2 %v9491_v27  ;;  %v11372_v60 = vld [vmem:[#allocation11 + $0x3c4] sm:$0xf]  ;;  %v9592_v27 = vld [vmem:[#allocation11 + $0x3c8] sm:$0xf0]  ;;  %v9571_v17 = vor.u32 %v11366_v52, %v9568_v34  ;;  %v3566_v3 = vadd.f32 %v3565_v41, %v3552_v59  ;;  %v9664_v41 = vld [vmem:[#allocation11 + $0x458] sm:$0xf0] }
 0x2be   :  { %4894 = vmatpush.bf16.msrb.mxu1 %v9251_v38  ;;  %4908 = vmatpush.bf16.msrb.mxu3 %v9315_v24  ;;  %v11336_v38 = vld [vmem:[#allocation11 + $0x2a4] sm:$0xf]  ;;  %v9448_v24 = vld [vmem:[#allocation11 + $0x2a8] sm:$0xf0]  ;;  %v12446_v15 = vpop.f32.mrf.mxu0  ;;  %v9595_v50 = vor.u32 %v11372_v60, %v9592_v27  ;;  %v3567_v44 = vpop.f32.mrf.mxu1  ;;  %v9790_v34 = vld [vmem:[#allocation11 + $0x550] sm:$0xf] }
 0x2bf   :  { %v11392_v60 = vld [vmem:[#allocation11 + $0x464] sm:$0xf]  ;;  %v9672_v27 = vld [vmem:[#allocation11 + $0x468] sm:$0xf0] }
 0x2c1   :  { %4917 = vmatpush.bf16.msrb.mxu0 %v9419_v11  ;;  %4931 = vmatpush.bf16.msrb.mxu2 %v9483_v16  ;;  %v9451_v11 = vor.u32 %v11336_v38, %v9448_v24  ;;  %v11318_v16 = vld [vmem:[#allocation11 + $0x214] sm:$0xf]  ;;  %v11348_v38 = vld [vmem:[#allocation11 + $0x304] sm:$0xf]  ;;  %v9496_v24 = vld [vmem:[#allocation11 + $0x308] sm:$0xf0] }
 0x2c2   :  { %4895 = vmatpush.bf16.msrb.mxu1 %v9243_v28  ;;  %4909 = vmatpush.bf16.msrb.mxu3 %v9307_v47  ;;  %v9440_v28 = vld [vmem:[#allocation11 + $0x298] sm:$0xf0]  ;;  %v9523_v47 = vor.u32 %v11354_v25, %v9520_v12  ;;  %v9560_v25 = vld [vmem:[#allocation11 + $0x388] sm:$0xf0]  ;;  %v9806_v12 = vld [vmem:[#allocation11 + $0x570] sm:$0xf] }
 0x2c5   :  { %4918 = vmatpush.bf16.msrb.mxu0 %v9411_v49  ;;  %4932 = vmatpush.bf16.msrb.mxu2 %v9475_v45  ;;  %v9379_v49 = vor.u32 %v11318_v16, %v9376_v53  ;;  %v9443_v45 = vor.u32 %v11334_v35, %v9440_v28  ;;  %v9675_v16 = vor.u32 %v11392_v60, %v9672_v27  ;;  %v11390_v35 = vld [vmem:[#allocation11 + $0x454] sm:$0xf] }
 0x2c6   :  { %4944 = vmatpush.bf16.msra.mxu1 %v9555_v46  ;;  %4958 = vmatpush.bf16.msra.mxu3 %v9619_v51  ;;  %v9587_v46 = vor.u32 %v11370_v9, %v9584_v21  ;;  %v11352_v51 = vld [vmem:[#allocation11 + $0x324] sm:$0xf]  ;;  %v12450_v56 = vpop.f32.mrf.mxu0  ;;  %v3607_v9 = vpop.f32.mrf.mxu2  ;;  %v11427_v21 = vld [vmem:[#allocation11 + $0x574] sm:$0xf0]  ;;  %v3554_v28 = vadd.f32 %v3553_v43, %v12446_v15  ;;  %v11441_v15 = vld [vmem:[#allocation11 + $0x5e4] sm:$0xf0] }
 0x2c7   :  { %4896 = vmatmul.bf16.vlgmr.msrb.gmra.mxu1 %v12344_v30  ;;  %4910 = vmatmul.bf16.vlgmr.msrb.gmra.mxu3 %v12354_v29  ;;  %v9515_v20 = vor.u32 %v11352_v51, %v9512_v55  ;;  %v9499_v51 = vor.u32 %v11348_v38, %v9496_v24  ;;  %v11386_v60 = vld [vmem:[#allocation11 + $0x434] sm:$0xf] }
 0x2c8   :  { %v3568_v6 = vadd.f32 %v3567_v44, %v3554_v28  ;;  %v9782_v44 = vld [vmem:[#allocation11 + $0x540] sm:$0xf]  ;;  %v9704_v28 = vld [vmem:[#allocation11 + $0x4a8] sm:$0xf0] }
 0x2c9   :  { %4919 = vmatpush.bf16.msrb.mxu0 %v9403_v10  ;;  %4933 = vmatpush.bf16.msrb.mxu2 %v9467_v57  ;;  %v9579_v10 = vor.u32 %v11368_v48, %v9576_v39  ;;  %v11350_v57 = vld [vmem:[#allocation11 + $0x314] sm:$0xf]  ;;  %v3580_v48 = vadd.f32 %v12448_v22, %v3566_v3  ;;  %v9807_v39 = vor.u32 %v11427_v21, %v9806_v12  ;;  %v9656_v22 = vld [vmem:[#allocation11 + $0x448] sm:$0xf0]  ;;  %v11421_v12 = vld [vmem:[#allocation11 + $0x544] sm:$0xf0] }
 0x2ca   :  { %4945 = vmatpush.bf16.msra.mxu1 %v9547_v36  ;;  %4959 = vmatpush.bf16.msra.mxu3 %v9611_v23  ;;  %v11394_v36 = vld [vmem:[#allocation11 + $0x474] sm:$0xf]  ;;  %v9680_v23 = vld [vmem:[#allocation11 + $0x478] sm:$0xf0]  ;;  %v9507_v32 = vor.u32 %v11350_v57, %v9504_v5  ;;  %v3621_v57 = vpop.f32.mrf.mxu1  ;;  %v11437_v21 = vld [vmem:[#allocation11 + $0x5c4] sm:$0xf0] }
 0x2cb   :  { %v9683_v63 = vor.u32 %v11394_v36, %v9680_v23  ;;  %v3594_v43 = vadd.f32 %v12450_v56, %v3580_v48  ;;  %v11388_v23 = vld [vmem:[#allocation11 + $0x444] sm:$0xf]  ;;  %v11423_v56 = vld [vmem:[#allocation11 + $0x554] sm:$0xf0]  ;;  %v9838_v48 = vld [vmem:[#allocation11 + $0x5b0] sm:$0xf] }
 0x2cc   :  { %v9791_v24 = vor.u32 %v11423_v56, %v9790_v34  ;;  %v11433_v34 = vld [vmem:[#allocation11 + $0x5a4] sm:$0xf0] }
 0x2cd   :  { %4920 = vmatpush.bf16.msrb.mxu0 %v9395_v18  ;;  %4934 = vmatpush.bf16.msrb.mxu2 %v9459_v40  ;;  %v11408_v18 = vld [vmem:[#allocation11 + $0x4e4] sm:$0xf]  ;;  %v9736_v40 = vld [vmem:[#allocation11 + $0x4e8] sm:$0xf0] }
 0x2ce   :  { %4946 = vmatpush.bf16.msra.mxu1 %v9539_v1  ;;  %4960 = vmatpush.bf16.msra.mxu3 %v9603_v0  ;;  %v9371_v1 = vor.u32 %v11316_v4, %v9368_v19  ;;  %v9435_v0 = vor.u32 %v11332_v33, %v9432_v61  ;;  %v9739_v53 = vor.u32 %v11408_v18, %v9736_v40  ;;  %v3595_v4 = vpop.f32.mrf.mxu0  ;;  %v11425_v19 = vld [vmem:[#allocation11 + $0x564] sm:$0xf0]  ;;  %v9862_v33 = vld [vmem:[#allocation11 + $0x5e0] sm:$0xf]  ;;  %v3609_v18 = vpop.f32.mrf.mxu2  ;;  %v9648_v40 = vld [vmem:[#allocation11 + $0x438] sm:$0xf0] }
 0x2cf   :  { %v9667_v61 = vor.u32 %v11390_v35, %v9664_v41  ;;  %v9863_v52 = vor.u32 %v11441_v15, %v9862_v33  ;;  %v11400_v35 = vld [vmem:[#allocation11 + $0x4a4] sm:$0xf]  ;;  %v11382_v15 = vld [vmem:[#allocation11 + $0x414] sm:$0xf] }
 0x2d0   :  { %v9707_v33 = vor.u32 %v11400_v35, %v9704_v28 }
 0x2d1   :  { %4921 = vmatpush.bf16.msrb.mxu0 %v9387_v26  ;;  %4935 = vmatpush.bf16.msrb.mxu2 %v9451_v11  ;;  %v9870_v26 = vld [vmem:[#allocation11 + $0x5f0] sm:$0xf]  ;;  %v11443_v11 = vld [vmem:[#allocation11 + $0x5f4] sm:$0xf0] }
 0x2d2   :  { %4947 = vmatpush.bf16.msra.mxu1 %v9531_v14  ;;  %4961 = vmatpush.bf16.msra.mxu3 %v9595_v50  ;;  %v3581_v14 = vpop.f32.mrf.mxu3  ;;  %v11364_v50 = vld [vmem:[#allocation11 + $0x384] sm:$0xf] }
 0x2d3   :  { %v9563_v55 = vor.u32 %v11364_v50, %v9560_v25  ;;  %v3582_v27 = vadd.f32 %v3581_v14, %v3568_v6  ;;  %v9651_v14 = vor.u32 %v11386_v60, %v9648_v40  ;;  %v9696_v6 = vld [vmem:[#allocation11 + $0x498] sm:$0xf0]  ;;  %v9688_v60 = vld [vmem:[#allocation11 + $0x488] sm:$0xf0]  ;;  %v11459_v40 = vld [vmem:[#allocation11 + $0x674] sm:$0xf0] }
 0x2d5   :  { %4922 = vmatpush.bf16.msrb.mxu0 %v9379_v49  ;;  %4936 = vmatpush.bf16.msrb.mxu2 %v9443_v45  ;;  %v9871_v49 = vor.u32 %v11443_v11, %v9870_v26  ;;  %v9798_v45 = vld [vmem:[#allocation11 + $0x560] sm:$0xf]  ;;  %v3596_v50 = vadd.f32 %v3595_v4, %v3582_v27  ;;  %v11384_v11 = vld [vmem:[#allocation11 + $0x424] sm:$0xf] }
 0x2d6   :  { %4948 = vmatpush.bf16.msra.mxu1 %v9523_v47  ;;  %4962 = vmatpush.bf16.msra.mxu3 %v9587_v46  ;;  %v11406_v47 = vld [vmem:[#allocation11 + $0x4d4] sm:$0xf]  ;;  %v9728_v46 = vld [vmem:[#allocation11 + $0x4d8] sm:$0xf0]  ;;  %v9799_v5 = vor.u32 %v11425_v19, %v9798_v45 }
 0x2d7   :  { %v9731_v36 = vor.u32 %v11406_v47, %v9728_v46  ;;  %v9783_v47 = vor.u32 %v11421_v12, %v9782_v44  ;;  %v9758_v44 = vld [vmem:[#allocation11 + $0x510] sm:$0xf]  ;;  %v11431_v12 = vld [vmem:[#allocation11 + $0x594] sm:$0xf0] }
 0x2d9   :  { %4923 = vmatpush.bf16.msrb.mxu0 %v9371_v1  ;;  %4937 = vmatpush.bf16.msrb.mxu2 %v9435_v0  ;;  %v9854_v1 = vld [vmem:[#allocation11 + $0x5d0] sm:$0xf]  ;;  %v11439_v0 = vld [vmem:[#allocation11 + $0x5d4] sm:$0xf0]  ;;  %v3649_v25 = vpop.f32.mrf.mxu0 }
 0x2da   :  { %4949 = vmatpush.bf16.msra.mxu1 %v9515_v20  ;;  %4963 = vmatpush.bf16.msra.mxu3 %v9579_v10  ;;  %v9720_v20 = vld [vmem:[#allocation11 + $0x4c8] sm:$0xf0]  ;;  %v3608_v10 = vadd.f32 %v3607_v9, %v3594_v43  ;;  %v3635_v59 = vpop.f32.mrf.mxu3  ;;  %v9855_v3 = vor.u32 %v11439_v0, %v9854_v1  ;;  %v9846_v9 = vld [vmem:[#allocation11 + $0x5c0] sm:$0xf] }
 0x2db   :  { %v9847_v46 = vor.u32 %v11437_v21, %v9846_v9 }
 0x2dc   :  { %4924 = vmatmul.bf16.vlgmr.msrb.gmra.mxu0 %v12368_v13  ;;  %4938 = vmatmul.bf16.vlgmr.msrb.gmra.mxu2 %v12370_v54  ;;  %v3622_v38 = vadd.f32 %v3621_v57, %v3608_v10  ;;  %v9766_v57 = vld [vmem:[#allocation11 + $0x520] sm:$0xf] }
 0x2dd   :  { %4972 = vmatpush.bf16.msra.mxu0 %v9683_v63  ;;  %4986 = vmatpush.bf16.msra.mxu2 %v9747_v37  ;;  %v9659_v63 = vor.u32 %v11388_v23, %v9656_v22  ;;  %v9723_v37 = vor.u32 %v11404_v31, %v9720_v20  ;;  %v11398_v23 = vld [vmem:[#allocation11 + $0x494] sm:$0xf]  ;;  %v3669_v31 = vld [vmem:[#allocation3 + $0x18] sm:$0xff] }
 0x2de   :  { %4950 = vmatpush.bf16.msra.mxu1 %v9507_v32  ;;  %4964 = vmatpush.bf16.msra.mxu3 %v9571_v17  ;;  %v11402_v32 = vld [vmem:[#allocation11 + $0x4b4] sm:$0xf]  ;;  %v9712_v17 = vld [vmem:[#allocation11 + $0x4b8] sm:$0xf0]  ;;  %v3636_v41 = vadd.f32 %v3635_v59, %v3622_v38  ;;  %v11380_v59 = vld [vmem:[#allocation11 + $0x404] sm:$0xf]  ;;  %v9699_v0 = vor.u32 %v11398_v23, %v9696_v6 }
 0x2df   :  { %v9715_v26 = vor.u32 %v11402_v32, %v9712_v17  ;;  %v9998_v32 = vld [vmem:[#allocation11 + $0x6f0] sm:$0xf]  ;;  %v11475_v38 = vld [vmem:[#allocation11 + $0x6f4] sm:$0xf0] }
 0x2e0   :  { %v3650_v4 = vadd.f32 %v3649_v25, %v3636_v41  ;;  %v9822_v25 = vld [vmem:[#allocation11 + $0x590] sm:$0xf]  ;;  %v9999_v28 = vor.u32 %v11475_v38, %v9998_v32  ;;  %v11507_v23 = vld [vmem:[#allocation11 + $0x7f4] sm:$0xf0]  ;;  %v11469_v32 = vld [vmem:[#allocation11 + $0x6c4] sm:$0xf0] }
 0x2e1   :  { %4973 = vmatpush.bf16.msra.mxu0 %v9675_v16  ;;  %4987 = vmatpush.bf16.msra.mxu2 %v9739_v53  ;;  %v3610_v16 = vadd.f32 %v3609_v18, %v3596_v50  ;;  %v9640_v53 = vld [vmem:[#allocation11 + $0x428] sm:$0xf0]  ;;  %v3651_v27 = vpop.f32.mrf.mxu0  ;;  %v9934_v18 = vld [vmem:[#allocation11 + $0x670] sm:$0xf]  ;;  %v11415_v50 = vld [vmem:[#allocation11 + $0x514] sm:$0xf0] }
 0x2e2   :  { %4951 = vmatpush.bf16.msra.mxu1 %v9499_v51  ;;  %4965 = vmatpush.bf16.msra.mxu3 %v9563_v55  ;;  %v9774_v51 = vld [vmem:[#allocation11 + $0x530] sm:$0xf]  ;;  %v11419_v55 = vld [vmem:[#allocation11 + $0x534] sm:$0xf0]  ;;  %v3637_v45 = vpop.f32.mrf.mxu3  ;;  %v9643_v19 = vor.u32 %v11384_v11, %v9640_v53  ;;  %v9935_v35 = vor.u32 %v11459_v40, %v9934_v18  ;;  %v11453_v18 = vld [vmem:[#allocation11 + $0x644] sm:$0xf0] }
 0x2e3   :  { %v9775_v20 = vor.u32 %v11419_v55, %v9774_v51  ;;  %v3671_v53 = vld [vmem:[#allocation3 + $0x8] sm:$0x3f]  ;;  %v9990_v51 = vld [vmem:[#allocation11 + $0x6e0] sm:$0xf] }
 0x2e4   :  { %v9974_v40 = vld [vmem:[#allocation11 + $0x6c0] sm:$0xf] }
 0x2e5   :  { %4974 = vmatpush.bf16.msra.mxu0 %v9667_v61  ;;  %4988 = vmatpush.bf16.msra.mxu2 %v9731_v36  ;;  %v3663_v61 = vpop.f32.mrf.mxu2  ;;  %v9632_v36 = vld [vmem:[#allocation11 + $0x418] sm:$0xf0] }
 0x2e6   :  { %5972 = vmatpush.bf16.msrb.mxu1 %v9807_v39  ;;  %5986 = vmatpush.bf16.msrb.mxu3 %v9871_v49  ;;  %v11435_v39 = vld [vmem:[#allocation11 + $0x5b4] sm:$0xf0]  ;;  %v3623_v49 = vpop.f32.mrf.mxu1  ;;  %v3664_v22 = vadd.f32 %v3663_v61, %v3650_v4  ;;  %v9635_v1 = vor.u32 %v11382_v15, %v9632_v36  ;;  %v11413_v4 = vld [vmem:[#allocation11 + $0x504] sm:$0xf0]  ;;  %v10062_v15 = vld [vmem:[#allocation11 + $0x770] sm:$0xf] }
 0x2e7   :  { %4952 = vmatmul.bf16.vlgmr.msra.gmra.mxu1 %v12416_v58  ;;  %4966 = vmatmul.bf16.vlgmr.msra.gmra.mxu3 %v12423_v42  ;;  %v3624_v43 = vadd.f32 %v3623_v49, %v3610_v16  ;;  %v9839_v10 = vor.u32 %v11435_v39, %v9838_v48  ;;  %v11473_v48 = vld [vmem:[#allocation11 + $0x6e4] sm:$0xf0]  ;;  %v9759_v39 = vor.u32 %v11415_v50, %v9758_v44  ;;  %v11491_v61 = vld [vmem:[#allocation11 + $0x774] sm:$0xf0]  ;;  %v10126_v36 = vld [vmem:[#allocation11 + $0x7f0] sm:$0xf] }
 0x2e8   :  { %v3673_v56 = vmax.f32 %v3669_v31, %v3664_v22  ;;  %v9823_v49 = vor.u32 %v11431_v12, %v9822_v25  ;;  %v9991_v22 = vor.u32 %v11473_v48, %v9990_v51  ;;  %v9918_v31 = vld [vmem:[#allocation11 + $0x650] sm:$0xf]  ;;  %v11503_v50 = vld [vmem:[#allocation11 + $0x7d4] sm:$0xf0]  ;;  %v9975_v12 = vor.u32 %v11469_v32, %v9974_v40  ;;  %v11501_v51 = vld [vmem:[#allocation11 + $0x7c4] sm:$0xf0] }
 0x2e9   :  { %4975 = vmatpush.bf16.msra.mxu0 %v9659_v63  ;;  %4989 = vmatpush.bf16.msra.mxu2 %v9723_v37  ;;  %v9624_v63 = vld [vmem:[#allocation11 + $0x408] sm:$0xf0]  ;;  %v11396_v37 = vld [vmem:[#allocation11 + $0x484] sm:$0xf]  ;;  %v3638_v17 = vadd.f32 %v3637_v45, %v3624_v43  ;;  %v9750_v45 = vld [vmem:[#allocation11 + $0x500] sm:$0xf] }
 0x2ea   :  { %5973 = vmatpush.bf16.msrb.mxu1 %v9799_v5  ;;  %5987 = vmatpush.bf16.msrb.mxu3 %v9863_v52  ;;  %v11417_v5 = vld [vmem:[#allocation11 + $0x524] sm:$0xf0]  ;;  %v9830_v52 = vld [vmem:[#allocation11 + $0x5a0] sm:$0xf]  ;;  %3677 = vst [vmem:[#allocation3 + $0x18] sm:$0xff] %v3673_v56  ;;  %v4743_v11 = vpop.f32.mrf.mxu3 }
 0x2eb   :  { %v3652_v9 = vadd.f32 %v3651_v27, %v3638_v17  ;;  %v10054_v56 = vld [vmem:[#allocation11 + $0x760] sm:$0xf]  ;;  %v10110_v44 = vld [vmem:[#allocation11 + $0x7d0] sm:$0xf]  ;;  %v11445_v32 = vld [vmem:[#allocation11 + $0x604] sm:$0xf0] }
 0x2ec   :  { %v9910_v27 = vld [vmem:[#allocation11 + $0x640] sm:$0xf] }
 0x2ed   :  { %4976 = vmatpush.bf16.msra.mxu0 %v9651_v14  ;;  %4990 = vmatpush.bf16.msra.mxu2 %v9715_v26  ;;  %v9627_v14 = vor.u32 %v11380_v59, %v9624_v63  ;;  %v9691_v26 = vor.u32 %v11396_v37, %v9688_v60  ;;  %v3665_v16 = vpop.f32.mrf.mxu2  ;;  %v9751_v59 = vor.u32 %v11413_v4, %v9750_v45  ;;  %v11505_v63 = vld [vmem:[#allocation11 + $0x7e4] sm:$0xf0]  ;;  %v9958_v4 = vld [vmem:[#allocation11 + $0x6a0] sm:$0xf] }
 0x2ee   :  { %5974 = vmatpush.bf16.msrb.mxu1 %v9791_v24  ;;  %5988 = vmatpush.bf16.msrb.mxu3 %v9855_v3  ;;  %v9767_v24 = vor.u32 %v11417_v5, %v9766_v57  ;;  %v9831_v3 = vor.u32 %v11433_v34, %v9830_v52  ;;  %v4729_v21 = vpop.f32.mrf.mxu1  ;;  %v3666_v55 = vadd.f32 %v3665_v16, %v3652_v9  ;;  %v11471_v57 = vld [vmem:[#allocation11 + $0x6d4] sm:$0xf0]  ;;  %v9902_v9 = vld [vmem:[#allocation11 + $0x630] sm:$0xf]  ;;  %v11449_v45 = vld [vmem:[#allocation11 + $0x624] sm:$0xf0] }
 0x2ef   :  { %v12461_v41 = vadd.f32 %v4743_v11, %v4729_v21  ;;  %v10063_v52 = vor.u32 %v11491_v61, %v10062_v15  ;;  %v10127_v34 = vor.u32 %v11507_v23, %v10126_v36  ;;  %v9911_v25 = vor.u32 %v11453_v18, %v9910_v27  ;;  %v11451_v21 = vld [vmem:[#allocation11 + $0x634] sm:$0xf0]  ;;  %v10094_v36 = vld [vmem:[#allocation11 + $0x7b0] sm:$0xf]  ;;  %v9878_v40 = vld [vmem:[#allocation11 + $0x600] sm:$0xf] }
 0x2f0   :  { %v3675_v43 = vmax.f32 %v3671_v53, %v3666_v55  ;;  %v10111_v16 = vor.u32 %v11503_v50, %v10110_v44  ;;  %v10038_v53 = vld [vmem:[#allocation11 + $0x740] sm:$0xf]  ;;  %v9903_v48 = vor.u32 %v11451_v21, %v9902_v9  ;;  %v11483_v61 = vld [vmem:[#allocation11 + $0x734] sm:$0xf0]  ;;  %v10254_v44 = vld [vmem:[#allocation11 + $0x8f0] sm:$0xf] }
 0x2f1   :  { %4977 = vmatpush.bf16.msra.mxu0 %v9643_v19  ;;  %4991 = vmatpush.bf16.msra.mxu2 %v9707_v33  ;;  %v9814_v19 = vld [vmem:[#allocation11 + $0x580] sm:$0xf]  ;;  %v11429_v33 = vld [vmem:[#allocation11 + $0x584] sm:$0xf0]  ;;  %v11499_v23 = vld [vmem:[#allocation11 + $0x7b4] sm:$0xf0] }
 0x2f2   :  { %5975 = vmatpush.bf16.msrb.mxu1 %v9783_v47  ;;  %5989 = vmatpush.bf16.msrb.mxu3 %v9847_v46  ;;  %v9926_v47 = vld [vmem:[#allocation11 + $0x660] sm:$0xf]  ;;  %v11457_v46 = vld [vmem:[#allocation11 + $0x664] sm:$0xf0]  ;;  %3679 = vst [vmem:[#allocation3 + $0x8] sm:$0x3f] %v3675_v43  ;;  %v9815_v5 = vor.u32 %v11429_v33, %v9814_v19 }
 0x2f3   :  { %v9927_v6 = vor.u32 %v11457_v46, %v9926_v47  ;;  %v11485_v47 = vld [vmem:[#allocation11 + $0x744] sm:$0xf0]  ;;  %v10102_v46 = vld [vmem:[#allocation11 + $0x7c0] sm:$0xf]  ;;  %v10030_v43 = vld [vmem:[#allocation11 + $0x730] sm:$0xf] }
 0x2f4   :  { %v11465_v19 = vld [vmem:[#allocation11 + $0x6a4] sm:$0xf0]  ;;  %v10039_v33 = vor.u32 %v11485_v47, %v10038_v53  ;;  %v10103_v15 = vor.u32 %v11501_v51, %v10102_v46  ;;  %v11539_v50 = vld [vmem:[#allocation11 + $0x8f4] sm:$0xf0]  ;;  %v10014_v9 = vld [vmem:[#allocation11 + $0x710] sm:$0xf] }
 0x2f5   :  { %4978 = vmatpush.bf16.msra.mxu0 %v9635_v1  ;;  %4992 = vmatpush.bf16.msra.mxu2 %v9699_v0  ;;  %v11489_v1 = vld [vmem:[#allocation11 + $0x764] sm:$0xf0]  ;;  %v10118_v0 = vld [vmem:[#allocation11 + $0x7e0] sm:$0xf]  ;;  %v11479_v21 = vld [vmem:[#allocation11 + $0x714] sm:$0xf0]  ;;  %v10255_v47 = vor.u32 %v11539_v50, %v10254_v44 }
 0x2f6   :  { %5976 = vmatpush.bf16.msrb.mxu1 %v9775_v20  ;;  %5990 = vmatpush.bf16.msrb.mxu3 %v9839_v10  ;;  %v11455_v20 = vld [vmem:[#allocation11 + $0x654] sm:$0xf0]  ;;  %v9982_v10 = vld [vmem:[#allocation11 + $0x6d0] sm:$0xf]  ;;  %v10055_v17 = vor.u32 %v11489_v1, %v10054_v56  ;;  %v10119_v38 = vor.u32 %v11505_v63, %v10118_v0  ;;  %v10022_v56 = vld [vmem:[#allocation11 + $0x720] sm:$0xf] }
 0x2f7   :  { %v9919_v37 = vor.u32 %v11455_v20, %v9918_v31  ;;  %v9983_v60 = vor.u32 %v11471_v57, %v9982_v10  ;;  %v9886_v31 = vld [vmem:[#allocation11 + $0x610] sm:$0xf]  ;;  %v11447_v10 = vld [vmem:[#allocation11 + $0x614] sm:$0xf0]  ;;  %v11481_v0 = vld [vmem:[#allocation11 + $0x724] sm:$0xf0] }
 0x2f8   :  { %v9950_v57 = vld [vmem:[#allocation11 + $0x690] sm:$0xf]  ;;  %v10086_v63 = vld [vmem:[#allocation11 + $0x7a0] sm:$0xf]  ;;  %v9887_v27 = vor.u32 %v11447_v10, %v9886_v31  ;;  %v11551_v44 = vld [vmem:[#allocation11 + $0x954] sm:$0xf0] }
 0x2f9   :  { %4979 = vmatpush.bf16.msra.mxu0 %v9627_v14  ;;  %4993 = vmatpush.bf16.msra.mxu2 %v9691_v26  ;;  %v9966_v14 = vld [vmem:[#allocation11 + $0x6b0] sm:$0xf]  ;;  %v11467_v26 = vld [vmem:[#allocation11 + $0x6b4] sm:$0xf0]  ;;  %v10182_v51 = vld [vmem:[#allocation11 + $0x860] sm:$0xf] }
 0x2fa   :  { %5977 = vmatpush.bf16.msrb.mxu1 %v9767_v24  ;;  %5991 = vmatpush.bf16.msrb.mxu3 %v9831_v3  ;;  %v10046_v24 = vld [vmem:[#allocation11 + $0x750] sm:$0xf]  ;;  %v11487_v3 = vld [vmem:[#allocation11 + $0x754] sm:$0xf0] }
 0x2fb   :  { %v10047_v11 = vor.u32 %v11487_v3, %v10046_v24  ;;  %v10190_v24 = vld [vmem:[#allocation11 + $0x870] sm:$0xf]  ;;  %v11523_v3 = vld [vmem:[#allocation11 + $0x874] sm:$0xf0] }
 0x2fc   :  { %4980 = vmatmul.bf16.vlgmr.msra.gmra.mxu0 %v12431_v7  ;;  %4994 = vmatmul.bf16.vlgmr.msra.gmra.mxu2 %v12434_v2  ;;  %v10174_v31 = vld [vmem:[#allocation11 + $0x850] sm:$0xf] }
 0x2fd   :  { %6000 = vmatpush.bf16.msrb.mxu0 %v9935_v35  ;;  %6014 = vmatpush.bf16.msrb.mxu2 %v9999_v28  ;;  %v12467_v35 = vpop.f32.mrf.mxu1  ;;  %v4757_v28 = vpop.f32.mrf.mxu0  ;;  %v10238_v10 = vld [vmem:[#allocation11 + $0x8d0] sm:$0xf] }
 0x2fe   :  { %5978 = vmatpush.bf16.msrb.mxu1 %v9759_v39  ;;  %5992 = vmatpush.bf16.msrb.mxu3 %v9823_v49  ;;  %v4758_v55 = vadd.f32 %v4757_v28, %v12461_v41  ;;  %v9967_v39 = vor.u32 %v11467_v26, %v9966_v14  ;;  %v9894_v49 = vld [vmem:[#allocation11 + $0x620] sm:$0xf]  ;;  %v10078_v14 = vld [vmem:[#allocation11 + $0x790] sm:$0xf]  ;;  %v11495_v26 = vld [vmem:[#allocation11 + $0x794] sm:$0xf0]  ;;  %v10191_v28 = vor.u32 %v11523_v3, %v10190_v24 }
 0x2ff   :  { %v9895_v41 = vor.u32 %v11449_v45, %v9894_v49  ;;  %v4771_v20 = vpop.f32.mrf.mxu2  ;;  %v10015_v49 = vor.u32 %v11479_v21, %v10014_v9  ;;  %v10079_v45 = vor.u32 %v11495_v26, %v10078_v14  ;;  %v10302_v3 = vld [vmem:[#allocation11 + $0x950] sm:$0xf]  ;;  %v11515_v14 = vld [vmem:[#allocation11 + $0x834] sm:$0xf0] }
 0x300   :  { %v10366_v50 = vld [vmem:[#allocation11 + $0x9d0] sm:$0xf] }
 0x301   :  { %6001 = vmatpush.bf16.msrb.mxu0 %v9927_v6  ;;  %6015 = vmatpush.bf16.msrb.mxu2 %v9991_v22  ;;  %v12470_v6 = vpop.f32.mrf.mxu3  ;;  %v9959_v22 = vor.u32 %v11465_v19, %v9958_v4  ;;  %v10006_v4 = vld [vmem:[#allocation11 + $0x700] sm:$0xf]  ;;  %v11477_v19 = vld [vmem:[#allocation11 + $0x704] sm:$0xf0]  ;;  %v10158_v21 = vld [vmem:[#allocation11 + $0x830] sm:$0xf] }
 0x302   :  { %5979 = vmatpush.bf16.msrb.mxu1 %v9751_v59  ;;  %5993 = vmatpush.bf16.msrb.mxu3 %v9815_v5  ;;  %v11463_v59 = vld [vmem:[#allocation11 + $0x694] sm:$0xf0]  ;;  %v4772_v5 = vadd.f32 %v4771_v20, %v4758_v55  ;;  %v11521_v55 = vld [vmem:[#allocation11 + $0x864] sm:$0xf0] }
 0x303   :  { %v9951_v18 = vor.u32 %v11463_v59, %v9950_v57  ;;  %v11519_v20 = vld [vmem:[#allocation11 + $0x854] sm:$0xf0]  ;;  %v10007_v59 = vor.u32 %v11477_v19, %v10006_v4  ;;  %v11565_v4 = vld [vmem:[#allocation11 + $0x9c4] sm:$0xf0] }
 0x304   :  { %v11535_v57 = vld [vmem:[#allocation11 + $0x8d4] sm:$0xf0] }
 0x305   :  { %6002 = vmatpush.bf16.msrb.mxu0 %v9919_v37  ;;  %6016 = vmatpush.bf16.msrb.mxu2 %v9983_v60  ;;  %v4785_v1 = vpop.f32.mrf.mxu1  ;;  %v11497_v37 = vld [vmem:[#allocation11 + $0x7a4] sm:$0xf0] }
 0x306   :  { %6028 = vmatpush.bf16.msra.mxu1 %v10063_v52  ;;  %6042 = vmatpush.bf16.msra.mxu3 %v10127_v34  ;;  %v10031_v52 = vor.u32 %v11483_v61, %v10030_v43  ;;  %v10095_v34 = vor.u32 %v11499_v23, %v10094_v36  ;;  %v4786_v60 = vadd.f32 %v4785_v1, %v4772_v5  ;;  %v10318_v43 = vld [vmem:[#allocation11 + $0x970] sm:$0xf]  ;;  %v11555_v61 = vld [vmem:[#allocation11 + $0x974] sm:$0xf0]  ;;  %v4759_v1 = vpop.f32.mrf.mxu0 }
 0x307   :  { %5980 = vmatmul.bf16.vlgmr.msrb.gmra.mxu1 %v12322_v62  ;;  %5994 = vmatmul.bf16.vlgmr.msrb.gmra.mxu3 %v12324_v8  ;;  %v10382_v36 = vld [vmem:[#allocation11 + $0x9f0] sm:$0xf]  ;;  %v11571_v23 = vld [vmem:[#allocation11 + $0x9f4] sm:$0xf0]  ;;  %v4773_v26 = vpop.f32.mrf.mxu2 }
 0x309   :  { %6003 = vmatpush.bf16.msrb.mxu0 %v9911_v25  ;;  %6017 = vmatpush.bf16.msrb.mxu2 %v9975_v12  ;;  %v10023_v25 = vor.u32 %v11481_v0, %v10022_v56  ;;  %v10087_v12 = vor.u32 %v11497_v37, %v10086_v63  ;;  %v10310_v56 = vld [vmem:[#allocation11 + $0x960] sm:$0xf]  ;;  %v11553_v0 = vld [vmem:[#allocation11 + $0x964] sm:$0xf0] }
 0x30a   :  { %6029 = vmatpush.bf16.msra.mxu1 %v10055_v17  ;;  %6043 = vmatpush.bf16.msra.mxu3 %v10119_v38  ;;  %v9942_v17 = vld [vmem:[#allocation11 + $0x680] sm:$0xf]  ;;  %v11461_v38 = vld [vmem:[#allocation11 + $0x684] sm:$0xf0]  ;;  %v4799_v53 = vpop.f32.mrf.mxu3 }
 0x30b   :  { %v12472_v46 = vadd.f32 %v4799_v53, %v4786_v60  ;;  %v10374_v63 = vld [vmem:[#allocation11 + $0x9e0] sm:$0xf]  ;;  %v11569_v37 = vld [vmem:[#allocation11 + $0x9e4] sm:$0xf0]  ;;  %v10175_v60 = vor.u32 %v11519_v20, %v10174_v31  ;;  %v4746_v53 = vadd.f32 %v12470_v6, %v12467_v35  ;;  %v11547_v31 = vld [vmem:[#allocation11 + $0x934] sm:$0xf0] }
 0x30c   :  { %v10375_v24 = vor.u32 %v11569_v37, %v10374_v63  ;;  %v10214_v35 = vld [vmem:[#allocation11 + $0x8a0] sm:$0xf]  ;;  %v11529_v6 = vld [vmem:[#allocation11 + $0x8a4] sm:$0xf0]  ;;  %v10350_v20 = vld [vmem:[#allocation11 + $0x9b0] sm:$0xf] }
 0x30d   :  { %6004 = vmatpush.bf16.msrb.mxu0 %v9903_v48  ;;  %6018 = vmatpush.bf16.msrb.mxu2 %v9967_v39  ;;  %v10246_v48 = vld [vmem:[#allocation11 + $0x8e0] sm:$0xf]  ;;  %v11537_v39 = vld [vmem:[#allocation11 + $0x8e4] sm:$0xf0]  ;;  %v4760_v19 = vadd.f32 %v4759_v1, %v4746_v53  ;;  %v11527_v1 = vld [vmem:[#allocation11 + $0x894] sm:$0xf0] }
 0x30e   :  { %6030 = vmatpush.bf16.msra.mxu1 %v10047_v11  ;;  %6044 = vmatpush.bf16.msra.mxu3 %v10111_v16  ;;  %v9879_v11 = vor.u32 %v11445_v32, %v9878_v40  ;;  %v9943_v16 = vor.u32 %v11461_v38, %v9942_v17  ;;  %v11517_v40 = vld [vmem:[#allocation11 + $0x844] sm:$0xf0]  ;;  %v10230_v32 = vld [vmem:[#allocation11 + $0x8c0] sm:$0xf]  ;;  %v10311_v38 = vor.u32 %v11553_v0, %v10310_v56  ;;  %v10206_v56 = vld [vmem:[#allocation11 + $0x890] sm:$0xf] }
 0x30f   :  { %v11533_v17 = vld [vmem:[#allocation11 + $0x8c4] sm:$0xf0] }
 0x310   :  { %v10231_v9 = vor.u32 %v11533_v17, %v10230_v32  ;;  %v10342_v32 = vld [vmem:[#allocation11 + $0x9a0] sm:$0xf]  ;;  %v11561_v17 = vld [vmem:[#allocation11 + $0x9a4] sm:$0xf0] }
 0x311   :  { %6005 = vmatpush.bf16.msrb.mxu0 %v9895_v41  ;;  %6019 = vmatpush.bf16.msrb.mxu2 %v9959_v22  ;;  %v10183_v41 = vor.u32 %v11521_v55, %v10182_v51  ;;  %v10247_v22 = vor.u32 %v11537_v39, %v10246_v48  ;;  %v10294_v55 = vld [vmem:[#allocation11 + $0x940] sm:$0xf]  ;;  %v10159_v39 = vor.u32 %v11515_v14, %v10158_v21  ;;  %v11426_v21 = vld [vmem:[#allocation11 + $0x574] sm:$0xf]  ;;  %v9808_v14 = vld [vmem:[#allocation11 + $0x578] sm:$0xf0] }
 0x312   :  { %6031 = vmatpush.bf16.msra.mxu1 %v10039_v33  ;;  %6045 = vmatpush.bf16.msra.mxu3 %v10103_v15  ;;  %v10070_v33 = vld [vmem:[#allocation11 + $0x780] sm:$0xf]  ;;  %v11493_v15 = vld [vmem:[#allocation11 + $0x784] sm:$0xf0] }
 0x313   :  { %v10071_v5 = vor.u32 %v11493_v15, %v10070_v33 }
 0x315   :  { %6006 = vmatpush.bf16.msrb.mxu0 %v9887_v27  ;;  %6020 = vmatpush.bf16.msrb.mxu2 %v9951_v18  ;;  %v10239_v27 = vor.u32 %v11535_v57, %v10238_v10  ;;  %v10166_v18 = vld [vmem:[#allocation11 + $0x840] sm:$0xf]  ;;  %v11563_v10 = vld [vmem:[#allocation11 + $0x9b4] sm:$0xf0]  ;;  %v4801_v57 = vpop.f32.mrf.mxu3 }
 0x316   :  { %6032 = vmatpush.bf16.msra.mxu1 %v10031_v52  ;;  %6046 = vmatpush.bf16.msra.mxu3 %v10095_v34  ;;  %v10319_v52 = vor.u32 %v11555_v61, %v10318_v43  ;;  %v10383_v34 = vor.u32 %v11571_v23, %v10382_v36  ;;  %v10150_v43 = vld [vmem:[#allocation11 + $0x820] sm:$0xf]  ;;  %v11513_v61 = vld [vmem:[#allocation11 + $0x824] sm:$0xf0]  ;;  %v4774_v36 = vadd.f32 %v4773_v26, %v4760_v19 }
 0x319   :  { %6007 = vmatpush.bf16.msrb.mxu0 %v9879_v11  ;;  %6021 = vmatpush.bf16.msrb.mxu2 %v9943_v16  ;;  %v10222_v11 = vld [vmem:[#allocation11 + $0x8b0] sm:$0xf]  ;;  %v11531_v16 = vld [vmem:[#allocation11 + $0x8b4] sm:$0xf0]  ;;  %v4813_v48 = vpop.f32.mrf.mxu0 }
 0x31a   :  { %6033 = vmatpush.bf16.msra.mxu1 %v10023_v25  ;;  %6047 = vmatpush.bf16.msra.mxu3 %v10087_v12  ;;  %v11567_v25 = vld [vmem:[#allocation11 + $0x9d4] sm:$0xf0]  ;;  %v10167_v12 = vor.u32 %v11517_v40, %v10166_v18  ;;  %v4814_v33 = vadd.f32 %v4813_v48, %v12472_v46  ;;  %v10223_v15 = vor.u32 %v11531_v16, %v10222_v11  ;;  %v10278_v18 = vld [vmem:[#allocation11 + $0x920] sm:$0xf]  ;;  %v11545_v40 = vld [vmem:[#allocation11 + $0x924] sm:$0xf0] }
 0x31b   :  { %v10367_v51 = vor.u32 %v11567_v25, %v10366_v50  ;;  %v10151_v46 = vor.u32 %v11513_v61, %v10150_v43  ;;  %v11509_v50 = vld [vmem:[#allocation11 + $0x804] sm:$0xf0]  ;;  %v10198_v25 = vld [vmem:[#allocation11 + $0x880] sm:$0xf]  ;;  %v11442_v11 = vld [vmem:[#allocation11 + $0x5f4] sm:$0xf]  ;;  %v10279_v53 = vor.u32 %v11545_v40, %v10278_v18 }
 0x31c   :  { %6008 = vmatmul.bf16.vlgmr.msrb.gmra.mxu0 %v12344_v30  ;;  %6022 = vmatmul.bf16.vlgmr.msrb.gmra.mxu2 %v12354_v29  ;;  %v9872_v16 = vld [vmem:[#allocation11 + $0x5f8] sm:$0xf0]  ;;  %v11559_v48 = vld [vmem:[#allocation11 + $0x994] sm:$0xf0]  ;;  %v11424_v61 = vld [vmem:[#allocation11 + $0x564] sm:$0xf] }
 0x31d   :  { %6056 = vmatpush.bf16.msra.mxu0 %v10191_v28  ;;  %6070 = vmatpush.bf16.msra.mxu2 %v10255_v47  ;;  %v4787_v28 = vpop.f32.mrf.mxu1  ;;  %v10303_v47 = vor.u32 %v11551_v44, %v10302_v3  ;;  %v10207_v3 = vor.u32 %v11527_v1, %v10206_v56  ;;  %v10134_v44 = vld [vmem:[#allocation11 + $0x800] sm:$0xf] }
 0x31e   :  { %6034 = vmatpush.bf16.msra.mxu1 %v10015_v49  ;;  %6048 = vmatpush.bf16.msra.mxu3 %v10079_v45  ;;  %v11549_v49 = vld [vmem:[#allocation11 + $0x944] sm:$0xf0]  ;;  %v10358_v45 = vld [vmem:[#allocation11 + $0x9c0] sm:$0xf]  ;;  %v4788_v63 = vadd.f32 %v4787_v28, %v4774_v36  ;;  %v10343_v28 = vor.u32 %v11561_v17, %v10342_v32 }
 0x31f   :  { %v10295_v23 = vor.u32 %v11549_v49, %v10294_v55  ;;  %v10334_v55 = vld [vmem:[#allocation11 + $0x990] sm:$0xf]  ;;  %v10135_v49 = vor.u32 %v11509_v50, %v10134_v44  ;;  %v11472_v44 = vld [vmem:[#allocation11 + $0x6e4] sm:$0xf]  ;;  %v9992_v50 = vld [vmem:[#allocation11 + $0x6e8] sm:$0xf0] }
 0x320   :  { %v4802_v26 = vadd.f32 %v4801_v57, %v4788_v63  ;;  %v11557_v57 = vld [vmem:[#allocation11 + $0x984] sm:$0xf0]  ;;  %v11422_v63 = vld [vmem:[#allocation11 + $0x554] sm:$0xf] }
 0x321   :  { %6057 = vmatpush.bf16.msra.mxu0 %v10183_v41  ;;  %6071 = vmatpush.bf16.msra.mxu2 %v10247_v22  ;;  %v10359_v41 = vor.u32 %v11565_v4, %v10358_v45  ;;  %v10286_v22 = vld [vmem:[#allocation11 + $0x930] sm:$0xf] }
 0x322   :  { %6035 = vmatpush.bf16.msra.mxu1 %v10007_v59  ;;  %6049 = vmatpush.bf16.msra.mxu3 %v10071_v5  ;;  %v10215_v59 = vor.u32 %v11529_v6, %v10214_v35  ;;  %v10142_v5 = vld [vmem:[#allocation11 + $0x810] sm:$0xf]  ;;  %v10287_v0 = vor.u32 %v11547_v31, %v10286_v22  ;;  %v9800_v35 = vld [vmem:[#allocation11 + $0x568] sm:$0xf0]  ;;  %v11440_v6 = vld [vmem:[#allocation11 + $0x5e4] sm:$0xf]  ;;  %v10335_v22 = vor.u32 %v11559_v48, %v10334_v55 }
 0x323   :  { %v10262_v31 = vld [vmem:[#allocation11 + $0x900] sm:$0xf]  ;;  %v9803_v1 = vor.u32 %v11424_v61, %v9800_v35  ;;  %v9920_v55 = vld [vmem:[#allocation11 + $0x658] sm:$0xf0]  ;;  %v11470_v48 = vld [vmem:[#allocation11 + $0x6d4] sm:$0xf] }
 0x325   :  { %6058 = vmatpush.bf16.msra.mxu0 %v10175_v60  ;;  %6072 = vmatpush.bf16.msra.mxu2 %v10239_v27  ;;  %v4841_v60 = vpop.f32.mrf.mxu1  ;;  %v10351_v27 = vor.u32 %v11563_v10, %v10350_v20  ;;  %v11541_v20 = vld [vmem:[#allocation11 + $0x904] sm:$0xf0]  ;;  %v10326_v10 = vld [vmem:[#allocation11 + $0x980] sm:$0xf] }
 0x326   :  { %6084 = vmatpush.bf16.msrb.mxu1 %v10319_v52  ;;  %6098 = vmatpush.bf16.msrb.mxu3 %v10383_v34  ;;  %v4827_v52 = vpop.f32.mrf.mxu2  ;;  %v11511_v34 = vld [vmem:[#allocation11 + $0x814] sm:$0xf0]  ;;  %v10263_v18 = vor.u32 %v11541_v20, %v10262_v31  ;;  %v10327_v40 = vor.u32 %v11557_v57, %v10326_v10  ;;  %v11416_v20 = vld [vmem:[#allocation11 + $0x524] sm:$0xf]  ;;  %v9768_v10 = vld [vmem:[#allocation11 + $0x528] sm:$0xf0] }
 0x327   :  { %6036 = vmatmul.bf16.vlgmr.msra.gmra.mxu1 %v12368_v13  ;;  %6050 = vmatmul.bf16.vlgmr.msra.gmra.mxu3 %v12370_v54  ;;  %v4828_v37 = vadd.f32 %v4827_v52, %v4814_v33  ;;  %v9811_v33 = vor.u32 %v11426_v21, %v9808_v14  ;;  %v11474_v52 = vld [vmem:[#allocation11 + $0x6f4] sm:$0xf]  ;;  %v5002_v21 = vld [vmem:[#allocation3 + $0x10] sm:$0x3f]  ;;  %v11420_v14 = vld [vmem:[#allocation11 + $0x544] sm:$0xf] }
 0x328   :  { %v11432_v57 = vld [vmem:[#allocation11 + $0x5a4] sm:$0xf] }
 0x329   :  { %6059 = vmatpush.bf16.msra.mxu0 %v10167_v12  ;;  %6073 = vmatpush.bf16.msra.mxu2 %v10231_v9  ;;  %v4815_v12 = vpop.f32.mrf.mxu0  ;;  %v11525_v9 = vld [vmem:[#allocation11 + $0x884] sm:$0xf0] }
 0x32a   :  { %6085 = vmatpush.bf16.msrb.mxu1 %v10311_v38  ;;  %6099 = vmatpush.bf16.msrb.mxu3 %v10375_v24  ;;  %v4842_v38 = vadd.f32 %v4841_v60, %v4828_v37  ;;  %v10143_v24 = vor.u32 %v11511_v34, %v10142_v5  ;;  %v10199_v45 = vor.u32 %v11525_v9, %v10198_v25  ;;  %v4855_v4 = vpop.f32.mrf.mxu3  ;;  %v9936_v5 = vld [vmem:[#allocation11 + $0x678] sm:$0xf0]  ;;  %v11438_v60 = vld [vmem:[#allocation11 + $0x5d4] sm:$0xf] }
 0x32b   :  { %v10000_v34 = vld [vmem:[#allocation11 + $0x6f8] sm:$0xf0] }
 0x32c   :  { %v12481_v43 = vadd.f32 %v4855_v4, %v4842_v38  ;;  %v9792_v37 = vld [vmem:[#allocation11 + $0x558] sm:$0xf0]  ;;  %v10003_v17 = vor.u32 %v11474_v52, %v10000_v34  ;;  %v11456_v38 = vld [vmem:[#allocation11 + $0x664] sm:$0xf]  ;;  %v11418_v4 = vld [vmem:[#allocation11 + $0x534] sm:$0xf] }
 0x32d   :  { %6060 = vmatpush.bf16.msra.mxu0 %v10159_v39  ;;  %6074 = vmatpush.bf16.msra.mxu2 %v10223_v15  ;;  %v4816_v39 = vadd.f32 %v4815_v12, %v4802_v26  ;;  %v9875_v15 = vor.u32 %v11442_v11, %v9872_v16  ;;  %v9795_v25 = vor.u32 %v11422_v63, %v9792_v37  ;;  %v9784_v26 = vld [vmem:[#allocation11 + $0x548] sm:$0xf0]  ;;  %v11436_v11 = vld [vmem:[#allocation11 + $0x5c4] sm:$0xf]  ;;  %v11450_v52 = vld [vmem:[#allocation11 + $0x634] sm:$0xf] }
 0x32e   :  { %6086 = vmatpush.bf16.msrb.mxu1 %v10303_v47  ;;  %6100 = vmatpush.bf16.msrb.mxu3 %v10367_v51  ;;  %v10270_v47 = vld [vmem:[#allocation11 + $0x910] sm:$0xf]  ;;  %v11543_v51 = vld [vmem:[#allocation11 + $0x914] sm:$0xf0]  ;;  %v4829_v19 = vpop.f32.mrf.mxu2  ;;  %v9848_v16 = vld [vmem:[#allocation11 + $0x5c8] sm:$0xf0] }
 0x32f   :  { %v4830_v36 = vadd.f32 %v4829_v19, %v4816_v39  ;;  %v9984_v39 = vld [vmem:[#allocation11 + $0x6d8] sm:$0xf0]  ;;  %v11414_v37 = vld [vmem:[#allocation11 + $0x514] sm:$0xf] }
 0x330   :  { %v9776_v19 = vld [vmem:[#allocation11 + $0x538] sm:$0xf0]  ;;  %v9987_v35 = vor.u32 %v11470_v48, %v9984_v39 }
 0x331   :  { %6061 = vmatpush.bf16.msra.mxu0 %v10151_v46  ;;  %6075 = vmatpush.bf16.msra.mxu2 %v10215_v59  ;;  %v11458_v46 = vld [vmem:[#allocation11 + $0x674] sm:$0xf]  ;;  %v4843_v59 = vpop.f32.mrf.mxu1  ;;  %v9904_v34 = vld [vmem:[#allocation11 + $0x638] sm:$0xf0] }
 0x332   :  { %6087 = vmatpush.bf16.msrb.mxu1 %v10295_v23  ;;  %6101 = vmatpush.bf16.msrb.mxu3 %v10359_v41  ;;  %v9864_v23 = vld [vmem:[#allocation11 + $0x5e8] sm:$0xf0]  ;;  %v10271_v41 = vor.u32 %v11543_v51, %v10270_v47  ;;  %v4844_v56 = vadd.f32 %v4843_v59, %v4830_v36  ;;  %v9939_v32 = vor.u32 %v11458_v46, %v9936_v5  ;;  %v11454_v51 = vld [vmem:[#allocation11 + $0x654] sm:$0xf] }
 0x333   :  { %v9995_v47 = vor.u32 %v11472_v44, %v9992_v50  ;;  %v9923_v61 = vor.u32 %v11454_v51, %v9920_v55  ;;  %v9912_v36 = vld [vmem:[#allocation11 + $0x648] sm:$0xf0]  ;;  %v11506_v51 = vld [vmem:[#allocation11 + $0x7f4] sm:$0xf]  ;;  %v10128_v55 = vld [vmem:[#allocation11 + $0x7f8] sm:$0xf0] }
 0x334   :  { %v9832_v46 = vld [vmem:[#allocation11 + $0x5a8] sm:$0xf0] }
 0x335   :  { %6062 = vmatpush.bf16.msra.mxu0 %v10143_v24  ;;  %6076 = vmatpush.bf16.msra.mxu2 %v10207_v3  ;;  %v4857_v24 = vpop.f32.mrf.mxu3  ;;  %v9928_v3 = vld [vmem:[#allocation11 + $0x668] sm:$0xf0]  ;;  %v9835_v63 = vor.u32 %v11432_v57, %v9832_v46  ;;  %v11444_v57 = vld [vmem:[#allocation11 + $0x604] sm:$0xf] }
 0x336   :  { %6088 = vmatpush.bf16.msrb.mxu1 %v10287_v0  ;;  %6102 = vmatpush.bf16.msrb.mxu3 %v10351_v27  ;;  %v9867_v0 = vor.u32 %v11440_v6, %v9864_v23  ;;  %v9856_v27 = vld [vmem:[#allocation11 + $0x5d8] sm:$0xf0]  ;;  %v4858_v9 = vadd.f32 %v4857_v24, %v4844_v56  ;;  %v11452_v6 = vld [vmem:[#allocation11 + $0x644] sm:$0xf]  ;;  %v11466_v56 = vld [vmem:[#allocation11 + $0x6b4] sm:$0xf] }
 0x337   :  { %v9859_v12 = vor.u32 %v11438_v60, %v9856_v27  ;;  %v11468_v23 = vld [vmem:[#allocation11 + $0x6c4] sm:$0xf]  ;;  %v9915_v59 = vor.u32 %v11452_v6, %v9912_v36  ;;  %v9896_v50 = vld [vmem:[#allocation11 + $0x628] sm:$0xf0]  ;;  %v10131_v6 = vor.u32 %v11506_v51, %v10128_v55 }
 0x338   :  { %v9880_v46 = vld [vmem:[#allocation11 + $0x608] sm:$0xf0] }
 0x339   :  { %6063 = vmatpush.bf16.msra.mxu0 %v10135_v49  ;;  %6077 = vmatpush.bf16.msra.mxu2 %v10199_v45  ;;  %v9787_v49 = vor.u32 %v11420_v14, %v9784_v26  ;;  %v9851_v45 = vor.u32 %v11436_v11, %v9848_v16  ;;  %v4869_v60 = vpop.f32.mrf.mxu0  ;;  %v11412_v26 = vld [vmem:[#allocation11 + $0x504] sm:$0xf]  ;;  %v9752_v11 = vld [vmem:[#allocation11 + $0x508] sm:$0xf0] }
 0x33a   :  { %6089 = vmatpush.bf16.msrb.mxu1 %v10279_v53  ;;  %6103 = vmatpush.bf16.msrb.mxu3 %v10343_v28  ;;  %v5006_v53 = vmax.f32 %v5002_v21, %v4858_v9  ;;  %v9931_v28 = vor.u32 %v11456_v38, %v9928_v3  ;;  %v9907_v38 = vor.u32 %v11450_v52, %v9904_v34  ;;  %v11448_v3 = vld [vmem:[#allocation11 + $0x624] sm:$0xf]  ;;  %v11522_v52 = vld [vmem:[#allocation11 + $0x874] sm:$0xf]  ;;  %v10192_v34 = vld [vmem:[#allocation11 + $0x878] sm:$0xf0] }
 0x33b   :  { %v11428_v16 = vld [vmem:[#allocation11 + $0x584] sm:$0xf]  ;;  %v9899_v48 = vor.u32 %v11448_v3, %v9896_v50 }
 0x33c   :  { %6064 = vmatmul.bf16.vlgmr.msra.gmra.mxu0 %v12416_v58  ;;  %6078 = vmatmul.bf16.vlgmr.msra.gmra.mxu2 %v12423_v42  ;;  %5010 = vst [vmem:[#allocation3 + $0x10] sm:$0x3f] %v5006_v53  ;;  %v9816_v53 = vld [vmem:[#allocation11 + $0x588] sm:$0xf0]  ;;  %v11536_v50 = vld [vmem:[#allocation11 + $0x8e4] sm:$0xf] }
 0x33d   :  { %6112 = vmatpush.bf16.msrb.mxu0 %v9811_v33  ;;  %6126 = vmatpush.bf16.msrb.mxu2 %v9875_v15  ;;  %v11434_v33 = vld [vmem:[#allocation11 + $0x5b4] sm:$0xf]  ;;  %v9840_v15 = vld [vmem:[#allocation11 + $0x5b8] sm:$0xf0] }
 0x33e   :  { %6090 = vmatpush.bf16.msrb.mxu1 %v10271_v41  ;;  %6104 = vmatpush.bf16.msrb.mxu3 %v10335_v22  ;;  %v9976_v41 = vld [vmem:[#allocation11 + $0x6c8] sm:$0xf0]  ;;  %v9779_v22 = vor.u32 %v11418_v4, %v9776_v19  ;;  %v9843_v31 = vor.u32 %v11434_v33, %v9840_v15  ;;  %v11462_v4 = vld [vmem:[#allocation11 + $0x694] sm:$0xf]  ;;  %v9952_v19 = vld [vmem:[#allocation11 + $0x698] sm:$0xf0]  ;;  %v9755_v33 = vor.u32 %v11412_v26, %v9752_v11 }
 0x33f   :  { %v9979_v5 = vor.u32 %v11468_v23, %v9976_v41  ;;  %v4883_v27 = vpop.f32.mrf.mxu2  ;;  %v9819_v15 = vor.u32 %v11428_v16, %v9816_v53  ;;  %v11488_v23 = vld [vmem:[#allocation11 + $0x764] sm:$0xf]  ;;  %v10056_v41 = vld [vmem:[#allocation11 + $0x768] sm:$0xf0]  ;;  %v11518_v16 = vld [vmem:[#allocation11 + $0x854] sm:$0xf] }
 0x340   :  { %v11500_v26 = vld [vmem:[#allocation11 + $0x7c4] sm:$0xf]  ;;  %v10176_v53 = vld [vmem:[#allocation11 + $0x858] sm:$0xf0] }
 0x341   :  { %6113 = vmatpush.bf16.msrb.mxu0 %v9803_v1  ;;  %6127 = vmatpush.bf16.msrb.mxu2 %v9867_v0  ;;  %v9968_v1 = vld [vmem:[#allocation11 + $0x6b8] sm:$0xf0]  ;;  %v9771_v0 = vor.u32 %v11416_v20, %v9768_v10  ;;  %v9955_v10 = vor.u32 %v11462_v4, %v9952_v19  ;;  %v12491_v3 = vpop.f32.mrf.mxu0  ;;  %v10179_v19 = vor.u32 %v11518_v16, %v10176_v53  ;;  %v11570_v53 = vld [vmem:[#allocation11 + $0x9f4] sm:$0xf] }
 0x342   :  { %6091 = vmatpush.bf16.msrb.mxu1 %v10263_v18  ;;  %6105 = vmatpush.bf16.msrb.mxu3 %v10327_v40  ;;  %v9760_v18 = vld [vmem:[#allocation11 + $0x518] sm:$0xf0]  ;;  %v11430_v40 = vld [vmem:[#allocation11 + $0x594] sm:$0xf]  ;;  %v9971_v24 = vor.u32 %v11466_v56, %v9968_v1 }
 0x343   :  { %v9763_v21 = vor.u32 %v11414_v37, %v9760_v18  ;;  %v11538_v56 = vld [vmem:[#allocation11 + $0x8f4] sm:$0xf]  ;;  %v10256_v1 = vld [vmem:[#allocation11 + $0x8f8] sm:$0xf0] }
 0x344   :  { %v4897_v44 = vpop.f32.mrf.mxu1  ;;  %v11486_v37 = vld [vmem:[#allocation11 + $0x754] sm:$0xf]  ;;  %v10112_v18 = vld [vmem:[#allocation11 + $0x7d8] sm:$0xf0] }
 0x345   :  { %6114 = vmatpush.bf16.msrb.mxu0 %v9795_v25  ;;  %6128 = vmatpush.bf16.msrb.mxu2 %v9859_v12  ;;  %v11464_v25 = vld [vmem:[#allocation11 + $0x6a4] sm:$0xf]  ;;  %v9960_v12 = vld [vmem:[#allocation11 + $0x6a8] sm:$0xf0]  ;;  %v10096_v4 = vld [vmem:[#allocation11 + $0x7b8] sm:$0xf0] }
 0x346   :  { %6140 = vmatpush.bf16.msra.mxu1 %v9939_v32  ;;  %6154 = vmatpush.bf16.msra.mxu3 %v10003_v17  ;;  %v9824_v32 = vld [vmem:[#allocation11 + $0x598] sm:$0xf0]  ;;  %v4884_v17 = vadd.f32 %v4883_v27, %v4869_v60  ;;  %v9963_v39 = vor.u32 %v11464_v25, %v9960_v12  ;;  %v11502_v27 = vld [vmem:[#allocation11 + $0x7d4] sm:$0xf]  ;;  %v10248_v25 = vld [vmem:[#allocation11 + $0x8e8] sm:$0xf0] }
 0x347   :  { %6092 = vmatmul.bf16.vlgmr.msrb.gmra.mxu1 %v12431_v7  ;;  %6106 = vmatmul.bf16.vlgmr.msrb.gmra.mxu3 %v12434_v2  ;;  %v9827_v14 = vor.u32 %v11430_v40, %v9824_v32  ;;  %v10048_v60 = vld [vmem:[#allocation11 + $0x758] sm:$0xf0]  ;;  %v9883_v40 = vor.u32 %v11444_v57, %v9880_v46  ;;  %v10251_v11 = vor.u32 %v11536_v50, %v10248_v25  ;;  %v10088_v57 = vld [vmem:[#allocation11 + $0x7a8] sm:$0xf0]  ;;  %v11528_v50 = vld [vmem:[#allocation11 + $0x8a4] sm:$0xf] }
 0x348   :  { %v4898_v9 = vadd.f32 %v4897_v44, %v4884_v17  ;;  %v10195_v17 = vor.u32 %v11522_v52, %v10192_v34  ;;  %v10184_v44 = vld [vmem:[#allocation11 + $0x868] sm:$0xf0]  ;;  %v10051_v12 = vor.u32 %v11486_v37, %v10048_v60  ;;  %v10160_v52 = vld [vmem:[#allocation11 + $0x838] sm:$0xf0]  ;;  %v11530_v34 = vld [vmem:[#allocation11 + $0x8b4] sm:$0xf] }
 0x349   :  { %6115 = vmatpush.bf16.msrb.mxu0 %v9787_v49  ;;  %6129 = vmatpush.bf16.msrb.mxu2 %v9851_v45  ;;  %v11446_v49 = vld [vmem:[#allocation11 + $0x614] sm:$0xf]  ;;  %v9888_v45 = vld [vmem:[#allocation11 + $0x618] sm:$0xf0]  ;;  %v10216_v25 = vld [vmem:[#allocation11 + $0x8a8] sm:$0xf0] }
 0x34a   :  { %6141 = vmatpush.bf16.msra.mxu1 %v9931_v28  ;;  %6155 = vmatpush.bf16.msra.mxu3 %v9995_v47  ;;  %v11490_v28 = vld [vmem:[#allocation11 + $0x774] sm:$0xf]  ;;  %v10064_v47 = vld [vmem:[#allocation11 + $0x778] sm:$0xf0]  ;;  %v9891_v20 = vor.u32 %v11446_v49, %v9888_v45 }
 0x34b   :  { %v10032_v49 = vld [vmem:[#allocation11 + $0x738] sm:$0xf0]  ;;  %v11498_v45 = vld [vmem:[#allocation11 + $0x7b4] sm:$0xf] }
 0x34c   :  { %v10016_v60 = vld [vmem:[#allocation11 + $0x718] sm:$0xf0] }
 0x34d   :  { %6116 = vmatpush.bf16.msrb.mxu0 %v9779_v22  ;;  %6130 = vmatpush.bf16.msrb.mxu2 %v9843_v31  ;;  %v11504_v22 = vld [vmem:[#allocation11 + $0x7e4] sm:$0xf]  ;;  %v10120_v31 = vld [vmem:[#allocation11 + $0x7e8] sm:$0xf0]  ;;  %v10320_v16 = vld [vmem:[#allocation11 + $0x978] sm:$0xf0] }
 0x34e   :  { %6142 = vmatpush.bf16.msra.mxu1 %v9923_v61  ;;  %6156 = vmatpush.bf16.msra.mxu3 %v9987_v35  ;;  %v4911_v61 = vpop.f32.mrf.mxu3  ;;  %v10067_v35 = vor.u32 %v11490_v28, %v10064_v47  ;;  %v11534_v28 = vld [vmem:[#allocation11 + $0x8d4] sm:$0xf]  ;;  %v10240_v47 = vld [vmem:[#allocation11 + $0x8d8] sm:$0xf0] }
 0x34f   :  { %v12487_v36 = vadd.f32 %v4911_v61, %v4898_v9  ;;  %v10115_v9 = vor.u32 %v11502_v27, %v10112_v18  ;;  %v12497_v61 = vpop.f32.mrf.mxu1  ;;  %v11494_v27 = vld [vmem:[#allocation11 + $0x794] sm:$0xf]  ;;  %v10080_v18 = vld [vmem:[#allocation11 + $0x798] sm:$0xf0] }
 0x351   :  { %6117 = vmatpush.bf16.msrb.mxu0 %v9771_v0  ;;  %6131 = vmatpush.bf16.msrb.mxu2 %v9835_v63  ;;  %v10059_v0 = vor.u32 %v11488_v23, %v10056_v41  ;;  %v10123_v63 = vor.u32 %v11504_v22, %v10120_v31  ;;  %v11532_v23 = vld [vmem:[#allocation11 + $0x8c4] sm:$0xf]  ;;  %v10232_v41 = vld [vmem:[#allocation11 + $0x8c8] sm:$0xf0] }
 0x352   :  { %6143 = vmatpush.bf16.msra.mxu1 %v9915_v59  ;;  %6157 = vmatpush.bf16.msra.mxu3 %v9979_v5  ;;  %v11460_v59 = vld [vmem:[#allocation11 + $0x684] sm:$0xf]  ;;  %v9944_v5 = vld [vmem:[#allocation11 + $0x688] sm:$0xf0] }
 0x353   :  { %v9947_v32 = vor.u32 %v11460_v59, %v9944_v5  ;;  %v11480_v31 = vld [vmem:[#allocation11 + $0x724] sm:$0xf]  ;;  %v10235_v59 = vor.u32 %v11532_v23, %v10232_v41  ;;  %v11514_v5 = vld [vmem:[#allocation11 + $0x834] sm:$0xf]  ;;  %v10312_v41 = vld [vmem:[#allocation11 + $0x968] sm:$0xf0] }
 0x354   :  { %v11552_v23 = vld [vmem:[#allocation11 + $0x964] sm:$0xf] }
 0x355   :  { %6118 = vmatpush.bf16.msrb.mxu0 %v9763_v21  ;;  %6132 = vmatpush.bf16.msrb.mxu2 %v9827_v14  ;;  %v11484_v21 = vld [vmem:[#allocation11 + $0x744] sm:$0xf]  ;;  %v10040_v14 = vld [vmem:[#allocation11 + $0x748] sm:$0xf0] }
 0x356   :  { %6144 = vmatpush.bf16.msra.mxu1 %v9907_v38  ;;  %6158 = vmatpush.bf16.msra.mxu3 %v9971_v24  ;;  %v10259_v38 = vor.u32 %v11538_v56, %v10256_v1  ;;  %v11520_v24 = vld [vmem:[#allocation11 + $0x864] sm:$0xf]  ;;  %v10043_v51 = vor.u32 %v11484_v21, %v10040_v14  ;;  %v10224_v56 = vld [vmem:[#allocation11 + $0x8b8] sm:$0xf0]  ;;  %v12500_v1 = vpop.f32.mrf.mxu3  ;;  %v10083_v21 = vor.u32 %v11494_v27, %v10080_v18 }
 0x357   :  { %v11476_v14 = vld [vmem:[#allocation11 + $0x704] sm:$0xf] }
 0x359   :  { %6119 = vmatpush.bf16.msrb.mxu0 %v9755_v33  ;;  %6133 = vmatpush.bf16.msrb.mxu2 %v9819_v15  ;;  %v10243_v33 = vor.u32 %v11534_v28, %v10240_v47  ;;  %v11516_v15 = vld [vmem:[#allocation11 + $0x844] sm:$0xf]  ;;  %v10384_v28 = vld [vmem:[#allocation11 + $0x9f8] sm:$0xf0] }
 0x35a   :  { %6145 = vmatpush.bf16.msra.mxu1 %v9899_v48  ;;  %6159 = vmatpush.bf16.msra.mxu3 %v9963_v39  ;;  %v11482_v48 = vld [vmem:[#allocation11 + $0x734] sm:$0xf]  ;;  %v12493_v39 = vpop.f32.mrf.mxu2 }
 0x35c   :  { %6120 = vmatmul.bf16.vlgmr.msrb.gmra.mxu0 %v12322_v62  ;;  %6134 = vmatmul.bf16.vlgmr.msrb.gmra.mxu2 %v12324_v8  ;;  %v10104_v62 = vld [vmem:[#allocation11 + $0x7c8] sm:$0xf0]  ;;  %v10187_v8 = vor.u32 %v11520_v24, %v10184_v44 }
 0x35d   :  { %6168 = vmatpush.bf16.msra.mxu0 %v10067_v35  ;;  %6182 = vmatpush.bf16.msra.mxu2 %v10131_v6  ;;  %v10107_v55 = vor.u32 %v11500_v26, %v10104_v62  ;;  %v4925_v35 = vpop.f32.mrf.mxu0  ;;  %v10168_v6 = vld [vmem:[#allocation11 + $0x848] sm:$0xf0]  ;;  %v11492_v62 = vld [vmem:[#allocation11 + $0x784] sm:$0xf] }
 0x35e   :  { %6146 = vmatpush.bf16.msra.mxu1 %v9891_v20  ;;  %6160 = vmatpush.bf16.msra.mxu3 %v9955_v10  ;;  %v4926_v22 = vadd.f32 %v4925_v35, %v12487_v36  ;;  %v10024_v20 = vld [vmem:[#allocation11 + $0x728] sm:$0xf0]  ;;  %v11496_v10 = vld [vmem:[#allocation11 + $0x7a4] sm:$0xf]  ;;  %v10171_v46 = vor.u32 %v11516_v15, %v10168_v6  ;;  %v10387_v35 = vor.u32 %v11570_v53, %v10384_v28  ;;  %v11542_v28 = vld [vmem:[#allocation11 + $0x914] sm:$0xf] }
 0x35f   :  { %v10027_v36 = vor.u32 %v11480_v31, %v10024_v20  ;;  %v10152_v44 = vld [vmem:[#allocation11 + $0x828] sm:$0xf0]  ;;  %v11508_v20 = vld [vmem:[#allocation11 + $0x804] sm:$0xf] }
 0x360   :  { %v10008_v26 = vld [vmem:[#allocation11 + $0x708] sm:$0xf0] }
 0x361   :  { %6169 = vmatpush.bf16.msra.mxu0 %v10059_v0  ;;  %6183 = vmatpush.bf16.msra.mxu2 %v10123_v63  ;;  %v10091_v0 = vor.u32 %v11496_v10, %v10088_v57  ;;  %v11478_v63 = vld [vmem:[#allocation11 + $0x714] sm:$0xf]  ;;  %v10136_v10 = vld [vmem:[#allocation11 + $0x808] sm:$0xf0]  ;;  %v11524_v57 = vld [vmem:[#allocation11 + $0x884] sm:$0xf] }
 0x362   :  { %6147 = vmatpush.bf16.msra.mxu1 %v9883_v40  ;;  %6161 = vmatpush.bf16.msra.mxu3 %v9947_v32  ;;  %v4939_v37 = vpop.f32.mrf.mxu2  ;;  %v10163_v32 = vor.u32 %v11514_v5, %v10160_v52  ;;  %v11550_v52 = vld [vmem:[#allocation11 + $0x954] sm:$0xf] }
 0x363   :  { %v4940_v40 = vadd.f32 %v4939_v37, %v4926_v22  ;;  %v11568_v22 = vld [vmem:[#allocation11 + $0x9e4] sm:$0xf]  ;;  %v4886_v37 = vadd.f32 %v12493_v39, %v12491_v3 }
 0x364   :  { %v4953_v24 = vpop.f32.mrf.mxu1 }
 0x365   :  { %6170 = vmatpush.bf16.msra.mxu0 %v10051_v12  ;;  %6184 = vmatpush.bf16.msra.mxu2 %v10115_v9  ;;  %v4954_v12 = vadd.f32 %v4953_v24, %v4940_v40  ;;  %v10019_v9 = vor.u32 %v11478_v63, %v10016_v60  ;;  %v4927_v60 = vpop.f32.mrf.mxu0  ;;  %v11548_v40 = vld [vmem:[#allocation11 + $0x944] sm:$0xf]  ;;  %v4900_v24 = vadd.f32 %v12497_v61, %v4886_v37 }
 0x366   :  { %6196 = vmatpush.bf16.msrb.mxu1 %v10195_v17  ;;  %6210 = vmatpush.bf16.msrb.mxu3 %v10259_v38  ;;  %v10227_v17 = vor.u32 %v11530_v34, %v10224_v56  ;;  %v11512_v38 = vld [vmem:[#allocation11 + $0x824] sm:$0xf]  ;;  %v10304_v34 = vld [vmem:[#allocation11 + $0x958] sm:$0xf0]  ;;  %v11566_v56 = vld [vmem:[#allocation11 + $0x9d4] sm:$0xf] }
 0x367   :  { %6148 = vmatmul.bf16.vlgmr.msra.gmra.mxu1 %v12344_v30  ;;  %6162 = vmatmul.bf16.vlgmr.msra.gmra.mxu3 %v12354_v29  ;;  %v10035_v30 = vor.u32 %v11482_v48, %v10032_v49  ;;  %v10099_v29 = vor.u32 %v11498_v45, %v10096_v4  ;;  %v10155_v47 = vor.u32 %v11512_v38, %v10152_v44  ;;  %v10144_v48 = vld [vmem:[#allocation11 + $0x818] sm:$0xf0]  ;;  %v11526_v49 = vld [vmem:[#allocation11 + $0x894] sm:$0xf]  ;;  %v10360_v38 = vld [vmem:[#allocation11 + $0x9c8] sm:$0xf0] }
 0x368   :  { %v10208_v45 = vld [vmem:[#allocation11 + $0x898] sm:$0xf0]  ;;  %v10011_v4 = vor.u32 %v11476_v14, %v10008_v26  ;;  %v10307_v27 = vor.u32 %v11550_v52, %v10304_v34 }
 0x369   :  { %6171 = vmatpush.bf16.msra.mxu0 %v10043_v51  ;;  %6185 = vmatpush.bf16.msra.mxu2 %v10107_v55  ;;  %v10219_v51 = vor.u32 %v11528_v50, %v10216_v25  ;;  %v11510_v55 = vld [vmem:[#allocation11 + $0x814] sm:$0xf]  ;;  %v10211_v31 = vor.u32 %v11526_v49, %v10208_v45  ;;  %v10288_v44 = vld [vmem:[#allocation11 + $0x938] sm:$0xf0] }
 0x36a   :  { %6197 = vmatpush.bf16.msrb.mxu1 %v10187_v8  ;;  %6211 = vmatpush.bf16.msrb.mxu3 %v10251_v11  ;;  %v10072_v8 = vld [vmem:[#allocation11 + $0x788] sm:$0xf0]  ;;  %v11554_v11 = vld [vmem:[#allocation11 + $0x974] sm:$0xf]  ;;  %v10352_v25 = vld [vmem:[#allocation11 + $0x9b8] sm:$0xf0] }
 0x36b   :  { %v10323_v15 = vor.u32 %v11554_v11, %v10320_v16  ;;  %v11562_v50 = vld [vmem:[#allocation11 + $0x9b4] sm:$0xf]  ;;  %v11560_v11 = vld [vmem:[#allocation11 + $0x9a4] sm:$0xf]  ;;  %v10344_v16 = vld [vmem:[#allocation11 + $0x9a8] sm:$0xf0] }
 0x36c   :  { %v10355_v61 = vor.u32 %v11562_v50, %v10352_v25 }
 0x36d   :  { %6172 = vmatpush.bf16.msra.mxu0 %v10035_v30  ;;  %6186 = vmatpush.bf16.msra.mxu2 %v10099_v29  ;;  %v10376_v30 = vld [vmem:[#allocation11 + $0x9e8] sm:$0xf0]  ;;  %v10147_v29 = vor.u32 %v11510_v55, %v10144_v48  ;;  %v11558_v55 = vld [vmem:[#allocation11 + $0x994] sm:$0xf]  ;;  %v10336_v48 = vld [vmem:[#allocation11 + $0x998] sm:$0xf0] }
 0x36e   :  { %6198 = vmatpush.bf16.msrb.mxu1 %v10179_v19  ;;  %6212 = vmatpush.bf16.msrb.mxu3 %v10243_v33  ;;  %v10075_v19 = vor.u32 %v11492_v62, %v10072_v8  ;;  %v4967_v33 = vpop.f32.mrf.mxu3  ;;  %v10379_v5 = vor.u32 %v11568_v22, %v10376_v30  ;;  %v11544_v62 = vld [vmem:[#allocation11 + $0x924] sm:$0xf]  ;;  %v10280_v8 = vld [vmem:[#allocation11 + $0x928] sm:$0xf0] }
 0x36f   :  { %v4968_v6 = vadd.f32 %v4967_v33, %v4954_v12  ;;  %v4914_v12 = vadd.f32 %v12500_v1, %v4900_v24  ;;  %v10272_v1 = vld [vmem:[#allocation11 + $0x918] sm:$0xf0]  ;;  %v10339_v33 = vor.u32 %v11558_v55, %v10336_v48 }
 0x370   :  { %v11579_v55 = vld [vmem:[#allocation14 + $0x38] sm:$0xff] }
 0x371   :  { %6173 = vmatpush.bf16.msra.mxu0 %v10027_v36  ;;  %6187 = vmatpush.bf16.msra.mxu2 %v10091_v0  ;;  %v10368_v36 = vld [vmem:[#allocation11 + $0x9d8] sm:$0xf0]  ;;  %v10139_v0 = vor.u32 %v11508_v20, %v10136_v10  ;;  %v4928_v14 = vadd.f32 %v4927_v60, %v4914_v12 }
 0x372   :  { %6199 = vmatpush.bf16.msrb.mxu1 %v10171_v46  ;;  %6213 = vmatpush.bf16.msrb.mxu3 %v10235_v59  ;;  %v10200_v46 = vld [vmem:[#allocation11 + $0x888] sm:$0xf0]  ;;  %v10315_v59 = vor.u32 %v11552_v23, %v10312_v41  ;;  %v10371_v18 = vor.u32 %v11566_v56, %v10368_v36  ;;  %v11556_v23 = vld [vmem:[#allocation11 + $0x984] sm:$0xf]  ;;  %v11587_v48 = vld [vmem:[#allocation14 + $0x78] sm:$0xff] }
 0x373   :  { %v10203_v63 = vor.u32 %v11524_v57, %v10200_v46  ;;  %v10328_v41 = vld [vmem:[#allocation11 + $0x988] sm:$0xf0]  ;;  %v5003_v57 = vld [vmem:[#allocation3 + $0x8] sm:$0x3f] }
 0x375   :  { %6174 = vmatpush.bf16.msra.mxu0 %v10019_v9  ;;  %6188 = vmatpush.bf16.msra.mxu2 %v10083_v21 }
 0x376   :  { %6200 = vmatpush.bf16.msrb.mxu1 %v10163_v32  ;;  %6214 = vmatpush.bf16.msrb.mxu3 %v10227_v17  ;;  %v10296_v32 = vld [vmem:[#allocation11 + $0x948] sm:$0xf0]  ;;  %v11564_v17 = vld [vmem:[#allocation11 + $0x9c4] sm:$0xf] }
 0x377   :  { %v10299_v3 = vor.u32 %v11548_v40, %v10296_v32  ;;  %v10363_v39 = vor.u32 %v11564_v17, %v10360_v38 }
 0x379   :  { %6175 = vmatpush.bf16.msra.mxu0 %v10011_v4  ;;  %6189 = vmatpush.bf16.msra.mxu2 %v10075_v19  ;;  %v4981_v9 = vpop.f32.mrf.mxu0  ;;  %v4969_v4 = vpop.f32.mrf.mxu3  ;;  %v10275_v19 = vor.u32 %v11542_v28, %v10272_v1 }
 0x37a   :  { %6201 = vmatpush.bf16.msrb.mxu1 %v10155_v47  ;;  %6215 = vmatpush.bf16.msrb.mxu3 %v10219_v51  ;;  %v4982_v26 = vadd.f32 %v4981_v9, %v4968_v6  ;;  %v4955_v47 = vpop.f32.mrf.mxu1  ;;  %v10264_v6 = vld [vmem:[#allocation11 + $0x908] sm:$0xf0] }
 0x37c   :  { %6176 = vmatmul.bf16.vlgmr.msra.gmra.mxu0 %v12368_v13  ;;  %6190 = vmatmul.bf16.vlgmr.msra.gmra.mxu2 %v12370_v54  ;;  %v11546_v13 = vld [vmem:[#allocation11 + $0x934] sm:$0xf]  ;;  %v4941_v54 = vpop.f32.mrf.mxu2 }
 0x37d   :  { %6224 = vmatpush.bf16.msrb.mxu0 %v10323_v15  ;;  %6238 = vmatpush.bf16.msrb.mxu2 %v10387_v35  ;;  %v10291_v21 = vor.u32 %v11546_v13, %v10288_v44  ;;  %v4942_v53 = vadd.f32 %v4941_v54, %v4928_v14  ;;  %v11540_v15 = vld [vmem:[#allocation11 + $0x904] sm:$0xf]  ;;  %v5000_v14 = vld [vmem:[#allocation3] sm:$0xff] }
 0x37e   :  { %6202 = vmatpush.bf16.msrb.mxu1 %v10147_v29  ;;  %6216 = vmatpush.bf16.msrb.mxu3 %v10211_v31  ;;  %v10267_v29 = vor.u32 %v11540_v15, %v10264_v6  ;;  %v10331_v31 = vor.u32 %v11556_v23, %v10328_v41  ;;  %v11602_v15 = vld [vmem:[#allocation14 + $0xf0] sm:$0xff]  ;;  %v11585_v6 = vld [vmem:[#allocation14 + $0x68] sm:$0xff] }
 0x37f   :  { %v4956_v49 = vadd.f32 %v4955_v47, %v4942_v53  ;;  %v11593_v23 = vld [vmem:[#allocation14 + $0xa8] sm:$0xff] }
 0x380   :  { %v11601_v41 = vld [vmem:[#allocation14 + $0xe8] sm:$0xff] }
 0x381   :  { %6225 = vmatpush.bf16.msrb.mxu0 %v10315_v59  ;;  %6239 = vmatpush.bf16.msrb.mxu2 %v10379_v5  ;;  %v4983_v35 = vpop.f32.mrf.mxu0  ;;  %v4970_v22 = vadd.f32 %v4969_v4, %v4956_v49  ;;  %v11595_v49 = vld [vmem:[#allocation14 + $0xb8] sm:$0xff] }
 0x382   :  { %6203 = vmatpush.bf16.msrb.mxu1 %v10139_v0  ;;  %6217 = vmatpush.bf16.msrb.mxu3 %v10203_v63  ;;  %v11603_v4 = vld [vmem:[#allocation14 + $0xf8] sm:$0xff] }
 0x383   :  { %v4984_v30 = vadd.f32 %v4983_v35, %v4970_v22  ;;  %v11577_v35 = vld [vmem:[#allocation14 + $0x28] sm:$0xff]  ;;  %v11576_v22 = vld [vmem:[#allocation14 + $0x20] sm:$0xff] }
 0x384   :  { %v4995_v51 = vpop.f32.mrf.mxu2  ;;  %v5981_v59 = vpop.f32.mrf.mxu1 }
 0x385   :  { %6226 = vmatpush.bf16.msrb.mxu0 %v10307_v27  ;;  %6240 = vmatpush.bf16.msrb.mxu2 %v10371_v18  ;;  %v12510_v45 = vadd.f32 %v4995_v51, %v4982_v26  ;;  %v6254_v51 = vld [vmem:[#allocation3 + $0x10] sm:$0x3f] }
 0x386   :  { %6204 = vmatmul.bf16.vlgmr.msrb.gmra.mxu1 %v12416_v58  ;;  %6218 = vmatmul.bf16.vlgmr.msrb.gmra.mxu3 %v12423_v42  ;;  %v10283_v58 = vor.u32 %v11544_v62, %v10280_v8  ;;  %v10347_v42 = vor.u32 %v11560_v11, %v10344_v16  ;;  %v5004_v62 = vmax.f32 %v5000_v14, %v12481_v43  ;;  %v11578_v43 = vld [vmem:[#allocation14 + $0x30] sm:$0xff]  ;;  %v11633_v14 = vld [vmem:[#allocation14 + $0x1e8] sm:$0xff] }
 0x387   :  { %7220 = vmatpush.bf16.msra.mxu1 %v11579_v55  ;;  %7233 = vmatpush.bf16.msra.mxu3 %v11587_v48  ;;  %v11631_v55 = vld [vmem:[#allocation14 + $0x1d8] sm:$0xff] }
 0x389   :  { %6227 = vmatpush.bf16.msrb.mxu0 %v10299_v3  ;;  %6241 = vmatpush.bf16.msrb.mxu2 %v10363_v39 }
 0x38a   :  { %v5995_v5 = vpop.f32.mrf.mxu3 }
 0x38b   :  { %v5996_v63 = vadd.f32 %v5995_v5, %v5981_v59  ;;  %7221 = vmatpush.bf16.msra.mxu1 %v11578_v43  ;;  %v11574_v59 = vld [vmem:[#allocation14 + $0x10] sm:$0xff] }
 0x38c   :  { %v4997_v20 = vpop.f32.mrf.mxu2  ;;  %v5983_v52 = vpop.f32.mrf.mxu1  ;;  %v11582_v5 = vld [vmem:[#allocation14 + $0x50] sm:$0xff] }
 0x38d   :  { %6228 = vmatpush.bf16.msrb.mxu0 %v10291_v21  ;;  %6242 = vmatpush.bf16.msrb.mxu2 %v10355_v61  ;;  %v4998_v10 = vadd.f32 %v4997_v20, %v4984_v30  ;;  %v11584_v30 = vld [vmem:[#allocation14 + $0x60] sm:$0xff]  ;;  %v11575_v20 = vld [vmem:[#allocation14 + $0x18] sm:$0xff] }
 0x38f   :  { %v5007_v46 = vmax.f32 %v5003_v57, %v4998_v10  ;;  %7222 = vmatpush.bf16.msra.mxu1 %v11577_v35  ;;  %v11583_v10 = vld [vmem:[#allocation14 + $0x58] sm:$0xff]  ;;  %v11622_v35 = vld [vmem:[#allocation14 + $0x190] sm:$0xff] }
 0x390   :  { %v11591_v57 = vld [vmem:[#allocation14 + $0x98] sm:$0xff] }
 0x391   :  { %6229 = vmatpush.bf16.msrb.mxu0 %v10283_v58  ;;  %6243 = vmatpush.bf16.msrb.mxu2 %v10347_v42  ;;  %5011 = vst [vmem:[#allocation3 + $0x8] sm:$0x3f] %v5007_v46  ;;  %v11599_v46 = vld [vmem:[#allocation14 + $0xd8] sm:$0xff] }
 0x392   :  { %v5997_v56 = vpop.f32.mrf.mxu3 }
 0x393   :  { %v5998_v32 = vadd.f32 %v5997_v56, %v5983_v52  ;;  %7223 = vmatpush.bf16.msra.mxu1 %v11576_v22  ;;  %v11590_v52 = vld [vmem:[#allocation14 + $0x90] sm:$0xff]  ;;  %v11573_v56 = vld [vmem:[#allocation14 + $0x8] sm:$0xff] }
 0x395   :  { %6230 = vmatpush.bf16.msrb.mxu0 %v10275_v19  ;;  %6244 = vmatpush.bf16.msrb.mxu2 %v10339_v33  ;;  %v11586_v19 = vld [vmem:[#allocation14 + $0x70] sm:$0xff] }
 0x396   :  { %7234 = vmatpush.bf16.msra.mxu3 %v11586_v19  ;;  %v11594_v33 = vld [vmem:[#allocation14 + $0xb0] sm:$0xff] }
 0x397   :  { %7224 = vmatpush.bf16.msra.mxu1 %v11575_v20  ;;  %v11629_v20 = vld [vmem:[#allocation14 + $0x1c8] sm:$0xff] }
 0x399   :  { %6231 = vmatpush.bf16.msrb.mxu0 %v10267_v29  ;;  %6245 = vmatpush.bf16.msrb.mxu2 %v10331_v31  ;;  %v6009_v34 = vpop.f32.mrf.mxu0  ;;  %v11592_v29 = vld [vmem:[#allocation14 + $0xa0] sm:$0xff] }
 0x39a   :  { %v6010_v60 = vadd.f32 %v6009_v34, %v5996_v63  ;;  %7235 = vmatpush.bf16.msra.mxu3 %v11585_v6  ;;  %v11600_v31 = vld [vmem:[#allocation14 + $0xe0] sm:$0xff]  ;;  %v11598_v34 = vld [vmem:[#allocation14 + $0xd0] sm:$0xff]  ;;  %v11589_v63 = vld [vmem:[#allocation14 + $0x88] sm:$0xff] }
 0x39b   :  { %7225 = vmatpush.bf16.msra.mxu1 %v11574_v59  ;;  %v11630_v6 = vld [vmem:[#allocation14 + $0x1d0] sm:$0xff]  ;;  %v11612_v59 = vld [vmem:[#allocation14 + $0x140] sm:$0xff] }
 0x39c   :  { %6232 = vmatmul.bf16.vlgmr.msrb.gmra.mxu0 %v12431_v7  ;;  %6246 = vmatmul.bf16.vlgmr.msrb.gmra.mxu2 %v12434_v2 }
 0x39d   :  { %7246 = vmatpush.bf16.msra.mxu0 %v11595_v49  ;;  %7259 = vmatpush.bf16.msra.mxu2 %v11603_v4  ;;  %v11606_v49 = vld [vmem:[#allocation14 + $0x110] sm:$0xff] }
 0x39e   :  { %7236 = vmatpush.bf16.msra.mxu3 %v11584_v30  ;;  %v11614_v4 = vld [vmem:[#allocation14 + $0x150] sm:$0xff] }
 0x39f   :  { %v6023_v36 = vpop.f32.mrf.mxu2  ;;  %7226 = vmatpush.bf16.msra.mxu1 %v11573_v56 }
 0x3a0   :  { %v6024_v27 = vadd.f32 %v6023_v36, %v6010_v60  ;;  %v11581_v36 = vld [vmem:[#allocation14 + $0x48] sm:$0xff]  ;;  %v11572_v60 = vld [vmem:[#allocation14] sm:$0xff] }
 0x3a1   :  { %v6011_v37 = vpop.f32.mrf.mxu0  ;;  %7247 = vmatpush.bf16.msra.mxu0 %v11594_v33  ;;  %7260 = vmatpush.bf16.msra.mxu2 %v11602_v15 }
 0x3a2   :  { %v6012_v7 = vadd.f32 %v6011_v37, %v5998_v32  ;;  %7237 = vmatpush.bf16.msra.mxu3 %v11583_v10  ;;  %v11597_v37 = vld [vmem:[#allocation14 + $0xc8] sm:$0xff]  ;;  %v11588_v32 = vld [vmem:[#allocation14 + $0x80] sm:$0xff] }
 0x3a3   :  { %7227 = vmatpush.bf16.msra.mxu1 %v11572_v60 }
 0x3a4   :  { %v6037_v0 = vpop.f32.mrf.mxu1 }
 0x3a5   :  { %v6038_v17 = vadd.f32 %v6037_v0, %v6024_v27  ;;  %7248 = vmatpush.bf16.msra.mxu0 %v11593_v23  ;;  %7261 = vmatpush.bf16.msra.mxu2 %v11601_v41  ;;  %v11580_v27 = vld [vmem:[#allocation14 + $0x40] sm:$0xff]  ;;  %v11605_v23 = vld [vmem:[#allocation14 + $0x108] sm:$0xff] }
 0x3a6   :  { %7238 = vmatpush.bf16.msra.mxu3 %v11582_v5  ;;  %v11613_v41 = vld [vmem:[#allocation14 + $0x148] sm:$0xff] }
 0x3a7   :  { %v6025_v40 = vpop.f32.mrf.mxu2 }
 0x3a8   :  { %v6026_v3 = vadd.f32 %v6025_v40, %v6012_v7  ;;  %v11619_v40 = vld [vmem:[#allocation14 + $0x178] sm:$0xff] }
 0x3a9   :  { %7249 = vmatpush.bf16.msra.mxu0 %v11592_v29  ;;  %7262 = vmatpush.bf16.msra.mxu2 %v11600_v31  ;;  %v11635_v7 = vld [vmem:[#allocation14 + $0x1f8] sm:$0xff]  ;;  %v11621_v31 = vld [vmem:[#allocation14 + $0x188] sm:$0xff] }
 0x3aa   :  { %v6051_v18 = vpop.f32.mrf.mxu3  ;;  %7239 = vmatpush.bf16.msra.mxu3 %v11581_v36  ;;  %v11620_v36 = vld [vmem:[#allocation14 + $0x180] sm:$0xff] }
 0x3ab   :  { %v6052_v2 = vadd.f32 %v6051_v18, %v6038_v17  ;;  %v11611_v18 = vld [vmem:[#allocation14 + $0x138] sm:$0xff] }
 0x3ac   :  { %v6039_v38 = vpop.f32.mrf.mxu1  ;;  %7272 = vmatpush.bf16.msrb.mxu1 %v11611_v18 }
 0x3ad   :  { %v6040_v54 = vadd.f32 %v6039_v38, %v6026_v3  ;;  %7250 = vmatpush.bf16.msra.mxu0 %v11591_v57  ;;  %7263 = vmatpush.bf16.msra.mxu2 %v11599_v46  ;;  %v11596_v38 = vld [vmem:[#allocation14 + $0xc0] sm:$0xff]  ;;  %v11610_v3 = vld [vmem:[#allocation14 + $0x130] sm:$0xff] }
 0x3ae   :  { %7240 = vmatpush.bf16.msra.mxu3 %v11580_v27  ;;  %v11604_v46 = vld [vmem:[#allocation14 + $0x100] sm:$0xff] }
 0x3b0   :  { %7273 = vmatpush.bf16.msrb.mxu1 %v11610_v3 }
 0x3b1   :  { %7251 = vmatpush.bf16.msra.mxu0 %v11590_v52  ;;  %7264 = vmatpush.bf16.msra.mxu2 %v11598_v34 }
 0x3b2   :  { %v6053_v39 = vpop.f32.mrf.mxu3  ;;  %7285 = vmatpush.bf16.msrb.mxu3 %v11619_v40  ;;  %v5001_v40 = vld [vmem:[#allocation3 + $0x18] sm:$0xff] }
 0x3b3   :  { %v6054_v21 = vadd.f32 %v6053_v39, %v6040_v54  ;;  %v11634_v54 = vld [vmem:[#allocation14 + $0x1f0] sm:$0xff] }
 0x3b5   :  { %7252 = vmatpush.bf16.msra.mxu0 %v11589_v63  ;;  %7265 = vmatpush.bf16.msra.mxu2 %v11597_v37  ;;  %v6268_v63 = vld [vmem:[#allocation12] sm:$0x3] }
 0x3b6   :  { %v6270_v18 = vperm.slane %v6268_v63, 0  ;;  %v6271_v3 = vperm.slane %v6268_v63, 1  ;;  %v11646_v63 = vld [vmem:[#allocation14 + $0x250] sm:$0xff] }
 0x3b9   :  { %v6065_v24 = vpop.f32.mrf.mxu0  ;;  %7253 = vmatpush.bf16.msra.mxu0 %v11588_v32  ;;  %7266 = vmatpush.bf16.msra.mxu2 %v11596_v38  ;;  %v5005_v38 = vmax.f32 %v5001_v40, %v12510_v45  ;;  %v11653_v40 = vld [vmem:[#allocation14 + $0x288] sm:$0xff] }
 0x3ba   :  { %v6066_v13 = vadd.f32 %v6065_v24, %v6052_v2  ;;  %v11627_v24 = vld [vmem:[#allocation14 + $0x1b8] sm:$0xff]  ;;  %v11618_v2 = vld [vmem:[#allocation14 + $0x170] sm:$0xff] }
 0x3bb   :  { %7286 = vmatpush.bf16.msrb.mxu3 %v11618_v2 }
 0x3bd   :  { %7298 = vmatpush.bf16.msrb.mxu0 %v11627_v24  ;;  %7311 = vmatpush.bf16.msrb.mxu2 %v11635_v7 }
 0x3bf   :  { %v6079_v44 = vpop.f32.mrf.mxu2 }
 0x3c0   :  { %v6080_v50 = vadd.f32 %v6079_v44, %v6066_v13  ;;  %v11626_v44 = vld [vmem:[#allocation14 + $0x1b0] sm:$0xff] }
 0x3c1   :  { %v6067_v12 = vpop.f32.mrf.mxu0  ;;  %7299 = vmatpush.bf16.msrb.mxu0 %v11626_v44  ;;  %7312 = vmatpush.bf16.msrb.mxu2 %v11634_v54 }
 0x3c2   :  { %v6068_v26 = vadd.f32 %v6067_v12, %v6054_v21  ;;  %v11625_v21 = vld [vmem:[#allocation14 + $0x1a8] sm:$0xff] }
 0x3c4   :  { %v6093_v25 = vpop.f32.mrf.mxu1 }
 0x3c5   :  { %v6094_v9 = vadd.f32 %v6093_v25, %v6080_v50  ;;  %v11609_v50 = vld [vmem:[#allocation14 + $0x128] sm:$0xff]  ;;  %7300 = vmatpush.bf16.msrb.mxu0 %v11625_v21  ;;  %7313 = vmatpush.bf16.msrb.mxu2 %v11633_v14 }
 0x3c6   :  { %7274 = vmatpush.bf16.msrb.mxu1 %v11609_v50 }
 0x3c7   :  { %v6081_v8 = vpop.f32.mrf.mxu2 }
 0x3c8   :  { %v6082_v16 = vadd.f32 %v6081_v8, %v6068_v26 }
 0x3ca   :  { %v6107_v61 = vpop.f32.mrf.mxu3 }
 0x3cb   :  { %v6108_v11 = vadd.f32 %v6107_v61, %v6094_v9  ;;  %v11617_v9 = vld [vmem:[#allocation14 + $0x168] sm:$0xff]  ;;  %v11608_v61 = vld [vmem:[#allocation14 + $0x120] sm:$0xff] }
 0x3cc   :  { %v6095_v58 = vpop.f32.mrf.mxu1  ;;  %7287 = vmatpush.bf16.msrb.mxu3 %v11617_v9  ;;  %7275 = vmatpush.bf16.msrb.mxu1 %v11608_v61  ;;  %v6255_v61 = vld [vmem:[#allocation3 + $0x8] sm:$0x3f] }
 0x3cd   :  { %v12515_v53 = vmax.f32 %v5004_v62, %v6108_v11  ;;  %v6096_v42 = vadd.f32 %v6095_v58, %v6082_v16  ;;  %v11616_v62 = vld [vmem:[#allocation14 + $0x160] sm:$0xff] }
 0x3ce   :  { %v11624_v16 = vld [vmem:[#allocation14 + $0x1a0] sm:$0xff] }
 0x3cf   :  { %6260 = vst [vmem:[#allocation3] sm:$0xff] %v12515_v53  ;;  %v11632_v58 = vld [vmem:[#allocation14 + $0x1e0] sm:$0xff]  ;;  %7301 = vmatpush.bf16.msrb.mxu0 %v11624_v16 }
 0x3d0   :  { %7288 = vmatpush.bf16.msrb.mxu3 %v11616_v62  ;;  %7314 = vmatpush.bf16.msrb.mxu2 %v11632_v58 }
 0x3d2   :  { %v6109_v28 = vpop.f32.mrf.mxu3 }
 0x3d3   :  { %v6110_v47 = vadd.f32 %v6109_v28, %v6096_v42  ;;  %v11607_v42 = vld [vmem:[#allocation14 + $0x118] sm:$0xff] }
 0x3d4   :  { %7276 = vmatpush.bf16.msrb.mxu1 %v11607_v42  ;;  %7315 = vmatpush.bf16.msrb.mxu2 %v11631_v55  ;;  %v11659_v42 = vld [vmem:[#allocation14 + $0x2b8] sm:$0xff]  ;;  %v11650_v55 = vld [vmem:[#allocation14 + $0x270] sm:$0xff] }
 0x3d5   :  { %v6258_v1 = vmax.f32 %v6254_v51, %v6110_v47  ;;  %v11615_v51 = vld [vmem:[#allocation14 + $0x158] sm:$0xff] }
 0x3d6   :  { %7289 = vmatpush.bf16.msrb.mxu3 %v11615_v51 }
 0x3d7   :  { %6262 = vst [vmem:[#allocation3 + $0x10] sm:$0x3f] %v6258_v1  ;;  %v11623_v1 = vld [vmem:[#allocation14 + $0x198] sm:$0xff] }
 0x3d8   :  { %7302 = vmatpush.bf16.msrb.mxu0 %v11623_v1  ;;  %7277 = vmatpush.bf16.msrb.mxu1 %v11606_v49  ;;  %v11642_v1 = vld [vmem:[#allocation14 + $0x230] sm:$0xff] }
 0x3d9   :  { %v6121_v0 = vpop.f32.mrf.mxu0  ;;  %7316 = vmatpush.bf16.msrb.mxu2 %v11630_v6  ;;  %v11658_v49 = vld [vmem:[#allocation14 + $0x2b0] sm:$0xff]  ;;  %v11657_v6 = vld [vmem:[#allocation14 + $0x2a8] sm:$0xff] }
 0x3da   :  { %7290 = vmatpush.bf16.msrb.mxu3 %v11614_v4  ;;  %v11666_v4 = vld [vmem:[#allocation14 + $0x2f0] sm:$0xff] }
 0x3dc   :  { %7303 = vmatpush.bf16.msrb.mxu0 %v11622_v35  ;;  %7278 = vmatpush.bf16.msrb.mxu1 %v11605_v23  ;;  %v11665_v23 = vld [vmem:[#allocation14 + $0x2e8] sm:$0xff] }
 0x3dd   :  { %7317 = vmatpush.bf16.msrb.mxu2 %v11629_v20  ;;  %v11656_v20 = vld [vmem:[#allocation14 + $0x2a0] sm:$0xff] }
 0x3de   :  { %7291 = vmatpush.bf16.msrb.mxu3 %v11613_v41 }
 0x3df   :  { %v6135_v17 = vpop.f32.mrf.mxu2 }
 0x3e0   :  { %v6136_v8 = vadd.f32 %v6135_v17, %v6121_v0  ;;  %7304 = vmatpush.bf16.msrb.mxu0 %v11621_v31  ;;  %v11628_v0 = vld [vmem:[#allocation14 + $0x1c0] sm:$0xff]  ;;  %7279 = vmatpush.bf16.msrb.mxu1 %v11604_v46  ;;  %v11647_v46 = vld [vmem:[#allocation14 + $0x258] sm:$0xff] }
 0x3e1   :  { %v6123_v39 = vpop.f32.mrf.mxu0  ;;  %7318 = vmatpush.bf16.msrb.mxu2 %v11628_v0  ;;  %v11638_v0 = vld [vmem:[#allocation14 + $0x210] sm:$0xff] }
 0x3e2   :  { %7292 = vmatpush.bf16.msrb.mxu3 %v11612_v59 }
 0x3e4   :  { %v6149_v13 = vpop.f32.mrf.mxu1  ;;  %7305 = vmatpush.bf16.msrb.mxu0 %v11620_v36 }
 0x3e5   :  { %v6150_v11 = vadd.f32 %v6149_v13, %v6136_v8  ;;  %v6274_v13 = vadd.f32 %v6270_v18, %v12515_v53  ;;  %v11651_v53 = vld [vmem:[#allocation14 + $0x278] sm:$0xff] }
 0x3e7   :  { %v6137_v25 = vpop.f32.mrf.mxu2 }
 0x3e8   :  { %v6138_v43 = vadd.f32 %v6137_v25, %v6123_v39 }
 0x3ea   :  { %v6163_v12 = vpop.f32.mrf.mxu3 }
 0x3eb   :  { %v6164_v19 = vadd.f32 %v6163_v12, %v6150_v11  ;;  %v6278_v12 = vmax.f32 %v6274_v13, 0.0  ;;  %v11643_v11 = vld [vmem:[#allocation14 + $0x238] sm:$0xff]  ;;  %v11660_v13 = vld [vmem:[#allocation14 + $0x2c0] sm:$0xff] }
 0x3ec   :  { %v6151_v28 = vpop.f32.mrf.mxu1 }
 0x3ed   :  { %v6152_v22 = vadd.f32 %v6151_v28, %v6138_v43  ;;  %v11667_v28 = vld [vmem:[#allocation14 + $0x2f8] sm:$0xff] }
 0x3f2   :  { %v6165_v48 = vpop.f32.mrf.mxu3 }
 0x3f3   :  { %v6166_v5 = vadd.f32 %v6165_v48, %v6152_v22  ;;  %v6266_v48 = vld [vmem:[#allocation3 + $0x10] sm:$0x3f] }
 0x3f4   :  { %v6276_v43 = vadd.f32 %v6270_v18, %v6266_v48  ;;  %v11645_v18 = vld [vmem:[#allocation14 + $0x248] sm:$0xff] }
 0x3f6   :  { %v6280_v41 = vmax.f32 %v6276_v43, 0.0 }
 0x3f9   :  { %v6177_v26 = vpop.f32.mrf.mxu0 }
 0x3fa   :  { %v6178_v15 = vadd.f32 %v6177_v26, %v6164_v19  ;;  %v11641_v19 = vld [vmem:[#allocation14 + $0x228] sm:$0xff] }
 0x3ff   :  { %v6191_v47 = vpop.f32.mrf.mxu2 }
 0x400   :  { %v6192_v30 = vadd.f32 %v6191_v47, %v6178_v15 }
 0x401   :  { %v6179_v33 = vpop.f32.mrf.mxu0 }
 0x402   :  { %v6180_v56 = vadd.f32 %v6179_v33, %v6166_v5  ;;  %v11649_v33 = vld [vmem:[#allocation14 + $0x268] sm:$0xff] }
 0x403   :  { %v6205_v29 = vpop.f32.mrf.mxu1 }
 0x404   :  { %v6206_v52 = vadd.f32 %v6205_v29, %v6192_v30  ;;  %v11640_v30 = vld [vmem:[#allocation14 + $0x220] sm:$0xff] }
 0x405   :  { %v11648_v29 = vld [vmem:[#allocation14 + $0x260] sm:$0xff] }
 0x407   :  { %v6193_v10 = vpop.f32.mrf.mxu2 }
 0x408   :  { %v6194_v37 = vadd.f32 %v6193_v10, %v6180_v56  ;;  %v11664_v10 = vld [vmem:[#allocation14 + $0x2e0] sm:$0xff] }
 0x409   :  { %v6219_v57 = vpop.f32.mrf.mxu3 }
 0x40a   :  { %v6220_v60 = vadd.f32 %v6219_v57, %v6206_v52  ;;  %v11639_v57 = vld [vmem:[#allocation14 + $0x218] sm:$0xff] }
 0x40b   :  { %v6207_v32 = vpop.f32.mrf.mxu1  ;;  %v11655_v52 = vld [vmem:[#allocation14 + $0x298] sm:$0xff] }
 0x40c   :  { %v6208_v24 = vadd.f32 %v6207_v32, %v6194_v37  ;;  %v11654_v37 = vld [vmem:[#allocation14 + $0x290] sm:$0xff]  ;;  %v11661_v32 = vld [vmem:[#allocation14 + $0x2c8] sm:$0xff] }
 0x411   :  { %v6221_v2 = vpop.f32.mrf.mxu3 }
 0x412   :  { %v6222_v54 = vadd.f32 %v6221_v2, %v6208_v24  ;;  %v11683_v2 = vld [vmem:[#allocation14 + $0x378] sm:$0xff] }
 0x419   :  { %v6233_v34 = vpop.f32.mrf.mxu0 }
 0x41a   :  { %v6234_v27 = vadd.f32 %v6233_v34, %v6220_v60  ;;  %v11663_v34 = vld [vmem:[#allocation14 + $0x2d8] sm:$0xff]  ;;  %v11662_v60 = vld [vmem:[#allocation14 + $0x2d0] sm:$0xff] }
 0x41f   :  { %v6247_v17 = vpop.f32.mrf.mxu2 }
 0x420   :  { %v6248_v7 = vadd.f32 %v6247_v17, %v6234_v27  ;;  %v11637_v27 = vld [vmem:[#allocation14 + $0x208] sm:$0xff]  ;;  %v11636_v17 = vld [vmem:[#allocation14 + $0x200] sm:$0xff] }
 0x421   :  { %v6235_v44 = vpop.f32.mrf.mxu0 }
 0x422   :  { %v6257_v39 = vmax.f32 %v5005_v38, %v6248_v7  ;;  %v6236_v25 = vadd.f32 %v6235_v44, %v6222_v54  ;;  %v11644_v38 = vld [vmem:[#allocation14 + $0x240] sm:$0xff] }
 0x424   :  { %6261 = vst [vmem:[#allocation3 + $0x18] sm:$0xff] %v6257_v39  ;;  %v6275_v50 = vadd.f32 %v6271_v3, %v6257_v39  ;;  %v11652_v39 = vld [vmem:[#allocation14 + $0x280] sm:$0xff] }
 0x426   :  { %v6279_v9 = vmax.f32 %v6275_v50, 0.0  ;;  %v11674_v50 = vld [vmem:[#allocation14 + $0x330] sm:$0xff] }
 0x427   :  { %v6249_v21 = vpop.f32.mrf.mxu2 }
 0x428   :  { %v6250_v14 = vadd.f32 %v6249_v21, %v6236_v25  ;;  %v6282_v26 = vpack.c.bf16 %v6279_v9, %v6278_v12  ;;  %v11682_v25 = vld [vmem:[#allocation14 + $0x370] sm:$0xff]  ;;  %v11673_v21 = vld [vmem:[#allocation14 + $0x328] sm:$0xff] }
 0x42a   :  { %v6259_v62 = vmax.f32 %v6255_v61, %v6250_v14  ;;  %6284 = vst [vmem:[%s12537_s8] sm:$0xff] %v6282_v26  ;;  %v6287_v45 = vunpack.c.l.b16 %v6282_v26  ;;  %v6288_v8 = vunpack.c.h.b16 %v6282_v26  ;;  %v11681_v14 = vld [vmem:[#allocation14 + $0x368] sm:$0xff]  ;;  %v11672_v26 = vld [vmem:[#allocation14 + $0x320] sm:$0xff] }
 0x42b   :  { %v11680_v61 = vld [vmem:[#allocation14 + $0x360] sm:$0xff] }
 0x42c   :  { %6263 = vst [vmem:[#allocation3 + $0x8] sm:$0x3f] %v6259_v62  ;;  %v6289_v16 = vpack.c.b16 %v6287_v45, %v6287_v45  ;;  %v6290_v58 = vpack.c.b16 %v6288_v8, %v6288_v8  ;;  %v11671_v62 = vld [vmem:[#allocation14 + $0x318] sm:$0xff]  ;;  %v11670_v8 = vld [vmem:[#allocation14 + $0x310] sm:$0xff] }
 0x42d   :  { %v11679_v45 = vld [vmem:[#allocation14 + $0x358] sm:$0xff] }
 0x42e   :  { %7228 = vmatmul.bf16.vlgmr.msra.gmra.mxu1 %v6289_v16  ;;  %7241 = vmatmul.bf16.vlgmr.msra.gmra.mxu3 %v6290_v58  ;;  %v6293_v47 = vrot.slane %v6289_v16, 1  ;;  %v6294_v51 = vrot.slane %v6290_v58, 1  ;;  %v6297_v59 = vrot.slane %v6289_v16, 2  ;;  %v6298_v5 = vrot.slane %v6290_v58, 2 }
 0x42f   :  { %7324 = vmatpush.bf16.msra.mxu1 %v11643_v11  ;;  %7337 = vmatpush.bf16.msra.mxu3 %v11651_v53  ;;  %v6301_v56 = vrot.slane %v6289_v16, 3  ;;  %v6302_v36 = vrot.slane %v6290_v58, 3  ;;  %v11678_v11 = vld [vmem:[#allocation14 + $0x350] sm:$0xff]  ;;  %v11669_v53 = vld [vmem:[#allocation14 + $0x308] sm:$0xff]  ;;  %v11668_v58 = vld [vmem:[#allocation14 + $0x300] sm:$0xff] }
 0x430   :  { %7254 = vmatmul.bf16.vlgmr.msra.gmra.mxu0 %v6293_v47  ;;  %7267 = vmatmul.bf16.vlgmr.msra.gmra.mxu2 %v6294_v51  ;;  %v11677_v16 = vld [vmem:[#allocation14 + $0x348] sm:$0xff] }
 0x431   :  { %7350 = vmatpush.bf16.msra.mxu0 %v11659_v42  ;;  %7363 = vmatpush.bf16.msra.mxu2 %v11667_v28  ;;  %v11676_v42 = vld [vmem:[#allocation14 + $0x340] sm:$0xff] }
 0x433   :  { %7325 = vmatpush.bf16.msra.mxu1 %v11642_v1  ;;  %7338 = vmatpush.bf16.msra.mxu3 %v11650_v55  ;;  %v6267_v15 = vld [vmem:[#allocation3 + $0x8] sm:$0x3f] }
 0x434   :  { %v6277_v35 = vadd.f32 %v6271_v3, %v6267_v15  ;;  %v11675_v3 = vld [vmem:[#allocation14 + $0x338] sm:$0xff] }
 0x435   :  { %7351 = vmatpush.bf16.msra.mxu0 %v11658_v49  ;;  %7364 = vmatpush.bf16.msra.mxu2 %v11666_v4 }
 0x436   :  { %v6281_v22 = vmax.f32 %v6277_v35, 0.0 }
 0x437   :  { %7326 = vmatpush.bf16.msra.mxu1 %v11641_v19  ;;  %7339 = vmatpush.bf16.msra.mxu3 %v11649_v33 }
 0x438   :  { %v6283_v31 = vpack.c.bf16 %v6281_v22, %v6280_v41  ;;  %v11696_v41 = vld [vmem:[#allocation15] ss:$0 sm:$0xff] }
 0x439   :  { %7352 = vmatpush.bf16.msra.mxu0 %v11657_v6  ;;  %7365 = vmatpush.bf16.msra.mxu2 %v11665_v23 }
 0x43a   :  { %6285 = vst [vmem:[%s12537_s8 + $0x8] sm:$0x77] %v6283_v31  ;;  %v6306_v24 = vunpack.c.l.b16 %v6283_v31  ;;  %v6307_v7 = vunpack.c.h.b16 %v6283_v31  ;;  %s11886_s8 = smov [#allocation17]  }
 0x43b   :  { %7327 = vmatpush.bf16.msra.mxu1 %v11640_v30  ;;  %7340 = vmatpush.bf16.msra.mxu3 %v11648_v29  ;;  %s7410_s22 = sshll.u32 %s11886_s8, 4  ;;  %s7411_s22 = int_to_ptr.vmem [resolvable:$true] %s7410_s22 }
 0x43c   :  { %v6308_v44 = vpack.c.b16 %v6306_v24, %v6306_v24  ;;  %v6309_v54 = vpack.c.b16 %v6307_v7, %v6307_v7 }
 0x43d   :  { %7353 = vmatpush.bf16.msra.mxu0 %v11656_v20  ;;  %7366 = vmatpush.bf16.msra.mxu2 %v11664_v10 }
 0x43e   :  { %7280 = vmatmul.bf16.vlgmr.msrb.gmra.mxu1 %v6297_v59  ;;  %7293 = vmatmul.bf16.vlgmr.msrb.gmra.mxu3 %v6298_v5  ;;  %v6312_v12 = vrot.slane %v6308_v44, 1  ;;  %v6313_v9 = vrot.slane %v6309_v54, 1  ;;  %v6316_v28 = vrot.slane %v6308_v44, 2  ;;  %v6317_v47 = vrot.slane %v6309_v54, 2 }
 0x43f   :  { %7328 = vmatpush.bf16.msra.mxu1 %v11639_v57  ;;  %7341 = vmatpush.bf16.msra.mxu3 %v11647_v46 }
 0x440   :  { %7306 = vmatmul.bf16.vlgmr.msrb.gmra.mxu0 %v6301_v56  ;;  %7319 = vmatmul.bf16.vlgmr.msrb.gmra.mxu2 %v6302_v36 }
 0x441   :  { %7354 = vmatpush.bf16.msra.mxu0 %v11655_v52  ;;  %7367 = vmatpush.bf16.msra.mxu2 %v11663_v34 }
 0x443   :  { %7329 = vmatpush.bf16.msra.mxu1 %v11638_v0  ;;  %7342 = vmatpush.bf16.msra.mxu3 %v11646_v63 }
 0x445   :  { %7355 = vmatpush.bf16.msra.mxu0 %v11654_v37  ;;  %7368 = vmatpush.bf16.msra.mxu2 %v11662_v60 }
 0x447   :  { %7330 = vmatpush.bf16.msra.mxu1 %v11637_v27  ;;  %7343 = vmatpush.bf16.msra.mxu3 %v11645_v18 }
 0x449   :  { %7356 = vmatpush.bf16.msra.mxu0 %v11653_v40  ;;  %7369 = vmatpush.bf16.msra.mxu2 %v11661_v32 }
 0x44b   :  { %7331 = vmatpush.bf16.msra.mxu1 %v11636_v17  ;;  %7344 = vmatpush.bf16.msra.mxu3 %v11644_v38 }
 0x44d   :  { %7357 = vmatpush.bf16.msra.mxu0 %v11652_v39  ;;  %7370 = vmatpush.bf16.msra.mxu2 %v11660_v13 }
 0x44e   :  { %7332 = vmatmul.bf16.vlgmr.msra.gmra.mxu1 %v6308_v44  ;;  %7345 = vmatmul.bf16.vlgmr.msra.gmra.mxu3 %v6309_v54 }
 0x44f   :  { %7376 = vmatpush.bf16.msrb.mxu1 %v11675_v3  ;;  %7389 = vmatpush.bf16.msrb.mxu3 %v11683_v2 }
 0x450   :  { %7358 = vmatmul.bf16.vlgmr.msra.gmra.mxu0 %v6312_v12  ;;  %7371 = vmatmul.bf16.vlgmr.msra.gmra.mxu2 %v6313_v9 }
 0x453   :  { %7377 = vmatpush.bf16.msrb.mxu1 %v11674_v50  ;;  %7390 = vmatpush.bf16.msrb.mxu3 %v11682_v25 }
 0x457   :  { %7378 = vmatpush.bf16.msrb.mxu1 %v11673_v21  ;;  %7391 = vmatpush.bf16.msrb.mxu3 %v11681_v14 }
 0x45b   :  { %7379 = vmatpush.bf16.msrb.mxu1 %v11672_v26  ;;  %7392 = vmatpush.bf16.msrb.mxu3 %v11680_v61 }
 0x45f   :  { %7380 = vmatpush.bf16.msrb.mxu1 %v11671_v62  ;;  %7393 = vmatpush.bf16.msrb.mxu3 %v11679_v45 }
 0x463   :  { %7381 = vmatpush.bf16.msrb.mxu1 %v11670_v8  ;;  %7394 = vmatpush.bf16.msrb.mxu3 %v11678_v11 }
 0x467   :  { %7382 = vmatpush.bf16.msrb.mxu1 %v11669_v53  ;;  %7395 = vmatpush.bf16.msrb.mxu3 %v11677_v16 }
 0x46b   :  { %7383 = vmatpush.bf16.msrb.mxu1 %v11668_v58  ;;  %7396 = vmatpush.bf16.msrb.mxu3 %v11676_v42 }
 0x46e   :  { %7384 = vmatmul.bf16.vlgmr.msrb.gmra.mxu1 %v6316_v28  ;;  %7397 = vmatmul.bf16.vlgmr.msrb.gmra.mxu3 %v6317_v47 }
 0x4ab   :  { %v7229_v51 = vpop.f32.mrf.mxu1 }
 0x4ac   :  { %v7230_v30 = vadd.f32 %v11696_v41, %v7229_v51 }
 0x4ad   :  { %v7255_v1 = vpop.f32.mrf.mxu0 }
 0x4b1   :  { %v7242_v55 = vpop.f32.mrf.mxu3 }
 0x4b2   :  { %v7243_v31 = vadd.f32 %v7242_v55, %v7230_v30 }
 0x4b3   :  { %v7231_v48 = vpop.f32.mrf.mxu1  ;;  %v7268_v49 = vpop.f32.mrf.mxu2 }
 0x4b4   :  { %v7256_v46 = vadd.f32 %v7255_v1, %v7243_v31 }
 0x4b5   :  { %v7257_v4 = vpop.f32.mrf.mxu0 }
 0x4b6   :  { %v7269_v5 = vadd.f32 %v7268_v49, %v7256_v46 }
 0x4b9   :  { %v7244_v43 = vpop.f32.mrf.mxu3 }
 0x4bb   :  { %v7270_v19 = vpop.f32.mrf.mxu2  ;;  %v7281_v33 = vpop.f32.mrf.mxu1 }
 0x4bc   :  { %v7282_v56 = vadd.f32 %v7281_v33, %v7269_v5 }
 0x4bd   :  { %v7307_v15 = vpop.f32.mrf.mxu0 }
 0x4c1   :  { %v7294_v35 = vpop.f32.mrf.mxu3 }
 0x4c2   :  { %v7295_v0 = vadd.f32 %v7294_v35, %v7282_v56 }
 0x4c3   :  { %v7283_v6 = vpop.f32.mrf.mxu1  ;;  %v7320_v23 = vpop.f32.mrf.mxu2 }
 0x4c4   :  { %v7308_v37 = vadd.f32 %v7307_v15, %v7295_v0 }
 0x4c5   :  { %v7309_v22 = vpop.f32.mrf.mxu0 }
 0x4c6   :  { %v7321_v27 = vadd.f32 %v7320_v23, %v7308_v37 }
 0x4c9   :  { %v7296_v29 = vpop.f32.mrf.mxu3 }
 0x4cb   :  { %v7322_v20 = vpop.f32.mrf.mxu2  ;;  %v7333_v10 = vpop.f32.mrf.mxu1 }
 0x4cc   :  { %v7334_v18 = vadd.f32 %v7333_v10, %v7321_v27 }
 0x4cd   :  { %v7359_v57 = vpop.f32.mrf.mxu0 }
 0x4d1   :  { %v7346_v59 = vpop.f32.mrf.mxu3 }
 0x4d2   :  { %v7347_v40 = vadd.f32 %v7346_v59, %v7334_v18 }
 0x4d3   :  { %v7335_v52 = vpop.f32.mrf.mxu1  ;;  %v7372_v34 = vpop.f32.mrf.mxu2 }
 0x4d4   :  { %v7360_v32 = vadd.f32 %v7359_v57, %v7347_v40 }
 0x4d5   :  { %v7361_v36 = vpop.f32.mrf.mxu0 }
 0x4d6   :  { %v7373_v38 = vadd.f32 %v7372_v34, %v7360_v32 }
 0x4d9   :  { %v7348_v63 = vpop.f32.mrf.mxu3 }
 0x4db   :  { %v7374_v60 = vpop.f32.mrf.mxu2 }
 0x4eb   :  { %v7385_v17 = vpop.f32.mrf.mxu1 }
 0x4ec   :  { %v7386_v24 = vadd.f32 %v7385_v17, %v7373_v38 }
 0x4f1   :  { %v7398_v7 = vpop.f32.mrf.mxu3 }
 0x4f2   :  { %v7399_v3 = vadd.f32 %v7398_v7, %v7386_v24 }
 0x4f3   :  { %v7387_v2 = vpop.f32.mrf.mxu1 }
 0x4f4   :  { %7402 = vst [vmem:[#allocation17] sm:$0x3] %v7399_v3 }
 0x4f5   :  { %7415 = dma.vmem_to_hbm [thread:$0]  %s7411_s22, 32, %s7413_s25, [#allocation8]  }
 0x4f9   :  { %v7400_v39 = vpop.f32.mrf.mxu3 }
 0x4fa   :  { %11873 = dma.done.wait [#allocation8], 32  }
 0x4fb   :  { %11874 = vsyncadd [#allocation8], 4294967264 }
 0x4fc   :  { %7422 = vsyncpa [#allocation7], 1 }
 0x4fd   :  { %7423 = vsyncpa [#allocation10], 1 }
 0x4fe   :  { %7424 = vsyncpa [#allocation13], 1 }
 0x4ff   :  { %7425 = vsyncpa [#allocation16], 1 }
 0x500   :  { %7426 = vsyncpa [#allocation8], 1 }

</bundles_post_ra>
